<compile_context>
chip_gen: v7x
topology: tpu7x:2x2x1
jax: 0.10.0
libtpu: 0.0.40
codegen_flags: <defaults>
</compile_context>

<pallas_src>
import functools

import jax
import jax.numpy as jnp
from jax.experimental import pallas as pl
from jax.experimental.pallas import tpu as pltpu

# Conservative VMEM budget (v7x has 64 MiB physical / 32 MiB default scoped).
_VMEM_LIMIT_BYTES = 32 * 1024 * 1024


def _params_1d():
    return pltpu.CompilerParams(
        dimension_semantics=("parallel",),
        vmem_limit_bytes=_VMEM_LIMIT_BYTES,
    )


# ---------------------------------------------------------------------------
# Fused 3x3 "same" conv (+bias, optional ReLU): im2col built in VMEM.
# ---------------------------------------------------------------------------
def _accum_taps(acc, x_bf16, w_all, H, W):
    """Add the 9 shifted-window contributions of a 3x3 conv to `acc` (f32)."""
    for t in range(9):
        dh, dw = divmod(t, 3)
        patch = x_bf16[dh:dh + H, dw:dw + W, :]           # (H, W, Cin) static slice
        patch = patch.reshape(H * W, patch.shape[-1])     # merge leading dims
        acc = acc + jnp.dot(patch, w_all[t],              # bf16 x bf16 -> f32 acc
                            preferred_element_type=jnp.float32)
    return acc


def _conv3x3_kernel(x_ref, w_ref, b_ref, o_ref, *, H, W, relu):
    x = x_ref[...]                                        # (H+2, W+2, Cin) bf16
    w = w_ref[...]                                        # (9, Cin, Cout) bf16
    acc = jnp.zeros((H * W, o_ref.shape[-1]), jnp.float32)
    acc = _accum_taps(acc, x, w, H, W)
    acc = acc + b_ref[...]                                # f32 bias, f32 epilogue
    if relu:
        acc = jnp.maximum(acc, 0.0)
    o_ref[...] = acc.astype(o_ref.dtype)


def _conv3x3_dual_kernel(xa_ref, xb_ref, wa_ref, wb_ref, b_ref, o_ref, *, H, W, relu):
    """conv3x3(concat([xa, xb], -1)) with the weight split along input channels."""
    acc = jnp.zeros((H * W, o_ref.shape[-1]), jnp.float32)
    acc = _accum_taps(acc, xa_ref[...], wa_ref[...], H, W)
    acc = _accum_taps(acc, xb_ref[...], wb_ref[...], H, W)
    acc = acc + b_ref[...]
    if relu:
        acc = jnp.maximum(acc, 0.0)
    o_ref[...] = acc.astype(o_ref.dtype)


def _conv_cost(B, H, W, Cin, Cout, in_bytes):
    flops = 2 * B * H * W * 9 * Cin * Cout
    out_bytes = B * H * W * Cout * 4
    return pl.CostEstimate(flops=flops, transcendentals=0,
                           bytes_accessed=in_bytes + out_bytes)


def conv3x3(x, w_taps, b_row, *, relu, out_dtype):
    """x: (B, H, W, Cin); w_taps: (9, Cin, Cout) bf16; b_row: (1, Cout) f32."""
    B, H, W, Cin = x.shape
    Cout = w_taps.shape[-1]
    Hp, Wp = H + 2, W + 2
    x_pad = jnp.pad(x.astype(jnp.bfloat16), ((0, 0), (1, 1), (1, 1), (0, 0)))
    x_pad = x_pad.reshape(B * Hp, Wp, Cin)                # contiguous: free
    out = pl.pallas_call(
        functools.partial(_conv3x3_kernel, H=H, W=W, relu=relu),
        out_shape=jax.ShapeDtypeStruct((B * H * W, Cout), out_dtype),
        grid=(B,),
        in_specs=[
            pl.BlockSpec((Hp, Wp, Cin), lambda b: (b, 0, 0)),
            pl.BlockSpec((9, Cin, Cout), lambda b: (0, 0, 0)),
            pl.BlockSpec((1, Cout), lambda b: (0, 0)),
        ],
        out_specs=pl.BlockSpec((H * W, Cout), lambda b: (b, 0)),
        compiler_params=_params_1d(),
        cost_estimate=_conv_cost(B, H, W, Cin, Cout, x_pad.size * 2),
    )(x_pad, w_taps, b_row)
    return out.reshape(B, H, W, Cout)


def conv3x3_dual(xa, xb, wa_taps, wb_taps, b_row, *, relu, out_dtype):
    """Fused conv3x3 over concat([xa, xb], channel) without materializing it."""
    B, H, W, Ca = xa.shape
    Cb = xb.shape[-1]
    Cout = wa_taps.shape[-1]
    Hp, Wp = H + 2, W + 2
    xa_pad = jnp.pad(xa.astype(jnp.bfloat16), ((0, 0), (1, 1), (1, 1), (0, 0)))
    xb_pad = jnp.pad(xb.astype(jnp.bfloat16), ((0, 0), (1, 1), (1, 1), (0, 0)))
    xa_pad = xa_pad.reshape(B * Hp, Wp, Ca)
    xb_pad = xb_pad.reshape(B * Hp, Wp, Cb)
    out = pl.pallas_call(
        functools.partial(_conv3x3_dual_kernel, H=H, W=W, relu=relu),
        out_shape=jax.ShapeDtypeStruct((B * H * W, Cout), out_dtype),
        grid=(B,),
        in_specs=[
            pl.BlockSpec((Hp, Wp, Ca), lambda b: (b, 0, 0)),
            pl.BlockSpec((Hp, Wp, Cb), lambda b: (b, 0, 0)),
            pl.BlockSpec((9, Ca, Cout), lambda b: (0, 0, 0)),
            pl.BlockSpec((9, Cb, Cout), lambda b: (0, 0, 0)),
            pl.BlockSpec((1, Cout), lambda b: (0, 0)),
        ],
        out_specs=pl.BlockSpec((H * W, Cout), lambda b: (b, 0)),
        compiler_params=_params_1d(),
        cost_estimate=_conv_cost(B, H, W, Ca + Cb, Cout,
                                 (xa_pad.size + xb_pad.size) * 2),
    )(xa_pad, xb_pad, wa_taps, wb_taps, b_row)
    return out.reshape(B, H, W, Cout)


# ---------------------------------------------------------------------------
# 2x2 max pool: free wrapper reshape + in-kernel window reduction.
# ---------------------------------------------------------------------------
def _maxpool_kernel(x_ref, o_ref):
    x = x_ref[...].astype(jnp.float32)          # (Hh, 2, Wh, 2, C)
    m = jnp.max(x, axis=3)                      # reduce window column
    m = jnp.max(m, axis=1)                      # reduce window row
    o_ref[...] = m.astype(o_ref.dtype)


def maxpool2x2(x):
    B, H, W, C = x.shape
    Hh, Wh = H // 2, W // 2
    xr = x.reshape(B * Hh, 2, Wh, 2, C)         # contiguous split: no HBM copy
    out = pl.pallas_call(
        _maxpool_kernel,
        out_shape=jax.ShapeDtypeStruct((B * Hh, Wh, C), x.dtype),
        grid=(B,),
        in_specs=[pl.BlockSpec((Hh, 2, Wh, 2, C), lambda b: (b, 0, 0, 0, 0))],
        out_specs=pl.BlockSpec((Hh, Wh, C), lambda b: (b, 0, 0)),
        compiler_params=_params_1d(),
    )(xr)
    return out.reshape(B, Hh, Wh, C)


# ---------------------------------------------------------------------------
# Domain classifier head: GAP + linear as one matmul, tiled over batch.
# ---------------------------------------------------------------------------
def _dom_kernel(f_ref, w_ref, b_ref, o_ref):
    f = f_ref[...].astype(jnp.float32)          # (TB, Hf*Wf*C)
    logit = jnp.dot(f, w_ref[...], preferred_element_type=jnp.float32) + b_ref[...]
    o_ref[...] = logit.astype(o_ref.dtype)


def dom_classify(feature, dom_w, dom_b):
    B, Hf, Wf, C = feature.shape
    K = Hf * Wf * C
    TB = 8
    B_pad = pl.cdiv(B, TB) * TB
    f_flat = feature.reshape(B, K)              # contiguous: free
    f_flat = jnp.pad(f_flat, ((0, B_pad - B), (0, 0)))
    # Fold the 1/(Hf*Wf) mean into a spatially-tiled weight column.
    w_col = (jnp.tile(dom_w.reshape(-1), Hf * Wf) / float(Hf * Wf)).reshape(K, 1)
    out = pl.pallas_call(
        _dom_kernel,
        out_shape=jax.ShapeDtypeStruct((B_pad, 1), jnp.float32),
        grid=(B_pad // TB,),
        in_specs=[
            pl.BlockSpec((TB, K), lambda i: (i, 0)),
            pl.BlockSpec((K, 1), lambda i: (0, 0)),
            pl.BlockSpec((1, 1), lambda i: (0, 0)),
        ],
        out_specs=pl.BlockSpec((TB, 1), lambda i: (i, 0)),
        compiler_params=_params_1d(),
    )(f_flat, w_col.astype(jnp.float32), dom_b.astype(jnp.float32))
    return out[:B]


# ---------------------------------------------------------------------------
# Parameter setup / glue
# ---------------------------------------------------------------------------
def _prep_conv_w(w_oihw):
    """(Cout, Cin, 3, 3) OIHW -> (9, Cin, Cout) bf16 tap-major weights."""
    cout, cin = w_oihw.shape[0], w_oihw.shape[1]
    return jnp.transpose(w_oihw, (2, 3, 1, 0)).reshape(9, cin, cout).astype(jnp.bfloat16)


def nearest_upsample2x(x):
    x = jnp.repeat(x, 2, axis=1)
    return jnp.repeat(x, 2, axis=2)


def init_params(key, c_in=4, c1=8, c2=16, n_classes=3):
    ks = jax.random.split(key, 7)
    f32 = jnp.float32
    conv1_w = 0.1 * jax.random.normal(ks[0], (c1, c_in, 3, 3), f32)
    conv2_w = 0.1 * jax.random.normal(ks[2], (c2, c1, 3, 3), f32)
    conv3_w = 0.1 * jax.random.normal(ks[4], (n_classes, c1 + c2, 3, 3), f32)
    return {
        # feat_extractor
        "w1": _prep_conv_w(conv1_w),
        "b1": (0.01 * jax.random.normal(ks[1], (c1,), f32)).reshape(1, c1),
        "w2": _prep_conv_w(conv2_w),
        "b2": (0.01 * jax.random.normal(ks[3], (c2,), f32)).reshape(1, c2),
        # predictor: conv over concat([skip, up]) -> split weight along Cin
        "w3_skip": _prep_conv_w(conv3_w[:, :c1]),
        "w3_feat": _prep_conv_w(conv3_w[:, c1:]),
        "b3": (0.01 * jax.random.normal(ks[5], (n_classes,), f32)).reshape(1, n_classes),
        # dom_classifier
        "dom_w": 0.1 * jax.random.normal(ks[6], (1, c2), f32),
        "dom_b": jnp.zeros((1, 1), f32),
    }


# ---------------------------------------------------------------------------
# DANNModule.forward equivalent
# ---------------------------------------------------------------------------
def dann_forward(params, x_nchw, branch=0):
    x = jnp.transpose(x_nchw, (0, 2, 3, 1))                 # NCHW -> NHWC
    # --- feat_extractor: (skip_outputs, feature) ---
    skip = conv3x3(x, params["w1"], params["b1"], relu=True, out_dtype=jnp.bfloat16)
    pooled = maxpool2x2(skip)
    feature = conv3x3(pooled, params["w2"], params["b2"], relu=True,
                      out_dtype=jnp.bfloat16)

    if branch == 0:
        # --- predictor((skip_outputs, feature)): upsample + fused concat-conv ---
        up = nearest_upsample2x(feature)
        out = conv3x3_dual(skip, up, params["w3_skip"], params["w3_feat"],
                           params["b3"], relu=False, out_dtype=jnp.float32)
        return jnp.transpose(out, (0, 3, 1, 2))             # back to NCHW
    elif branch == 1:
        # --- dom_classifier(grl(feature)); GRL is identity in forward ---
        return dom_classify(feature, params["dom_w"], params["dom_b"])
    else:
        raise ValueError(f"Invalid branch number: {branch}. Expect 0 or 1.")


# TODO(synk): inference() (sliding_window_inference), loss/optimizer plumbing
# and save/load are training/IO utilities with no kernel equivalent — omitted.


if __name__ == "__main__":
    key = jax.random.PRNGKey(0)
    pkey, xkey = jax.random.split(key)
    params = init_params(pkey)

    B, C_in, H, W = 2, 4, 16, 16
    x = jax.random.normal(xkey, (B, C_in, H, W), jnp.float32)

    fwd_seg = jax.jit(functools.partial(dann_forward, branch=0))
    fwd_dom = jax.jit(functools.partial(dann_forward, branch=1))

    seg_logits = jax.block_until_ready(fwd_seg(params, x))
    dom_logits = jax.block_until_ready(fwd_dom(params, x))

    assert seg_logits.shape == (B, 3, H, W), seg_logits.shape
    assert dom_logits.shape == (B, 1), dom_logits.shape
    print("KERNEL_OK")
</pallas_src>

<mosaic_0001>
module attributes {stable_mosaic.version = 11 : i64} {
  func.func @_maxpool_kernel(%arg0: i32, %arg1: memref<8x2x8x2x8xbf16, #tpu.memory_space<vmem>>, %arg2: memref<8x8x8xbf16, #tpu.memory_space<vmem>>) attributes {dimension_semantics = [#tpu.dimension_semantics<parallel>], iteration_bounds = array<i64: 2>, scalar_prefetch = 0 : i64, scratch_operands = 0 : i64, tpu.core_type = #tpu.core_type<tc>, window_params = [{transform_indices = @transform_0, window_bounds = array<i64: 8, 2, 8, 2, 8>}, {transform_indices = @transform_1, window_bounds = array<i64: 8, 8, 8>}]} {
    %c0 = arith.constant 0 : index
    %c0_0 = arith.constant 0 : index
    %c0_1 = arith.constant 0 : index
    %c0_2 = arith.constant 0 : index
    %c0_3 = arith.constant 0 : index
    %0 = vector.load %arg1[%c0, %c0_0, %c0_1, %c0_2, %c0_3] : memref<8x2x8x2x8xbf16, #tpu.memory_space<vmem>>, vector<8x2x8x2x8xbf16>
    %1 = arith.extf %0 : vector<8x2x8x2x8xbf16> to vector<8x2x8x2x8xf32>
    %cst = arith.constant dense<0xFF800000> : vector<8x2x8x8xf32>
    %2 = vector.multi_reduction <maximumf>, %1, %cst [3] : vector<8x2x8x2x8xf32> to vector<8x2x8x8xf32>
    %cst_4 = arith.constant dense<0xFF800000> : vector<8x8x8xf32>
    %3 = vector.multi_reduction <maximumf>, %2, %cst_4 [1] : vector<8x2x8x8xf32> to vector<8x8x8xf32>
    %4 = arith.truncf %3 : vector<8x8x8xf32> to vector<8x8x8xbf16>
    %c0_5 = arith.constant 0 : index
    %c0_6 = arith.constant 0 : index
    %c0_7 = arith.constant 0 : index
    %5 = vector.load %arg2[%c0_5, %c0_6, %c0_7] : memref<8x8x8xbf16, #tpu.memory_space<vmem>>, vector<8x8x8xbf16>
    tpu.vector_store %arg2[%c0_5, %c0_6, %c0_7], %4 {strides = array<i32>} : memref<8x8x8xbf16, #tpu.memory_space<vmem>>, vector<8x8x8xbf16>,
    return
  }
  func.func @transform_0(%arg0: i32) -> (i32, i32, i32, i32, i32) {
    %c0_i32 = arith.constant 0 : i32
    %c0_i32_0 = arith.constant 0 : i32
    %c0_i32_1 = arith.constant 0 : i32
    %c0_i32_2 = arith.constant 0 : i32
    %c0_i32_3 = arith.constant 0 : i32
    return %arg0, %c0_i32, %c0_i32_0, %c0_i32_1, %c0_i32_2 : i32, i32, i32, i32, i32
  }
  func.func @transform_1(%arg0: i32) -> (i32, i32, i32) {
    %c0_i32 = arith.constant 0 : i32
    %c0_i32_0 = arith.constant 0 : i32
    %c0_i32_1 = arith.constant 0 : i32
    return %arg0, %c0_i32, %c0_i32_0 : i32, i32, i32
  }
}

module attributes {stable_mosaic.version = 11 : i64} {
  func.func @_conv3x3_kernel(%arg0: i32, %arg1: memref<18x18x4xbf16, #tpu.memory_space<vmem>>, %arg2: memref<9x4x8xbf16, #tpu.memory_space<vmem>>, %arg3: memref<1x8xf32, #tpu.memory_space<vmem>>, %arg4: memref<256x8xbf16, #tpu.memory_space<vmem>>) attributes {dimension_semantics = [#tpu.dimension_semantics<parallel>], iteration_bounds = array<i64: 2>, scalar_prefetch = 0 : i64, scratch_operands = 0 : i64, tpu.core_type = #tpu.core_type<tc>, window_params = [{transform_indices = @transform_0, window_bounds = array<i64: 18, 18, 4>}, {pipeline_mode = #tpu.pipeline_mode<synchronous>, transform_indices = @transform_1, window_bounds = array<i64: 9, 4, 8>}, {pipeline_mode = #tpu.pipeline_mode<synchronous>, transform_indices = @transform_2, window_bounds = array<i64: 1, 8>}, {transform_indices = @transform_3, window_bounds = array<i64: 256, 8>}]} {
    %c0 = arith.constant 0 : index
    %c0_0 = arith.constant 0 : index
    %c0_1 = arith.constant 0 : index
    %0 = vector.load %arg1[%c0, %c0_0, %c0_1] : memref<18x18x4xbf16, #tpu.memory_space<vmem>>, vector<18x18x4xbf16>
    %c0_2 = arith.constant 0 : index
    %c0_3 = arith.constant 0 : index
    %c0_4 = arith.constant 0 : index
    %1 = vector.load %arg2[%c0_2, %c0_3, %c0_4] : memref<9x4x8xbf16, #tpu.memory_space<vmem>>, vector<9x4x8xbf16>
    %cst = arith.constant 0.000000e+00 : f32
    %2 = vector.broadcast %cst : f32 to vector<256x8xf32>
    %3 = vector.extract_strided_slice %0 {offsets = [0, 0, 0], sizes = [16, 16, 4], strides = [1, 1, 1]} : vector<18x18x4xbf16> to vector<16x16x4xbf16>
    %4 = vector.shape_cast %3 : vector<16x16x4xbf16> to vector<256x4xbf16>
    %5 = vector.extract_strided_slice %1 {offsets = [0, 0, 0], sizes = [1, 4, 8], strides = [1, 1, 1]} : vector<9x4x8xbf16> to vector<1x4x8xbf16>
    %6 = vector.shape_cast %5 : vector<1x4x8xbf16> to vector<4x8xbf16>
    %cst_5 = arith.constant dense<0.000000e+00> : vector<256x8xf32>
    %7 = tpu.matmul %4, %6, %cst_5 {dimension_numbers = #tpu.dot_dimension_numbers<[1], [0], [0], [1], [0, 0, 1, 1], [], []>} : vector<256x4xbf16>, vector<4x8xbf16>, vector<256x8xf32> -> vector<256x8xf32>
    %8 = arith.addf %2, %7 : vector<256x8xf32>
    %9 = vector.extract_strided_slice %0 {offsets = [0, 1, 0], sizes = [16, 16, 4], strides = [1, 1, 1]} : vector<18x18x4xbf16> to vector<16x16x4xbf16>
    %10 = vector.shape_cast %9 : vector<16x16x4xbf16> to vector<256x4xbf16>
    %11 = vector.extract_strided_slice %1 {offsets = [1, 0, 0], sizes = [1, 4, 8], strides = [1, 1, 1]} : vector<9x4x8xbf16> to vector<1x4x8xbf16>
    %12 = vector.shape_cast %11 : vector<1x4x8xbf16> to vector<4x8xbf16>
    %cst_6 = arith.constant dense<0.000000e+00> : vector<256x8xf32>
    %13 = tpu.matmul %10, %12, %cst_6 {dimension_numbers = #tpu.dot_dimension_numbers<[1], [0], [0], [1], [0, 0, 1, 1], [], []>} : vector<256x4xbf16>, vector<4x8xbf16>, vector<256x8xf32> -> vector<256x8xf32>
    %14 = arith.addf %8, %13 : vector<256x8xf32>
    %15 = vector.extract_strided_slice %0 {offsets = [0, 2, 0], sizes = [16, 16, 4], strides = [1, 1, 1]} : vector<18x18x4xbf16> to vector<16x16x4xbf16>
    %16 = vector.shape_cast %15 : vector<16x16x4xbf16> to vector<256x4xbf16>
    %17 = vector.extract_strided_slice %1 {offsets = [2, 0, 0], sizes = [1, 4, 8], strides = [1, 1, 1]} : vector<9x4x8xbf16> to vector<1x4x8xbf16>
    %18 = vector.shape_cast %17 : vector<1x4x8xbf16> to vector<4x8xbf16>
    %cst_7 = arith.constant dense<0.000000e+00> : vector<256x8xf32>
    %19 = tpu.matmul %16, %18, %cst_7 {dimension_numbers = #tpu.dot_dimension_numbers<[1], [0], [0], [1], [0, 0, 1, 1], [], []>} : vector<256x4xbf16>, vector<4x8xbf16>, vector<256x8xf32> -> vector<256x8xf32>
    %20 = arith.addf %14, %19 : vector<256x8xf32>
    %21 = vector.extract_strided_slice %0 {offsets = [1, 0, 0], sizes = [16, 16, 4], strides = [1, 1, 1]} : vector<18x18x4xbf16> to vector<16x16x4xbf16>
    %22 = vector.shape_cast %21 : vector<16x16x4xbf16> to vector<256x4xbf16>
    %23 = vector.extract_strided_slice %1 {offsets = [3, 0, 0], sizes = [1, 4, 8], strides = [1, 1, 1]} : vector<9x4x8xbf16> to vector<1x4x8xbf16>
    %24 = vector.shape_cast %23 : vector<1x4x8xbf16> to vector<4x8xbf16>
    %cst_8 = arith.constant dense<0.000000e+00> : vector<256x8xf32>
    %25 = tpu.matmul %22, %24, %cst_8 {dimension_numbers = #tpu.dot_dimension_numbers<[1], [0], [0], [1], [0, 0, 1, 1], [], []>} : vector<256x4xbf16>, vector<4x8xbf16>, vector<256x8xf32> -> vector<256x8xf32>
    %26 = arith.addf %20, %25 : vector<256x8xf32>
    %27 = vector.extract_strided_slice %0 {offsets = [1, 1, 0], sizes = [16, 16, 4], strides = [1, 1, 1]} : vector<18x18x4xbf16> to vector<16x16x4xbf16>
    %28 = vector.shape_cast %27 : vector<16x16x4xbf16> to vector<256x4xbf16>
    %29 = vector.extract_strided_slice %1 {offsets = [4, 0, 0], sizes = [1, 4, 8], strides = [1, 1, 1]} : vector<9x4x8xbf16> to vector<1x4x8xbf16>
    %30 = vector.shape_cast %29 : vector<1x4x8xbf16> to vector<4x8xbf16>
    %cst_9 = arith.constant dense<0.000000e+00> : vector<256x8xf32>
    %31 = tpu.matmul %28, %30, %cst_9 {dimension_numbers = #tpu.dot_dimension_numbers<[1], [0], [0], [1], [0, 0, 1, 1], [], []>} : vector<256x4xbf16>, vector<4x8xbf16>, vector<256x8xf32> -> vector<256x8xf32>
    %32 = arith.addf %26, %31 : vector<256x8xf32>
    %33 = vector.extract_strided_slice %0 {offsets = [1, 2, 0], sizes = [16, 16, 4], strides = [1, 1, 1]} : vector<18x18x4xbf16> to vector<16x16x4xbf16>
    %34 = vector.shape_cast %33 : vector<16x16x4xbf16> to vector<256x4xbf16>
    %35 = vector.extract_strided_slice %1 {offsets = [5, 0, 0], sizes = [1, 4, 8], strides = [1, 1, 1]} : vector<9x4x8xbf16> to vector<1x4x8xbf16>
    %36 = vector.shape_cast %35 : vector<1x4x8xbf16> to vector<4x8xbf16>
    %cst_10 = arith.constant dense<0.000000e+00> : vector<256x8xf32>
    %37 = tpu.matmul %34, %36, %cst_10 {dimension_numbers = #tpu.dot_dimension_numbers<[1], [0], [0], [1], [0, 0, 1, 1], [], []>} : vector<256x4xbf16>, vector<4x8xbf16>, vector<256x8xf32> -> vector<256x8xf32>
    %38 = arith.addf %32, %37 : vector<256x8xf32>
    %39 = vector.extract_strided_slice %0 {offsets = [2, 0, 0], sizes = [16, 16, 4], strides = [1, 1, 1]} : vector<18x18x4xbf16> to vector<16x16x4xbf16>
    %40 = vector.shape_cast %39 : vector<16x16x4xbf16> to vector<256x4xbf16>
    %41 = vector.extract_strided_slice %1 {offsets = [6, 0, 0], sizes = [1, 4, 8], strides = [1, 1, 1]} : vector<9x4x8xbf16> to vector<1x4x8xbf16>
    %42 = vector.shape_cast %41 : vector<1x4x8xbf16> to vector<4x8xbf16>
    %cst_11 = arith.constant dense<0.000000e+00> : vector<256x8xf32>
    %43 = tpu.matmul %40, %42, %cst_11 {dimension_numbers = #tpu.dot_dimension_numbers<[1], [0], [0], [1], [0, 0, 1, 1], [], []>} : vector<256x4xbf16>, vector<4x8xbf16>, vector<256x8xf32> -> vector<256x8xf32>
    %44 = arith.addf %38, %43 : vector<256x8xf32>
    %45 = vector.extract_strided_slice %0 {offsets = [2, 1, 0], sizes = [16, 16, 4], strides = [1, 1, 1]} : vector<18x18x4xbf16> to vector<16x16x4xbf16>
    %46 = vector.shape_cast %45 : vector<16x16x4xbf16> to vector<256x4xbf16>
    %47 = vector.extract_strided_slice %1 {offsets = [7, 0, 0], sizes = [1, 4, 8], strides = [1, 1, 1]} : vector<9x4x8xbf16> to vector<1x4x8xbf16>
    %48 = vector.shape_cast %47 : vector<1x4x8xbf16> to vector<4x8xbf16>
    %cst_12 = arith.constant dense<0.000000e+00> : vector<256x8xf32>
    %49 = tpu.matmul %46, %48, %cst_12 {dimension_numbers = #tpu.dot_dimension_numbers<[1], [0], [0], [1], [0, 0, 1, 1], [], []>} : vector<256x4xbf16>, vector<4x8xbf16>, vector<256x8xf32> -> vector<256x8xf32>
    %50 = arith.addf %44, %49 : vector<256x8xf32>
    %51 = vector.extract_strided_slice %0 {offsets = [2, 2, 0], sizes = [16, 16, 4], strides = [1, 1, 1]} : vector<18x18x4xbf16> to vector<16x16x4xbf16>
    %52 = vector.shape_cast %51 : vector<16x16x4xbf16> to vector<256x4xbf16>
    %53 = vector.extract_strided_slice %1 {offsets = [8, 0, 0], sizes = [1, 4, 8], strides = [1, 1, 1]} : vector<9x4x8xbf16> to vector<1x4x8xbf16>
    %54 = vector.shape_cast %53 : vector<1x4x8xbf16> to vector<4x8xbf16>
    %cst_13 = arith.constant dense<0.000000e+00> : vector<256x8xf32>
    %55 = tpu.matmul %52, %54, %cst_13 {dimension_numbers = #tpu.dot_dimension_numbers<[1], [0], [0], [1], [0, 0, 1, 1], [], []>} : vector<256x4xbf16>, vector<4x8xbf16>, vector<256x8xf32> -> vector<256x8xf32>
    %56 = arith.addf %50, %55 : vector<256x8xf32>
    %c0_14 = arith.constant 0 : index
    %c0_15 = arith.constant 0 : index
    %57 = vector.load %arg3[%c0_14, %c0_15] : memref<1x8xf32, #tpu.memory_space<vmem>>, vector<1x8xf32>
    %58 = vector.broadcast %57 : vector<1x8xf32> to vector<256x8xf32>
    %59 = arith.addf %56, %58 : vector<256x8xf32>
    %cst_16 = arith.constant 0.000000e+00 : f32
    %60 = vector.broadcast %cst_16 : f32 to vector<256x8xf32>
    %61 = arith.maximumf %59, %60 : vector<256x8xf32>
    %62 = arith.truncf %61 : vector<256x8xf32> to vector<256x8xbf16>
    %c0_17 = arith.constant 0 : index
    %c0_18 = arith.constant 0 : index
    %63 = vector.load %arg4[%c0_17, %c0_18] : memref<256x8xbf16, #tpu.memory_space<vmem>>, vector<256x8xbf16>
    tpu.vector_store %arg4[%c0_17, %c0_18], %62 {strides = array<i32>} : memref<256x8xbf16, #tpu.memory_space<vmem>>, vector<256x8xbf16>,
    return
  }
  func.func @transform_0(%arg0: i32) -> (i32, i32, i32) {
    %c0_i32 = arith.constant 0 : i32
    %c0_i32_0 = arith.constant 0 : i32
    %c0_i32_1 = arith.constant 0 : i32
    return %arg0, %c0_i32, %c0_i32_0 : i32, i32, i32
  }
  func.func @transform_1(%arg0: i32) -> (i32, i32, i32) {
    %c0_i32 = arith.constant 0 : i32
    %c0_i32_0 = arith.constant 0 : i32
    %c0_i32_1 = arith.constant 0 : i32
    %c0_i32_2 = arith.constant 0 : i32
    return %c0_i32, %c0_i32_0, %c0_i32_1 : i32, i32, i32
  }
  func.func @transform_2(%arg0: i32) -> (i32, i32) {
    %c0_i32 = arith.constant 0 : i32
    %c0_i32_0 = arith.constant 0 : i32
    %c0_i32_1 = arith.constant 0 : i32
    return %c0_i32, %c0_i32_0 : i32, i32
  }
  func.func @transform_3(%arg0: i32) -> (i32, i32) {
    %c0_i32 = arith.constant 0 : i32
    %c0_i32_0 = arith.constant 0 : i32
    return %arg0, %c0_i32 : i32, i32
  }
}

module attributes {stable_mosaic.version = 11 : i64} {
  func.func @_conv3x3_kernel(%arg0: i32, %arg1: memref<10x10x8xbf16, #tpu.memory_space<vmem>>, %arg2: memref<9x8x16xbf16, #tpu.memory_space<vmem>>, %arg3: memref<1x16xf32, #tpu.memory_space<vmem>>, %arg4: memref<64x16xbf16, #tpu.memory_space<vmem>>) attributes {dimension_semantics = [#tpu.dimension_semantics<parallel>], iteration_bounds = array<i64: 2>, scalar_prefetch = 0 : i64, scratch_operands = 0 : i64, tpu.core_type = #tpu.core_type<tc>, window_params = [{transform_indices = @transform_0, window_bounds = array<i64: 10, 10, 8>}, {pipeline_mode = #tpu.pipeline_mode<synchronous>, transform_indices = @transform_1, window_bounds = array<i64: 9, 8, 16>}, {pipeline_mode = #tpu.pipeline_mode<synchronous>, transform_indices = @transform_2, window_bounds = array<i64: 1, 16>}, {transform_indices = @transform_3, window_bounds = array<i64: 64, 16>}]} {
    %c0 = arith.constant 0 : index
    %c0_0 = arith.constant 0 : index
    %c0_1 = arith.constant 0 : index
    %0 = vector.load %arg1[%c0, %c0_0, %c0_1] : memref<10x10x8xbf16, #tpu.memory_space<vmem>>, vector<10x10x8xbf16>
    %c0_2 = arith.constant 0 : index
    %c0_3 = arith.constant 0 : index
    %c0_4 = arith.constant 0 : index
    %1 = vector.load %arg2[%c0_2, %c0_3, %c0_4] : memref<9x8x16xbf16, #tpu.memory_space<vmem>>, vector<9x8x16xbf16>
    %cst = arith.constant 0.000000e+00 : f32
    %2 = vector.broadcast %cst : f32 to vector<64x16xf32>
    %3 = vector.extract_strided_slice %0 {offsets = [0, 0, 0], sizes = [8, 8, 8], strides = [1, 1, 1]} : vector<10x10x8xbf16> to vector<8x8x8xbf16>
    %4 = vector.shape_cast %3 : vector<8x8x8xbf16> to vector<64x8xbf16>
    %5 = vector.extract_strided_slice %1 {offsets = [0, 0, 0], sizes = [1, 8, 16], strides = [1, 1, 1]} : vector<9x8x16xbf16> to vector<1x8x16xbf16>
    %6 = vector.shape_cast %5 : vector<1x8x16xbf16> to vector<8x16xbf16>
    %cst_5 = arith.constant dense<0.000000e+00> : vector<64x16xf32>
    %7 = tpu.matmul %4, %6, %cst_5 {dimension_numbers = #tpu.dot_dimension_numbers<[1], [0], [0], [1], [0, 0, 1, 1], [], []>} : vector<64x8xbf16>, vector<8x16xbf16>, vector<64x16xf32> -> vector<64x16xf32>
    %8 = arith.addf %2, %7 : vector<64x16xf32>
    %9 = vector.extract_strided_slice %0 {offsets = [0, 1, 0], sizes = [8, 8, 8], strides = [1, 1, 1]} : vector<10x10x8xbf16> to vector<8x8x8xbf16>
    %10 = vector.shape_cast %9 : vector<8x8x8xbf16> to vector<64x8xbf16>
    %11 = vector.extract_strided_slice %1 {offsets = [1, 0, 0], sizes = [1, 8, 16], strides = [1, 1, 1]} : vector<9x8x16xbf16> to vector<1x8x16xbf16>
    %12 = vector.shape_cast %11 : vector<1x8x16xbf16> to vector<8x16xbf16>
    %cst_6 = arith.constant dense<0.000000e+00> : vector<64x16xf32>
    %13 = tpu.matmul %10, %12, %cst_6 {dimension_numbers = #tpu.dot_dimension_numbers<[1], [0], [0], [1], [0, 0, 1, 1], [], []>} : vector<64x8xbf16>, vector<8x16xbf16>, vector<64x16xf32> -> vector<64x16xf32>
    %14 = arith.addf %8, %13 : vector<64x16xf32>
    %15 = vector.extract_strided_slice %0 {offsets = [0, 2, 0], sizes = [8, 8, 8], strides = [1, 1, 1]} : vector<10x10x8xbf16> to vector<8x8x8xbf16>
    %16 = vector.shape_cast %15 : vector<8x8x8xbf16> to vector<64x8xbf16>
    %17 = vector.extract_strided_slice %1 {offsets = [2, 0, 0], sizes = [1, 8, 16], strides = [1, 1, 1]} : vector<9x8x16xbf16> to vector<1x8x16xbf16>
    %18 = vector.shape_cast %17 : vector<1x8x16xbf16> to vector<8x16xbf16>
    %cst_7 = arith.constant dense<0.000000e+00> : vector<64x16xf32>
    %19 = tpu.matmul %16, %18, %cst_7 {dimension_numbers = #tpu.dot_dimension_numbers<[1], [0], [0], [1], [0, 0, 1, 1], [], []>} : vector<64x8xbf16>, vector<8x16xbf16>, vector<64x16xf32> -> vector<64x16xf32>
    %20 = arith.addf %14, %19 : vector<64x16xf32>
    %21 = vector.extract_strided_slice %0 {offsets = [1, 0, 0], sizes = [8, 8, 8], strides = [1, 1, 1]} : vector<10x10x8xbf16> to vector<8x8x8xbf16>
    %22 = vector.shape_cast %21 : vector<8x8x8xbf16> to vector<64x8xbf16>
    %23 = vector.extract_strided_slice %1 {offsets = [3, 0, 0], sizes = [1, 8, 16], strides = [1, 1, 1]} : vector<9x8x16xbf16> to vector<1x8x16xbf16>
    %24 = vector.shape_cast %23 : vector<1x8x16xbf16> to vector<8x16xbf16>
    %cst_8 = arith.constant dense<0.000000e+00> : vector<64x16xf32>
    %25 = tpu.matmul %22, %24, %cst_8 {dimension_numbers = #tpu.dot_dimension_numbers<[1], [0], [0], [1], [0, 0, 1, 1], [], []>} : vector<64x8xbf16>, vector<8x16xbf16>, vector<64x16xf32> -> vector<64x16xf32>
    %26 = arith.addf %20, %25 : vector<64x16xf32>
    %27 = vector.extract_strided_slice %0 {offsets = [1, 1, 0], sizes = [8, 8, 8], strides = [1, 1, 1]} : vector<10x10x8xbf16> to vector<8x8x8xbf16>
    %28 = vector.shape_cast %27 : vector<8x8x8xbf16> to vector<64x8xbf16>
    %29 = vector.extract_strided_slice %1 {offsets = [4, 0, 0], sizes = [1, 8, 16], strides = [1, 1, 1]} : vector<9x8x16xbf16> to vector<1x8x16xbf16>
    %30 = vector.shape_cast %29 : vector<1x8x16xbf16> to vector<8x16xbf16>
    %cst_9 = arith.constant dense<0.000000e+00> : vector<64x16xf32>
    %31 = tpu.matmul %28, %30, %cst_9 {dimension_numbers = #tpu.dot_dimension_numbers<[1], [0], [0], [1], [0, 0, 1, 1], [], []>} : vector<64x8xbf16>, vector<8x16xbf16>, vector<64x16xf32> -> vector<64x16xf32>
    %32 = arith.addf %26, %31 : vector<64x16xf32>
    %33 = vector.extract_strided_slice %0 {offsets = [1, 2, 0], sizes = [8, 8, 8], strides = [1, 1, 1]} : vector<10x10x8xbf16> to vector<8x8x8xbf16>
    %34 = vector.shape_cast %33 : vector<8x8x8xbf16> to vector<64x8xbf16>
    %35 = vector.extract_strided_slice %1 {offsets = [5, 0, 0], sizes = [1, 8, 16], strides = [1, 1, 1]} : vector<9x8x16xbf16> to vector<1x8x16xbf16>
    %36 = vector.shape_cast %35 : vector<1x8x16xbf16> to vector<8x16xbf16>
    %cst_10 = arith.constant dense<0.000000e+00> : vector<64x16xf32>
    %37 = tpu.matmul %34, %36, %cst_10 {dimension_numbers = #tpu.dot_dimension_numbers<[1], [0], [0], [1], [0, 0, 1, 1], [], []>} : vector<64x8xbf16>, vector<8x16xbf16>, vector<64x16xf32> -> vector<64x16xf32>
    %38 = arith.addf %32, %37 : vector<64x16xf32>
    %39 = vector.extract_strided_slice %0 {offsets = [2, 0, 0], sizes = [8, 8, 8], strides = [1, 1, 1]} : vector<10x10x8xbf16> to vector<8x8x8xbf16>
    %40 = vector.shape_cast %39 : vector<8x8x8xbf16> to vector<64x8xbf16>
    %41 = vector.extract_strided_slice %1 {offsets = [6, 0, 0], sizes = [1, 8, 16], strides = [1, 1, 1]} : vector<9x8x16xbf16> to vector<1x8x16xbf16>
    %42 = vector.shape_cast %41 : vector<1x8x16xbf16> to vector<8x16xbf16>
    %cst_11 = arith.constant dense<0.000000e+00> : vector<64x16xf32>
    %43 = tpu.matmul %40, %42, %cst_11 {dimension_numbers = #tpu.dot_dimension_numbers<[1], [0], [0], [1], [0, 0, 1, 1], [], []>} : vector<64x8xbf16>, vector<8x16xbf16>, vector<64x16xf32> -> vector<64x16xf32>
    %44 = arith.addf %38, %43 : vector<64x16xf32>
    %45 = vector.extract_strided_slice %0 {offsets = [2, 1, 0], sizes = [8, 8, 8], strides = [1, 1, 1]} : vector<10x10x8xbf16> to vector<8x8x8xbf16>
    %46 = vector.shape_cast %45 : vector<8x8x8xbf16> to vector<64x8xbf16>
    %47 = vector.extract_strided_slice %1 {offsets = [7, 0, 0], sizes = [1, 8, 16], strides = [1, 1, 1]} : vector<9x8x16xbf16> to vector<1x8x16xbf16>
    %48 = vector.shape_cast %47 : vector<1x8x16xbf16> to vector<8x16xbf16>
    %cst_12 = arith.constant dense<0.000000e+00> : vector<64x16xf32>
    %49 = tpu.matmul %46, %48, %cst_12 {dimension_numbers = #tpu.dot_dimension_numbers<[1], [0], [0], [1], [0, 0, 1, 1], [], []>} : vector<64x8xbf16>, vector<8x16xbf16>, vector<64x16xf32> -> vector<64x16xf32>
    %50 = arith.addf %44, %49 : vector<64x16xf32>
    %51 = vector.extract_strided_slice %0 {offsets = [2, 2, 0], sizes = [8, 8, 8], strides = [1, 1, 1]} : vector<10x10x8xbf16> to vector<8x8x8xbf16>
    %52 = vector.shape_cast %51 : vector<8x8x8xbf16> to vector<64x8xbf16>
    %53 = vector.extract_strided_slice %1 {offsets = [8, 0, 0], sizes = [1, 8, 16], strides = [1, 1, 1]} : vector<9x8x16xbf16> to vector<1x8x16xbf16>
    %54 = vector.shape_cast %53 : vector<1x8x16xbf16> to vector<8x16xbf16>
    %cst_13 = arith.constant dense<0.000000e+00> : vector<64x16xf32>
    %55 = tpu.matmul %52, %54, %cst_13 {dimension_numbers = #tpu.dot_dimension_numbers<[1], [0], [0], [1], [0, 0, 1, 1], [], []>} : vector<64x8xbf16>, vector<8x16xbf16>, vector<64x16xf32> -> vector<64x16xf32>
    %56 = arith.addf %50, %55 : vector<64x16xf32>
    %c0_14 = arith.constant 0 : index
    %c0_15 = arith.constant 0 : index
    %57 = vector.load %arg3[%c0_14, %c0_15] : memref<1x16xf32, #tpu.memory_space<vmem>>, vector<1x16xf32>
    %58 = vector.broadcast %57 : vector<1x16xf32> to vector<64x16xf32>
    %59 = arith.addf %56, %58 : vector<64x16xf32>
    %cst_16 = arith.constant 0.000000e+00 : f32
    %60 = vector.broadcast %cst_16 : f32 to vector<64x16xf32>
    %61 = arith.maximumf %59, %60 : vector<64x16xf32>
    %62 = arith.truncf %61 : vector<64x16xf32> to vector<64x16xbf16>
    %c0_17 = arith.constant 0 : index
    %c0_18 = arith.constant 0 : index
    %63 = vector.load %arg4[%c0_17, %c0_18] : memref<64x16xbf16, #tpu.memory_space<vmem>>, vector<64x16xbf16>
    tpu.vector_store %arg4[%c0_17, %c0_18], %62 {strides = array<i32>} : memref<64x16xbf16, #tpu.memory_space<vmem>>, vector<64x16xbf16>,
    return
  }
  func.func @transform_0(%arg0: i32) -> (i32, i32, i32) {
    %c0_i32 = arith.constant 0 : i32
    %c0_i32_0 = arith.constant 0 : i32
    %c0_i32_1 = arith.constant 0 : i32
    return %arg0, %c0_i32, %c0_i32_0 : i32, i32, i32
  }
  func.func @transform_1(%arg0: i32) -> (i32, i32, i32) {
    %c0_i32 = arith.constant 0 : i32
    %c0_i32_0 = arith.constant 0 : i32
    %c0_i32_1 = arith.constant 0 : i32
    %c0_i32_2 = arith.constant 0 : i32
    return %c0_i32, %c0_i32_0, %c0_i32_1 : i32, i32, i32
  }
  func.func @transform_2(%arg0: i32) -> (i32, i32) {
    %c0_i32 = arith.constant 0 : i32
    %c0_i32_0 = arith.constant 0 : i32
    %c0_i32_1 = arith.constant 0 : i32
    return %c0_i32, %c0_i32_0 : i32, i32
  }
  func.func @transform_3(%arg0: i32) -> (i32, i32) {
    %c0_i32 = arith.constant 0 : i32
    %c0_i32_0 = arith.constant 0 : i32
    return %arg0, %c0_i32 : i32, i32
  }
}

module attributes {stable_mosaic.version = 11 : i64} {
  func.func @_conv3x3_dual_kernel(%arg0: i32, %arg1: memref<18x18x8xbf16, #tpu.memory_space<vmem>>, %arg2: memref<18x18x16xbf16, #tpu.memory_space<vmem>>, %arg3: memref<9x8x3xbf16, #tpu.memory_space<vmem>>, %arg4: memref<9x16x3xbf16, #tpu.memory_space<vmem>>, %arg5: memref<1x3xf32, #tpu.memory_space<vmem>>, %arg6: memref<256x3xf32, #tpu.memory_space<vmem>>) attributes {dimension_semantics = [#tpu.dimension_semantics<parallel>], iteration_bounds = array<i64: 2>, scalar_prefetch = 0 : i64, scratch_operands = 0 : i64, tpu.core_type = #tpu.core_type<tc>, window_params = [{transform_indices = @transform_0, window_bounds = array<i64: 18, 18, 8>}, {transform_indices = @transform_1, window_bounds = array<i64: 18, 18, 16>}, {pipeline_mode = #tpu.pipeline_mode<synchronous>, transform_indices = @transform_2, window_bounds = array<i64: 9, 8, 3>}, {pipeline_mode = #tpu.pipeline_mode<synchronous>, transform_indices = @transform_3, window_bounds = array<i64: 9, 16, 3>}, {pipeline_mode = #tpu.pipeline_mode<synchronous>, transform_indices = @transform_4, window_bounds = array<i64: 1, 3>}, {transform_indices = @transform_5, window_bounds = array<i64: 256, 3>}]} {
    %cst = arith.constant 0.000000e+00 : f32
    %0 = vector.broadcast %cst : f32 to vector<256x3xf32>
    %c0 = arith.constant 0 : index
    %c0_0 = arith.constant 0 : index
    %c0_1 = arith.constant 0 : index
    %1 = vector.load %arg1[%c0, %c0_0, %c0_1] : memref<18x18x8xbf16, #tpu.memory_space<vmem>>, vector<18x18x8xbf16>
    %c0_2 = arith.constant 0 : index
    %c0_3 = arith.constant 0 : index
    %c0_4 = arith.constant 0 : index
    %2 = vector.load %arg3[%c0_2, %c0_3, %c0_4] : memref<9x8x3xbf16, #tpu.memory_space<vmem>>, vector<9x8x3xbf16>
    %3 = vector.extract_strided_slice %1 {offsets = [0, 0, 0], sizes = [16, 16, 8], strides = [1, 1, 1]} : vector<18x18x8xbf16> to vector<16x16x8xbf16>
    %4 = vector.shape_cast %3 : vector<16x16x8xbf16> to vector<256x8xbf16>
    %5 = vector.extract_strided_slice %2 {offsets = [0, 0, 0], sizes = [1, 8, 3], strides = [1, 1, 1]} : vector<9x8x3xbf16> to vector<1x8x3xbf16>
    %6 = vector.shape_cast %5 : vector<1x8x3xbf16> to vector<8x3xbf16>
    %cst_5 = arith.constant dense<0.000000e+00> : vector<256x3xf32>
    %7 = tpu.matmul %4, %6, %cst_5 {dimension_numbers = #tpu.dot_dimension_numbers<[1], [0], [0], [1], [0, 0, 1, 1], [], []>} : vector<256x8xbf16>, vector<8x3xbf16>, vector<256x3xf32> -> vector<256x3xf32>
    %8 = arith.addf %0, %7 : vector<256x3xf32>
    %9 = vector.extract_strided_slice %1 {offsets = [0, 1, 0], sizes = [16, 16, 8], strides = [1, 1, 1]} : vector<18x18x8xbf16> to vector<16x16x8xbf16>
    %10 = vector.shape_cast %9 : vector<16x16x8xbf16> to vector<256x8xbf16>
    %11 = vector.extract_strided_slice %2 {offsets = [1, 0, 0], sizes = [1, 8, 3], strides = [1, 1, 1]} : vector<9x8x3xbf16> to vector<1x8x3xbf16>
    %12 = vector.shape_cast %11 : vector<1x8x3xbf16> to vector<8x3xbf16>
    %cst_6 = arith.constant dense<0.000000e+00> : vector<256x3xf32>
    %13 = tpu.matmul %10, %12, %cst_6 {dimension_numbers = #tpu.dot_dimension_numbers<[1], [0], [0], [1], [0, 0, 1, 1], [], []>} : vector<256x8xbf16>, vector<8x3xbf16>, vector<256x3xf32> -> vector<256x3xf32>
    %14 = arith.addf %8, %13 : vector<256x3xf32>
    %15 = vector.extract_strided_slice %1 {offsets = [0, 2, 0], sizes = [16, 16, 8], strides = [1, 1, 1]} : vector<18x18x8xbf16> to vector<16x16x8xbf16>
    %16 = vector.shape_cast %15 : vector<16x16x8xbf16> to vector<256x8xbf16>
    %17 = vector.extract_strided_slice %2 {offsets = [2, 0, 0], sizes = [1, 8, 3], strides = [1, 1, 1]} : vector<9x8x3xbf16> to vector<1x8x3xbf16>
    %18 = vector.shape_cast %17 : vector<1x8x3xbf16> to vector<8x3xbf16>
    %cst_7 = arith.constant dense<0.000000e+00> : vector<256x3xf32>
    %19 = tpu.matmul %16, %18, %cst_7 {dimension_numbers = #tpu.dot_dimension_numbers<[1], [0], [0], [1], [0, 0, 1, 1], [], []>} : vector<256x8xbf16>, vector<8x3xbf16>, vector<256x3xf32> -> vector<256x3xf32>
    %20 = arith.addf %14, %19 : vector<256x3xf32>
    %21 = vector.extract_strided_slice %1 {offsets = [1, 0, 0], sizes = [16, 16, 8], strides = [1, 1, 1]} : vector<18x18x8xbf16> to vector<16x16x8xbf16>
    %22 = vector.shape_cast %21 : vector<16x16x8xbf16> to vector<256x8xbf16>
    %23 = vector.extract_strided_slice %2 {offsets = [3, 0, 0], sizes = [1, 8, 3], strides = [1, 1, 1]} : vector<9x8x3xbf16> to vector<1x8x3xbf16>
    %24 = vector.shape_cast %23 : vector<1x8x3xbf16> to vector<8x3xbf16>
    %cst_8 = arith.constant dense<0.000000e+00> : vector<256x3xf32>
    %25 = tpu.matmul %22, %24, %cst_8 {dimension_numbers = #tpu.dot_dimension_numbers<[1], [0], [0], [1], [0, 0, 1, 1], [], []>} : vector<256x8xbf16>, vector<8x3xbf16>, vector<256x3xf32> -> vector<256x3xf32>
    %26 = arith.addf %20, %25 : vector<256x3xf32>
    %27 = vector.extract_strided_slice %1 {offsets = [1, 1, 0], sizes = [16, 16, 8], strides = [1, 1, 1]} : vector<18x18x8xbf16> to vector<16x16x8xbf16>
    %28 = vector.shape_cast %27 : vector<16x16x8xbf16> to vector<256x8xbf16>
    %29 = vector.extract_strided_slice %2 {offsets = [4, 0, 0], sizes = [1, 8, 3], strides = [1, 1, 1]} : vector<9x8x3xbf16> to vector<1x8x3xbf16>
    %30 = vector.shape_cast %29 : vector<1x8x3xbf16> to vector<8x3xbf16>
    %cst_9 = arith.constant dense<0.000000e+00> : vector<256x3xf32>
    %31 = tpu.matmul %28, %30, %cst_9 {dimension_numbers = #tpu.dot_dimension_numbers<[1], [0], [0], [1], [0, 0, 1, 1], [], []>} : vector<256x8xbf16>, vector<8x3xbf16>, vector<256x3xf32> -> vector<256x3xf32>
    %32 = arith.addf %26, %31 : vector<256x3xf32>
    %33 = vector.extract_strided_slice %1 {offsets = [1, 2, 0], sizes = [16, 16, 8], strides = [1, 1, 1]} : vector<18x18x8xbf16> to vector<16x16x8xbf16>
    %34 = vector.shape_cast %33 : vector<16x16x8xbf16> to vector<256x8xbf16>
    %35 = vector.extract_strided_slice %2 {offsets = [5, 0, 0], sizes = [1, 8, 3], strides = [1, 1, 1]} : vector<9x8x3xbf16> to vector<1x8x3xbf16>
    %36 = vector.shape_cast %35 : vector<1x8x3xbf16> to vector<8x3xbf16>
    %cst_10 = arith.constant dense<0.000000e+00> : vector<256x3xf32>
    %37 = tpu.matmul %34, %36, %cst_10 {dimension_numbers = #tpu.dot_dimension_numbers<[1], [0], [0], [1], [0, 0, 1, 1], [], []>} : vector<256x8xbf16>, vector<8x3xbf16>, vector<256x3xf32> -> vector<256x3xf32>
    %38 = arith.addf %32, %37 : vector<256x3xf32>
    %39 = vector.extract_strided_slice %1 {offsets = [2, 0, 0], sizes = [16, 16, 8], strides = [1, 1, 1]} : vector<18x18x8xbf16> to vector<16x16x8xbf16>
    %40 = vector.shape_cast %39 : vector<16x16x8xbf16> to vector<256x8xbf16>
    %41 = vector.extract_strided_slice %2 {offsets = [6, 0, 0], sizes = [1, 8, 3], strides = [1, 1, 1]} : vector<9x8x3xbf16> to vector<1x8x3xbf16>
    %42 = vector.shape_cast %41 : vector<1x8x3xbf16> to vector<8x3xbf16>
    %cst_11 = arith.constant dense<0.000000e+00> : vector<256x3xf32>
    %43 = tpu.matmul %40, %42, %cst_11 {dimension_numbers = #tpu.dot_dimension_numbers<[1], [0], [0], [1], [0, 0, 1, 1], [], []>} : vector<256x8xbf16>, vector<8x3xbf16>, vector<256x3xf32> -> vector<256x3xf32>
    %44 = arith.addf %38, %43 : vector<256x3xf32>
    %45 = vector.extract_strided_slice %1 {offsets = [2, 1, 0], sizes = [16, 16, 8], strides = [1, 1, 1]} : vector<18x18x8xbf16> to vector<16x16x8xbf16>
    %46 = vector.shape_cast %45 : vector<16x16x8xbf16> to vector<256x8xbf16>
    %47 = vector.extract_strided_slice %2 {offsets = [7, 0, 0], sizes = [1, 8, 3], strides = [1, 1, 1]} : vector<9x8x3xbf16> to vector<1x8x3xbf16>
    %48 = vector.shape_cast %47 : vector<1x8x3xbf16> to vector<8x3xbf16>
    %cst_12 = arith.constant dense<0.000000e+00> : vector<256x3xf32>
    %49 = tpu.matmul %46, %48, %cst_12 {dimension_numbers = #tpu.dot_dimension_numbers<[1], [0], [0], [1], [0, 0, 1, 1], [], []>} : vector<256x8xbf16>, vector<8x3xbf16>, vector<256x3xf32> -> vector<256x3xf32>
    %50 = arith.addf %44, %49 : vector<256x3xf32>
    %51 = vector.extract_strided_slice %1 {offsets = [2, 2, 0], sizes = [16, 16, 8], strides = [1, 1, 1]} : vector<18x18x8xbf16> to vector<16x16x8xbf16>
    %52 = vector.shape_cast %51 : vector<16x16x8xbf16> to vector<256x8xbf16>
    %53 = vector.extract_strided_slice %2 {offsets = [8, 0, 0], sizes = [1, 8, 3], strides = [1, 1, 1]} : vector<9x8x3xbf16> to vector<1x8x3xbf16>
    %54 = vector.shape_cast %53 : vector<1x8x3xbf16> to vector<8x3xbf16>
    %cst_13 = arith.constant dense<0.000000e+00> : vector<256x3xf32>
    %55 = tpu.matmul %52, %54, %cst_13 {dimension_numbers = #tpu.dot_dimension_numbers<[1], [0], [0], [1], [0, 0, 1, 1], [], []>} : vector<256x8xbf16>, vector<8x3xbf16>, vector<256x3xf32> -> vector<256x3xf32>
    %56 = arith.addf %50, %55 : vector<256x3xf32>
    %c0_14 = arith.constant 0 : index
    %c0_15 = arith.constant 0 : index
    %c0_16 = arith.constant 0 : index
    %57 = vector.load %arg2[%c0_14, %c0_15, %c0_16] : memref<18x18x16xbf16, #tpu.memory_space<vmem>>, vector<18x18x16xbf16>
    %c0_17 = arith.constant 0 : index
    %c0_18 = arith.constant 0 : index
    %c0_19 = arith.constant 0 : index
    %58 = vector.load %arg4[%c0_17, %c0_18, %c0_19] : memref<9x16x3xbf16, #tpu.memory_space<vmem>>, vector<9x16x3xbf16>
    %59 = vector.extract_strided_slice %57 {offsets = [0, 0, 0], sizes = [16, 16, 16], strides = [1, 1, 1]} : vector<18x18x16xbf16> to vector<16x16x16xbf16>
    %60 = vector.shape_cast %59 : vector<16x16x16xbf16> to vector<256x16xbf16>
    %61 = vector.extract_strided_slice %58 {offsets = [0, 0, 0], sizes = [1, 16, 3], strides = [1, 1, 1]} : vector<9x16x3xbf16> to vector<1x16x3xbf16>
    %62 = vector.shape_cast %61 : vector<1x16x3xbf16> to vector<16x3xbf16>
    %cst_20 = arith.constant dense<0.000000e+00> : vector<256x3xf32>
    %63 = tpu.matmul %60, %62, %cst_20 {dimension_numbers = #tpu.dot_dimension_numbers<[1], [0], [0], [1], [0, 0, 1, 1], [], []>} : vector<256x16xbf16>, vector<16x3xbf16>, vector<256x3xf32> -> vector<256x3xf32>
    %64 = arith.addf %56, %63 : vector<256x3xf32>
    %65 = vector.extract_strided_slice %57 {offsets = [0, 1, 0], sizes = [16, 16, 16], strides = [1, 1, 1]} : vector<18x18x16xbf16> to vector<16x16x16xbf16>
    %66 = vector.shape_cast %65 : vector<16x16x16xbf16> to vector<256x16xbf16>
    %67 = vector.extract_strided_slice %58 {offsets = [1, 0, 0], sizes = [1, 16, 3], strides = [1, 1, 1]} : vector<9x16x3xbf16> to vector<1x16x3xbf16>
    %68 = vector.shape_cast %67 : vector<1x16x3xbf16> to vector<16x3xbf16>
    %cst_21 = arith.constant dense<0.000000e+00> : vector<256x3xf32>
    %69 = tpu.matmul %66, %68, %cst_21 {dimension_numbers = #tpu.dot_dimension_numbers<[1], [0], [0], [1], [0, 0, 1, 1], [], []>} : vector<256x16xbf16>, vector<16x3xbf16>, vector<256x3xf32> -> vector<256x3xf32>
    %70 = arith.addf %64, %69 : vector<256x3xf32>
    %71 = vector.extract_strided_slice %57 {offsets = [0, 2, 0], sizes = [16, 16, 16], strides = [1, 1, 1]} : vector<18x18x16xbf16> to vector<16x16x16xbf16>
    %72 = vector.shape_cast %71 : vector<16x16x16xbf16> to vector<256x16xbf16>
    %73 = vector.extract_strided_slice %58 {offsets = [2, 0, 0], sizes = [1, 16, 3], strides = [1, 1, 1]} : vector<9x16x3xbf16> to vector<1x16x3xbf16>
    %74 = vector.shape_cast %73 : vector<1x16x3xbf16> to vector<16x3xbf16>
    %cst_22 = arith.constant dense<0.000000e+00> : vector<256x3xf32>
    %75 = tpu.matmul %72, %74, %cst_22 {dimension_numbers = #tpu.dot_dimension_numbers<[1], [0], [0], [1], [0, 0, 1, 1], [], []>} : vector<256x16xbf16>, vector<16x3xbf16>, vector<256x3xf32> -> vector<256x3xf32>
    %76 = arith.addf %70, %75 : vector<256x3xf32>
    %77 = vector.extract_strided_slice %57 {offsets = [1, 0, 0], sizes = [16, 16, 16], strides = [1, 1, 1]} : vector<18x18x16xbf16> to vector<16x16x16xbf16>
    %78 = vector.shape_cast %77 : vector<16x16x16xbf16> to vector<256x16xbf16>
    %79 = vector.extract_strided_slice %58 {offsets = [3, 0, 0], sizes = [1, 16, 3], strides = [1, 1, 1]} : vector<9x16x3xbf16> to vector<1x16x3xbf16>
    %80 = vector.shape_cast %79 : vector<1x16x3xbf16> to vector<16x3xbf16>
    %cst_23 = arith.constant dense<0.000000e+00> : vector<256x3xf32>
    %81 = tpu.matmul %78, %80, %cst_23 {dimension_numbers = #tpu.dot_dimension_numbers<[1], [0], [0], [1], [0, 0, 1, 1], [], []>} : vector<256x16xbf16>, vector<16x3xbf16>, vector<256x3xf32> -> vector<256x3xf32>
    %82 = arith.addf %76, %81 : vector<256x3xf32>
    %83 = vector.extract_strided_slice %57 {offsets = [1, 1, 0], sizes = [16, 16, 16], strides = [1, 1, 1]} : vector<18x18x16xbf16> to vector<16x16x16xbf16>
    %84 = vector.shape_cast %83 : vector<16x16x16xbf16> to vector<256x16xbf16>
    %85 = vector.extract_strided_slice %58 {offsets = [4, 0, 0], sizes = [1, 16, 3], strides = [1, 1, 1]} : vector<9x16x3xbf16> to vector<1x16x3xbf16>
    %86 = vector.shape_cast %85 : vector<1x16x3xbf16> to vector<16x3xbf16>
    %cst_24 = arith.constant dense<0.000000e+00> : vector<256x3xf32>
    %87 = tpu.matmul %84, %86, %cst_24 {dimension_numbers = #tpu.dot_dimension_numbers<[1], [0], [0], [1], [0, 0, 1, 1], [], []>} : vector<256x16xbf16>, vector<16x3xbf16>, vector<256x3xf32> -> vector<256x3xf32>
    %88 = arith.addf %82, %87 : vector<256x3xf32>
    %89 = vector.extract_strided_slice %57 {offsets = [1, 2, 0], sizes = [16, 16, 16], strides = [1, 1, 1]} : vector<18x18x16xbf16> to vector<16x16x16xbf16>
    %90 = vector.shape_cast %89 : vector<16x16x16xbf16> to vector<256x16xbf16>
    %91 = vector.extract_strided_slice %58 {offsets = [5, 0, 0], sizes = [1, 16, 3], strides = [1, 1, 1]} : vector<9x16x3xbf16> to vector<1x16x3xbf16>
    %92 = vector.shape_cast %91 : vector<1x16x3xbf16> to vector<16x3xbf16>
    %cst_25 = arith.constant dense<0.000000e+00> : vector<256x3xf32>
    %93 = tpu.matmul %90, %92, %cst_25 {dimension_numbers = #tpu.dot_dimension_numbers<[1], [0], [0], [1], [0, 0, 1, 1], [], []>} : vector<256x16xbf16>, vector<16x3xbf16>, vector<256x3xf32> -> vector<256x3xf32>
    %94 = arith.addf %88, %93 : vector<256x3xf32>
    %95 = vector.extract_strided_slice %57 {offsets = [2, 0, 0], sizes = [16, 16, 16], strides = [1, 1, 1]} : vector<18x18x16xbf16> to vector<16x16x16xbf16>
    %96 = vector.shape_cast %95 : vector<16x16x16xbf16> to vector<256x16xbf16>
    %97 = vector.extract_strided_slice %58 {offsets = [6, 0, 0], sizes = [1, 16, 3], strides = [1, 1, 1]} : vector<9x16x3xbf16> to vector<1x16x3xbf16>
    %98 = vector.shape_cast %97 : vector<1x16x3xbf16> to vector<16x3xbf16>
    %cst_26 = arith.constant dense<0.000000e+00> : vector<256x3xf32>
    %99 = tpu.matmul %96, %98, %cst_26 {dimension_numbers = #tpu.dot_dimension_numbers<[1], [0], [0], [1], [0, 0, 1, 1], [], []>} : vector<256x16xbf16>, vector<16x3xbf16>, vector<256x3xf32> -> vector<256x3xf32>
    %100 = arith.addf %94, %99 : vector<256x3xf32>
    %101 = vector.extract_strided_slice %57 {offsets = [2, 1, 0], sizes = [16, 16, 16], strides = [1, 1, 1]} : vector<18x18x16xbf16> to vector<16x16x16xbf16>
    %102 = vector.shape_cast %101 : vector<16x16x16xbf16> to vector<256x16xbf16>
    %103 = vector.extract_strided_slice %58 {offsets = [7, 0, 0], sizes = [1, 16, 3], strides = [1, 1, 1]} : vector<9x16x3xbf16> to vector<1x16x3xbf16>
    %104 = vector.shape_cast %103 : vector<1x16x3xbf16> to vector<16x3xbf16>
    %cst_27 = arith.constant dense<0.000000e+00> : vector<256x3xf32>
    %105 = tpu.matmul %102, %104, %cst_27 {dimension_numbers = #tpu.dot_dimension_numbers<[1], [0], [0], [1], [0, 0, 1, 1], [], []>} : vector<256x16xbf16>, vector<16x3xbf16>, vector<256x3xf32> -> vector<256x3xf32>
    %106 = arith.addf %100, %105 : vector<256x3xf32>
    %107 = vector.extract_strided_slice %57 {offsets = [2, 2, 0], sizes = [16, 16, 16], strides = [1, 1, 1]} : vector<18x18x16xbf16> to vector<16x16x16xbf16>
    %108 = vector.shape_cast %107 : vector<16x16x16xbf16> to vector<256x16xbf16>
    %109 = vector.extract_strided_slice %58 {offsets = [8, 0, 0], sizes = [1, 16, 3], strides = [1, 1, 1]} : vector<9x16x3xbf16> to vector<1x16x3xbf16>
    %110 = vector.shape_cast %109 : vector<1x16x3xbf16> to vector<16x3xbf16>
    %cst_28 = arith.constant dense<0.000000e+00> : vector<256x3xf32>
    %111 = tpu.matmul %108, %110, %cst_28 {dimension_numbers = #tpu.dot_dimension_numbers<[1], [0], [0], [1], [0, 0, 1, 1], [], []>} : vector<256x16xbf16>, vector<16x3xbf16>, vector<256x3xf32> -> vector<256x3xf32>
    %112 = arith.addf %106, %111 : vector<256x3xf32>
    %c0_29 = arith.constant 0 : index
    %c0_30 = arith.constant 0 : index
    %113 = vector.load %arg5[%c0_29, %c0_30] : memref<1x3xf32, #tpu.memory_space<vmem>>, vector<1x3xf32>
    %114 = vector.broadcast %113 : vector<1x3xf32> to vector<256x3xf32>
    %115 = arith.addf %112, %114 : vector<256x3xf32>
    %c0_31 = arith.constant 0 : index
    %c0_32 = arith.constant 0 : index
    %116 = vector.load %arg6[%c0_31, %c0_32] : memref<256x3xf32, #tpu.memory_space<vmem>>, vector<256x3xf32>
    tpu.vector_store %arg6[%c0_31, %c0_32], %115 {strides = array<i32>} : memref<256x3xf32, #tpu.memory_space<vmem>>, vector<256x3xf32>,
    return
  }
  func.func @transform_0(%arg0: i32) -> (i32, i32, i32) {
    %c0_i32 = arith.constant 0 : i32
    %c0_i32_0 = arith.constant 0 : i32
    %c0_i32_1 = arith.constant 0 : i32
    return %arg0, %c0_i32, %c0_i32_0 : i32, i32, i32
  }
  func.func @transform_1(%arg0: i32) -> (i32, i32, i32) {
    %c0_i32 = arith.constant 0 : i32
    %c0_i32_0 = arith.constant 0 : i32
    %c0_i32_1 = arith.constant 0 : i32
    return %arg0, %c0_i32, %c0_i32_0 : i32, i32, i32
  }
  func.func @transform_2(%arg0: i32) -> (i32, i32, i32) {
    %c0_i32 = arith.constant 0 : i32
    %c0_i32_0 = arith.constant 0 : i32
    %c0_i32_1 = arith.constant 0 : i32
    %c0_i32_2 = arith.constant 0 : i32
    return %c0_i32, %c0_i32_0, %c0_i32_1 : i32, i32, i32
  }
  func.func @transform_3(%arg0: i32) -> (i32, i32, i32) {
    %c0_i32 = arith.constant 0 : i32
    %c0_i32_0 = arith.constant 0 : i32
    %c0_i32_1 = arith.constant 0 : i32
    %c0_i32_2 = arith.constant 0 : i32
    return %c0_i32, %c0_i32_0, %c0_i32_1 : i32, i32, i32
  }
  func.func @transform_4(%arg0: i32) -> (i32, i32) {
    %c0_i32 = arith.constant 0 : i32
    %c0_i32_0 = arith.constant 0 : i32
    %c0_i32_1 = arith.constant 0 : i32
    return %c0_i32, %c0_i32_0 : i32, i32
  }
  func.func @transform_5(%arg0: i32) -> (i32, i32) {
    %c0_i32 = arith.constant 0 : i32
    %c0_i32_0 = arith.constant 0 : i32
    return %arg0, %c0_i32 : i32, i32
  }
}

</mosaic_0001>

<bundles_post_ra>
// kernel: dann_forward.5
= control target key start
LH: loop header
LB: loop body
LE: loop exit
PB: predicated region body
PF: predicated region fallthrough
CT: control target
= control target key end

     0   :  { %s2095_s6 = smov 0   ;;  %s4162_s0 = inlined_call_operand.vmem [shape: bf16[16,2,8,2,8], index: 0, kind: input, shape index: {}]   ;;  %s4163_s1 = inlined_call_operand.vmem [shape: bf16[16,8,8], index: 1, kind: output, shape index: {}]  }
   0x1 LB: > { %s1930_s7 = sadd.s32 4294967295, %s2083_s6   ;;  %p1934_p0 = scmp.ge.s32.totalorder %s2083_s6, 1  ;;  %s2083_s6 = sphi %s2095_s6, %s11_s6  }
   0x2   : > { %p88_p1 = scmp.lt.s32.totalorder %s2083_s6, 3 }
   0x4   : > { %p89_p2 = pnand %p1934_p0, %p88_p1 }
   0x6   : > { %92 = sbr.rel (%p89_p2) target bundleno = 433 (0x1b1), region = 24 }
   0xd   : > { %s1935_s8 = sshll.u32 %s1930_s7, 3  ;;  %vm376_vm0 = vcmask 58368   ;;  %vm1273_vm1 = vcmask 64512   ;;  %vm1786_vm2 = vcmask 1041409   ;;  %vm1788_vm3 = vcmask 1042434  }
   0xe   : > { %p109_p3 = scmp.lt.s32.totalorder %s1935_s8, 15  ;;  %vm1790_vm4 = vcmask 1043459   ;;  %vm1792_vm5 = vcmask 1044484   ;;  %vm1794_vm6 = vcmask 1045509   ;;  %vm1796_vm7 = vcmask 1046534  }
   0xf   : > { %vm1798_vm8 = vcmask 1047559   ;;  %vm1865_vm9 = vcmask 60416  }
  0x10   : > { %s4884_s8 = smov (!%p109_p3, %s1935_s8), 15 }
  0x11   : > { %s1936_s9 = sshll.u32 %s4884_s8, 4  ;;  %s1938_s13 = sshll.u32 %s4884_s8, 2 }
  0x12   : > { %s2109_s12 = scalar_lea.vmem %s4162_s0, %s1936_s9  ;;  %s118_s16 = scalar_lea.vmem %s4163_s1, %s1938_s13 }
  0x13   : > { %v2112_v0 = vld [vmem:[%s2109_s12] sm:$0x1]  ;;  %v2115_v1 = vld [vmem:[%s2109_s12 + $0x1] sm:$0x1]  ;;  %v2118_v2 = vld [vmem:[%s2109_s12 + $0x2] sm:$0x1] }
  0x14   : > { %v2121_v3 = vld [vmem:[%s2109_s12 + $0x3] sm:$0x1]  ;;  %v2124_v4 = vld [vmem:[%s2109_s12 + $0x4] sm:$0x1]  ;;  %v2127_v5 = vld [vmem:[%s2109_s12 + $0x5] sm:$0x1] }
  0x15   : > { %v2130_v6 = vld [vmem:[%s2109_s12 + $0x6] sm:$0x1]  ;;  %v2133_v7 = vld [vmem:[%s2109_s12 + $0x7] sm:$0x1]  ;;  %v2136_v8 = vld [vmem:[%s2109_s12 + $0x8] sm:$0x1] }
  0x16   : > { %v2139_v9 = vld [vmem:[%s2109_s12 + $0x9] sm:$0x1]  ;;  %v2142_v10 = vld [vmem:[%s2109_s12 + $0xa] sm:$0x1]  ;;  %v2145_v11 = vld [vmem:[%s2109_s12 + $0xb] sm:$0x1] }
  0x17   : > { %v2148_v12 = vld [vmem:[%s2109_s12 + $0xc] sm:$0x1]  ;;  %v2151_v13 = vld [vmem:[%s2109_s12 + $0xd] sm:$0x1]  ;;  %v2154_v14 = vld [vmem:[%s2109_s12 + $0xe] sm:$0x1] }
  0x18   : > { %v2157_v15 = vld [vmem:[%s2109_s12 + $0xf] sm:$0x1]  ;;  %v2160_v16 = vld [vmem:[%s2109_s12 + $0x10] sm:$0x1]  ;;  %v2163_v17 = vld [vmem:[%s2109_s12 + $0x11] sm:$0x1] }
  0x19   : > { %v2166_v18 = vld [vmem:[%s2109_s12 + $0x12] sm:$0x1]  ;;  %v2169_v19 = vld [vmem:[%s2109_s12 + $0x13] sm:$0x1]  ;;  %v2172_v20 = vld [vmem:[%s2109_s12 + $0x14] sm:$0x1] }
  0x1a   : > { %v2175_v21 = vld [vmem:[%s2109_s12 + $0x15] sm:$0x1]  ;;  %v2178_v22 = vld [vmem:[%s2109_s12 + $0x16] sm:$0x1]  ;;  %v2184_v26 = vld [vmem:[%s2109_s12 + $0x17] sm:$0x1] }
  0x1b   : > { %v2187_v27 = vld [vmem:[%s2109_s12 + $0x18] sm:$0x1]  ;;  %v2190_v28 = vld [vmem:[%s2109_s12 + $0x19] sm:$0x1]  ;;  %v2193_v29 = vld [vmem:[%s2109_s12 + $0x1a] sm:$0x1] }
  0x1c   : > { %v2200_v34 = vld [vmem:[%s2109_s12 + $0x1b] sm:$0x1]  ;;  %v2203_v35 = vld [vmem:[%s2109_s12 + $0x1c] sm:$0x1]  ;;  %v2206_v36 = vld [vmem:[%s2109_s12 + $0x1d] sm:$0x1] }
  0x1d   : > { %v2209_v37 = vld [vmem:[%s2109_s12 + $0x1e] sm:$0x1]  ;;  %v2216_v42 = vld [vmem:[%s2109_s12 + $0x1f] sm:$0x1]  ;;  %v2219_v43 = vld [vmem:[%s2109_s12 + $0x20] sm:$0x1] }
  0x1e   : > { %4274 = vst [vmem:[#allocation2_spill] sm:$0xff] %v2216_v42  ;;  %4275 = vst [vmem:[#allocation3_spill] sm:$0xff] %v2219_v43  ;;  %v2222_v44 = vld [vmem:[%s2109_s12 + $0x21] sm:$0x1]  ;;  %v2225_v45 = vld [vmem:[%s2109_s12 + $0x22] sm:$0x1] }
  0x1f   : > { %4276 = vst [vmem:[#allocation4_spill] sm:$0xff] %v2222_v44  ;;  %4277 = vst [vmem:[#allocation5_spill] sm:$0xff] %v2225_v45  ;;  %v2232_v50 = vld [vmem:[%s2109_s12 + $0x23] sm:$0x1]  ;;  %v2235_v51 = vld [vmem:[%s2109_s12 + $0x24] sm:$0x1] }
  0x20   : > { %4278 = vst [vmem:[#allocation6_spill] sm:$0xff] %v2232_v50  ;;  %4279 = vst [vmem:[#allocation7_spill] sm:$0xff] %v2235_v51  ;;  %v2238_v52 = vld [vmem:[%s2109_s12 + $0x25] sm:$0x1]  ;;  %v2241_v53 = vld [vmem:[%s2109_s12 + $0x26] sm:$0x1] }
  0x21   : > { %4280 = vst [vmem:[#allocation8_spill] sm:$0xff] %v2238_v52  ;;  %4281 = vst [vmem:[#allocation9_spill] sm:$0xff] %v2241_v53  ;;  %v2248_v58 = vld [vmem:[%s2109_s12 + $0x27] sm:$0x1]  ;;  %v2251_v59 = vld [vmem:[%s2109_s12 + $0x28] sm:$0x1] }
  0x22   : > { %4282 = vst [vmem:[#allocation10_spill] sm:$0xff] %v2248_v58  ;;  %4283 = vst [vmem:[#allocation11_spill] sm:$0xff] %v2251_v59  ;;  %v2254_v60 = vld [vmem:[%s2109_s12 + $0x29] sm:$0x1]  ;;  %v2257_v61 = vld [vmem:[%s2109_s12 + $0x2a] sm:$0x1] }
  0x23   : > { %4284 = vst [vmem:[#allocation12_spill] sm:$0xff] %v2254_v60  ;;  %4285 = vst [vmem:[#allocation13_spill] sm:$0xff] %v2257_v61  ;;  %v2264_v55 = vld [vmem:[%s2109_s12 + $0x2b] sm:$0x1]  ;;  %v2267_v54 = vld [vmem:[%s2109_s12 + $0x2c] sm:$0x1] }
  0x24   : > { %4286 = vst [vmem:[#allocation14_spill] sm:$0xff] %v2264_v55  ;;  %4287 = vst [vmem:[#allocation15_spill] sm:$0xff] %v2267_v54  ;;  %v2270_v49 = vld [vmem:[%s2109_s12 + $0x2d] sm:$0x1]  ;;  %v2273_v48 = vld [vmem:[%s2109_s12 + $0x2e] sm:$0x1] }
  0x25   : > { %4288 = vst [vmem:[#allocation16_spill] sm:$0xff] %v2270_v49  ;;  %4289 = vst [vmem:[#allocation17_spill] sm:$0xff] %v2273_v48  ;;  %v2280_v47 = vld [vmem:[%s2109_s12 + $0x2f] sm:$0x1]  ;;  %v2283_v46 = vld [vmem:[%s2109_s12 + $0x30] sm:$0x1] }
  0x26   : > { %4290 = vst [vmem:[#allocation18_spill] sm:$0xff] %v2280_v47  ;;  %4291 = vst [vmem:[#allocation19_spill] sm:$0xff] %v2283_v46  ;;  %v2286_v41 = vld [vmem:[%s2109_s12 + $0x31] sm:$0x1]  ;;  %v2289_v40 = vld [vmem:[%s2109_s12 + $0x32] sm:$0x1] }
  0x27   : > { %4292 = vst [vmem:[#allocation20_spill] sm:$0xff] %v2286_v41  ;;  %4293 = vst [vmem:[#allocation21_spill] sm:$0xff] %v2289_v40  ;;  %v2296_v39 = vld [vmem:[%s2109_s12 + $0x33] sm:$0x1]  ;;  %v2299_v38 = vld [vmem:[%s2109_s12 + $0x34] sm:$0x1] }
  0x28   : > { %4294 = vst [vmem:[#allocation22_spill] sm:$0xff] %v2299_v38  ;;  %v2302_v33 = vld [vmem:[%s2109_s12 + $0x35] sm:$0x1]  ;;  %v2305_v32 = vld [vmem:[%s2109_s12 + $0x36] sm:$0x1] }
  0x29   : > { %4295 = vst [vmem:[#allocation23_spill] sm:$0xff] %v2302_v33  ;;  %4296 = vst [vmem:[#allocation24_spill] sm:$0xff] %v2305_v32  ;;  %v2312_v31 = vld [vmem:[%s2109_s12 + $0x37] sm:$0x1]  ;;  %v2315_v30 = vld [vmem:[%s2109_s12 + $0x38] sm:$0x1] }
  0x2a   : > { %4297 = vst [vmem:[#allocation25_spill] sm:$0xff] %v2315_v30  ;;  %v2318_v25 = vld [vmem:[%s2109_s12 + $0x39] sm:$0x1]  ;;  %v2321_v24 = vld [vmem:[%s2109_s12 + $0x3a] sm:$0x1] }
  0x2b   : > { %4298 = vst [vmem:[#allocation26_spill] sm:$0xff] %v2318_v25  ;;  %4299 = vst [vmem:[#allocation27_spill] sm:$0xff] %v2321_v24  ;;  %v2328_v23 = vld [vmem:[%s2109_s12 + $0x3b] sm:$0x1]  ;;  %v2331_v45 = vld [vmem:[%s2109_s12 + $0x3c] sm:$0x1] }
  0x2c   : > { %4300 = vst [vmem:[#allocation28_spill] sm:$0xff] %v2331_v45  ;;  %v2334_v44 = vld [vmem:[%s2109_s12 + $0x3d] sm:$0x1]  ;;  %v2337_v43 = vld [vmem:[%s2109_s12 + $0x3e] sm:$0x1] }
  0x2d   : > { %4301 = vst [vmem:[#allocation29_spill] sm:$0xff] %v2334_v44  ;;  %4302 = vst [vmem:[#allocation30_spill] sm:$0xff] %v2337_v43  ;;  %v2344_v53 = vld [vmem:[%s2109_s12 + $0x3f] sm:$0x1]  ;;  %v2347_v52 = vld [vmem:[%s2109_s12 + $0x40] sm:$0x1] }
  0x2e   : > { %4303 = vst [vmem:[#allocation31_spill] sm:$0xff] %v2347_v52  ;;  %v2350_v51 = vld [vmem:[%s2109_s12 + $0x41] sm:$0x1]  ;;  %v2353_v50 = vld [vmem:[%s2109_s12 + $0x42] sm:$0x1] }
  0x2f   : > { %4304 = vst [vmem:[#allocation32_spill] sm:$0xff] %v2350_v51  ;;  %4305 = vst [vmem:[#allocation33_spill] sm:$0xff] %v2353_v50  ;;  %v2360_v61 = vld [vmem:[%s2109_s12 + $0x43] sm:$0x1]  ;;  %v2363_v60 = vld [vmem:[%s2109_s12 + $0x44] sm:$0x1] }
  0x30   : > { %4306 = vst [vmem:[#allocation34_spill] sm:$0xff] %v2363_v60  ;;  %v2366_v59 = vld [vmem:[%s2109_s12 + $0x45] sm:$0x1]  ;;  %v2369_v58 = vld [vmem:[%s2109_s12 + $0x46] sm:$0x1] }
  0x31   : > { %4307 = vst [vmem:[#allocation35_spill] sm:$0xff] %v2366_v59  ;;  %4308 = vst [vmem:[#allocation36_spill] sm:$0xff] %v2369_v58  ;;  %v2376_v57 = vld [vmem:[%s2109_s12 + $0x47] sm:$0x1]  ;;  %v2379_v48 = vld [vmem:[%s2109_s12 + $0x48] sm:$0x1] }
  0x32   : > { %4309 = vst [vmem:[#allocation37_spill] sm:$0xff] %v2379_v48  ;;  %v2382_v49 = vld [vmem:[%s2109_s12 + $0x49] sm:$0x1]  ;;  %v2385_v54 = vld [vmem:[%s2109_s12 + $0x4a] sm:$0x1] }
  0x33   : > { %4310 = vst [vmem:[#allocation38_spill] sm:$0xff] %v2382_v49  ;;  %4311 = vst [vmem:[#allocation39_spill] sm:$0xff] %v2385_v54  ;;  %v2392_v63 = vld [vmem:[%s2109_s12 + $0x4b] sm:$0x1]  ;;  %v2395_v40 = vld [vmem:[%s2109_s12 + $0x4c] sm:$0x1] }
  0x34   : > { %v2398_v41 = vld [vmem:[%s2109_s12 + $0x4d] sm:$0x1]  ;;  %v2405_v42 = vld [vmem:[%s2109_s12 + $0x4e] sm:$0x1]  ;;  %v2408_v56 = vld [vmem:[%s2109_s12 + $0x4f] sm:$0x1] }
  0x35   : > { %4312 = vst [vmem:[#allocation40_spill] sm:$0xff] %v2398_v41  ;;  %4313 = vst [vmem:[#allocation41_spill] sm:$0xff] %v2405_v42  ;;  %v2411_v32 = vld [vmem:[%s2109_s12 + $0x50] sm:$0x1]  ;;  %v2418_v47 = vld [vmem:[%s2109_s12 + $0x51] sm:$0x1] }
  0x36   : > { %4314 = vst [vmem:[#allocation42_spill] sm:$0xff] %v2408_v56  ;;  %4315 = vst [vmem:[#allocation43_spill] sm:$0xff] %v2411_v32  ;;  %v2421_v62 = vld [vmem:[%s2109_s12 + $0x52] sm:$0x1]  ;;  %v2424_v24 = vld [vmem:[%s2109_s12 + $0x53] sm:$0x1] }
  0x37   : > { %4316 = vst [vmem:[#allocation44_spill] sm:$0xff] %v2418_v47  ;;  %4317 = vst [vmem:[#allocation45_spill] sm:$0xff] %v2421_v62  ;;  %v2431_v38 = vld [vmem:[%s2109_s12 + $0x54] sm:$0x1]  ;;  %v2434_v55 = vld [vmem:[%s2109_s12 + $0x55] sm:$0x1] }
  0x38   : > { %4318 = vst [vmem:[#allocation46_spill] sm:$0xff] %v2424_v24  ;;  %4319 = vst [vmem:[#allocation47_spill] sm:$0xff] %v2431_v38  ;;  %v2437_v43 = vld [vmem:[%s2109_s12 + $0x56] sm:$0x1]  ;;  %v2444_v30 = vld [vmem:[%s2109_s12 + $0x57] sm:$0x1] }
  0x39   : > { %4320 = vst [vmem:[#allocation48_spill] sm:$0xff] %v2434_v55  ;;  %4321 = vst [vmem:[#allocation49_spill] sm:$0xff] %v2437_v43  ;;  %v2447_v46 = vld [vmem:[%s2109_s12 + $0x58] sm:$0x1]  ;;  %v2450_v50 = vld [vmem:[%s2109_s12 + $0x59] sm:$0x1] }
  0x3a   : > { %4322 = vst [vmem:[#allocation50_spill] sm:$0xff] %v2444_v30  ;;  %4323 = vst [vmem:[#allocation51_spill] sm:$0xff] %v2447_v46  ;;  %v2457_v25 = vld [vmem:[%s2109_s12 + $0x5a] sm:$0x1]  ;;  %v2460_v33 = vld [vmem:[%s2109_s12 + $0x5b] sm:$0x1] }
  0x3b   : > { %4324 = vst [vmem:[#allocation52_spill] sm:$0xff] %v2450_v50  ;;  %4325 = vst [vmem:[#allocation53_spill] sm:$0xff] %v2457_v25  ;;  %v2463_v58 = vld [vmem:[%s2109_s12 + $0x5c] sm:$0x1]  ;;  %v2470_v44 = vld [vmem:[%s2109_s12 + $0x5d] sm:$0x1] }
  0x3c   : > { %4326 = vst [vmem:[#allocation54_spill] sm:$0xff] %v2460_v33  ;;  %4327 = vst [vmem:[#allocation55_spill] sm:$0xff] %v2463_v58  ;;  %v2473_v45 = vld [vmem:[%s2109_s12 + $0x5e] sm:$0x1]  ;;  %v2476_v54 = vld [vmem:[%s2109_s12 + $0x5f] sm:$0x1] }
  0x3d   : > { %4328 = vst [vmem:[#allocation56_spill] sm:$0xff] %v2470_v44  ;;  %4329 = vst [vmem:[#allocation57_spill] sm:$0xff] %v2473_v45  ;;  %v2483_v52 = vld [vmem:[%s2109_s12 + $0x60] sm:$0x1]  ;;  %v2486_v51 = vld [vmem:[%s2109_s12 + $0x61] sm:$0x1] }
  0x3e   : > { %4330 = vst [vmem:[#allocation58_spill] sm:$0xff] %v2476_v54  ;;  %4331 = vst [vmem:[#allocation59_spill] sm:$0xff] %v2483_v52  ;;  %v2489_v42 = vld [vmem:[%s2109_s12 + $0x62] sm:$0x1]  ;;  %v2496_v60 = vld [vmem:[%s2109_s12 + $0x63] sm:$0x1] }
  0x3f   : > { %4332 = vst [vmem:[#allocation60_spill] sm:$0xff] %v2486_v51  ;;  %4333 = vst [vmem:[#allocation61_spill] sm:$0xff] %v2489_v42  ;;  %v2499_v62 = vld [vmem:[%s2109_s12 + $0x64] sm:$0x1]  ;;  %v2502_v47 = vld [vmem:[%s2109_s12 + $0x65] sm:$0x1] }
  0x40   : > { %4334 = vst [vmem:[#allocation62_spill] sm:$0xff] %v2496_v60  ;;  %4335 = vst [vmem:[#allocation63_spill] sm:$0xff] %v2499_v62  ;;  %v2509_v49 = vld [vmem:[%s2109_s12 + $0x66] sm:$0x1]  ;;  %v2512_v59 = vld [vmem:[%s2109_s12 + $0x67] sm:$0x1] }
  0x41   : > { %4336 = vst [vmem:[#allocation64_spill] sm:$0xff] %v2502_v47  ;;  %4337 = vst [vmem:[#allocation65_spill] sm:$0xff] %v2509_v49  ;;  %v2515_v43 = vld [vmem:[%s2109_s12 + $0x68] sm:$0x1]  ;;  %v2522_v56 = vld [vmem:[%s2109_s12 + $0x69] sm:$0x1] }
  0x42   : > { %4338 = vst [vmem:[#allocation66_spill] sm:$0xff] %v2512_v59  ;;  %4339 = vst [vmem:[#allocation67_spill] sm:$0xff] %v2515_v43  ;;  %v2525_v48 = vld [vmem:[%s2109_s12 + $0x6a] sm:$0x1]  ;;  %v2528_v25 = vld [vmem:[%s2109_s12 + $0x6b] sm:$0x1]  ;;  %v4365_v43 = vunpack.c.l.bf16 %v2118_v2  ;;  %v4369_v2 = vunpack.c.l.bf16 %v2130_v6 }
  0x43   : > { %4340 = vst [vmem:[#allocation68_spill] sm:$0xff] %v2522_v56  ;;  %4341 = vst [vmem:[#allocation69_spill] sm:$0xff] %v2525_v48  ;;  %v2535_v38 = vld [vmem:[%s2109_s12 + $0x6c] sm:$0x1]  ;;  %v2538_v41 = vld [vmem:[%s2109_s12 + $0x6d] sm:$0x1] }
  0x44   : > { %4342 = vst [vmem:[#allocation70_spill] sm:$0xff] %v2528_v25  ;;  %4343 = vst [vmem:[#allocation71_spill] sm:$0xff] %v2535_v38  ;;  %v2541_v45 = vld [vmem:[%s2109_s12 + $0x6e] sm:$0x1]  ;;  %v2548_v46 = vld [vmem:[%s2109_s12 + $0x6f] sm:$0x1] }
  0x45   : > { %4344 = vst [vmem:[#allocation72_spill] sm:$0xff] %v2538_v41  ;;  %4345 = vst [vmem:[#allocation73_spill] sm:$0xff] %v2541_v45  ;;  %v2551_v32 = vld [vmem:[%s2109_s12 + $0x70] sm:$0x1]  ;;  %v2554_v42 = vld [vmem:[%s2109_s12 + $0x71] sm:$0x1]  ;;  %v4364_v41 = vunpack.c.l.bf16 %v2115_v1 }
  0x46   : > { %4346 = vst [vmem:[#allocation74_spill] sm:$0xff] %v2548_v46  ;;  %4347 = vst [vmem:[#allocation75_spill] sm:$0xff] %v2551_v32  ;;  %v2561_v58 = vld [vmem:[%s2109_s12 + $0x72] sm:$0x1]  ;;  %v2564_v55 = vld [vmem:[%s2109_s12 + $0x73] sm:$0x1] }
  0x47   : > { %4348 = vst [vmem:[#allocation76_spill] sm:$0xff] %v2554_v42  ;;  %4349 = vst [vmem:[#allocation77_spill] sm:$0xff] %v2561_v58  ;;  %v2567_v49 = vld [vmem:[%s2109_s12 + $0x74] sm:$0x1]  ;;  %v2574_v52 = vld [vmem:[%s2109_s12 + $0x75] sm:$0x1] }
  0x48   : > { %4350 = vst [vmem:[#allocation78_spill] sm:$0xff] %v2564_v55  ;;  %4351 = vst [vmem:[#allocation79_spill] sm:$0xff] %v2567_v49  ;;  %v2577_v50 = vld [vmem:[%s2109_s12 + $0x76] sm:$0x1]  ;;  %v2580_v48 = vld [vmem:[%s2109_s12 + $0x77] sm:$0x1] }
  0x49   : > { %4352 = vst [vmem:[#allocation80_spill] sm:$0xff] %v2574_v52  ;;  %4353 = vst [vmem:[#allocation81_spill] sm:$0xff] %v2577_v50  ;;  %v2587_v62 = vld [vmem:[%s2109_s12 + $0x78] sm:$0x1]  ;;  %v2590_v44 = vld [vmem:[%s2109_s12 + $0x79] sm:$0x1]  ;;  %v4363_v52 = vunpack.c.l.bf16 %v2112_v0  ;;  %v4366_v50 = vunpack.c.l.bf16 %v2121_v3  ;;  %v4370_v3 = vunpack.c.l.bf16 %v2133_v7 }
  0x4a   : > { %4354 = vst [vmem:[#allocation82_spill] sm:$0xff] %v2580_v48  ;;  %4355 = vst [vmem:[#allocation83_spill] sm:$0xff] %v2587_v62  ;;  %v2593_v45 = vld [vmem:[%s2109_s12 + $0x7a] sm:$0x1]  ;;  %v2600_v32 = vld [vmem:[%s2109_s12 + $0x7b] sm:$0x1] }
  0x4b   : > { %4356 = vst [vmem:[#allocation84_spill] sm:$0xff] %v2590_v44  ;;  %4357 = vst [vmem:[#allocation85_spill] sm:$0xff] %v2593_v45  ;;  %v2603_v47 = vld [vmem:[%s2109_s12 + $0x7c] sm:$0x1]  ;;  %v2606_v51 = vld [vmem:[%s2109_s12 + $0x7d] sm:$0x1] }
  0x4c   : > { %4358 = vst [vmem:[#allocation86_spill] sm:$0xff] %v2600_v32  ;;  %4359 = vst [vmem:[#allocation87_spill] sm:$0xff] %v2603_v47  ;;  %v2613_v55 = vld [vmem:[%s2109_s12 + $0x7e] sm:$0x1]  ;;  %v2616_v38 = vld [vmem:[%s2109_s12 + $0x7f] sm:$0x1] }
  0x4d   : > { %4360 = vst [vmem:[#allocation88_spill] sm:$0xff] %v2606_v51  ;;  %4361 = vst [vmem:[#allocation89_spill] sm:$0xff] %v2613_v55  ;;  %v377_v58 = vsel %vm376_vm0, %v4363_v52, -inf  ;;  %v384_v45 = vsel %vm376_vm0, %v4364_v41, -inf  ;;  %v391_v56 = vsel %vm376_vm0, %v4365_v43, -inf  ;;  %v398_v0 = vsel %vm376_vm0, %v4366_v50, -inf }
  0x4e   : > { %4362 = vst [vmem:[#allocation90_spill] sm:$0xff] %v2616_v38  ;;  %v378_v44 = vrot.slane %v377_v58, 4  ;;  %v385_v62 = vrot.slane %v384_v45, 4  ;;  %v4367_v52 = vunpack.c.l.bf16 %v2124_v4  ;;  %v392_v46 = vrot.slane %v391_v56, 4 }
  0x4f   : > { %v399_v38 = vrot.slane %v398_v0, 4  ;;  %v4368_v41 = vunpack.c.l.bf16 %v2127_v5  ;;  %v419_v43 = vsel %vm376_vm0, %v4369_v2, -inf  ;;  %v426_v50 = vsel %vm376_vm0, %v4370_v3, -inf }
  0x50   : > { %v405_v42 = vsel %vm376_vm0, %v4367_v52, -inf  ;;  %v379_v55 = vmax.f32 %v377_v58, %v378_v44  ;;  %v386_v1 = vmax.f32 %v384_v45, %v385_v62  ;;  %v393_v32 = vmax.f32 %v391_v56, %v392_v46 }
  0x51   : > { %v406_v51 = vrot.slane %v405_v42, 4  ;;  %v412_v47 = vsel %vm376_vm0, %v4368_v41, -inf  ;;  %v400_v52 = vmax.f32 %v398_v0, %v399_v38  ;;  %v420_v49 = vrot.slane %v419_v43, 4 }
  0x52   : > { %v380_v4 = vrot.slane %v379_v55, 2  ;;  %v387_v58 = vrot.slane %v386_v1, 2  ;;  %v413_v48 = vrot.slane %v412_v47, 4  ;;  %v427_v45 = vrot.slane %v426_v50, 4 }
  0x53   : > { %v407_v44 = vmax.f32 %v405_v42, %v406_v51  ;;  %v394_v5 = vrot.slane %v393_v32, 2  ;;  %v401_v25 = vrot.slane %v400_v52, 2  ;;  %v421_v60 = vmax.f32 %v419_v43, %v420_v49 }
  0x54   : > { %v381_v62 = vmax.f32 %v379_v55, %v380_v4  ;;  %v388_v59 = vmax.f32 %v386_v1, %v387_v58  ;;  %v414_v6 = vmax.f32 %v412_v47, %v413_v48  ;;  %v428_v2 = vmax.f32 %v426_v50, %v427_v45 }
  0x55   : > { %v408_v41 = vrot.slane %v407_v44, 2  ;;  %v395_v7 = vmax.f32 %v393_v32, %v394_v5  ;;  %v402_v33 = vmax.f32 %v400_v52, %v401_v25  ;;  %v422_v38 = vrot.slane %v421_v60, 2 }
  0x56   : > { %v382_v54 = vrot.slane %v381_v62, 1  ;;  %v389_v30 = vrot.slane %v388_v59, 1  ;;  %v415_v46 = vrot.slane %v414_v6, 2  ;;  %v429_v42 = vrot.slane %v428_v2, 2 }
  0x57   : > { %v409_v3 = vmax.f32 %v407_v44, %v408_v41  ;;  %v396_v56 = vrot.slane %v395_v7, 1  ;;  %v403_v0 = vrot.slane %v402_v33, 1  ;;  %v423_v1 = vmax.f32 %v421_v60, %v422_v38 }
  0x58   : > { %v2647_v51 = vmax.f32 %v381_v62, %v382_v54  ;;  %v2649_v4 = vmax.f32 %v388_v59, %v389_v30  ;;  %v416_v24 = vmax.f32 %v414_v6, %v415_v46  ;;  %v430_v47 = vmax.f32 %v428_v2, %v429_v42 }
  0x59   : > { %v410_v55 = vrot.slane %v409_v3, 1  ;;  %v2651_v48 = vmax.f32 %v395_v7, %v396_v56  ;;  %v2653_v49 = vmax.f32 %v402_v33, %v403_v0  ;;  %v4371_v32 = vunpack.c.l.bf16 %v2136_v8 }
  0x5a   : > { %v417_v54 = vrot.slane %v416_v24, 1  ;;  %v424_v50 = vrot.slane %v423_v1, 1  ;;  %v431_v52 = vrot.slane %v430_v47, 1  ;;  %v4372_v30 = vunpack.c.l.bf16 %v2139_v9 }
  0x5b   : > { %v2655_v25 = vmax.f32 %v409_v3, %v410_v55  ;;  %v433_v43 = vsel %vm376_vm0, %v4371_v32, -inf  ;;  %v4373_v60 = vunpack.c.l.bf16 %v2142_v10  ;;  %v4374_v33 = vunpack.c.l.bf16 %v2145_v11 }
  0x5c   : > { %v434_v44 = vrot.slane %v433_v43, 4  ;;  %v440_v59 = vsel %vm376_vm0, %v4372_v30, -inf  ;;  %v4375_v8 = vunpack.c.l.bf16 %v2148_v12  ;;  %v2672_v5 = vmax.f32 %v416_v24, %v417_v54 }
  0x5d   : > { %v447_v58 = vsel %vm376_vm0, %v4373_v60, -inf  ;;  %v454_v45 = vsel %vm376_vm0, %v4374_v33, -inf  ;;  %v2674_v41 = vmax.f32 %v423_v1, %v424_v50  ;;  %v2676_v6 = vmax.f32 %v430_v47, %v431_v52 }
  0x5e   : > { %v461_v62 = vsel %vm376_vm0, %v4375_v8, -inf  ;;  %v435_v9 = vmax.f32 %v433_v43, %v434_v44  ;;  %v441_v2 = vrot.slane %v440_v59, 4  ;;  %v448_v7 = vrot.slane %v447_v58, 4 }
  0x5f   : > { %4376 = vst [vmem:[#allocation91_spill] sm:$0xff] %v2676_v6  ;;  %v455_v10 = vrot.slane %v454_v45, 4  ;;  %v462_v3 = vrot.slane %v461_v62, 4  ;;  %v4377_v11 = vunpack.c.l.bf16 %v2151_v13  ;;  %v4378_v12 = vunpack.c.l.bf16 %v2154_v14 }
  0x60   : > { %v436_v46 = vrot.slane %v435_v9, 2  ;;  %v4379_v24 = vunpack.c.l.bf16 %v2157_v15  ;;  %v442_v0 = vmax.f32 %v440_v59, %v441_v2  ;;  %v449_v55 = vmax.f32 %v447_v58, %v448_v7 }
  0x61   : > { %v468_v38 = vsel %vm376_vm0, %v4377_v11, -inf  ;;  %v475_v42 = vsel %vm376_vm0, %v4378_v12, -inf  ;;  %v456_v1 = vmax.f32 %v454_v45, %v455_v10  ;;  %v463_v47 = vmax.f32 %v461_v62, %v462_v3 }
  0x62   : > { %v482_v56 = vsel %vm376_vm0, %v4379_v24, -inf  ;;  %v437_v32 = vmax.f32 %v435_v9, %v436_v46  ;;  %v469_v43 = vrot.slane %v468_v38, 4  ;;  %v476_v54 = vrot.slane %v475_v42, 4 }
  0x63   : > { %v483_v50 = vrot.slane %v482_v56, 4  ;;  %v443_v52 = vrot.slane %v442_v0, 2  ;;  %v450_v13 = vrot.slane %v449_v55, 2  ;;  %v457_v44 = vrot.slane %v456_v1, 2 }
  0x64   : > { %v464_v30 = vrot.slane %v463_v47, 2  ;;  %v438_v60 = vrot.slane %v437_v32, 1  ;;  %v470_v14 = vmax.f32 %v468_v38, %v469_v43  ;;  %v477_v33 = vmax.f32 %v475_v42, %v476_v54 }
  0x65   : > { %v484_v8 = vmax.f32 %v482_v56, %v483_v50  ;;  %v444_v11 = vmax.f32 %v442_v0, %v443_v52  ;;  %v451_v15 = vmax.f32 %v449_v55, %v450_v13  ;;  %v458_v12 = vmax.f32 %v456_v1, %v457_v44 }
  0x66   : > { %v465_v24 = vmax.f32 %v463_v47, %v464_v30  ;;  %v2687_v59 = vmax.f32 %v437_v32, %v438_v60  ;;  %v471_v58 = vrot.slane %v470_v14, 2  ;;  %v478_v45 = vrot.slane %v477_v33, 2 }
  0x67   : > { %v485_v62 = vrot.slane %v484_v8, 2  ;;  %v445_v9 = vrot.slane %v444_v11, 1  ;;  %v452_v2 = vrot.slane %v451_v15, 1  ;;  %v459_v7 = vrot.slane %v458_v12, 1 }
  0x68   : > { %v466_v10 = vrot.slane %v465_v24, 1  ;;  %v472_v3 = vmax.f32 %v470_v14, %v471_v58  ;;  %v479_v46 = vmax.f32 %v477_v33, %v478_v45  ;;  %v4380_v38 = vunpack.c.l.bf16 %v2160_v16 }
  0x69   : > { %v486_v6 = vmax.f32 %v484_v8, %v485_v62  ;;  %v2692_v56 = vmax.f32 %v444_v11, %v445_v9  ;;  %v2694_v0 = vmax.f32 %v451_v15, %v452_v2  ;;  %v2696_v55 = vmax.f32 %v458_v12, %v459_v7 }
  0x6a   : > { %v489_v42 = vsel %vm376_vm0, %v4380_v38, -inf  ;;  %v2698_v1 = vmax.f32 %v465_v24, %v466_v10  ;;  %v473_v47 = vrot.slane %v472_v3, 1  ;;  %v480_v32 = vrot.slane %v479_v46, 1 }
  0x6b   : > { %v487_v43 = vrot.slane %v486_v6, 1  ;;  %v490_v54 = vrot.slane %v489_v42, 4  ;;  %v4381_v50 = vunpack.c.l.bf16 %v2163_v17  ;;  %v4382_v16 = vunpack.c.l.bf16 %v2166_v18 }
  0x6c   : > { %v4383_v44 = vunpack.c.l.bf16 %v2169_v19  ;;  %v4384_v60 = vunpack.c.l.bf16 %v2172_v20  ;;  %v2712_v33 = vmax.f32 %v472_v3, %v473_v47  ;;  %v2714_v8 = vmax.f32 %v479_v46, %v480_v32 }
  0x6d   : > { %v496_v52 = vsel %vm376_vm0, %v4381_v50, -inf  ;;  %v503_v13 = vsel %vm376_vm0, %v4382_v16, -inf  ;;  %v2716_v11 = vmax.f32 %v486_v6, %v487_v43  ;;  %v491_v17 = vmax.f32 %v489_v42, %v490_v54 }
  0x6e   : > { %v510_v30 = vsel %vm376_vm0, %v4383_v44, -inf  ;;  %v517_v14 = vsel %vm376_vm0, %v4384_v60, -inf  ;;  %v497_v15 = vrot.slane %v496_v52, 4  ;;  %v504_v12 = vrot.slane %v503_v13, 4 }
  0x6f   : > { %v511_v18 = vrot.slane %v510_v30, 4  ;;  %v518_v24 = vrot.slane %v517_v14, 4  ;;  %v492_v58 = vrot.slane %v491_v17, 2  ;;  %v4385_v19 = vunpack.c.l.bf16 %v2175_v21 }
  0x70   : > { %v4386_v20 = vunpack.c.l.bf16 %v2178_v22  ;;  %v4387_v9 = vunpack.c.l.bf16 %v2184_v26  ;;  %v498_v6 = vmax.f32 %v496_v52, %v497_v15  ;;  %v505_v7 = vmax.f32 %v503_v13, %v504_v12 }
  0x71   : > { %v524_v45 = vsel %vm376_vm0, %v4385_v19, -inf  ;;  %v512_v10 = vmax.f32 %v510_v30, %v511_v18  ;;  %v519_v3 = vmax.f32 %v517_v14, %v518_v24  ;;  %v493_v46 = vmax.f32 %v491_v17, %v492_v58 }
  0x72   : > { %v531_v62 = vsel %vm376_vm0, %v4386_v20, -inf  ;;  %v538_v2 = vsel %vm376_vm0, %v4387_v9, -inf  ;;  %v525_v38 = vrot.slane %v524_v45, 4  ;;  %v499_v32 = vrot.slane %v498_v6, 2 }
  0x73   : > { %v532_v42 = vrot.slane %v531_v62, 4  ;;  %v539_v47 = vrot.slane %v538_v2, 4  ;;  %v506_v21 = vrot.slane %v505_v7, 2  ;;  %v513_v43 = vrot.slane %v512_v10, 2 }
  0x74   : > { %v520_v54 = vrot.slane %v519_v3, 2  ;;  %v494_v50 = vrot.slane %v493_v46, 1  ;;  %v526_v22 = vmax.f32 %v524_v45, %v525_v38  ;;  %v500_v60 = vmax.f32 %v498_v6, %v499_v32 }
  0x75   : > { %v533_v16 = vmax.f32 %v531_v62, %v532_v42  ;;  %v540_v44 = vmax.f32 %v538_v2, %v539_v47  ;;  %v507_v26 = vmax.f32 %v505_v7, %v506_v21  ;;  %v514_v19 = vmax.f32 %v512_v10, %v513_v43 }
  0x76   : > { %v521_v20 = vmax.f32 %v519_v3, %v520_v54  ;;  %v2727_v52 = vmax.f32 %v493_v46, %v494_v50  ;;  %v527_v13 = vrot.slane %v526_v22, 2  ;;  %v501_v17 = vrot.slane %v500_v60, 1 }
  0x77   : > { %v534_v30 = vrot.slane %v533_v16, 2  ;;  %v541_v14 = vrot.slane %v540_v44, 2  ;;  %v508_v15 = vrot.slane %v507_v26, 1  ;;  %v515_v12 = vrot.slane %v514_v19, 1 }
  0x78   : > { %v522_v18 = vrot.slane %v521_v20, 1  ;;  %v528_v24 = vmax.f32 %v526_v22, %v527_v13  ;;  %v4388_v45 = vunpack.c.l.bf16 %v2187_v27  ;;  %v2732_v2 = vmax.f32 %v500_v60, %v501_v17  ;;  %v4400_v17 = vld [vmem:[#allocation2_spill] sm:$0xff] }
  0x79   : > { %v535_v58 = vmax.f32 %v533_v16, %v534_v30  ;;  %v542_v9 = vmax.f32 %v540_v44, %v541_v14  ;;  %v2734_v6 = vmax.f32 %v507_v26, %v508_v15  ;;  %v2736_v7 = vmax.f32 %v514_v19, %v515_v12 }
  0x7a   : > { %v545_v62 = vsel %vm376_vm0, %v4388_v45, -inf  ;;  %v2738_v10 = vmax.f32 %v521_v20, %v522_v18  ;;  %v529_v3 = vrot.slane %v528_v24, 1  ;;  %v4391_v47 = vunpack.c.l.bf16 %v2190_v28 }
  0x7b   : > { %4389 = vst [vmem:[#allocation92_spill] sm:$0xff] %v2736_v7  ;;  %v536_v46 = vrot.slane %v535_v58, 1  ;;  %v543_v38 = vrot.slane %v542_v9, 1  ;;  %v546_v42 = vrot.slane %v545_v62, 4  ;;  %v4392_v27 = vunpack.c.l.bf16 %v2193_v29  ;;  %v4424_v7 = vld [vmem:[#allocation11_spill] sm:$0xff] }
  0x7c   : > { %4390 = vst [vmem:[#allocation93_spill] sm:$0xff] %v2738_v10  ;;  %v552_v32 = vsel %vm376_vm0, %v4391_v47, -inf  ;;  %v4393_v43 = vunpack.c.l.bf16 %v2200_v34  ;;  %v4394_v50 = vunpack.c.l.bf16 %v2203_v35  ;;  %v2752_v16 = vmax.f32 %v528_v24, %v529_v3 }
  0x7d   : > { %v559_v21 = vsel %vm376_vm0, %v4392_v27, -inf  ;;  %v2754_v44 = vmax.f32 %v535_v58, %v536_v46  ;;  %v2756_v60 = vmax.f32 %v542_v9, %v543_v38  ;;  %v547_v28 = vmax.f32 %v545_v62, %v546_v42 }
  0x7e   : > { %v566_v54 = vsel %vm376_vm0, %v4393_v43, -inf  ;;  %v573_v22 = vsel %vm376_vm0, %v4394_v50, -inf  ;;  %4395 = vst [vmem:[#allocation94_spill] sm:$0xff] %v2752_v16  ;;  %v553_v26 = vrot.slane %v552_v32, 4  ;;  %v560_v19 = vrot.slane %v559_v21, 4 }
  0x7f   : > { %4396 = vst [vmem:[#allocation95_spill] sm:$0xff] %v2754_v44  ;;  %4397 = vst [vmem:[#allocation96_spill] sm:$0xff] %v2756_v60  ;;  %v567_v29 = vrot.slane %v566_v54, 4  ;;  %v574_v20 = vrot.slane %v573_v22, 4  ;;  %v548_v13 = vrot.slane %v547_v28, 2  ;;  %v4398_v34 = vunpack.c.l.bf16 %v2206_v36  ;;  %v4402_v44 = vld [vmem:[#allocation3_spill] sm:$0xff] }
  0x80   : > { %v4399_v35 = vunpack.c.l.bf16 %v2209_v37  ;;  %v4401_v15 = vunpack.c.l.bf16 %v4400_v17  ;;  %v554_v18 = vmax.f32 %v552_v32, %v553_v26  ;;  %v561_v24 = vmax.f32 %v559_v21, %v560_v19 }
  0x81   : > { %v580_v30 = vsel %vm376_vm0, %v4398_v34, -inf  ;;  %v568_v58 = vmax.f32 %v566_v54, %v567_v29  ;;  %v575_v9 = vmax.f32 %v573_v22, %v574_v20  ;;  %v549_v45 = vmax.f32 %v547_v28, %v548_v13 }
  0x82   : > { %v587_v14 = vsel %vm376_vm0, %v4399_v35, -inf  ;;  %v594_v12 = vsel %vm376_vm0, %v4401_v15, -inf  ;;  %v581_v62 = vrot.slane %v580_v30, 4  ;;  %v555_v38 = vrot.slane %v554_v18, 2 }
  0x83   : > { %v588_v3 = vrot.slane %v587_v14, 4  ;;  %v595_v46 = vrot.slane %v594_v12, 4  ;;  %v562_v36 = vrot.slane %v561_v24, 2  ;;  %v569_v42 = vrot.slane %v568_v58, 2 }
  0x84   : > { %v576_v47 = vrot.slane %v575_v9, 2  ;;  %v550_v27 = vrot.slane %v549_v45, 1  ;;  %v582_v37 = vmax.f32 %v580_v30, %v581_v62  ;;  %v556_v34 = vmax.f32 %v554_v18, %v555_v38 }
  0x85   : > { %v589_v43 = vmax.f32 %v587_v14, %v588_v3  ;;  %v596_v50 = vmax.f32 %v594_v12, %v595_v46  ;;  %v563_v35 = vmax.f32 %v561_v24, %v562_v36  ;;  %v570_v17 = vmax.f32 %v568_v58, %v569_v42  ;;  %v4406_v46 = vld [vmem:[#allocation4_spill] sm:$0xff]  ;;  %v4408_v42 = vld [vmem:[#allocation5_spill] sm:$0xff] }
  0x86   : > { %v577_v15 = vmax.f32 %v575_v9, %v576_v47  ;;  %v2767_v32 = vmax.f32 %v549_v45, %v550_v27  ;;  %v583_v21 = vrot.slane %v582_v37, 2  ;;  %v557_v28 = vrot.slane %v556_v34, 1  ;;  %v4410_v27 = vld [vmem:[#allocation6_spill] sm:$0xff] }
  0x87   : > { %v590_v54 = vrot.slane %v589_v43, 2  ;;  %v597_v22 = vrot.slane %v596_v50, 2  ;;  %v564_v26 = vrot.slane %v563_v35, 1  ;;  %v571_v19 = vrot.slane %v570_v17, 1 }
  0x88   : > { %v578_v29 = vrot.slane %v577_v15, 1  ;;  %v584_v20 = vmax.f32 %v582_v37, %v583_v21  ;;  %v4403_v30 = vunpack.c.l.bf16 %v4402_v44  ;;  %v2772_v12 = vmax.f32 %v556_v34, %v557_v28 }
  0x89   : > { %v591_v13 = vmax.f32 %v589_v43, %v590_v54  ;;  %v598_v60 = vmax.f32 %v596_v50, %v597_v22  ;;  %v2774_v18 = vmax.f32 %v563_v35, %v564_v26  ;;  %v2776_v24 = vmax.f32 %v570_v17, %v571_v19  ;;  %v4412_v50 = vld [vmem:[#allocation7_spill] sm:$0xff] }
  0x8a   : > { %v601_v14 = vsel %vm376_vm0, %v4403_v30, -inf  ;;  %v2778_v58 = vmax.f32 %v577_v15, %v578_v29  ;;  %v585_v9 = vrot.slane %v584_v20, 1  ;;  %v4407_v38 = vunpack.c.l.bf16 %v4406_v46  ;;  %v4417_v30 = vld [vmem:[#allocation8_spill] sm:$0xff] }
  0x8b   : > { %4404 = vst [vmem:[#allocation2_spill] sm:$0xff] %v2776_v24  ;;  %v592_v45 = vrot.slane %v591_v13, 1  ;;  %v599_v62 = vrot.slane %v598_v60, 1  ;;  %v602_v3 = vrot.slane %v601_v14, 4  ;;  %v4409_v44 = vunpack.c.l.bf16 %v4408_v42  ;;  %v4419_v42 = vld [vmem:[#allocation9_spill] sm:$0xff] }
  0x8c   : > { %4405 = vst [vmem:[#allocation3_spill] sm:$0xff] %v2778_v58  ;;  %v608_v36 = vsel %vm376_vm0, %v4407_v38, -inf  ;;  %v4411_v37 = vunpack.c.l.bf16 %v4410_v27  ;;  %v4413_v34 = vunpack.c.l.bf16 %v4412_v50  ;;  %v2792_v17 = vmax.f32 %v584_v20, %v585_v9  ;;  %v4421_v20 = vld [vmem:[#allocation10_spill] sm:$0xff] }
  0x8d   : > { %v615_v47 = vsel %vm376_vm0, %v4409_v44, -inf  ;;  %v2794_v15 = vmax.f32 %v591_v13, %v592_v45  ;;  %v2796_v21 = vmax.f32 %v598_v60, %v599_v62  ;;  %v603_v54 = vmax.f32 %v601_v14, %v602_v3 }
  0x8e   : > { %v622_v43 = vsel %vm376_vm0, %v4411_v37, -inf  ;;  %v629_v35 = vsel %vm376_vm0, %v4413_v34, -inf  ;;  %4414 = vst [vmem:[#allocation4_spill] sm:$0xff] %v2792_v17  ;;  %v609_v22 = vrot.slane %v608_v36, 4  ;;  %v616_v28 = vrot.slane %v615_v47, 4 }
  0x8f   : > { %4415 = vst [vmem:[#allocation5_spill] sm:$0xff] %v2794_v15  ;;  %4416 = vst [vmem:[#allocation6_spill] sm:$0xff] %v2796_v21  ;;  %v623_v26 = vrot.slane %v622_v43, 4  ;;  %v630_v19 = vrot.slane %v629_v35, 4  ;;  %v604_v29 = vrot.slane %v603_v54, 2  ;;  %v4418_v46 = vunpack.c.l.bf16 %v4417_v30 }
  0x90   : > { %v4420_v44 = vunpack.c.l.bf16 %v4419_v42  ;;  %v4422_v9 = vunpack.c.l.bf16 %v4421_v20  ;;  %v610_v60 = vmax.f32 %v608_v36, %v609_v22  ;;  %v617_v45 = vmax.f32 %v615_v47, %v616_v28 }
  0x91   : > { %v636_v38 = vsel %vm376_vm0, %v4418_v46, -inf  ;;  %v624_v14 = vmax.f32 %v622_v43, %v623_v26  ;;  %v631_v62 = vmax.f32 %v629_v35, %v630_v19  ;;  %v605_v3 = vmax.f32 %v603_v54, %v604_v29 }
  0x92   : > { %v643_v27 = vsel %vm376_vm0, %v4420_v44, -inf  ;;  %v650_v13 = vsel %vm376_vm0, %v4422_v9, -inf  ;;  %v637_v37 = vrot.slane %v636_v38, 4  ;;  %v611_v21 = vrot.slane %v610_v60, 2 }
  0x93   : > { %v644_v50 = vrot.slane %v643_v27, 4  ;;  %v651_v34 = vrot.slane %v650_v13, 4  ;;  %v618_v30 = vrot.slane %v617_v45, 2  ;;  %v625_v15 = vrot.slane %v624_v14, 2 }
  0x94   : > { %v632_v46 = vrot.slane %v631_v62, 2  ;;  %v606_v17 = vrot.slane %v605_v3, 1  ;;  %v638_v42 = vmax.f32 %v636_v38, %v637_v37  ;;  %v612_v58 = vmax.f32 %v610_v60, %v611_v21 }
  0x95   : > { %v645_v16 = vmax.f32 %v643_v27, %v644_v50  ;;  %v652_v44 = vmax.f32 %v650_v13, %v651_v34  ;;  %v619_v20 = vmax.f32 %v617_v45, %v618_v30  ;;  %v626_v10 = vmax.f32 %v624_v14, %v625_v15  ;;  %v4432_v50 = vld [vmem:[#allocation13_spill] sm:$0xff] }
  0x96   : > { %v633_v9 = vmax.f32 %v631_v62, %v632_v46  ;;  %v2807_v36 = vmax.f32 %v605_v3, %v606_v17  ;;  %v639_v47 = vrot.slane %v638_v42, 2  ;;  %v613_v54 = vrot.slane %v612_v58, 1  ;;  %v4430_v3 = vld [vmem:[#allocation12_spill] sm:$0xff] }
  0x97   : > { %v646_v43 = vrot.slane %v645_v16, 2  ;;  %v653_v35 = vrot.slane %v652_v44, 2  ;;  %v620_v22 = vrot.slane %v619_v20, 1  ;;  %v627_v28 = vrot.slane %v626_v10, 1 }
  0x98   : > { %4423 = vst [vmem:[#allocation7_spill] sm:$0xff] %v2807_v36  ;;  %v634_v26 = vrot.slane %v633_v9, 1  ;;  %v640_v19 = vmax.f32 %v638_v42, %v639_v47  ;;  %v4425_v38 = vunpack.c.l.bf16 %v4424_v7  ;;  %v2812_v21 = vmax.f32 %v612_v58, %v613_v54  ;;  %v4434_v58 = vld [vmem:[#allocation14_spill] sm:$0xff]  ;;  %v4447_v36 = vld [vmem:[#allocation19_spill] sm:$0xff] }
  0x99   : > { %v647_v29 = vmax.f32 %v645_v16, %v646_v43  ;;  %v654_v24 = vmax.f32 %v652_v44, %v653_v35  ;;  %v2814_v15 = vmax.f32 %v619_v20, %v620_v22  ;;  %v2816_v17 = vmax.f32 %v626_v10, %v627_v28  ;;  %v4436_v10 = vld [vmem:[#allocation15_spill] sm:$0xff] }
  0x9a   : > { %v657_v27 = vsel %vm376_vm0, %v4425_v38, -inf  ;;  %4426 = vst [vmem:[#allocation8_spill] sm:$0xff] %v2812_v21  ;;  %v2818_v13 = vmax.f32 %v633_v9, %v634_v26  ;;  %v641_v60 = vrot.slane %v640_v19, 1  ;;  %v4431_v37 = vunpack.c.l.bf16 %v4430_v3  ;;  %v4441_v38 = vld [vmem:[#allocation16_spill] sm:$0xff] }
  0x9b   : > { %4427 = vst [vmem:[#allocation9_spill] sm:$0xff] %v2814_v15  ;;  %4428 = vst [vmem:[#allocation10_spill] sm:$0xff] %v2816_v17  ;;  %v648_v45 = vrot.slane %v647_v29, 1  ;;  %v655_v14 = vrot.slane %v654_v24, 1  ;;  %v658_v62 = vrot.slane %v657_v27, 4  ;;  %v4433_v7 = vunpack.c.l.bf16 %v4432_v50  ;;  %v4443_v50 = vld [vmem:[#allocation17_spill] sm:$0xff] }
  0x9c   : > { %4429 = vst [vmem:[#allocation11_spill] sm:$0xff] %v2818_v13  ;;  %v664_v16 = vsel %vm376_vm0, %v4431_v37, -inf  ;;  %v4435_v30 = vunpack.c.l.bf16 %v4434_v58  ;;  %v4437_v42 = vunpack.c.l.bf16 %v4436_v10  ;;  %v2832_v20 = vmax.f32 %v640_v19, %v641_v60  ;;  %v4445_v19 = vld [vmem:[#allocation18_spill] sm:$0xff] }
  0x9d   : > { %v671_v34 = vsel %vm376_vm0, %v4433_v7, -inf  ;;  %v2834_v9 = vmax.f32 %v647_v29, %v648_v45  ;;  %v2836_v47 = vmax.f32 %v654_v24, %v655_v14  ;;  %v659_v43 = vmax.f32 %v657_v27, %v658_v62 }
  0x9e   : > { %v678_v46 = vsel %vm376_vm0, %v4435_v30, -inf  ;;  %v685_v44 = vsel %vm376_vm0, %v4437_v42, -inf  ;;  %4438 = vst [vmem:[#allocation12_spill] sm:$0xff] %v2832_v20  ;;  %v665_v35 = vrot.slane %v664_v16, 4  ;;  %v672_v54 = vrot.slane %v671_v34, 4 }
  0x9f   : > { %4439 = vst [vmem:[#allocation13_spill] sm:$0xff] %v2834_v9  ;;  %4440 = vst [vmem:[#allocation14_spill] sm:$0xff] %v2836_v47  ;;  %v679_v22 = vrot.slane %v678_v46, 4  ;;  %v686_v28 = vrot.slane %v685_v44, 4  ;;  %v660_v26 = vrot.slane %v659_v43, 2  ;;  %v4442_v3 = vunpack.c.l.bf16 %v4441_v38 }
  0xa0   : > { %v4444_v7 = vunpack.c.l.bf16 %v4443_v50  ;;  %v4446_v60 = vunpack.c.l.bf16 %v4445_v19  ;;  %v666_v24 = vmax.f32 %v664_v16, %v665_v35  ;;  %v673_v45 = vmax.f32 %v671_v34, %v672_v54 }
  0xa1   : > { %v692_v37 = vsel %vm376_vm0, %v4442_v3, -inf  ;;  %v680_v27 = vmax.f32 %v678_v46, %v679_v22  ;;  %v687_v14 = vmax.f32 %v685_v44, %v686_v28  ;;  %v661_v62 = vmax.f32 %v659_v43, %v660_v26 }
  0xa2   : > { %v699_v58 = vsel %vm376_vm0, %v4444_v7, -inf  ;;  %v706_v29 = vsel %vm376_vm0, %v4446_v60, -inf  ;;  %v693_v30 = vrot.slane %v692_v37, 4  ;;  %v667_v47 = vrot.slane %v666_v24, 2 }
  0xa3   : > { %v700_v10 = vrot.slane %v699_v58, 4  ;;  %v707_v42 = vrot.slane %v706_v29, 4  ;;  %v674_v38 = vrot.slane %v673_v45, 2  ;;  %v681_v9 = vrot.slane %v680_v27, 2 }
  0xa4   : > { %v688_v3 = vrot.slane %v687_v14, 2  ;;  %v662_v20 = vrot.slane %v661_v62, 1  ;;  %v694_v50 = vmax.f32 %v692_v37, %v693_v30  ;;  %v668_v17 = vmax.f32 %v666_v24, %v667_v47 }
  0xa5   : > { %v701_v13 = vmax.f32 %v699_v58, %v700_v10  ;;  %v708_v7 = vmax.f32 %v706_v29, %v707_v42  ;;  %v675_v19 = vmax.f32 %v673_v45, %v674_v38  ;;  %v682_v15 = vmax.f32 %v680_v27, %v681_v9  ;;  %v4454_v10 = vld [vmem:[#allocation21_spill] sm:$0xff] }
  0xa6   : > { %v689_v60 = vmax.f32 %v687_v14, %v688_v3  ;;  %v2847_v16 = vmax.f32 %v661_v62, %v662_v20  ;;  %v695_v34 = vrot.slane %v694_v50, 2  ;;  %v669_v43 = vrot.slane %v668_v17, 1  ;;  %v4452_v62 = vld [vmem:[#allocation20_spill] sm:$0xff] }
  0xa7   : > { %v702_v46 = vrot.slane %v701_v13, 2  ;;  %v709_v44 = vrot.slane %v708_v7, 2  ;;  %v676_v35 = vrot.slane %v675_v19, 1  ;;  %v683_v54 = vrot.slane %v682_v15, 1 }
  0xa8   : > { %v690_v22 = vrot.slane %v689_v60, 1  ;;  %v696_v28 = vmax.f32 %v694_v50, %v695_v34  ;;  %v4448_v37 = vunpack.c.l.bf16 %v4447_v36  ;;  %v2852_v47 = vmax.f32 %v668_v17, %v669_v43 }
  0xa9   : > { %v703_v26 = vmax.f32 %v701_v13, %v702_v46  ;;  %v710_v21 = vmax.f32 %v708_v7, %v709_v44  ;;  %v2854_v9 = vmax.f32 %v675_v19, %v676_v35  ;;  %v2856_v20 = vmax.f32 %v682_v15, %v683_v54  ;;  %v4457_v15 = vld [vmem:[#allocation22_spill] sm:$0xff] }
  0xaa   : > { %v713_v58 = vsel %vm376_vm0, %v4448_v37, -inf  ;;  %v2858_v29 = vmax.f32 %v689_v60, %v690_v22  ;;  %v697_v24 = vrot.slane %v696_v28, 1  ;;  %v4453_v30 = vunpack.c.l.bf16 %v4452_v62  ;;  %v4462_v22 = vld [vmem:[#allocation23_spill] sm:$0xff]  ;;  %v4464_v62 = vld [vmem:[#allocation24_spill] sm:$0xff] }
  0xab   : > { %4449 = vst [vmem:[#allocation15_spill] sm:$0xff] %v2854_v9  ;;  %4450 = vst [vmem:[#allocation16_spill] sm:$0xff] %v2856_v20  ;;  %v704_v45 = vrot.slane %v703_v26, 1  ;;  %v711_v27 = vrot.slane %v710_v21, 1  ;;  %v714_v14 = vrot.slane %v713_v58, 4  ;;  %v4455_v36 = vunpack.c.l.bf16 %v4454_v10  ;;  %v4467_v9 = vld [vmem:[#allocation25_spill] sm:$0xff] }
  0xac   : > { %4451 = vst [vmem:[#allocation17_spill] sm:$0xff] %v2858_v29  ;;  %v720_v13 = vsel %vm376_vm0, %v4453_v30, -inf  ;;  %v4456_v17 = vunpack.c.l.bf16 %v2296_v39  ;;  %v4458_v3 = vunpack.c.l.bf16 %v4457_v15  ;;  %v2872_v7 = vmax.f32 %v696_v28, %v697_v24 }
  0xad   : > { %v727_v42 = vsel %vm376_vm0, %v4455_v36, -inf  ;;  %v2874_v19 = vmax.f32 %v703_v26, %v704_v45  ;;  %v2876_v60 = vmax.f32 %v710_v21, %v711_v27  ;;  %v715_v34 = vmax.f32 %v713_v58, %v714_v14 }
  0xae   : > { %v734_v38 = vsel %vm376_vm0, %v4456_v17, -inf  ;;  %v741_v50 = vsel %vm376_vm0, %v4458_v3, -inf  ;;  %4459 = vst [vmem:[#allocation18_spill] sm:$0xff] %v2872_v7  ;;  %v721_v46 = vrot.slane %v720_v13, 4  ;;  %v728_v44 = vrot.slane %v727_v42, 4 }
  0xaf   : > { %4460 = vst [vmem:[#allocation19_spill] sm:$0xff] %v2874_v19  ;;  %4461 = vst [vmem:[#allocation20_spill] sm:$0xff] %v2876_v60  ;;  %v735_v43 = vrot.slane %v734_v38, 4  ;;  %v742_v35 = vrot.slane %v741_v50, 4  ;;  %v716_v54 = vrot.slane %v715_v34, 2  ;;  %v4463_v39 = vunpack.c.l.bf16 %v4462_v22 }
  0xb0   : > { %v4465_v30 = vunpack.c.l.bf16 %v4464_v62  ;;  %v4466_v28 = vunpack.c.l.bf16 %v2312_v31  ;;  %v722_v21 = vmax.f32 %v720_v13, %v721_v46  ;;  %v729_v24 = vmax.f32 %v727_v42, %v728_v44 }
  0xb1   : > { %v748_v37 = vsel %vm376_vm0, %v4463_v39, -inf  ;;  %v736_v58 = vmax.f32 %v734_v38, %v735_v43  ;;  %v743_v45 = vmax.f32 %v741_v50, %v742_v35  ;;  %v717_v27 = vmax.f32 %v715_v34, %v716_v54 }
  0xb2   : > { %v755_v10 = vsel %vm376_vm0, %v4465_v30, -inf  ;;  %v762_v26 = vsel %vm376_vm0, %v4466_v28, -inf  ;;  %v749_v14 = vrot.slane %v748_v37, 4  ;;  %v723_v15 = vrot.slane %v722_v21, 2 }
  0xb3   : > { %v756_v36 = vrot.slane %v755_v10, 4  ;;  %v763_v17 = vrot.slane %v762_v26, 4  ;;  %v730_v3 = vrot.slane %v729_v24, 2  ;;  %v737_v22 = vrot.slane %v736_v58, 2 }
  0xb4   : > { %v744_v39 = vrot.slane %v743_v45, 2  ;;  %v718_v60 = vrot.slane %v717_v27, 1  ;;  %v750_v62 = vmax.f32 %v748_v37, %v749_v14  ;;  %v724_v7 = vmax.f32 %v722_v21, %v723_v15  ;;  %v4474_v15 = vld [vmem:[#allocation27_spill] sm:$0xff] }
  0xb5   : > { %v757_v19 = vmax.f32 %v755_v10, %v756_v36  ;;  %v764_v30 = vmax.f32 %v762_v26, %v763_v17  ;;  %v731_v31 = vmax.f32 %v729_v24, %v730_v3  ;;  %v738_v29 = vmax.f32 %v736_v58, %v737_v22  ;;  %v4472_v36 = vld [vmem:[#allocation26_spill] sm:$0xff] }
  0xb6   : > { %v745_v28 = vmax.f32 %v743_v45, %v744_v39  ;;  %v2887_v13 = vmax.f32 %v717_v27, %v718_v60  ;;  %v751_v42 = vrot.slane %v750_v62, 2  ;;  %v725_v34 = vrot.slane %v724_v7, 1 }
  0xb7   : > { %v758_v38 = vrot.slane %v757_v19, 2  ;;  %v765_v50 = vrot.slane %v764_v30, 2  ;;  %v732_v46 = vrot.slane %v731_v31, 1  ;;  %v739_v44 = vrot.slane %v738_v29, 1 }
  0xb8   : > { %v746_v43 = vrot.slane %v745_v28, 1  ;;  %v752_v35 = vmax.f32 %v750_v62, %v751_v42  ;;  %v4468_v37 = vunpack.c.l.bf16 %v4467_v9  ;;  %v2892_v26 = vmax.f32 %v724_v7, %v725_v34 }
  0xb9   : > { %v759_v54 = vmax.f32 %v757_v19, %v758_v38  ;;  %v766_v20 = vmax.f32 %v764_v30, %v765_v50  ;;  %v2894_v21 = vmax.f32 %v731_v31, %v732_v46  ;;  %v2896_v60 = vmax.f32 %v738_v29, %v739_v44  ;;  %v4477_v29 = vld [vmem:[#allocation28_spill] sm:$0xff] }
  0xba   : > { %v769_v10 = vsel %vm376_vm0, %v4468_v37, -inf  ;;  %v2898_v24 = vmax.f32 %v745_v28, %v746_v43  ;;  %v753_v58 = vrot.slane %v752_v35, 1  ;;  %v4473_v17 = vunpack.c.l.bf16 %v4472_v36  ;;  %v4482_v43 = vld [vmem:[#allocation29_spill] sm:$0xff]  ;;  %v4484_v36 = vld [vmem:[#allocation30_spill] sm:$0xff] }
  0xbb   : > { %4469 = vst [vmem:[#allocation21_spill] sm:$0xff] %v2894_v21  ;;  %4470 = vst [vmem:[#allocation22_spill] sm:$0xff] %v2896_v60  ;;  %v760_v45 = vrot.slane %v759_v54, 1  ;;  %v767_v27 = vrot.slane %v766_v20, 1  ;;  %v770_v14 = vrot.slane %v769_v10, 4  ;;  %v4475_v9 = vunpack.c.l.bf16 %v4474_v15  ;;  %v4487_v21 = vld [vmem:[#allocation31_spill] sm:$0xff] }
  0xbc   : > { %4471 = vst [vmem:[#allocation23_spill] sm:$0xff] %v2898_v24  ;;  %v776_v19 = vsel %vm376_vm0, %v4473_v17, -inf  ;;  %v4476_v7 = vunpack.c.l.bf16 %v2328_v23  ;;  %v4478_v39 = vunpack.c.l.bf16 %v4477_v29  ;;  %v2912_v30 = vmax.f32 %v752_v35, %v753_v58 }
  0xbd   : > { %v783_v3 = vsel %vm376_vm0, %v4475_v9, -inf  ;;  %v2914_v31 = vmax.f32 %v759_v54, %v760_v45  ;;  %v2916_v28 = vmax.f32 %v766_v20, %v767_v27  ;;  %v771_v42 = vmax.f32 %v769_v10, %v770_v14 }
  0xbe   : > { %v790_v22 = vsel %vm376_vm0, %v4476_v7, -inf  ;;  %v797_v62 = vsel %vm376_vm0, %v4478_v39, -inf  ;;  %4479 = vst [vmem:[#allocation24_spill] sm:$0xff] %v2912_v30  ;;  %v777_v38 = vrot.slane %v776_v19, 4  ;;  %v784_v50 = vrot.slane %v783_v3, 4 }
  0xbf   : > { %4480 = vst [vmem:[#allocation25_spill] sm:$0xff] %v2914_v31  ;;  %4481 = vst [vmem:[#allocation26_spill] sm:$0xff] %v2916_v28  ;;  %v791_v34 = vrot.slane %v790_v22, 4  ;;  %v798_v46 = vrot.slane %v797_v62, 4  ;;  %v772_v44 = vrot.slane %v771_v42, 2  ;;  %v4483_v23 = vunpack.c.l.bf16 %v4482_v43 }
  0xc0   : > { %v4485_v17 = vunpack.c.l.bf16 %v4484_v36  ;;  %v4486_v35 = vunpack.c.l.bf16 %v2344_v53  ;;  %v778_v20 = vmax.f32 %v776_v19, %v777_v38  ;;  %v785_v58 = vmax.f32 %v783_v3, %v784_v50 }
  0xc1   : > { %v804_v37 = vsel %vm376_vm0, %v4483_v23, -inf  ;;  %v792_v10 = vmax.f32 %v790_v22, %v791_v34  ;;  %v799_v45 = vmax.f32 %v797_v62, %v798_v46  ;;  %v773_v27 = vmax.f32 %v771_v42, %v772_v44 }
  0xc2   : > { %v811_v15 = vsel %vm376_vm0, %v4485_v17, -inf  ;;  %v818_v54 = vsel %vm376_vm0, %v4486_v35, -inf  ;;  %v805_v14 = vrot.slane %v804_v37, 4  ;;  %v779_v29 = vrot.slane %v778_v20, 2 }
  0xc3   : > { %v812_v9 = vrot.slane %v811_v15, 4  ;;  %v819_v7 = vrot.slane %v818_v54, 4  ;;  %v786_v39 = vrot.slane %v785_v58, 2  ;;  %v793_v43 = vrot.slane %v792_v10, 2 }
  0xc4   : > { %v800_v23 = vrot.slane %v799_v45, 2  ;;  %v774_v28 = vrot.slane %v773_v27, 1  ;;  %v806_v36 = vmax.f32 %v804_v37, %v805_v14  ;;  %v780_v30 = vmax.f32 %v778_v20, %v779_v29  ;;  %v4494_v29 = vld [vmem:[#allocation33_spill] sm:$0xff] }
  0xc5   : > { %v813_v31 = vmax.f32 %v811_v15, %v812_v9  ;;  %v820_v17 = vmax.f32 %v818_v54, %v819_v7  ;;  %v787_v53 = vmax.f32 %v785_v58, %v786_v39  ;;  %v794_v24 = vmax.f32 %v792_v10, %v793_v43  ;;  %v4492_v9 = vld [vmem:[#allocation32_spill] sm:$0xff] }
  0xc6   : > { %v801_v35 = vmax.f32 %v799_v45, %v800_v23  ;;  %v2927_v19 = vmax.f32 %v773_v27, %v774_v28  ;;  %v807_v3 = vrot.slane %v806_v36, 2  ;;  %v781_v42 = vrot.slane %v780_v30, 1 }
  0xc7   : > { %v814_v22 = vrot.slane %v813_v31, 2  ;;  %v821_v62 = vrot.slane %v820_v17, 2  ;;  %v788_v38 = vrot.slane %v787_v53, 1  ;;  %v795_v50 = vrot.slane %v794_v24, 1 }
  0xc8   : > { %v802_v34 = vrot.slane %v801_v35, 1  ;;  %v808_v46 = vmax.f32 %v806_v36, %v807_v3  ;;  %v4488_v37 = vunpack.c.l.bf16 %v4487_v21  ;;  %v2932_v54 = vmax.f32 %v780_v30, %v781_v42 }
  0xc9   : > { %v815_v44 = vmax.f32 %v813_v31, %v814_v22  ;;  %v822_v60 = vmax.f32 %v820_v17, %v821_v62  ;;  %v2934_v20 = vmax.f32 %v787_v53, %v788_v38  ;;  %v2936_v28 = vmax.f32 %v794_v24, %v795_v50  ;;  %v4497_v24 = vld [vmem:[#allocation34_spill] sm:$0xff] }
  0xca   : > { %v825_v15 = vsel %vm376_vm0, %v4488_v37, -inf  ;;  %v2938_v58 = vmax.f32 %v801_v35, %v802_v34  ;;  %v809_v10 = vrot.slane %v808_v46, 1  ;;  %v4493_v7 = vunpack.c.l.bf16 %v4492_v9  ;;  %v4502_v34 = vld [vmem:[#allocation35_spill] sm:$0xff]  ;;  %v4504_v9 = vld [vmem:[#allocation36_spill] sm:$0xff] }
  0xcb   : > { %4489 = vst [vmem:[#allocation27_spill] sm:$0xff] %v2934_v20  ;;  %4490 = vst [vmem:[#allocation28_spill] sm:$0xff] %v2936_v28  ;;  %v816_v45 = vrot.slane %v815_v44, 1  ;;  %v823_v27 = vrot.slane %v822_v60, 1  ;;  %v826_v14 = vrot.slane %v825_v15, 4  ;;  %v4495_v21 = vunpack.c.l.bf16 %v4494_v29  ;;  %v4507_v20 = vld [vmem:[#allocation37_spill] sm:$0xff] }
  0xcc   : > { %4491 = vst [vmem:[#allocation29_spill] sm:$0xff] %v2938_v58  ;;  %v832_v31 = vsel %vm376_vm0, %v4493_v7, -inf  ;;  %v4496_v30 = vunpack.c.l.bf16 %v2360_v61  ;;  %v4498_v23 = vunpack.c.l.bf16 %v4497_v24  ;;  %v2952_v17 = vmax.f32 %v808_v46, %v809_v10 }
  0xcd   : > { %v839_v39 = vsel %vm376_vm0, %v4495_v21, -inf  ;;  %v2954_v53 = vmax.f32 %v815_v44, %v816_v45  ;;  %v2956_v35 = vmax.f32 %v822_v60, %v823_v27  ;;  %v827_v3 = vmax.f32 %v825_v15, %v826_v14 }
  0xce   : > { %v846_v43 = vsel %vm376_vm0, %v4496_v30, -inf  ;;  %v853_v36 = vsel %vm376_vm0, %v4498_v23, -inf  ;;  %4499 = vst [vmem:[#allocation30_spill] sm:$0xff] %v2952_v17  ;;  %v833_v22 = vrot.slane %v832_v31, 4  ;;  %v840_v62 = vrot.slane %v839_v39, 4 }
  0xcf   : > { %4500 = vst [vmem:[#allocation31_spill] sm:$0xff] %v2954_v53  ;;  %4501 = vst [vmem:[#allocation32_spill] sm:$0xff] %v2956_v35  ;;  %v847_v42 = vrot.slane %v846_v43, 4  ;;  %v854_v38 = vrot.slane %v853_v36, 4  ;;  %v828_v50 = vrot.slane %v827_v3, 2  ;;  %v4503_v61 = vunpack.c.l.bf16 %v4502_v34 }
  0xd0   : > { %v4505_v7 = vunpack.c.l.bf16 %v4504_v9  ;;  %v4506_v46 = vunpack.c.l.bf16 %v2376_v57  ;;  %v834_v60 = vmax.f32 %v832_v31, %v833_v22  ;;  %v841_v10 = vmax.f32 %v839_v39, %v840_v62 }
  0xd1   : > { %v860_v37 = vsel %vm376_vm0, %v4503_v61, -inf  ;;  %v848_v15 = vmax.f32 %v846_v43, %v847_v42  ;;  %v855_v45 = vmax.f32 %v853_v36, %v854_v38  ;;  %v829_v27 = vmax.f32 %v827_v3, %v828_v50 }
  0xd2   : > { %v867_v29 = vsel %vm376_vm0, %v4505_v7, -inf  ;;  %v874_v44 = vsel %vm376_vm0, %v4506_v46, -inf  ;;  %v861_v14 = vrot.slane %v860_v37, 4  ;;  %v835_v24 = vrot.slane %v834_v60, 2 }
  0xd3   : > { %v868_v21 = vrot.slane %v867_v29, 4  ;;  %v875_v30 = vrot.slane %v874_v44, 4  ;;  %v842_v23 = vrot.slane %v841_v10, 2  ;;  %v849_v34 = vrot.slane %v848_v15, 2 }
  0xd4   : > { %v856_v61 = vrot.slane %v855_v45, 2  ;;  %v830_v35 = vrot.slane %v829_v27, 1  ;;  %v862_v9 = vmax.f32 %v860_v37, %v861_v14  ;;  %v836_v17 = vmax.f32 %v834_v60, %v835_v24  ;;  %v4515_v24 = vld [vmem:[#allocation39_spill] sm:$0xff] }
  0xd5   : > { %v869_v53 = vmax.f32 %v867_v29, %v868_v21  ;;  %v876_v7 = vmax.f32 %v874_v44, %v875_v30  ;;  %v843_v57 = vmax.f32 %v841_v10, %v842_v23  ;;  %v850_v58 = vmax.f32 %v848_v15, %v849_v34  ;;  %v4513_v21 = vld [vmem:[#allocation38_spill] sm:$0xff] }
  0xd6   : > { %v857_v46 = vmax.f32 %v855_v45, %v856_v61  ;;  %v2967_v31 = vmax.f32 %v829_v27, %v830_v35  ;;  %v863_v39 = vrot.slane %v862_v9, 2  ;;  %v837_v3 = vrot.slane %v836_v17, 1 }
  0xd7   : > { %v870_v43 = vrot.slane %v869_v53, 2  ;;  %v877_v36 = vrot.slane %v876_v7, 2  ;;  %v844_v22 = vrot.slane %v843_v57, 1  ;;  %v851_v62 = vrot.slane %v850_v58, 1 }
  0xd8   : > { %v858_v42 = vrot.slane %v857_v46, 1  ;;  %v864_v38 = vmax.f32 %v862_v9, %v863_v39  ;;  %v4508_v37 = vunpack.c.l.bf16 %v4507_v20  ;;  %v2972_v44 = vmax.f32 %v836_v17, %v837_v3 }
  0xd9   : > { %v871_v50 = vmax.f32 %v869_v53, %v870_v43  ;;  %v878_v28 = vmax.f32 %v876_v7, %v877_v36  ;;  %v2974_v60 = vmax.f32 %v843_v57, %v844_v22  ;;  %v2976_v35 = vmax.f32 %v850_v58, %v851_v62  ;;  %v4522_v62 = vld [vmem:[#allocation40_spill] sm:$0xff] }
  0xda   : > { %v881_v29 = vsel %vm376_vm0, %v4508_v37, -inf  ;;  %4509 = vst [vmem:[#allocation33_spill] sm:$0xff] %v2972_v44  ;;  %v2978_v10 = vmax.f32 %v857_v46, %v858_v42  ;;  %v865_v15 = vrot.slane %v864_v38, 1  ;;  %v4514_v30 = vunpack.c.l.bf16 %v4513_v21  ;;  %v4524_v37 = vld [vmem:[#allocation41_spill] sm:$0xff]  ;;  %v4552_v44 = vld [vmem:[#allocation51_spill] sm:$0xff] }
  0xdb   : > { %4510 = vst [vmem:[#allocation34_spill] sm:$0xff] %v2974_v60  ;;  %4511 = vst [vmem:[#allocation35_spill] sm:$0xff] %v2976_v35  ;;  %v872_v45 = vrot.slane %v871_v50, 1  ;;  %v879_v27 = vrot.slane %v878_v28, 1  ;;  %v882_v14 = vrot.slane %v881_v29, 4  ;;  %v4516_v20 = vunpack.c.l.bf16 %v4515_v24  ;;  %v4528_v60 = vld [vmem:[#allocation43_spill] sm:$0xff] }
  0xdc   : > { %4512 = vst [vmem:[#allocation36_spill] sm:$0xff] %v2978_v10  ;;  %v888_v53 = vsel %vm376_vm0, %v4514_v30, -inf  ;;  %v4517_v17 = vunpack.c.l.bf16 %v2392_v63  ;;  %v4518_v58 = vunpack.c.l.bf16 %v2395_v40  ;;  %v2992_v9 = vmax.f32 %v864_v38, %v865_v15  ;;  %v4526_v38 = vld [vmem:[#allocation42_spill] sm:$0xff] }
  0xdd   : > { %v895_v23 = vsel %vm376_vm0, %v4516_v20, -inf  ;;  %v2994_v7 = vmax.f32 %v871_v50, %v872_v45  ;;  %v2996_v57 = vmax.f32 %v878_v28, %v879_v27  ;;  %v883_v46 = vmax.f32 %v881_v29, %v882_v14 }
  0xde   : > { %v902_v34 = vsel %vm376_vm0, %v4517_v17, -inf  ;;  %v909_v61 = vsel %vm376_vm0, %v4518_v58, -inf  ;;  %4519 = vst [vmem:[#allocation37_spill] sm:$0xff] %v2992_v9  ;;  %v889_v39 = vrot.slane %v888_v53, 4  ;;  %v896_v43 = vrot.slane %v895_v23, 4 }
  0xdf   : > { %4520 = vst [vmem:[#allocation38_spill] sm:$0xff] %v2994_v7  ;;  %4521 = vst [vmem:[#allocation39_spill] sm:$0xff] %v2996_v57  ;;  %v903_v36 = vrot.slane %v902_v34, 4  ;;  %v910_v3 = vrot.slane %v909_v61, 4  ;;  %v884_v22 = vrot.slane %v883_v46, 2  ;;  %v4523_v63 = vunpack.c.l.bf16 %v4522_v62 }
  0xe0   : > { %v4525_v40 = vunpack.c.l.bf16 %v4524_v37  ;;  %v4527_v15 = vunpack.c.l.bf16 %v4526_v38  ;;  %v890_v28 = vmax.f32 %v888_v53, %v889_v39  ;;  %v897_v45 = vmax.f32 %v895_v23, %v896_v43 }
  0xe1   : > { %v916_v42 = vsel %vm376_vm0, %v4523_v63, -inf  ;;  %v904_v29 = vmax.f32 %v902_v34, %v903_v36  ;;  %v911_v27 = vmax.f32 %v909_v61, %v910_v3  ;;  %v885_v14 = vmax.f32 %v883_v46, %v884_v22 }
  0xe2   : > { %v923_v21 = vsel %vm376_vm0, %v4525_v40, -inf  ;;  %v930_v50 = vsel %vm376_vm0, %v4527_v15, -inf  ;;  %v917_v30 = vrot.slane %v916_v42, 4  ;;  %v891_v17 = vrot.slane %v890_v28, 2 }
  0xe3   : > { %v924_v24 = vrot.slane %v923_v21, 4  ;;  %v931_v20 = vrot.slane %v930_v50, 4  ;;  %v898_v58 = vrot.slane %v897_v45, 2  ;;  %v905_v62 = vrot.slane %v904_v29, 2 }
  0xe4   : > { %v912_v63 = vrot.slane %v911_v27, 2  ;;  %v886_v57 = vrot.slane %v885_v14, 1  ;;  %v918_v37 = vmax.f32 %v916_v42, %v917_v30  ;;  %v892_v9 = vmax.f32 %v890_v28, %v891_v17  ;;  %v4536_v17 = vld [vmem:[#allocation45_spill] sm:$0xff] }
  0xe5   : > { %v925_v7 = vmax.f32 %v923_v21, %v924_v24  ;;  %v932_v40 = vmax.f32 %v930_v50, %v931_v20  ;;  %v899_v38 = vmax.f32 %v897_v45, %v898_v58  ;;  %v906_v10 = vmax.f32 %v904_v29, %v905_v62  ;;  %v4534_v24 = vld [vmem:[#allocation44_spill] sm:$0xff] }
  0xe6   : > { %v913_v15 = vmax.f32 %v911_v27, %v912_v63  ;;  %v3007_v53 = vmax.f32 %v885_v14, %v886_v57  ;;  %v919_v23 = vrot.slane %v918_v37, 2  ;;  %v893_v46 = vrot.slane %v892_v9, 1 }
  0xe7   : > { %v926_v34 = vrot.slane %v925_v7, 2  ;;  %v933_v61 = vrot.slane %v932_v40, 2  ;;  %v900_v39 = vrot.slane %v899_v38, 1  ;;  %v907_v43 = vrot.slane %v906_v10, 1 }
  0xe8   : > { %v914_v36 = vrot.slane %v913_v15, 1  ;;  %v920_v3 = vmax.f32 %v918_v37, %v919_v23  ;;  %v4529_v42 = vunpack.c.l.bf16 %v4528_v60  ;;  %v3012_v50 = vmax.f32 %v892_v9, %v893_v46  ;;  %v4538_v9 = vld [vmem:[#allocation46_spill] sm:$0xff] }
  0xe9   : > { %v927_v22 = vmax.f32 %v925_v7, %v926_v34  ;;  %v934_v35 = vmax.f32 %v932_v40, %v933_v61  ;;  %v3014_v28 = vmax.f32 %v899_v38, %v900_v39  ;;  %v3016_v57 = vmax.f32 %v906_v10, %v907_v43  ;;  %v4540_v10 = vld [vmem:[#allocation47_spill] sm:$0xff] }
  0xea   : > { %v937_v21 = vsel %vm376_vm0, %v4529_v42, -inf  ;;  %4530 = vst [vmem:[#allocation40_spill] sm:$0xff] %v3012_v50  ;;  %v3018_v45 = vmax.f32 %v913_v15, %v914_v36  ;;  %v921_v29 = vrot.slane %v920_v3, 1  ;;  %v4535_v20 = vunpack.c.l.bf16 %v4534_v24  ;;  %v4545_v42 = vld [vmem:[#allocation48_spill] sm:$0xff] }
  0xeb   : > { %4531 = vst [vmem:[#allocation41_spill] sm:$0xff] %v3014_v28  ;;  %4532 = vst [vmem:[#allocation42_spill] sm:$0xff] %v3016_v57  ;;  %v928_v27 = vrot.slane %v927_v22, 1  ;;  %v935_v14 = vrot.slane %v934_v35, 1  ;;  %v938_v30 = vrot.slane %v937_v21, 4  ;;  %v4537_v60 = vunpack.c.l.bf16 %v4536_v17  ;;  %v4547_v17 = vld [vmem:[#allocation49_spill] sm:$0xff] }
  0xec   : > { %4533 = vst [vmem:[#allocation43_spill] sm:$0xff] %v3018_v45  ;;  %v944_v7 = vsel %vm376_vm0, %v4535_v20, -inf  ;;  %v4539_v62 = vunpack.c.l.bf16 %v4538_v9  ;;  %v4541_v37 = vunpack.c.l.bf16 %v4540_v10  ;;  %v3032_v38 = vmax.f32 %v920_v3, %v921_v29  ;;  %v4549_v3 = vld [vmem:[#allocation50_spill] sm:$0xff] }
  0xed   : > { %v951_v58 = vsel %vm376_vm0, %v4537_v60, -inf  ;;  %v3034_v15 = vmax.f32 %v927_v22, %v928_v27  ;;  %v3036_v23 = vmax.f32 %v934_v35, %v935_v14  ;;  %v939_v34 = vmax.f32 %v937_v21, %v938_v30 }
  0xee   : > { %v958_v63 = vsel %vm376_vm0, %v4539_v62, -inf  ;;  %v965_v40 = vsel %vm376_vm0, %v4541_v37, -inf  ;;  %4542 = vst [vmem:[#allocation44_spill] sm:$0xff] %v3032_v38  ;;  %v945_v61 = vrot.slane %v944_v7, 4  ;;  %v952_v46 = vrot.slane %v951_v58, 4 }
  0xef   : > { %4543 = vst [vmem:[#allocation45_spill] sm:$0xff] %v3034_v15  ;;  %4544 = vst [vmem:[#allocation46_spill] sm:$0xff] %v3036_v23  ;;  %v959_v39 = vrot.slane %v958_v63, 4  ;;  %v966_v43 = vrot.slane %v965_v40, 4  ;;  %v940_v36 = vrot.slane %v939_v34, 2  ;;  %v4546_v24 = vunpack.c.l.bf16 %v4545_v42 }
  0xf0   : > { %v4548_v60 = vunpack.c.l.bf16 %v4547_v17  ;;  %v4550_v29 = vunpack.c.l.bf16 %v4549_v3  ;;  %v946_v35 = vmax.f32 %v944_v7, %v945_v61  ;;  %v953_v27 = vmax.f32 %v951_v58, %v952_v46 }
  0xf1   : > { %v972_v20 = vsel %vm376_vm0, %v4546_v24, -inf  ;;  %v960_v21 = vmax.f32 %v958_v63, %v959_v39  ;;  %v967_v14 = vmax.f32 %v965_v40, %v966_v43  ;;  %v941_v30 = vmax.f32 %v939_v34, %v940_v36 }
  0xf2   : > { %v979_v9 = vsel %vm376_vm0, %v4548_v60, -inf  ;;  %v986_v22 = vsel %vm376_vm0, %v4550_v29, -inf  ;;  %v973_v62 = vrot.slane %v972_v20, 4  ;;  %v947_v23 = vrot.slane %v946_v35, 2 }
  0xf3   : > { %v980_v10 = vrot.slane %v979_v9, 4  ;;  %v987_v37 = vrot.slane %v986_v22, 4  ;;  %v954_v42 = vrot.slane %v953_v27, 2  ;;  %v961_v15 = vrot.slane %v960_v21, 2 }
  0xf4   : > { %v968_v24 = vrot.slane %v967_v14, 2  ;;  %v942_v38 = vrot.slane %v941_v30, 1  ;;  %v974_v17 = vmax.f32 %v972_v20, %v973_v62  ;;  %v948_v57 = vmax.f32 %v946_v35, %v947_v23 }
  0xf5   : > { %v981_v45 = vmax.f32 %v979_v9, %v980_v10  ;;  %v988_v60 = vmax.f32 %v986_v22, %v987_v37  ;;  %v955_v3 = vmax.f32 %v953_v27, %v954_v42  ;;  %v962_v28 = vmax.f32 %v960_v21, %v961_v15  ;;  %v4560_v10 = vld [vmem:[#allocation53_spill] sm:$0xff] }
  0xf6   : > { %v969_v29 = vmax.f32 %v967_v14, %v968_v24  ;;  %v3047_v7 = vmax.f32 %v941_v30, %v942_v38  ;;  %v975_v58 = vrot.slane %v974_v17, 2  ;;  %v949_v34 = vrot.slane %v948_v57, 1  ;;  %v4558_v30 = vld [vmem:[#allocation52_spill] sm:$0xff] }
  0xf7   : > { %v982_v63 = vrot.slane %v981_v45, 2  ;;  %v989_v40 = vrot.slane %v988_v60, 2  ;;  %v956_v61 = vrot.slane %v955_v3, 1  ;;  %v963_v46 = vrot.slane %v962_v28, 1 }
  0xf8   : > { %4551 = vst [vmem:[#allocation47_spill] sm:$0xff] %v3047_v7  ;;  %v970_v39 = vrot.slane %v969_v29, 1  ;;  %v976_v43 = vmax.f32 %v974_v17, %v975_v58  ;;  %v4553_v20 = vunpack.c.l.bf16 %v4552_v44  ;;  %v3052_v23 = vmax.f32 %v948_v57, %v949_v34  ;;  %v4562_v57 = vld [vmem:[#allocation54_spill] sm:$0xff]  ;;  %v4576_v7 = vld [vmem:[#allocation59_spill] sm:$0xff] }
  0xf9   : > { %v983_v36 = vmax.f32 %v981_v45, %v982_v63  ;;  %v990_v50 = vmax.f32 %v988_v60, %v989_v40  ;;  %v3054_v15 = vmax.f32 %v955_v3, %v956_v61  ;;  %v3056_v38 = vmax.f32 %v962_v28, %v963_v46  ;;  %v4564_v28 = vld [vmem:[#allocation55_spill] sm:$0xff] }
  0xfa   : > { %v993_v9 = vsel %vm376_vm0, %v4553_v20, -inf  ;;  %4554 = vst [vmem:[#allocation48_spill] sm:$0xff] %v3052_v23  ;;  %v3058_v22 = vmax.f32 %v969_v29, %v970_v39  ;;  %v977_v35 = vrot.slane %v976_v43, 1  ;;  %v4559_v62 = vunpack.c.l.bf16 %v4558_v30  ;;  %v4569_v20 = vld [vmem:[#allocation56_spill] sm:$0xff] }
  0xfb   : > { %4555 = vst [vmem:[#allocation49_spill] sm:$0xff] %v3054_v15  ;;  %4556 = vst [vmem:[#allocation50_spill] sm:$0xff] %v3056_v38  ;;  %v984_v27 = vrot.slane %v983_v36, 1  ;;  %v991_v21 = vrot.slane %v990_v50, 1  ;;  %v994_v14 = vrot.slane %v993_v9, 4  ;;  %v4561_v44 = vunpack.c.l.bf16 %v4560_v10  ;;  %v4571_v10 = vld [vmem:[#allocation57_spill] sm:$0xff] }
  0xfc   : > { %4557 = vst [vmem:[#allocation51_spill] sm:$0xff] %v3058_v22  ;;  %v1000_v45 = vsel %vm376_vm0, %v4559_v62, -inf  ;;  %v4563_v42 = vunpack.c.l.bf16 %v4562_v57  ;;  %v4565_v17 = vunpack.c.l.bf16 %v4564_v28  ;;  %v3072_v3 = vmax.f32 %v976_v43, %v977_v35  ;;  %v4573_v43 = vld [vmem:[#allocation58_spill] sm:$0xff] }
  0xfd   : > { %v1007_v37 = vsel %vm376_vm0, %v4561_v44, -inf  ;;  %v3074_v29 = vmax.f32 %v983_v36, %v984_v27  ;;  %v3076_v58 = vmax.f32 %v990_v50, %v991_v21  ;;  %v995_v63 = vmax.f32 %v993_v9, %v994_v14 }
  0xfe   : > { %v1014_v24 = vsel %vm376_vm0, %v4563_v42, -inf  ;;  %v1021_v60 = vsel %vm376_vm0, %v4565_v17, -inf  ;;  %4566 = vst [vmem:[#allocation52_spill] sm:$0xff] %v3072_v3  ;;  %v1001_v40 = vrot.slane %v1000_v45, 4  ;;  %v1008_v34 = vrot.slane %v1007_v37, 4 }
  0xff   : > { %4567 = vst [vmem:[#allocation53_spill] sm:$0xff] %v3074_v29  ;;  %4568 = vst [vmem:[#allocation54_spill] sm:$0xff] %v3076_v58  ;;  %v1015_v61 = vrot.slane %v1014_v24, 4  ;;  %v1022_v46 = vrot.slane %v1021_v60, 4  ;;  %v996_v39 = vrot.slane %v995_v63, 2  ;;  %v4570_v30 = vunpack.c.l.bf16 %v4569_v20 }
 0x100   : > { %v4572_v44 = vunpack.c.l.bf16 %v4571_v10  ;;  %v4574_v35 = vunpack.c.l.bf16 %v4573_v43  ;;  %v1002_v50 = vmax.f32 %v1000_v45, %v1001_v40  ;;  %v1009_v27 = vmax.f32 %v1007_v37, %v1008_v34 }
 0x101   : > { %v1028_v62 = vsel %vm376_vm0, %v4570_v30, -inf  ;;  %v1016_v9 = vmax.f32 %v1014_v24, %v1015_v61  ;;  %v1023_v21 = vmax.f32 %v1021_v60, %v1022_v46  ;;  %v997_v14 = vmax.f32 %v995_v63, %v996_v39 }
 0x102   : > { %v1035_v57 = vsel %vm376_vm0, %v4572_v44, -inf  ;;  %v1042_v36 = vsel %vm376_vm0, %v4574_v35, -inf  ;;  %v1029_v42 = vrot.slane %v1028_v62, 4  ;;  %v1003_v58 = vrot.slane %v1002_v50, 2 }
 0x103   : > { %v1036_v28 = vrot.slane %v1035_v57, 4  ;;  %v1043_v17 = vrot.slane %v1042_v36, 4  ;;  %v1010_v20 = vrot.slane %v1009_v27, 2  ;;  %v1017_v29 = vrot.slane %v1016_v9, 2 }
 0x104   : > { %v1024_v30 = vrot.slane %v1023_v21, 2  ;;  %v998_v3 = vrot.slane %v997_v14, 1  ;;  %v1030_v10 = vmax.f32 %v1028_v62, %v1029_v42  ;;  %v1004_v38 = vmax.f32 %v1002_v50, %v1003_v58 }
 0x105   : > { %v1037_v22 = vmax.f32 %v1035_v57, %v1036_v28  ;;  %v1044_v44 = vmax.f32 %v1042_v36, %v1043_v17  ;;  %v1011_v43 = vmax.f32 %v1009_v27, %v1010_v20  ;;  %v1018_v15 = vmax.f32 %v1016_v9, %v1017_v29  ;;  %v4584_v28 = vld [vmem:[#allocation61_spill] sm:$0xff] }
 0x106   : > { %v1025_v35 = vmax.f32 %v1023_v21, %v1024_v30  ;;  %v3087_v45 = vmax.f32 %v997_v14, %v998_v3  ;;  %v1031_v37 = vrot.slane %v1030_v10, 2  ;;  %v1005_v63 = vrot.slane %v1004_v38, 1  ;;  %v4582_v14 = vld [vmem:[#allocation60_spill] sm:$0xff] }
 0x107   : > { %v1038_v24 = vrot.slane %v1037_v22, 2  ;;  %v1045_v60 = vrot.slane %v1044_v44, 2  ;;  %v1012_v40 = vrot.slane %v1011_v43, 1  ;;  %v1019_v34 = vrot.slane %v1018_v15, 1 }
 0x108   : > { %4575 = vst [vmem:[#allocation55_spill] sm:$0xff] %v3087_v45  ;;  %v1026_v61 = vrot.slane %v1025_v35, 1  ;;  %v1032_v46 = vmax.f32 %v1030_v10, %v1031_v37  ;;  %v4577_v62 = vunpack.c.l.bf16 %v4576_v7  ;;  %v3092_v58 = vmax.f32 %v1004_v38, %v1005_v63  ;;  %v4586_v38 = vld [vmem:[#allocation62_spill] sm:$0xff]  ;;  %v4600_v45 = vld [vmem:[#allocation67_spill] sm:$0xff] }
 0x109   : > { %v1039_v39 = vmax.f32 %v1037_v22, %v1038_v24  ;;  %v1046_v23 = vmax.f32 %v1044_v44, %v1045_v60  ;;  %v3094_v29 = vmax.f32 %v1011_v43, %v1012_v40  ;;  %v3096_v3 = vmax.f32 %v1018_v15, %v1019_v34  ;;  %v4588_v15 = vld [vmem:[#allocation63_spill] sm:$0xff] }
 0x10a   : > { %v1049_v57 = vsel %vm376_vm0, %v4577_v62, -inf  ;;  %4578 = vst [vmem:[#allocation56_spill] sm:$0xff] %v3092_v58  ;;  %v3098_v36 = vmax.f32 %v1025_v35, %v1026_v61  ;;  %v1033_v50 = vrot.slane %v1032_v46, 1  ;;  %v4583_v42 = vunpack.c.l.bf16 %v4582_v14  ;;  %v4593_v62 = vld [vmem:[#allocation64_spill] sm:$0xff] }
 0x10b   : > { %4579 = vst [vmem:[#allocation57_spill] sm:$0xff] %v3094_v29  ;;  %4580 = vst [vmem:[#allocation58_spill] sm:$0xff] %v3096_v3  ;;  %v1040_v27 = vrot.slane %v1039_v39, 1  ;;  %v1047_v9 = vrot.slane %v1046_v23, 1  ;;  %v1050_v21 = vrot.slane %v1049_v57, 4  ;;  %v4585_v7 = vunpack.c.l.bf16 %v4584_v28  ;;  %v4595_v28 = vld [vmem:[#allocation65_spill] sm:$0xff] }
 0x10c   : > { %4581 = vst [vmem:[#allocation59_spill] sm:$0xff] %v3098_v36  ;;  %v1056_v22 = vsel %vm376_vm0, %v4583_v42, -inf  ;;  %v4587_v20 = vunpack.c.l.bf16 %v4586_v38  ;;  %v4589_v10 = vunpack.c.l.bf16 %v4588_v15  ;;  %v3112_v43 = vmax.f32 %v1032_v46, %v1033_v50  ;;  %v4597_v46 = vld [vmem:[#allocation66_spill] sm:$0xff] }
 0x10d   : > { %v1063_v17 = vsel %vm376_vm0, %v4585_v7, -inf  ;;  %v3114_v35 = vmax.f32 %v1039_v39, %v1040_v27  ;;  %v3116_v37 = vmax.f32 %v1046_v23, %v1047_v9  ;;  %v1051_v24 = vmax.f32 %v1049_v57, %v1050_v21 }
 0x10e   : > { %v1070_v30 = vsel %vm376_vm0, %v4587_v20, -inf  ;;  %v1077_v44 = vsel %vm376_vm0, %v4589_v10, -inf  ;;  %4590 = vst [vmem:[#allocation60_spill] sm:$0xff] %v3112_v43  ;;  %v1057_v60 = vrot.slane %v1056_v22, 4  ;;  %v1064_v63 = vrot.slane %v1063_v17, 4 }
 0x10f   : > { %4591 = vst [vmem:[#allocation61_spill] sm:$0xff] %v3114_v35  ;;  %4592 = vst [vmem:[#allocation62_spill] sm:$0xff] %v3116_v37  ;;  %v1071_v40 = vrot.slane %v1070_v30, 4  ;;  %v1078_v34 = vrot.slane %v1077_v44, 4  ;;  %v1052_v61 = vrot.slane %v1051_v24, 2  ;;  %v4594_v14 = vunpack.c.l.bf16 %v4593_v62 }
 0x110   : > { %v4596_v7 = vunpack.c.l.bf16 %v4595_v28  ;;  %v4598_v50 = vunpack.c.l.bf16 %v4597_v46  ;;  %v1058_v23 = vmax.f32 %v1056_v22, %v1057_v60  ;;  %v1065_v27 = vmax.f32 %v1063_v17, %v1064_v63 }
 0x111   : > { %v1084_v42 = vsel %vm376_vm0, %v4594_v14, -inf  ;;  %v1072_v57 = vmax.f32 %v1070_v30, %v1071_v40  ;;  %v1079_v9 = vmax.f32 %v1077_v44, %v1078_v34  ;;  %v1053_v21 = vmax.f32 %v1051_v24, %v1052_v61 }
 0x112   : > { %v1091_v38 = vsel %vm376_vm0, %v4596_v7, -inf  ;;  %v1098_v39 = vsel %vm376_vm0, %v4598_v50, -inf  ;;  %v1085_v20 = vrot.slane %v1084_v42, 4  ;;  %v1059_v37 = vrot.slane %v1058_v23, 2 }
 0x113   : > { %v1092_v15 = vrot.slane %v1091_v38, 4  ;;  %v1099_v10 = vrot.slane %v1098_v39, 4  ;;  %v1066_v62 = vrot.slane %v1065_v27, 2  ;;  %v1073_v35 = vrot.slane %v1072_v57, 2 }
 0x114   : > { %v1080_v14 = vrot.slane %v1079_v9, 2  ;;  %v1054_v43 = vrot.slane %v1053_v21, 1  ;;  %v1086_v28 = vmax.f32 %v1084_v42, %v1085_v20  ;;  %v1060_v3 = vmax.f32 %v1058_v23, %v1059_v37 }
 0x115   : > { %v1093_v36 = vmax.f32 %v1091_v38, %v1092_v15  ;;  %v1100_v7 = vmax.f32 %v1098_v39, %v1099_v10  ;;  %v1067_v46 = vmax.f32 %v1065_v27, %v1066_v62  ;;  %v1074_v29 = vmax.f32 %v1072_v57, %v1073_v35  ;;  %v4608_v15 = vld [vmem:[#allocation69_spill] sm:$0xff] }
 0x116   : > { %v1081_v50 = vmax.f32 %v1079_v9, %v1080_v14  ;;  %v3127_v22 = vmax.f32 %v1053_v21, %v1054_v43  ;;  %v1087_v17 = vrot.slane %v1086_v28, 2  ;;  %v1061_v24 = vrot.slane %v1060_v3, 1  ;;  %v4606_v21 = vld [vmem:[#allocation68_spill] sm:$0xff] }
 0x117   : > { %v1094_v30 = vrot.slane %v1093_v36, 2  ;;  %v1101_v44 = vrot.slane %v1100_v7, 2  ;;  %v1068_v60 = vrot.slane %v1067_v46, 1  ;;  %v1075_v63 = vrot.slane %v1074_v29, 1 }
 0x118   : > { %4599 = vst [vmem:[#allocation63_spill] sm:$0xff] %v3127_v22  ;;  %v1082_v40 = vrot.slane %v1081_v50, 1  ;;  %v1088_v34 = vmax.f32 %v1086_v28, %v1087_v17  ;;  %v4601_v42 = vunpack.c.l.bf16 %v4600_v45  ;;  %v3132_v37 = vmax.f32 %v1060_v3, %v1061_v24  ;;  %v4610_v3 = vld [vmem:[#allocation70_spill] sm:$0xff]  ;;  %v4624_v22 = vld [vmem:[#allocation75_spill] sm:$0xff] }
 0x119   : > { %v1095_v61 = vmax.f32 %v1093_v36, %v1094_v30  ;;  %v1102_v58 = vmax.f32 %v1100_v7, %v1101_v44  ;;  %v3134_v35 = vmax.f32 %v1067_v46, %v1068_v60  ;;  %v3136_v43 = vmax.f32 %v1074_v29, %v1075_v63  ;;  %v4612_v29 = vld [vmem:[#allocation71_spill] sm:$0xff] }
 0x11a   : > { %v1105_v38 = vsel %vm376_vm0, %v4601_v42, -inf  ;;  %4602 = vst [vmem:[#allocation64_spill] sm:$0xff] %v3132_v37  ;;  %v3138_v39 = vmax.f32 %v1081_v50, %v1082_v40  ;;  %v1089_v23 = vrot.slane %v1088_v34, 1  ;;  %v4607_v20 = vunpack.c.l.bf16 %v4606_v21  ;;  %v4617_v42 = vld [vmem:[#allocation72_spill] sm:$0xff] }
 0x11b   : > { %4603 = vst [vmem:[#allocation65_spill] sm:$0xff] %v3134_v35  ;;  %4604 = vst [vmem:[#allocation66_spill] sm:$0xff] %v3136_v43  ;;  %v1096_v27 = vrot.slane %v1095_v61, 1  ;;  %v1103_v57 = vrot.slane %v1102_v58, 1  ;;  %v1106_v9 = vrot.slane %v1105_v38, 4  ;;  %v4609_v45 = vunpack.c.l.bf16 %v4608_v15  ;;  %v4619_v15 = vld [vmem:[#allocation73_spill] sm:$0xff] }
 0x11c   : > { %4605 = vst [vmem:[#allocation67_spill] sm:$0xff] %v3138_v39  ;;  %v1112_v36 = vsel %vm376_vm0, %v4607_v20, -inf  ;;  %v4611_v62 = vunpack.c.l.bf16 %v4610_v3  ;;  %v4613_v28 = vunpack.c.l.bf16 %v4612_v29  ;;  %v3152_v46 = vmax.f32 %v1088_v34, %v1089_v23  ;;  %v4621_v34 = vld [vmem:[#allocation74_spill] sm:$0xff] }
 0x11d   : > { %v1119_v10 = vsel %vm376_vm0, %v4609_v45, -inf  ;;  %v3154_v50 = vmax.f32 %v1095_v61, %v1096_v27  ;;  %v3156_v17 = vmax.f32 %v1102_v58, %v1103_v57  ;;  %v1107_v30 = vmax.f32 %v1105_v38, %v1106_v9 }
 0x11e   : > { %v1126_v14 = vsel %vm376_vm0, %v4611_v62, -inf  ;;  %v1133_v7 = vsel %vm376_vm0, %v4613_v28, -inf  ;;  %4614 = vst [vmem:[#allocation68_spill] sm:$0xff] %v3152_v46  ;;  %v1113_v44 = vrot.slane %v1112_v36, 4  ;;  %v1120_v24 = vrot.slane %v1119_v10, 4 }
 0x11f   : > { %4615 = vst [vmem:[#allocation69_spill] sm:$0xff] %v3154_v50  ;;  %4616 = vst [vmem:[#allocation70_spill] sm:$0xff] %v3156_v17  ;;  %v1127_v60 = vrot.slane %v1126_v14, 4  ;;  %v1134_v63 = vrot.slane %v1133_v7, 4  ;;  %v1108_v40 = vrot.slane %v1107_v30, 2  ;;  %v4618_v21 = vunpack.c.l.bf16 %v4617_v42 }
 0x120   : > { %v4620_v45 = vunpack.c.l.bf16 %v4619_v15  ;;  %v4622_v23 = vunpack.c.l.bf16 %v4621_v34  ;;  %v1114_v58 = vmax.f32 %v1112_v36, %v1113_v44  ;;  %v1121_v27 = vmax.f32 %v1119_v10, %v1120_v24 }
 0x121   : > { %v1140_v20 = vsel %vm376_vm0, %v4618_v21, -inf  ;;  %v1128_v38 = vmax.f32 %v1126_v14, %v1127_v60  ;;  %v1135_v57 = vmax.f32 %v1133_v7, %v1134_v63  ;;  %v1109_v9 = vmax.f32 %v1107_v30, %v1108_v40 }
 0x122   : > { %v1147_v3 = vsel %vm376_vm0, %v4620_v45, -inf  ;;  %v1154_v61 = vsel %vm376_vm0, %v4622_v23, -inf  ;;  %v1141_v62 = vrot.slane %v1140_v20, 4  ;;  %v1115_v17 = vrot.slane %v1114_v58, 2 }
 0x123   : > { %v1148_v29 = vrot.slane %v1147_v3, 4  ;;  %v1155_v28 = vrot.slane %v1154_v61, 4  ;;  %v1122_v42 = vrot.slane %v1121_v27, 2  ;;  %v1129_v50 = vrot.slane %v1128_v38, 2 }
 0x124   : > { %v1136_v21 = vrot.slane %v1135_v57, 2  ;;  %v1110_v46 = vrot.slane %v1109_v9, 1  ;;  %v1142_v15 = vmax.f32 %v1140_v20, %v1141_v62  ;;  %v1116_v43 = vmax.f32 %v1114_v58, %v1115_v17 }
 0x125   : > { %v1149_v39 = vmax.f32 %v1147_v3, %v1148_v29  ;;  %v1156_v45 = vmax.f32 %v1154_v61, %v1155_v28  ;;  %v1123_v34 = vmax.f32 %v1121_v27, %v1122_v42  ;;  %v1130_v35 = vmax.f32 %v1128_v38, %v1129_v50  ;;  %v4632_v29 = vld [vmem:[#allocation77_spill] sm:$0xff] }
 0x126   : > { %v1137_v23 = vmax.f32 %v1135_v57, %v1136_v21  ;;  %v3167_v36 = vmax.f32 %v1109_v9, %v1110_v46  ;;  %v1143_v10 = vrot.slane %v1142_v15, 2  ;;  %v1117_v30 = vrot.slane %v1116_v43, 1  ;;  %v4630_v9 = vld [vmem:[#allocation76_spill] sm:$0xff] }
 0x127   : > { %v1150_v14 = vrot.slane %v1149_v39, 2  ;;  %v1157_v7 = vrot.slane %v1156_v45, 2  ;;  %v1124_v44 = vrot.slane %v1123_v34, 1  ;;  %v1131_v24 = vrot.slane %v1130_v35, 1 }
 0x128   : > { %4623 = vst [vmem:[#allocation71_spill] sm:$0xff] %v3167_v36  ;;  %v1138_v60 = vrot.slane %v1137_v23, 1  ;;  %v1144_v63 = vmax.f32 %v1142_v15, %v1143_v10  ;;  %v4625_v20 = vunpack.c.l.bf16 %v4624_v22  ;;  %v3172_v17 = vmax.f32 %v1116_v43, %v1117_v30  ;;  %v4634_v43 = vld [vmem:[#allocation78_spill] sm:$0xff]  ;;  %v4647_v36 = vld [vmem:[#allocation83_spill] sm:$0xff] }
 0x129   : > { %v1151_v40 = vmax.f32 %v1149_v39, %v1150_v14  ;;  %v1158_v37 = vmax.f32 %v1156_v45, %v1157_v7  ;;  %v3174_v50 = vmax.f32 %v1123_v34, %v1124_v44  ;;  %v3176_v46 = vmax.f32 %v1130_v35, %v1131_v24  ;;  %v4636_v35 = vld [vmem:[#allocation79_spill] sm:$0xff] }
 0x12a   : > { %v1161_v3 = vsel %vm376_vm0, %v4625_v20, -inf  ;;  %4626 = vst [vmem:[#allocation72_spill] sm:$0xff] %v3172_v17  ;;  %v3178_v61 = vmax.f32 %v1137_v23, %v1138_v60  ;;  %v1145_v58 = vrot.slane %v1144_v63, 1  ;;  %v4631_v62 = vunpack.c.l.bf16 %v4630_v9  ;;  %v4641_v20 = vld [vmem:[#allocation80_spill] sm:$0xff] }
 0x12b   : > { %4627 = vst [vmem:[#allocation73_spill] sm:$0xff] %v3174_v50  ;;  %4628 = vst [vmem:[#allocation74_spill] sm:$0xff] %v3176_v46  ;;  %v1152_v27 = vrot.slane %v1151_v40, 1  ;;  %v1159_v38 = vrot.slane %v1158_v37, 1  ;;  %v1162_v57 = vrot.slane %v1161_v3, 4  ;;  %v4633_v22 = vunpack.c.l.bf16 %v4632_v29  ;;  %v4643_v29 = vld [vmem:[#allocation81_spill] sm:$0xff] }
 0x12c   : > { %4629 = vst [vmem:[#allocation75_spill] sm:$0xff] %v3178_v61  ;;  %v1168_v39 = vsel %vm376_vm0, %v4631_v62, -inf  ;;  %v4635_v42 = vunpack.c.l.bf16 %v4634_v43  ;;  %v4637_v15 = vunpack.c.l.bf16 %v4636_v35  ;;  %v3192_v34 = vmax.f32 %v1144_v63, %v1145_v58  ;;  %v4645_v63 = vld [vmem:[#allocation82_spill] sm:$0xff] }
 0x12d   : > { %v1175_v28 = vsel %vm376_vm0, %v4633_v22, -inf  ;;  %v3194_v23 = vmax.f32 %v1151_v40, %v1152_v27  ;;  %v3196_v10 = vmax.f32 %v1158_v37, %v1159_v38  ;;  %v1163_v14 = vmax.f32 %v1161_v3, %v1162_v57 }
 0x12e   : > { %v1182_v21 = vsel %vm376_vm0, %v4635_v42, -inf  ;;  %v1189_v45 = vsel %vm376_vm0, %v4637_v15, -inf  ;;  %4638 = vst [vmem:[#allocation76_spill] sm:$0xff] %v3192_v34  ;;  %v1169_v7 = vrot.slane %v1168_v39, 4  ;;  %v1176_v30 = vrot.slane %v1175_v28, 4 }
 0x12f   : > { %4639 = vst [vmem:[#allocation77_spill] sm:$0xff] %v3194_v23  ;;  %4640 = vst [vmem:[#allocation78_spill] sm:$0xff] %v3196_v10  ;;  %v1183_v44 = vrot.slane %v1182_v21, 4  ;;  %v1190_v24 = vrot.slane %v1189_v45, 4  ;;  %v1164_v60 = vrot.slane %v1163_v14, 2  ;;  %v4642_v9 = vunpack.c.l.bf16 %v4641_v20 }
 0x130   : > { %v4644_v22 = vunpack.c.l.bf16 %v4643_v29  ;;  %v4646_v58 = vunpack.c.l.bf16 %v4645_v63  ;;  %v1170_v37 = vmax.f32 %v1168_v39, %v1169_v7  ;;  %v1177_v27 = vmax.f32 %v1175_v28, %v1176_v30 }
 0x131   : > { %v1196_v62 = vsel %vm376_vm0, %v4642_v9, -inf  ;;  %v1184_v3 = vmax.f32 %v1182_v21, %v1183_v44  ;;  %v1191_v38 = vmax.f32 %v1189_v45, %v1190_v24  ;;  %v1165_v57 = vmax.f32 %v1163_v14, %v1164_v60 }
 0x132   : > { %v1203_v43 = vsel %vm376_vm0, %v4644_v22, -inf  ;;  %v1210_v40 = vsel %vm376_vm0, %v4646_v58, -inf  ;;  %v1197_v42 = vrot.slane %v1196_v62, 4  ;;  %v1171_v10 = vrot.slane %v1170_v37, 2 }
 0x133   : > { %v1204_v35 = vrot.slane %v1203_v43, 4  ;;  %v1211_v15 = vrot.slane %v1210_v40, 4  ;;  %v1178_v20 = vrot.slane %v1177_v27, 2  ;;  %v1185_v23 = vrot.slane %v1184_v3, 2 }
 0x134   : > { %v1192_v9 = vrot.slane %v1191_v38, 2  ;;  %v1166_v34 = vrot.slane %v1165_v57, 1  ;;  %v1198_v29 = vmax.f32 %v1196_v62, %v1197_v42  ;;  %v1172_v46 = vmax.f32 %v1170_v37, %v1171_v10 }
 0x135   : > { %v1205_v61 = vmax.f32 %v1203_v43, %v1204_v35  ;;  %v1212_v22 = vmax.f32 %v1210_v40, %v1211_v15  ;;  %v1179_v63 = vmax.f32 %v1177_v27, %v1178_v20  ;;  %v1186_v50 = vmax.f32 %v1184_v3, %v1185_v23  ;;  %v4655_v35 = vld [vmem:[#allocation85_spill] sm:$0xff] }
 0x136   : > { %v1193_v58 = vmax.f32 %v1191_v38, %v1192_v9  ;;  %v3207_v39 = vmax.f32 %v1165_v57, %v1166_v34  ;;  %v1199_v28 = vrot.slane %v1198_v29, 2  ;;  %v1173_v14 = vrot.slane %v1172_v46, 1  ;;  %v4653_v57 = vld [vmem:[#allocation84_spill] sm:$0xff] }
 0x137   : > { %v1206_v21 = vrot.slane %v1205_v61, 2  ;;  %v1213_v45 = vrot.slane %v1212_v22, 2  ;;  %v1180_v7 = vrot.slane %v1179_v63, 1  ;;  %v1187_v30 = vrot.slane %v1186_v50, 1 }
 0x138   : > { %v1194_v44 = vrot.slane %v1193_v58, 1  ;;  %v1200_v24 = vmax.f32 %v1198_v29, %v1199_v28  ;;  %v4648_v62 = vunpack.c.l.bf16 %v4647_v36  ;;  %v3212_v10 = vmax.f32 %v1172_v46, %v1173_v14  ;;  %v4657_v46 = vld [vmem:[#allocation86_spill] sm:$0xff] }
 0x139   : > { %v1207_v60 = vmax.f32 %v1205_v61, %v1206_v21  ;;  %v1214_v17 = vmax.f32 %v1212_v22, %v1213_v45  ;;  %v3214_v23 = vmax.f32 %v1179_v63, %v1180_v7  ;;  %v3216_v34 = vmax.f32 %v1186_v50, %v1187_v30  ;;  %v4659_v50 = vld [vmem:[#allocation87_spill] sm:$0xff] }
 0x13a   : > { %v1217_v43 = vsel %vm376_vm0, %v4648_v62, -inf  ;;  %4649 = vst [vmem:[#allocation79_spill] sm:$0xff] %v3212_v10  ;;  %v3218_v40 = vmax.f32 %v1193_v58, %v1194_v44  ;;  %v1201_v37 = vrot.slane %v1200_v24, 1  ;;  %v4654_v42 = vunpack.c.l.bf16 %v4653_v57  ;;  %v4664_v62 = vld [vmem:[#allocation88_spill] sm:$0xff] }
 0x13b   : > { %4650 = vst [vmem:[#allocation80_spill] sm:$0xff] %v3214_v23  ;;  %4651 = vst [vmem:[#allocation81_spill] sm:$0xff] %v3216_v34  ;;  %v1208_v27 = vrot.slane %v1207_v60, 1  ;;  %v1215_v3 = vrot.slane %v1214_v17, 1  ;;  %v1218_v38 = vrot.slane %v1217_v43, 4  ;;  %v4656_v36 = vunpack.c.l.bf16 %v4655_v35  ;;  %v4666_v35 = vld [vmem:[#allocation89_spill] sm:$0xff] }
 0x13c   : > { %4652 = vst [vmem:[#allocation82_spill] sm:$0xff] %v3218_v40  ;;  %v1224_v61 = vsel %vm376_vm0, %v4654_v42, -inf  ;;  %v4658_v20 = vunpack.c.l.bf16 %v4657_v46  ;;  %v4660_v29 = vunpack.c.l.bf16 %v4659_v50  ;;  %v3232_v63 = vmax.f32 %v1200_v24, %v1201_v37  ;;  %v4668_v24 = vld [vmem:[#allocation90_spill] sm:$0xff] }
 0x13d   : > { %v1231_v15 = vsel %vm376_vm0, %v4656_v36, -inf  ;;  %v3234_v58 = vmax.f32 %v1207_v60, %v1208_v27  ;;  %v3236_v28 = vmax.f32 %v1214_v17, %v1215_v3  ;;  %v1219_v21 = vmax.f32 %v1217_v43, %v1218_v38 }
 0x13e   : > { %v1238_v9 = vsel %vm376_vm0, %v4658_v20, -inf  ;;  %v1245_v22 = vsel %vm376_vm0, %v4660_v29, -inf  ;;  %4661 = vst [vmem:[#allocation83_spill] sm:$0xff] %v3232_v63  ;;  %v1225_v45 = vrot.slane %v1224_v61, 4  ;;  %v1232_v14 = vrot.slane %v1231_v15, 4 }
 0x13f   : > { %4662 = vst [vmem:[#allocation84_spill] sm:$0xff] %v3234_v58  ;;  %4663 = vst [vmem:[#allocation85_spill] sm:$0xff] %v3236_v28  ;;  %v1239_v7 = vrot.slane %v1238_v9, 4  ;;  %v1246_v30 = vrot.slane %v1245_v22, 4  ;;  %v1220_v44 = vrot.slane %v1219_v21, 2  ;;  %v4665_v57 = vunpack.c.l.bf16 %v4664_v62 }
 0x140   : > { %v4667_v36 = vunpack.c.l.bf16 %v4666_v35  ;;  %v4669_v37 = vunpack.c.l.bf16 %v4668_v24  ;;  %v1226_v17 = vmax.f32 %v1224_v61, %v1225_v45  ;;  %v1233_v27 = vmax.f32 %v1231_v15, %v1232_v14 }
 0x141   : > { %v1252_v42 = vsel %vm376_vm0, %v4665_v57, -inf  ;;  %v1240_v43 = vmax.f32 %v1238_v9, %v1239_v7  ;;  %v1247_v3 = vmax.f32 %v1245_v22, %v1246_v30  ;;  %v1221_v38 = vmax.f32 %v1219_v21, %v1220_v44 }
 0x142   : > { %v1259_v46 = vsel %vm376_vm0, %v4667_v36, -inf  ;;  %v1266_v60 = vsel %vm376_vm0, %v4669_v37, -inf  ;;  %v1253_v20 = vrot.slane %v1252_v42, 4  ;;  %v1227_v28 = vrot.slane %v1226_v17, 2 }
 0x143   : > { %v1260_v50 = vrot.slane %v1259_v46, 4  ;;  %v1267_v29 = vrot.slane %v1266_v60, 4  ;;  %v1234_v62 = vrot.slane %v1233_v27, 2  ;;  %v1241_v58 = vrot.slane %v1240_v43, 2 }
 0x144   : > { %v1248_v57 = vrot.slane %v1247_v3, 2  ;;  %v1222_v63 = vrot.slane %v1221_v38, 1  ;;  %v1254_v35 = vmax.f32 %v1252_v42, %v1253_v20  ;;  %v1228_v34 = vmax.f32 %v1226_v17, %v1227_v28 }
 0x145   : > { %v1261_v40 = vmax.f32 %v1259_v46, %v1260_v50  ;;  %v1268_v36 = vmax.f32 %v1266_v60, %v1267_v29  ;;  %v1235_v24 = vmax.f32 %v1233_v27, %v1234_v62  ;;  %v1242_v23 = vmax.f32 %v1240_v43, %v1241_v58 }
 0x146   : > { %v1249_v37 = vmax.f32 %v1247_v3, %v1248_v57  ;;  %v3247_v61 = vmax.f32 %v1221_v38, %v1222_v63  ;;  %v1255_v15 = vrot.slane %v1254_v35, 2  ;;  %v1229_v21 = vrot.slane %v1228_v34, 1 }
 0x147   : > { %v1262_v9 = vrot.slane %v1261_v40, 2  ;;  %v1269_v22 = vrot.slane %v1268_v36, 2  ;;  %v1236_v45 = vrot.slane %v1235_v24, 1  ;;  %v1243_v14 = vrot.slane %v1242_v23, 1 }
 0x148   : > { %v1250_v7 = vrot.slane %v1249_v37, 1  ;;  %v1256_v30 = vmax.f32 %v1254_v35, %v1255_v15  ;;  %v3249_v42 = vmax.f32 %v1228_v34, %v1229_v21  ;;  %v1274_v27 = vsel %vm1273_vm1, %v2647_v51, -inf }
 0x149   : > { %v1263_v44 = vmax.f32 %v1261_v40, %v1262_v9  ;;  %v1270_v10 = vmax.f32 %v1268_v36, %v1269_v22  ;;  %v3251_v46 = vmax.f32 %v1235_v24, %v1236_v45  ;;  %v3253_v28 = vmax.f32 %v1242_v23, %v1243_v14 }
 0x14a   : > { %v3255_v58 = vmax.f32 %v1249_v37, %v1250_v7  ;;  %v1257_v63 = vrot.slane %v1256_v30, 1  ;;  %v1275_v43 = vsel %vm1273_vm1, %v2687_v59, -inf  ;;  %v1277_v40 = vsel %vm1273_vm1, %v2649_v4, -inf }
 0x14b   : > { %v1264_v60 = vrot.slane %v1263_v44, 1  ;;  %v1271_v17 = vrot.slane %v1270_v10, 1  ;;  %v1278_v34 = vsel %vm1273_vm1, %v2692_v56, -inf  ;;  %v1280_v23 = vsel %vm1273_vm1, %v2651_v48, -inf }
 0x14c   : > { %v3267_v3 = vmax.f32 %v1256_v30, %v1257_v63  ;;  %v3273_v50 = vmax.f32 %v1274_v27, %v1275_v43  ;;  %v3275_v51 = vmax.f32 %v1277_v40, %v1278_v34  ;;  %v1281_v59 = vsel %vm1273_vm1, %v2694_v0, -inf  ;;  %v4673_v30 = vld [vmem:[#allocation93_spill] sm:$0xff]  ;;  %v4677_v43 = vld [vmem:[#allocation95_spill] sm:$0xff] }
 0x14d   : > { %v3269_v38 = vmax.f32 %v1263_v44, %v1264_v60  ;;  %v3271_v20 = vmax.f32 %v1270_v10, %v1271_v17  ;;  %v1283_v4 = vsel %vm1273_vm1, %v2653_v49, -inf  ;;  %v1284_v56 = vsel %vm1273_vm1, %v2696_v55, -inf  ;;  %v4674_v44 = vld [vmem:[#allocation3_spill] sm:$0xff]  ;;  %v4675_v60 = vld [vmem:[#allocation94_spill] sm:$0xff]  ;;  %v4676_v17 = vld [vmem:[#allocation4_spill] sm:$0xff] }
 0x14e   : > { %v3283_v48 = vmax.f32 %v1280_v23, %v1281_v59  ;;  %v3285_v29 = vmax.f32 %v1283_v4, %v1284_v56  ;;  %v1286_v10 = vsel %vm1273_vm1, %v2655_v25, -inf  ;;  %v1287_v62 = vsel %vm1273_vm1, %v2698_v1, -inf  ;;  %v4670_v25 = vld [vmem:[#allocation91_spill] sm:$0xff]  ;;  %v4678_v23 = vld [vmem:[#allocation5_spill] sm:$0xff]  ;;  %v4679_v4 = vld [vmem:[#allocation96_spill] sm:$0xff] }
 0x14f   : > { %v3291_v57 = vmax.f32 %v1286_v10, %v1287_v62  ;;  %v1289_v0 = vsel %vm1273_vm1, %v2672_v5, -inf  ;;  %v1290_v49 = vsel %vm1273_vm1, %v2712_v33, -inf  ;;  %v1292_v55 = vsel %vm1273_vm1, %v2674_v41, -inf  ;;  %v4680_v10 = vld [vmem:[#allocation6_spill] sm:$0xff] }
 0x150   : > { %v3299_v35 = vmax.f32 %v1289_v0, %v1290_v49  ;;  %v1293_v36 = vsel %vm1273_vm1, %v2714_v8, -inf  ;;  %v1295_v24 = vsel %vm1273_vm1, %v4670_v25, -inf  ;;  %v1296_v1 = vsel %vm1273_vm1, %v2716_v11, -inf }
 0x151   : > { %v3307_v37 = vmax.f32 %v1292_v55, %v1293_v36  ;;  %v3309_v5 = vmax.f32 %v1295_v24, %v1296_v1  ;;  %v1298_v33 = vsel %vm1273_vm1, %v2727_v52, -inf  ;;  %v1299_v41 = vsel %vm1273_vm1, %v2767_v32, -inf  ;;  %v4671_v52 = vld [vmem:[#allocation92_spill] sm:$0xff]  ;;  %v4672_v32 = vld [vmem:[#allocation2_spill] sm:$0xff]  ;;  %v4681_v55 = vld [vmem:[#allocation7_spill] sm:$0xff] }
 0x152   : > { %v3315_v15 = vmax.f32 %v1298_v33, %v1299_v41  ;;  %v1301_v8 = vsel %vm1273_vm1, %v2732_v2, -inf  ;;  %v1302_v9 = vsel %vm1273_vm1, %v2772_v12, -inf  ;;  %v1304_v11 = vsel %vm1273_vm1, %v2734_v6, -inf  ;;  %v4682_v1 = vld [vmem:[#allocation8_spill] sm:$0xff] }
 0x153   : > { %v3323_v22 = vmax.f32 %v1301_v8, %v1302_v9  ;;  %v1305_v21 = vsel %vm1273_vm1, %v2774_v18, -inf  ;;  %v1307_v45 = vsel %vm1273_vm1, %v4671_v52, -inf  ;;  %v1308_v14 = vsel %vm1273_vm1, %v4672_v32, -inf  ;;  %v4683_v8 = vld [vmem:[#allocation9_spill] sm:$0xff] }
 0x154   : > { %v3331_v7 = vmax.f32 %v1304_v11, %v1305_v21  ;;  %v3333_v2 = vmax.f32 %v1307_v45, %v1308_v14  ;;  %v1310_v12 = vsel %vm1273_vm1, %v4673_v30, -inf  ;;  %v1311_v6 = vsel %vm1273_vm1, %v4674_v44, -inf  ;;  %v4684_v21 = vld [vmem:[#allocation15_spill] sm:$0xff]  ;;  %v4685_v45 = vld [vmem:[#allocation10_spill] sm:$0xff] }
 0x155   : > { %v3339_v63 = vmax.f32 %v1310_v12, %v1311_v6  ;;  %v1313_v18 = vsel %vm1273_vm1, %v4675_v60, -inf  ;;  %v1314_v27 = vsel %vm1273_vm1, %v4676_v17, -inf  ;;  %v1316_v40 = vsel %vm1273_vm1, %v4677_v43, -inf  ;;  %v4687_v44 = vld [vmem:[#allocation11_spill] sm:$0xff]  ;;  %v4688_v6 = vld [vmem:[#allocation17_spill] sm:$0xff]  ;;  %v4689_v17 = vld [vmem:[#allocation12_spill] sm:$0xff] }
 0x156   : > { %v3347_v34 = vmax.f32 %v1313_v18, %v1314_v27  ;;  %v1317_v59 = vsel %vm1273_vm1, %v4678_v23, -inf  ;;  %v1319_v56 = vsel %vm1273_vm1, %v4679_v4, -inf  ;;  %v1320_v62 = vsel %vm1273_vm1, %v4680_v10, -inf  ;;  %v4690_v43 = vld [vmem:[#allocation18_spill] sm:$0xff]  ;;  %v4691_v23 = vld [vmem:[#allocation13_spill] sm:$0xff] }
 0x157   : > { %v3355_v0 = vmax.f32 %v1316_v40, %v1317_v59  ;;  %v3357_v49 = vmax.f32 %v1319_v56, %v1320_v62  ;;  %v1322_v36 = vsel %vm1273_vm1, %v4681_v55, -inf  ;;  %v1323_v25 = vsel %vm1273_vm1, %v2847_v16, -inf  ;;  %v4686_v16 = vld [vmem:[#allocation16_spill] sm:$0xff]  ;;  %v4692_v56 = vld [vmem:[#allocation19_spill] sm:$0xff]  ;;  %v4693_v62 = vld [vmem:[#allocation14_spill] sm:$0xff] }
 0x158   : > { %v3363_v24 = vmax.f32 %v1322_v36, %v1323_v25  ;;  %v1325_v33 = vsel %vm1273_vm1, %v4682_v1, -inf  ;;  %v1326_v41 = vsel %vm1273_vm1, %v2852_v47, -inf  ;;  %v1328_v9 = vsel %vm1273_vm1, %v4683_v8, -inf  ;;  %v4694_v36 = vld [vmem:[#allocation20_spill] sm:$0xff] }
 0x159   : > { %v3371_v11 = vmax.f32 %v1325_v33, %v1326_v41  ;;  %v1329_v52 = vsel %vm1273_vm1, %v4684_v21, -inf  ;;  %v1331_v32 = vsel %vm1273_vm1, %v4685_v45, -inf  ;;  %v1332_v14 = vsel %vm1273_vm1, %v4686_v16, -inf  ;;  %v4695_v45 = vld [vmem:[#allocation21_spill] sm:$0xff] }
 0x15a   : > { %v3379_v30 = vmax.f32 %v1328_v9, %v1329_v52  ;;  %v3381_v12 = vmax.f32 %v1331_v32, %v1332_v14  ;;  %v1334_v47 = vsel %vm1273_vm1, %v4687_v44, -inf  ;;  %v1335_v60 = vsel %vm1273_vm1, %v4688_v6, -inf  ;;  %v4696_v14 = vld [vmem:[#allocation27_spill] sm:$0xff] }
 0x15b   : > { %v3387_v18 = vmax.f32 %v1334_v47, %v1335_v60  ;;  %v1337_v27 = vsel %vm1273_vm1, %v4689_v17, -inf  ;;  %v1338_v40 = vsel %vm1273_vm1, %v4690_v43, -inf  ;;  %v1340_v59 = vsel %vm1273_vm1, %v4691_v23, -inf  ;;  %v4699_v17 = vld [vmem:[#allocation23_spill] sm:$0xff]  ;;  %v4701_v23 = vld [vmem:[#allocation24_spill] sm:$0xff] }
 0x15c   : > { %v3395_v4 = vmax.f32 %v1337_v27, %v1338_v40  ;;  %v1341_v10 = vsel %vm1273_vm1, %v4692_v56, -inf  ;;  %v1343_v55 = vsel %vm1273_vm1, %v4693_v62, -inf  ;;  %v1344_v25 = vsel %vm1273_vm1, %v4694_v36, -inf  ;;  %v4700_v27 = vld [vmem:[#allocation29_spill] sm:$0xff]  ;;  %v4702_v56 = vld [vmem:[#allocation30_spill] sm:$0xff] }
 0x15d   : > { %v3403_v1 = vmax.f32 %v1340_v59, %v1341_v10  ;;  %v3405_v33 = vmax.f32 %v1343_v55, %v1344_v25  ;;  %v1346_v41 = vsel %vm1273_vm1, %v2887_v13, -inf  ;;  %v1347_v8 = vsel %vm1273_vm1, %v2927_v19, -inf  ;;  %v4697_v13 = vld [vmem:[#allocation22_spill] sm:$0xff]  ;;  %v4698_v19 = vld [vmem:[#allocation28_spill] sm:$0xff]  ;;  %v4703_v62 = vld [vmem:[#allocation25_spill] sm:$0xff] }
 0x15e   : > { %v3411_v9 = vmax.f32 %v1346_v41, %v1347_v8  ;;  %v1349_v21 = vsel %vm1273_vm1, %v2892_v26, -inf  ;;  %v1350_v52 = vsel %vm1273_vm1, %v2932_v54, -inf  ;;  %v1352_v32 = vsel %vm1273_vm1, %v4695_v45, -inf  ;;  %v4704_v25 = vld [vmem:[#allocation31_spill] sm:$0xff]  ;;  %v4705_v8 = vld [vmem:[#allocation26_spill] sm:$0xff] }
 0x15f   : > { %v3419_v16 = vmax.f32 %v1349_v21, %v1350_v52  ;;  %v1353_v44 = vsel %vm1273_vm1, %v4696_v14, -inf  ;;  %v1355_v47 = vsel %vm1273_vm1, %v4697_v13, -inf  ;;  %v1356_v6 = vsel %vm1273_vm1, %v4698_v19, -inf  ;;  %v4706_v52 = vld [vmem:[#allocation32_spill] sm:$0xff]  ;;  %v4707_v19 = vld [vmem:[#allocation33_spill] sm:$0xff] }
 0x160   : > { %v3427_v60 = vmax.f32 %v1352_v32, %v1353_v44  ;;  %v3429_v26 = vmax.f32 %v1355_v47, %v1356_v6  ;;  %v1358_v54 = vsel %vm1273_vm1, %v4699_v17, -inf  ;;  %v1359_v43 = vsel %vm1273_vm1, %v4700_v27, -inf  ;;  %v4708_v17 = vld [vmem:[#allocation40_spill] sm:$0xff]  ;;  %v4709_v27 = vld [vmem:[#allocation34_spill] sm:$0xff] }
 0x161   : > { %v3435_v40 = vmax.f32 %v1358_v54, %v1359_v43  ;;  %v1361_v59 = vsel %vm1273_vm1, %v4701_v23, -inf  ;;  %v1362_v10 = vsel %vm1273_vm1, %v4702_v56, -inf  ;;  %v1364_v55 = vsel %vm1273_vm1, %v4703_v62, -inf }
 0x162   : > { %v3443_v36 = vmax.f32 %v1361_v59, %v1362_v10  ;;  %v1365_v41 = vsel %vm1273_vm1, %v4704_v25, -inf  ;;  %v1367_v21 = vsel %vm1273_vm1, %v4705_v8, -inf  ;;  %v1368_v45 = vsel %vm1273_vm1, %v4706_v52, -inf  ;;  %v4710_v59 = vld [vmem:[#allocation41_spill] sm:$0xff] }
 0x163   : > { %v3451_v32 = vmax.f32 %v1364_v55, %v1365_v41  ;;  %v3453_v14 = vmax.f32 %v1367_v21, %v1368_v45  ;;  %v1370_v44 = vsel %vm1273_vm1, %v2967_v31, -inf  ;;  %v1371_v13 = vsel %vm1273_vm1, %v3007_v53, -inf  ;;  %v4711_v31 = vld [vmem:[#allocation35_spill] sm:$0xff]  ;;  %v4712_v53 = vld [vmem:[#allocation42_spill] sm:$0xff]  ;;  %v4713_v41 = vld [vmem:[#allocation36_spill] sm:$0xff] }
 0x164   : > { %v3459_v47 = vmax.f32 %v1370_v44, %v1371_v13  ;;  %v1373_v6 = vsel %vm1273_vm1, %v4707_v19, -inf  ;;  %v1374_v54 = vsel %vm1273_vm1, %v4708_v17, -inf  ;;  %v1376_v43 = vsel %vm1273_vm1, %v4709_v27, -inf  ;;  %v4714_v21 = vld [vmem:[#allocation43_spill] sm:$0xff]  ;;  %v4716_v44 = vld [vmem:[#allocation37_spill] sm:$0xff]  ;;  %v4717_v19 = vld [vmem:[#allocation44_spill] sm:$0xff] }
 0x165   : > { %v3467_v23 = vmax.f32 %v1373_v6, %v1374_v54  ;;  %v1377_v56 = vsel %vm1273_vm1, %v4710_v59, -inf  ;;  %v1379_v10 = vsel %vm1273_vm1, %v4711_v31, -inf  ;;  %v1380_v62 = vsel %vm1273_vm1, %v4712_v53, -inf  ;;  %v4718_v17 = vld [vmem:[#allocation38_spill] sm:$0xff] }
 0x166   : > { %v3475_v55 = vmax.f32 %v1376_v43, %v1377_v56  ;;  %v3477_v25 = vmax.f32 %v1379_v10, %v1380_v62  ;;  %v1382_v8 = vsel %vm1273_vm1, %v4713_v41, -inf  ;;  %v1383_v52 = vsel %vm1273_vm1, %v4714_v21, -inf  ;;  %v4720_v43 = vld [vmem:[#allocation45_spill] sm:$0xff]  ;;  %v4721_v56 = vld [vmem:[#allocation39_spill] sm:$0xff]  ;;  %v4722_v10 = vld [vmem:[#allocation46_spill] sm:$0xff] }
 0x167   : > { %v3483_v45 = vmax.f32 %v1382_v8, %v1383_v52  ;;  %v1385_v13 = vsel %vm1273_vm1, %v4716_v44, -inf  ;;  %v1386_v6 = vsel %vm1273_vm1, %v4717_v19, -inf  ;;  %v1388_v54 = vsel %vm1273_vm1, %v4718_v17, -inf  ;;  %v4725_v8 = vld [vmem:[#allocation47_spill] sm:$0xff]  ;;  %v4728_v19 = vld [vmem:[#allocation48_spill] sm:$0xff] }
 0x168   : > { %v3491_v27 = vmax.f32 %v1385_v13, %v1386_v6  ;;  %v1389_v59 = vsel %vm1273_vm1, %v4720_v43, -inf  ;;  %v1391_v31 = vsel %vm1273_vm1, %v4721_v56, -inf  ;;  %v1392_v53 = vsel %vm1273_vm1, %v4722_v10, -inf  ;;  %v4726_v52 = vld [vmem:[#allocation55_spill] sm:$0xff]  ;;  %v4729_v17 = vld [vmem:[#allocation56_spill] sm:$0xff]  ;;  %v4730_v56 = vld [vmem:[#allocation49_spill] sm:$0xff] }
 0x169   : > { %4715 = vst [vmem:[#allocation86_spill] sm:$0xff] %v3483_v45  ;;  %v3499_v62 = vmax.f32 %v1388_v54, %v1389_v59  ;;  %v3501_v41 = vmax.f32 %v1391_v31, %v1392_v53  ;;  %v1394_v21 = vsel %vm1273_vm1, %v4725_v8, -inf  ;;  %v1395_v44 = vsel %vm1273_vm1, %v4726_v52, -inf  ;;  %v4732_v31 = vld [vmem:[#allocation57_spill] sm:$0xff]  ;;  %v4733_v53 = vld [vmem:[#allocation50_spill] sm:$0xff] }
 0x16a   : > { %4719 = vst [vmem:[#allocation87_spill] sm:$0xff] %v3491_v27  ;;  %v3507_v13 = vmax.f32 %v1394_v21, %v1395_v44  ;;  %v1397_v6 = vsel %vm1273_vm1, %v4728_v19, -inf  ;;  %v1398_v43 = vsel %vm1273_vm1, %v4729_v17, -inf  ;;  %v1400_v54 = vsel %vm1273_vm1, %v4730_v56, -inf  ;;  %v4734_v52 = vld [vmem:[#allocation58_spill] sm:$0xff]  ;;  %v4740_v56 = vld [vmem:[#allocation52_spill] sm:$0xff] }
 0x16b   : > { %4723 = vst [vmem:[#allocation88_spill] sm:$0xff] %v3499_v62  ;;  %4724 = vst [vmem:[#allocation89_spill] sm:$0xff] %v3501_v41  ;;  %v3515_v59 = vmax.f32 %v1397_v6, %v1398_v43  ;;  %v1401_v10 = vsel %vm1273_vm1, %v4732_v31, -inf  ;;  %v1403_v8 = vsel %vm1273_vm1, %v4733_v53, -inf  ;;  %v1404_v21 = vsel %vm1273_vm1, %v4734_v52, -inf  ;;  %v4738_v41 = vld [vmem:[#allocation59_spill] sm:$0xff] }
 0x16c   : > { %4727 = vst [vmem:[#allocation90_spill] sm:$0xff] %v3507_v13  ;;  %v3523_v44 = vmax.f32 %v1400_v54, %v1401_v10  ;;  %v3525_v19 = vmax.f32 %v1403_v8, %v1404_v21  ;;  %v4737_v13 = vld [vmem:[#allocation51_spill] sm:$0xff]  ;;  %v1407_v6 = vsel %vm1273_vm1, %v4738_v41, -inf  ;;  %v1409_v31 = vsel %vm1273_vm1, %v4740_v56, -inf  ;;  %v4742_v62 = vld [vmem:[#allocation53_spill] sm:$0xff]  ;;  %v4746_v41 = vld [vmem:[#allocation62_spill] sm:$0xff] }
 0x16d   : > { %4731 = vst [vmem:[#allocation91_spill] sm:$0xff] %v3515_v59  ;;  %v1406_v17 = vsel %vm1273_vm1, %v4737_v13, -inf  ;;  %v4741_v59 = vld [vmem:[#allocation60_spill] sm:$0xff]  ;;  %v1412_v54 = vsel %vm1273_vm1, %v4742_v62, -inf  ;;  %v4744_v8 = vld [vmem:[#allocation61_spill] sm:$0xff]  ;;  %v4745_v13 = vld [vmem:[#allocation54_spill] sm:$0xff] }
 0x16e   : > { %4735 = vst [vmem:[#allocation92_spill] sm:$0xff] %v3523_v44  ;;  %4736 = vst [vmem:[#allocation2_spill] sm:$0xff] %v3525_v19  ;;  %v3531_v43 = vmax.f32 %v1406_v17, %v1407_v6  ;;  %v1410_v53 = vsel %vm1273_vm1, %v4741_v59, -inf  ;;  %v1413_v52 = vsel %vm1273_vm1, %v4744_v8, -inf  ;;  %v1415_v21 = vsel %vm1273_vm1, %v4745_v13, -inf  ;;  %v4750_v19 = vld [vmem:[#allocation71_spill] sm:$0xff] }
 0x16f   : > { %v3539_v10 = vmax.f32 %v1409_v31, %v1410_v53  ;;  %v1416_v17 = vsel %vm1273_vm1, %v4746_v41, -inf  ;;  %v3547_v6 = vmax.f32 %v1412_v54, %v1413_v52  ;;  %v1419_v62 = vsel %vm1273_vm1, %v4750_v19, -inf  ;;  %v4752_v53 = vld [vmem:[#allocation64_spill] sm:$0xff]  ;;  %v4754_v44 = vld [vmem:[#allocation65_spill] sm:$0xff]  ;;  %v4758_v19 = vld [vmem:[#allocation74_spill] sm:$0xff] }
 0x170   : > { %4739 = vst [vmem:[#allocation93_spill] sm:$0xff] %v3531_v43  ;;  %v3549_v56 = vmax.f32 %v1415_v21, %v1416_v17  ;;  %v4749_v43 = vld [vmem:[#allocation63_spill] sm:$0xff]  ;;  %v1421_v8 = vsel %vm1273_vm1, %v4752_v53, -inf  ;;  %v1424_v54 = vsel %vm1273_vm1, %v4754_v44, -inf  ;;  %v4756_v21 = vld [vmem:[#allocation73_spill] sm:$0xff] }
 0x171   : > { %4743 = vst [vmem:[#allocation3_spill] sm:$0xff] %v3539_v10  ;;  %4747 = vst [vmem:[#allocation94_spill] sm:$0xff] %v3547_v6  ;;  %v1418_v59 = vsel %vm1273_vm1, %v4749_v43, -inf  ;;  %v4753_v10 = vld [vmem:[#allocation72_spill] sm:$0xff]  ;;  %v1425_v41 = vsel %vm1273_vm1, %v4756_v21, -inf  ;;  %v4757_v43 = vld [vmem:[#allocation66_spill] sm:$0xff] }
 0x172   : > { %4748 = vst [vmem:[#allocation4_spill] sm:$0xff] %v3549_v56  ;;  %v3555_v31 = vmax.f32 %v1418_v59, %v1419_v62  ;;  %v1422_v13 = vsel %vm1273_vm1, %v4753_v10, -inf  ;;  %v1427_v17 = vsel %vm1273_vm1, %v4757_v43, -inf  ;;  %v1428_v59 = vsel %vm1273_vm1, %v4758_v19, -inf  ;;  %v4760_v56 = vld [vmem:[#allocation75_spill] sm:$0xff]  ;;  %v4763_v6 = vld [vmem:[#allocation69_spill] sm:$0xff] }
 0x173   : > { %v3563_v52 = vmax.f32 %v1421_v8, %v1422_v13  ;;  %v3571_v62 = vmax.f32 %v1424_v54, %v1425_v41  ;;  %v3573_v53 = vmax.f32 %v1427_v17, %v1428_v59  ;;  %v1431_v44 = vsel %vm1273_vm1, %v4760_v56, -inf  ;;  %v4761_v13 = vld [vmem:[#allocation68_spill] sm:$0xff]  ;;  %v4765_v17 = vld [vmem:[#allocation77_spill] sm:$0xff]  ;;  %v4767_v56 = vld [vmem:[#allocation78_spill] sm:$0xff] }
 0x174   : > { %4751 = vst [vmem:[#allocation95_spill] sm:$0xff] %v3555_v31  ;;  %v4759_v31 = vld [vmem:[#allocation67_spill] sm:$0xff]  ;;  %v1433_v21 = vsel %vm1273_vm1, %v4761_v13, -inf  ;;  %v1436_v54 = vsel %vm1273_vm1, %v4763_v6, -inf  ;;  %v1437_v19 = vsel %vm1273_vm1, %v4765_v17, -inf  ;;  %v1443_v6 = vsel %vm1273_vm1, %v3247_v61, -inf }
 0x175   : > { %4755 = vst [vmem:[#allocation5_spill] sm:$0xff] %v3563_v52  ;;  %v1430_v10 = vsel %vm1273_vm1, %v4759_v31, -inf  ;;  %v4762_v52 = vld [vmem:[#allocation76_spill] sm:$0xff]  ;;  %v4766_v31 = vld [vmem:[#allocation70_spill] sm:$0xff]  ;;  %v1452_v61 = vsel %vm1273_vm1, %v3253_v28, -inf }
 0x176   : > { %v3579_v8 = vmax.f32 %v1430_v10, %v1431_v44  ;;  %v1434_v43 = vsel %vm1273_vm1, %v4762_v52, -inf  ;;  %v1439_v59 = vsel %vm1273_vm1, %v4766_v31, -inf  ;;  %v1440_v10 = vsel %vm1273_vm1, %v4767_v56, -inf }
 0x177   : > { %v3587_v41 = vmax.f32 %v1433_v21, %v1434_v43  ;;  %v3595_v44 = vmax.f32 %v1436_v54, %v1437_v19  ;;  %v3597_v13 = vmax.f32 %v1439_v59, %v1440_v10  ;;  %v1442_v52 = vsel %vm1273_vm1, %v3207_v39, -inf  ;;  %v4768_v43 = vld [vmem:[#allocation79_spill] sm:$0xff]  ;;  %v4771_v39 = vld [vmem:[#allocation81_spill] sm:$0xff] }
 0x178   : > { %v3603_v21 = vmax.f32 %v1442_v52, %v1443_v6  ;;  %v1445_v17 = vsel %vm1273_vm1, %v4768_v43, -inf  ;;  %v1446_v31 = vsel %vm1273_vm1, %v3249_v42, -inf  ;;  %v1449_v59 = vsel %vm1273_vm1, %v3251_v46, -inf  ;;  %v4772_v6 = vld [vmem:[#allocation82_spill] sm:$0xff]  ;;  %v4783_v45 = vld [vmem:[#allocation93_spill] sm:$0xff] }
 0x179   : > { %4764 = vst [vmem:[#allocation96_spill] sm:$0xff] %v3587_v41  ;;  %v4769_v41 = vld [vmem:[#allocation80_spill] sm:$0xff]  ;;  %v3611_v19 = vmax.f32 %v1445_v17, %v1446_v31  ;;  %v1451_v56 = vsel %vm1273_vm1, %v4771_v39, -inf  ;;  %v1454_v42 = vsel %vm1273_vm1, %v4772_v6, -inf  ;;  %v4773_v17 = vld [vmem:[#allocation83_spill] sm:$0xff]  ;;  %v1458_v31 = vsel %vm1273_vm1, %v3267_v3, -inf }
 0x17a   : > { %v1448_v54 = vsel %vm1273_vm1, %v4769_v41, -inf  ;;  %v3621_v52 = vmax.f32 %v1451_v56, %v1452_v61  ;;  %v1455_v41 = vsel %vm1273_vm1, %v3255_v58, -inf  ;;  %v1457_v46 = vsel %vm1273_vm1, %v4773_v17, -inf  ;;  %v4774_v39 = vld [vmem:[#allocation84_spill] sm:$0xff]  ;;  %v4775_v56 = vld [vmem:[#allocation85_spill] sm:$0xff]  ;;  %v4782_v3 = vld [vmem:[#allocation2_spill] sm:$0xff] }
 0x17b   : > { %4770 = vst [vmem:[#allocation6_spill] sm:$0xff] %v3611_v19  ;;  %v3619_v10 = vmax.f32 %v1448_v54, %v1449_v59  ;;  %v3627_v43 = vmax.f32 %v1454_v42, %v1455_v41  ;;  %v1460_v28 = vsel %vm1273_vm1, %v4774_v39, -inf  ;;  %v3635_v54 = vmax.f32 %v1457_v46, %v1458_v31  ;;  %v4781_v41 = vld [vmem:[#allocation92_spill] sm:$0xff] }
 0x17c   : > { %v1461_v59 = vsel %vm1273_vm1, %v3269_v38, -inf  ;;  %v1463_v61 = vsel %vm1273_vm1, %v4775_v56, -inf  ;;  %v1464_v58 = vsel %vm1273_vm1, %v3271_v20, -inf  ;;  %v4785_v20 = vld [vmem:[#allocation94_spill] sm:$0xff]  ;;  %v4786_v46 = vld [vmem:[#allocation4_spill] sm:$0xff]  ;;  %v4787_v38 = vld [vmem:[#allocation95_spill] sm:$0xff]  ;;  %v4791_v56 = vpack.c.bf16 %v3275_v51, %v3275_v51 }
 0x17d   : > { %v3643_v6 = vmax.f32 %v1460_v28, %v1461_v59  ;;  %v3645_v42 = vmax.f32 %v1463_v61, %v1464_v58  ;;  %v4788_v17 = vld [vmem:[#allocation5_spill] sm:$0xff]  ;;  %v4790_v28 = vpack.c.bf16 %v3273_v50, %v3273_v50  ;;  %v4792_v61 = vpack.c.bf16 %v3283_v48, %v3283_v48 }
 0x17e   : > { %v3783_v59 = vunpack.c.l.b16 %v4791_v56  ;;  %v4793_v31 = vpack.c.bf16 %v3285_v29, %v3285_v29  ;;  %v4794_v50 = vpack.c.bf16 %v3291_v57, %v3291_v57  ;;  %v4795_v51 = vpack.c.bf16 %v3299_v35, %v3299_v35 }
 0x17f   : > { %4776 = vst [vmem:[#allocation7_spill] sm:$0xff] %v3643_v6  ;;  %v3778_v19 = vunpack.c.l.b16 %v4790_v28  ;;  %v3788_v58 = vunpack.c.l.b16 %v4792_v61  ;;  %v4796_v48 = vpack.c.bf16 %v3307_v37, %v3307_v37  ;;  %v4797_v29 = vpack.c.bf16 %v3309_v5, %v3309_v5 }
 0x180   : > { %v4789_v27 = vld [vmem:[#allocation96_spill] sm:$0xff]  ;;  %v3793_v6 = vunpack.c.l.b16 %v4793_v31  ;;  %v3798_v28 = vunpack.c.l.b16 %v4794_v50  ;;  %v3803_v56 = vunpack.c.l.b16 %v4795_v51  ;;  %v4799_v57 = vpack.c.bf16 %v3315_v15, %v3315_v15 }
 0x181   : > { %v3808_v61 = vunpack.c.l.b16 %v4796_v48  ;;  %v3813_v31 = vunpack.c.l.b16 %v4797_v29  ;;  %v4800_v35 = vpack.c.bf16 %v3323_v22, %v3323_v22  ;;  %v4801_v37 = vpack.c.bf16 %v3331_v7, %v3331_v7 }
 0x182   : > { %v3818_v50 = vunpack.c.l.b16 %v4799_v57  ;;  %v4802_v5 = vpack.c.bf16 %v3333_v2, %v3333_v2  ;;  %v4803_v15 = vpack.c.bf16 %v3339_v63, %v3339_v63  ;;  %v4804_v22 = vpack.c.bf16 %v3347_v34, %v3347_v34 }
 0x183   : > { %4798 = vst [vmem:[#allocation8_spill] sm:$0xff] %v3813_v31  ;;  %v3823_v51 = vunpack.c.l.b16 %v4800_v35  ;;  %v3828_v48 = vunpack.c.l.b16 %v4801_v37  ;;  %v4805_v7 = vpack.c.bf16 %v3355_v0, %v3355_v0  ;;  %v4806_v2 = vpack.c.bf16 %v3357_v49, %v3357_v49 }
 0x184   : > { %v3833_v29 = vunpack.c.l.b16 %v4802_v5  ;;  %v3838_v57 = vunpack.c.l.b16 %v4803_v15  ;;  %v3843_v35 = vunpack.c.l.b16 %v4804_v22  ;;  %v4807_v63 = vpack.c.bf16 %v3363_v24, %v3363_v24 }
 0x185   : > { %v3848_v37 = vunpack.c.l.b16 %v4805_v7  ;;  %v3853_v5 = vunpack.c.l.b16 %v4806_v2  ;;  %v4808_v39 = vpack.c.bf16 %v3371_v11, %v3371_v11  ;;  %v4809_v22 = vpack.c.bf16 %v3379_v30, %v3379_v30 }
 0x186   : > { %v1738_v15 = vunpack.c.l.b16 %v4807_v63  ;;  %v4810_v0 = vpack.c.bf16 %v3381_v12, %v3381_v12  ;;  %v4811_v49 = vpack.c.bf16 %v3387_v18, %v3387_v18  ;;  %v4812_v24 = vpack.c.bf16 %v3395_v4, %v3395_v4 }
 0x187   : > { %v1739_v34 = vunpack.c.l.b16 %v4808_v39  ;;  %v3864_v31 = vunpack.c.l.b16 %v4809_v22  ;;  %v4813_v30 = vpack.c.bf16 %v3403_v1, %v3403_v1  ;;  %v4814_v12 = vpack.c.bf16 %v3405_v33, %v3405_v33 }
 0x188   : > { %v3869_v7 = vunpack.c.l.b16 %v4810_v0  ;;  %v3874_v2 = vunpack.c.l.b16 %v4811_v49  ;;  %v3879_v11 = vunpack.c.l.b16 %v4812_v24  ;;  %v4816_v18 = vpack.c.bf16 %v3411_v9, %v3411_v9 }
 0x189   : > { %v3884_v39 = vunpack.c.l.b16 %v4813_v30  ;;  %v3889_v63 = vunpack.c.l.b16 %v4814_v12  ;;  %v4817_v0 = vpack.c.bf16 %v3419_v16, %v3419_v16  ;;  %v4818_v49 = vpack.c.bf16 %v3427_v60, %v3427_v60 }
 0x18a   : > { %v1746_v22 = vunpack.c.l.b16 %v4816_v18  ;;  %v4819_v1 = vpack.c.bf16 %v3429_v26, %v3429_v26  ;;  %v4820_v33 = vpack.c.bf16 %v3435_v40, %v3435_v40  ;;  %v4821_v9 = vpack.c.bf16 %v3443_v36, %v3443_v36 }
 0x18b   : > { %4815 = vst [vmem:[#allocation9_spill] sm:$0xff] %v3889_v63  ;;  %v1747_v4 = vunpack.c.l.b16 %v4817_v0  ;;  %v1748_v24 = vunpack.c.l.b16 %v4818_v49  ;;  %v4822_v16 = vpack.c.bf16 %v3451_v32, %v3451_v32  ;;  %v4823_v60 = vpack.c.bf16 %v3453_v14, %v3453_v14 }
 0x18c   : > { %v1749_v30 = vunpack.c.l.b16 %v4819_v1  ;;  %v1750_v12 = vunpack.c.l.b16 %v4820_v33  ;;  %v3909_v18 = vunpack.c.l.b16 %v4821_v9  ;;  %v4825_v26 = vpack.c.bf16 %v3459_v47, %v3459_v47 }
 0x18d   : > { %v3914_v0 = vunpack.c.l.b16 %v4822_v16  ;;  %v3919_v49 = vunpack.c.l.b16 %v4823_v60  ;;  %v4826_v36 = vpack.c.bf16 %v3467_v23, %v3467_v23  ;;  %v4827_v32 = vpack.c.bf16 %v3475_v55, %v3475_v55  ;;  %v4831_v16 = vld [vmem:[#allocation86_spill] sm:$0xff] }
 0x18e   : > { %v3924_v40 = vunpack.c.l.b16 %v4825_v26  ;;  %v4829_v14 = vpack.c.bf16 %v3477_v25, %v3477_v25  ;;  %v4832_v47 = vpack.c.bf16 %v4831_v16, %v4831_v16  ;;  %v4834_v26 = vld [vmem:[#allocation87_spill] sm:$0xff] }
 0x18f   : > { %4824 = vst [vmem:[#allocation15_spill] sm:$0xff] %v3919_v49  ;;  %v3929_v1 = vunpack.c.l.b16 %v4826_v36  ;;  %v3934_v33 = vunpack.c.l.b16 %v4827_v32  ;;  %v4835_v23 = vpack.c.bf16 %v4834_v26, %v4834_v26  ;;  %v4837_v49 = vld [vmem:[#allocation88_spill] sm:$0xff] }
 0x190   : > { %v3939_v9 = vunpack.c.l.b16 %v4829_v14  ;;  %v3944_v60 = vunpack.c.l.b16 %v4832_v47  ;;  %v4838_v55 = vpack.c.bf16 %v4837_v49, %v4837_v49  ;;  %v4847_v49 = vpack.c.bf16 %v4782_v3, %v4782_v3 }
 0x191   : > { %4828 = vst [vmem:[#allocation10_spill] sm:$0xff] %v3934_v33  ;;  %v3949_v36 = vunpack.c.l.b16 %v4835_v23  ;;  %v4839_v33 = vld [vmem:[#allocation89_spill] sm:$0xff]  ;;  %v4846_v23 = vpack.c.bf16 %v4781_v41, %v4781_v41  ;;  %v4852_v3 = vpack.c.bf16 %v4786_v46, %v4786_v46  ;;  %v4858_v46 = vpack.c.bf16 %v3579_v8, %v3579_v8 }
 0x192   : > { %4830 = vst [vmem:[#allocation16_spill] sm:$0xff] %v3939_v9  ;;  %4833 = vst [vmem:[#allocation11_spill] sm:$0xff] %v3944_v60  ;;  %v3954_v32 = vunpack.c.l.b16 %v4838_v55  ;;  %v4840_v25 = vpack.c.bf16 %v4839_v33, %v4839_v33  ;;  %v4842_v9 = vld [vmem:[#allocation90_spill] sm:$0xff]  ;;  %v4844_v60 = vld [vmem:[#allocation91_spill] sm:$0xff]  ;;  %v3973_v55 = vunpack.c.l.b16 %v4847_v49  ;;  %v4848_v33 = vpack.c.bf16 %v4783_v45, %v4783_v45 }
 0x193   : > { %4836 = vst [vmem:[#allocation17_spill] sm:$0xff] %v3949_v36  ;;  %v4843_v16 = vpack.c.bf16 %v4842_v9, %v4842_v9  ;;  %v4845_v63 = vpack.c.bf16 %v4844_v60, %v4844_v60  ;;  %v1764_v36 = vunpack.c.l.b16 %v4846_v23  ;;  %v4849_v9 = vld [vmem:[#allocation3_spill] sm:$0xff]  ;;  %v3993_v60 = vunpack.c.l.b16 %v4852_v3 }
 0x194   : > { %v3959_v14 = vunpack.c.l.b16 %v4840_v25  ;;  %v3978_v25 = vunpack.c.l.b16 %v4848_v33  ;;  %v4854_v45 = vpack.c.bf16 %v4787_v38, %v4787_v38  ;;  %v4855_v49 = vpack.c.bf16 %v4788_v17, %v4788_v17 }
 0x195   : > { %v1762_v47 = vunpack.c.l.b16 %v4843_v16  ;;  %v1763_v26 = vunpack.c.l.b16 %v4845_v63  ;;  %v4850_v16 = vpack.c.bf16 %v4849_v9, %v4849_v9  ;;  %v4851_v63 = vpack.c.bf16 %v4785_v20, %v4785_v20  ;;  %4853 = vst [vmem:[#allocation18_spill] sm:$0xff] %v3993_v60 }
 0x196   : > { %4841 = vst [vmem:[#allocation12_spill] sm:$0xff] %v3959_v14  ;;  %v1770_v23 = vunpack.c.l.b16 %v4854_v45  ;;  %v1771_v33 = vunpack.c.l.b16 %v4855_v49  ;;  %v4856_v9 = vpack.c.bf16 %v3571_v62, %v3571_v62  ;;  %v4857_v20 = vpack.c.bf16 %v3573_v53, %v3573_v53 }
 0x197   : > { %v3983_v14 = vunpack.c.l.b16 %v4850_v16  ;;  %v3988_v41 = vunpack.c.l.b16 %v4851_v63  ;;  %v4010_v3 = vunpack.c.l.b16 %v4858_v46  ;;  %v4859_v38 = vpack.c.bf16 %v4789_v27, %v4789_v27 }
 0x198   : > { %v1772_v16 = vunpack.c.l.b16 %v4856_v9  ;;  %v1773_v63 = vunpack.c.l.b16 %v4857_v20  ;;  %v4860_v17 = vpack.c.bf16 %v3595_v44, %v3595_v44  ;;  %v4861_v62 = vpack.c.bf16 %v3597_v13, %v3597_v13  ;;  %v4864_v20 = vld [vmem:[#allocation6_spill] sm:$0xff] }
 0x199   : > { %v4015_v45 = vunpack.c.l.b16 %v4859_v38  ;;  %v4863_v8 = vpack.c.bf16 %v3603_v21, %v3603_v21  ;;  %v4865_v46 = vpack.c.bf16 %v4864_v20, %v4864_v20  ;;  %v4866_v38 = vpack.c.bf16 %v3619_v10, %v3619_v10 }
 0x19a   : > { %v4020_v49 = vunpack.c.l.b16 %v4860_v17  ;;  %v4025_v53 = vunpack.c.l.b16 %v4861_v62  ;;  %v4867_v44 = vpack.c.bf16 %v3621_v52, %v3621_v52  ;;  %v4868_v13 = vpack.c.bf16 %v3627_v43, %v3627_v43 }
 0x19b   : > { %v1778_v9 = vunpack.c.l.b16 %v4863_v8  ;;  %v1779_v27 = vunpack.c.l.b16 %v4865_v46  ;;  %v1780_v60 = vunpack.c.l.b16 %v4866_v38  ;;  %v4869_v21 = vpack.c.bf16 %v3635_v54, %v3635_v54 }
 0x19c   : > { %4862 = vst [vmem:[#allocation13_spill] sm:$0xff] %v4025_v53  ;;  %v1781_v17 = vunpack.c.l.b16 %v4867_v44  ;;  %v1782_v62 = vunpack.c.l.b16 %v4868_v13  ;;  %v4870_v53 = vld [vmem:[#allocation7_spill] sm:$0xff]  ;;  %v4872_v10 = vpack.c.bf16 %v3645_v42, %v3645_v42  ;;  %v1787_v52 = vsel %vm1786_vm2, %v3783_v59, %v3778_v19 }
 0x19d   : > { %v1783_v8 = vunpack.c.l.b16 %v4869_v21  ;;  %v4871_v20 = vpack.c.bf16 %v4870_v53, %v4870_v53  ;;  %v1789_v43 = vsel %vm1788_vm3, %v3788_v58, %v1787_v52  ;;  %v1800_v54 = vsel %vm1786_vm2, %v3823_v51, %v3818_v50 }
 0x19e   : > { %v4053_v38 = vunpack.c.l.b16 %v4872_v10  ;;  %v1791_v42 = vsel %vm1790_vm4, %v3793_v6, %v1789_v43  ;;  %v1801_v53 = vsel %vm1788_vm3, %v3828_v48, %v1800_v54  ;;  %v1807_v19 = vsel %vm1786_vm2, %v1739_v34, %v1738_v15 }
 0x19f   : > { %v4048_v46 = vunpack.c.l.b16 %v4871_v20  ;;  %v1814_v59 = vsel %vm1786_vm2, %v1747_v4, %v1746_v22  ;;  %v1793_v44 = vsel %vm1792_vm5, %v3798_v28, %v1791_v42  ;;  %v1802_v58 = vsel %vm1790_vm4, %v3833_v29, %v1801_v53 }
 0x1a0   : > { %v1808_v13 = vsel %vm1788_vm3, %v3864_v31, %v1807_v19  ;;  %v1815_v50 = vsel %vm1788_vm3, %v1748_v24, %v1814_v59  ;;  %v1795_v6 = vsel %vm1794_vm6, %v3803_v56, %v1793_v44  ;;  %v1803_v51 = vsel %vm1792_vm5, %v3838_v57, %v1802_v58  ;;  %v4873_v56 = vld [vmem:[#allocation8_spill] sm:$0xff] }
 0x1a1   : > { %v1809_v48 = vsel %vm1790_vm4, %v3869_v7, %v1808_v13  ;;  %v1816_v15 = vsel %vm1790_vm4, %v1749_v30, %v1815_v50  ;;  %v1797_v28 = vsel %vm1796_vm7, %v3808_v61, %v1795_v6  ;;  %v1804_v29 = vsel %vm1794_vm6, %v3843_v35, %v1803_v51 }
 0x1a2   : > { %v1810_v31 = vsel %vm1792_vm5, %v3874_v2, %v1809_v48  ;;  %v1817_v34 = vsel %vm1792_vm5, %v1750_v12, %v1816_v15  ;;  %v1799_v22 = vsel %vm1798_vm8, %v4873_v56, %v1797_v28  ;;  %v1805_v57 = vsel %vm1796_vm7, %v3848_v37, %v1804_v29  ;;  %v4874_v37 = vld [vmem:[#allocation9_spill] sm:$0xff] }
 0x1a3   : > { %v1811_v7 = vsel %vm1794_vm6, %v3879_v11, %v1810_v31  ;;  %v1818_v61 = vsel %vm1794_vm6, %v3909_v18, %v1817_v34  ;;  %v1806_v35 = vsel %vm1798_vm8, %v3853_v5, %v1805_v57  ;;  %v1821_v24 = vsel %vm1786_vm2, %v3929_v1, %v3924_v40  ;;  %v4875_v11 = vld [vmem:[#allocation15_spill] sm:$0xff]  ;;  %v4876_v18 = vld [vmem:[#allocation10_spill] sm:$0xff] }
 0x1a4   : > { %v1812_v2 = vsel %vm1796_vm7, %v3884_v39, %v1811_v7  ;;  %v1819_v4 = vsel %vm1796_vm7, %v3914_v0, %v1818_v61  ;;  %v1822_v5 = vsel %vm1788_vm3, %v4876_v18, %v1821_v24  ;;  %v1828_v21 = vsel %vm1786_vm2, %v1763_v26, %v1762_v47  ;;  %v4877_v39 = vld [vmem:[#allocation16_spill] sm:$0xff]  ;;  %v4878_v1 = vld [vmem:[#allocation11_spill] sm:$0xff]  ;;  %v4879_v47 = vld [vmem:[#allocation17_spill] sm:$0xff] }
 0x1a5   : > { %v1813_v30 = vsel %vm1798_vm8, %v4874_v37, %v1812_v2  ;;  %v1820_v12 = vsel %vm1798_vm8, %v4875_v11, %v1819_v4  ;;  %v1823_v20 = vsel %vm1790_vm4, %v4877_v39, %v1822_v5  ;;  %v1829_v0 = vsel %vm1788_vm3, %v1764_v36, %v1828_v21 }
 0x1a6   : > { %v1835_v10 = vsel %vm1786_vm2, %v1771_v33, %v1770_v23  ;;  %v1842_v40 = vsel %vm1786_vm2, %v1779_v27, %v1778_v9  ;;  %v1824_v52 = vsel %vm1792_vm5, %v4878_v1, %v1823_v20  ;;  %v1830_v43 = vsel %vm1790_vm4, %v3973_v55, %v1829_v0  ;;  %v4880_v27 = vld [vmem:[#allocation12_spill] sm:$0xff] }
 0x1a7   : > { %v1836_v54 = vsel %vm1788_vm3, %v1772_v16, %v1835_v10  ;;  %v1843_v42 = vsel %vm1788_vm3, %v1780_v60, %v1842_v40  ;;  %v1825_v26 = vsel %vm1794_vm6, %v4879_v47, %v1824_v52  ;;  %v1831_v36 = vsel %vm1792_vm5, %v3978_v25, %v1830_v43 }
 0x1a8   : > { %v1837_v23 = vsel %vm1790_vm4, %v1773_v63, %v1836_v54  ;;  %v1844_v33 = vsel %vm1790_vm4, %v1781_v17, %v1843_v42  ;;  %v1826_v9 = vsel %vm1796_vm7, %v3954_v32, %v1825_v26  ;;  %v1832_v55 = vsel %vm1794_vm6, %v3983_v14, %v1831_v36  ;;  %v4881_v32 = vld [vmem:[#allocation18_spill] sm:$0xff] }
 0x1a9   : > { %v1838_v60 = vsel %vm1792_vm5, %v4010_v3, %v1837_v23  ;;  %v1845_v16 = vsel %vm1792_vm5, %v1782_v62, %v1844_v33  ;;  %v1827_v53 = vsel %vm1798_vm8, %v4880_v27, %v1826_v9  ;;  %v1833_v25 = vsel %vm1796_vm7, %v3988_v41, %v1832_v55  ;;  %v4882_v41 = vld [vmem:[#allocation13_spill] sm:$0xff] }
 0x1aa   : > { %v1839_v63 = vsel %vm1794_vm6, %v4015_v45, %v1838_v60  ;;  %v1846_v17 = vsel %vm1794_vm6, %v1783_v8, %v1845_v16  ;;  %v1834_v19 = vsel %vm1798_vm8, %v4881_v32, %v1833_v25  ;;  %v1849_v62 = vpack.c.b16 %v1799_v22, %v1799_v22 }
 0x1ab   : > { %v1840_v14 = vsel %vm1796_vm7, %v4020_v49, %v1839_v63  ;;  %v1847_v3 = vsel %vm1796_vm7, %v4048_v46, %v1846_v17  ;;  %v1850_v8 = vpack.c.b16 %v1806_v35, %v1806_v35  ;;  %v1851_v44 = vpack.c.b16 %v1813_v30, %v1813_v30 }
 0x1ac   : > { %v1841_v59 = vsel %vm1798_vm8, %v4882_v41, %v1840_v14  ;;  %v1848_v45 = vsel %vm1798_vm8, %v4053_v38, %v1847_v3  ;;  %v1852_v58 = vpack.c.b16 %v1820_v12, %v1820_v12  ;;  %v1853_v13 = vpack.c.b16 %v1827_v53, %v1827_v53  ;;  %1866 = vst.msk [vmem:[%s118_s16] sm:$0xf] %vm1865_vm9, %v1849_v62 }
 0x1ad   : > { %v1854_v50 = vpack.c.b16 %v1834_v19, %v1834_v19  ;;  %v1855_v49 = vpack.c.b16 %v1841_v59, %v1841_v59  ;;  %v1856_v6 = vpack.c.b16 %v1848_v45, %v1848_v45  ;;  %1867 = vst.msk [vmem:[%s118_s16 + $0x4] sm:$0xf] %vm1865_vm9, %v1850_v8  ;;  %1868 = vst.msk [vmem:[%s118_s16 + $0x8] sm:$0xf] %vm1865_vm9, %v1851_v44 }
 0x1ae   : > { %1869 = vst.msk [vmem:[%s118_s16 + $0xc] sm:$0xf] %vm1865_vm9, %v1852_v58  ;;  %1870 = vst.msk [vmem:[%s118_s16 + $0x10] sm:$0xf] %vm1865_vm9, %v1853_v13 }
 0x1af   : > { %1871 = vst.msk [vmem:[%s118_s16 + $0x14] sm:$0xf] %vm1865_vm9, %v1854_v50  ;;  %1872 = vst.msk [vmem:[%s118_s16 + $0x18] sm:$0xf] %vm1865_vm9, %v1855_v49 }
 0x1b0   : > { %1873 = vst.msk [vmem:[%s118_s16 + $0x1c] sm:$0xf] %vm1865_vm9, %v1856_v6 }
 0x1b1 PF: > { %s11_s6 = sadd.s32 1, %s2083_s6  }
 0x1b2   : > { %p8_p4 = scmp.ge.s32.totalorder %s11_s6, 4  }
 0x1b4   :  { %10 = sbr.rel (!%p8_p4) target bundleno = 1 (0x1), region = 54 }

// kernel: dann_forward.6
= control target key start
LH: loop header
LB: loop body
LE: loop exit
PB: predicated region body
PF: predicated region fallthrough
CT: control target
= control target key end

     0   :  { %s1699_s12 = smov 0   ;;  %s2055_s0 = inlined_call_operand.vmem [shape: bf16[20,10,8], index: 0, kind: input, shape index: {}]   ;;  %s2056_s1 = inlined_call_operand.vmem [shape: bf16[9,8,16], index: 1, kind: input, shape index: {}]   ;;  %s2057_s2 = inlined_call_operand.vmem [shape: f32[1,16], index: 2, kind: input, shape index: {}]   ;;  %s2058_s3 = inlined_call_operand.vmem [shape: bf16[128,16], index: 3, kind: output, shape index: {}]  }
   0x1 LB: > { %s1341_s13 = sadd.s32 4294967295, %s1677_s12   ;;  %p1345_p0 = scmp.ge.s32.totalorder %s1677_s12, 1  ;;  %s1677_s12 = sphi %s1699_s12, %s13_s12  }
   0x2   : > { %p139_p1 = scmp.lt.s32.totalorder %s1677_s12, 3 }
   0x4   : > { %p140_p2 = pnand %p1345_p0, %p139_p1 }
   0x5   : > { %v199_v0 = vld [vmem:[%s2056_s1 + $0x4] sm:$0xf] (!%p140_p2)  ;;  %vm347_vm0 = vcmask (!%p140_p2), 1043456   ;;  %v1713_v1 = vld [vmem:[%s2056_s1 + $0x10] sm:$0xf] (!%p140_p2)  ;;  %s164_s18 = smul.u32 (!%p140_p2), 10, %s1341_s13 }
   0x6   : > { %143 = sbr.rel (%p140_p2) target bundleno = 328 (0x148), region = 32  ;;  %1644 = vmatprep.subr.msk.bf16.mxu1 (!%p140_p2), %vm347_vm0, %v199_v0  ;;  %1648 = vmatprep.subr.msk.bf16.mxu0 (!%p140_p2), %vm347_vm0, %v1713_v1  ;;  %v349_v2 = vsel (!%p140_p2), %vm347_vm0, %v199_v0, 0  ;;  %v1723_v3 = vsel (!%p140_p2), %vm347_vm0, %v1713_v1, 0  ;;  %v198_v4 = vld [vmem:[%s2056_s1] sm:$0xf] (!%p140_p2)  ;;  %vm334_vm3 = vcmask (!%p140_p2), 64512  }
   0x7   : > { %1489 = vmatpush3.bf16.msra.mxu1 (!%p140_p2), %v349_v2  ;;  %1529 = vmatpush3.bf16.msra.mxu0 (!%p140_p2), %v1723_v3  ;;  %p165_p3 = scmp.lt.s32.totalorder (!%p140_p2), %s164_s18, 19  ;;  %v203_v5 = vld [vmem:[%s2056_s1 + $0x14] sm:$0xf] (!%p140_p2)  ;;  %vm207_vm1 = vsmask.f32 (!%p140_p2), 3328  ;;  %v1761_v17 = vsel (!%p140_p2), %vm347_vm0, %v198_v4, 0 }
   0x8   : > { %1645 = vmatprep.subr.msk.bf16.mxu1 (!%p140_p2), %vm347_vm0, %v198_v4  ;;  %1650 = vmatprep.subr.msk.bf16.mxu0 (!%p140_p2), %vm347_vm0, %v203_v5  ;;  %vm208_vm2 = vsmask.f32 (!%p140_p2), 7440  ;;  %v1764_v18 = vsel (!%p140_p2), %vm347_vm0, %v203_v5, 0  ;;  %vm524_vm5 = vcmask (!%p140_p2), 1042432   ;;  %vm525_vm6 = vcmask (!%p140_p2), 1046532   ;;  %s1348_s10 = sshll.u32 (!%p140_p2), %s1341_s13, 3 }
   0x9   : > { %vm1780_vm4 = vmor (!%p140_p2), %vm207_vm1, %vm208_vm2  ;;  %p172_p4 = scmp.lt.s32.totalorder (!%p140_p2), %s1348_s10, 15  ;;  %vm1276_vm8 = vcmask (!%p140_p2), 125952  }
   0xa   : > { %vm1851_vm7 = vmor (!%p140_p2), %vm524_vm5, %vm525_vm6 }
   0xd   : > { %s2064_s18 = smov (!%p165_p3, %s164_s18), 19  ;;  %s2066_s10 = smov (!%p172_p4, %s1348_s10), 15 }
   0xe   : > { %s1434_s23 = sshll.u32 %s2064_s18, 3  ;;  %s1349_s15 = sshll.u32 %s2066_s10, 2 }
   0xf   : > { %s1737_s26 = scalar_lea.vmem %s2055_s0, %s1434_s23  ;;  %s2034_s17 = scalar_lea.vmem %s2058_s3, %s1349_s15 }
  0x10   : > { %v1740_v6 = vld [vmem:[%s1737_s26] sm:$0xf]  ;;  %v1743_v7 = vld [vmem:[%s1737_s26 + $0x4] sm:$0x1]  ;;  %v1746_v8 = vld [vmem:[%s1737_s26 + $0x8] sm:$0xf] }
  0x11   : > { %v1749_v9 = vld [vmem:[%s1737_s26 + $0xc] sm:$0x1]  ;;  %v211_v10 = vshrl.u32 %v1740_v6, 16  ;;  %v214_v11 = vshll.u32 %v1740_v6, 16  ;;  %v220_v12 = vshll.u32 %v1743_v7, 16  ;;  %v225_v13 = vshrl.u32 %v1746_v8, 16 }
  0x12   : > { %v228_v14 = vshll.u32 %v1746_v8, 16  ;;  %v234_v15 = vshll.u32 %v1749_v9, 16  ;;  %v1758_v16 = vld [vmem:[%s1737_s26 + $0x10] sm:$0xf]  ;;  %v533_v22 = vrot.slane %v1749_v9, 5  ;;  %v1358_v9 = vcombine.low %v1740_v6, %v1746_v8 }
  0x13   : > { %v213_v19 = vrot.slane %v211_v10, 4  ;;  %v216_v20 = vrot.slane %v214_v11, 5  ;;  %v227_v21 = vrot.slane %v225_v13, 4  ;;  %v1768_v23 = vld [vmem:[%s1737_s26 + $0x14] sm:$0x1]  ;;  %v222_v24 = vrot.slane %v220_v12, 5 }
  0x14   : > { %v230_v25 = vrot.slane %v228_v14, 5  ;;  %v1771_v26 = vld [vmem:[%s1737_s26 + $0x18] sm:$0xf]  ;;  %v1774_v27 = vld [vmem:[%s1737_s26 + $0x1c] sm:$0x1]  ;;  %v236_v29 = vrot.slane %v234_v15, 5 }
  0x15   : > { %v217_v28 = vor.u32 %v216_v20, %v213_v19  ;;  %v239_v30 = vshrl.u32 %v1758_v16, 16  ;;  %v242_v31 = vshll.u32 %v1758_v16, 16  ;;  %v1785_v34 = vld [vmem:[%s1737_s26 + $0x20] sm:$0xf]  ;;  %v248_v35 = vshll.u32 %v1768_v23, 16 }
  0x16   : > { %v231_v33 = vor.u32 %v230_v25, %v227_v21  ;;  %v253_v36 = vshrl.u32 %v1771_v26, 16  ;;  %v256_v37 = vshll.u32 %v1771_v26, 16  ;;  %v1791_v39 = vld [vmem:[%s1737_s26 + $0x24] sm:$0x1]  ;;  %v262_v42 = vshll.u32 %v1774_v27, 16 }
  0x17   : > { %v218_v38 = vrot.slane %v217_v28, 4  ;;  %v241_v40 = vrot.slane %v239_v30, 4  ;;  %v244_v41 = vrot.slane %v242_v31, 5  ;;  %v250_v44 = vrot.slane %v248_v35, 5  ;;  %v1802_v55 = vld [vmem:[%s1737_s26 + $0x28] sm:$0xf] }
  0x18   : > { %v232_v43 = vrot.slane %v231_v33, 4  ;;  %v255_v45 = vrot.slane %v253_v36, 4  ;;  %v258_v46 = vrot.slane %v256_v37, 5  ;;  %v264_v49 = vrot.slane %v262_v42, 5  ;;  %v1806_v60 = vld [vmem:[%s1737_s26 + $0x2c] sm:$0x1] }
  0x19   : > { %v223_v47 = vsel %vm1780_vm4, %v218_v38, %v222_v24  ;;  %v245_v48 = vor.u32 %v244_v41, %v241_v40  ;;  %v267_v50 = vshrl.u32 %v1785_v34, 16  ;;  %v270_v53 = vshll.u32 %v1785_v34, 16  ;;  %v1810_v2 = vld [vmem:[%s1737_s26 + $0x30] sm:$0xf]  ;;  %v1819_v12 = vld [vmem:[%s1737_s26 + $0x34] sm:$0x1] }
  0x1a   : > { %v237_v51 = vsel %vm1780_vm4, %v232_v43, %v236_v29  ;;  %v259_v52 = vor.u32 %v258_v46, %v255_v45  ;;  %v276_v54 = vshll.u32 %v1791_v39, 16  ;;  %v537_v59 = vrot.slane %v1768_v23, 5  ;;  %v1825_v20 = vld [vmem:[%s1737_s26 + $0x38] sm:$0xf]  ;;  %v1830_v25 = vld [vmem:[%s1737_s26 + $0x3c] sm:$0x1] }
  0x1b   : > { %v1350_v56 = vcombine.low %v223_v47, %v237_v51  ;;  %v246_v57 = vrot.slane %v245_v48, 4  ;;  %v269_v58 = vrot.slane %v267_v50, 4  ;;  %v272_v62 = vrot.slane %v270_v53, 5  ;;  %v1839_v35 = vld [vmem:[%s2056_s1 + $0x8] sm:$0xf] }
  0x1c   : > { %v260_v61 = vrot.slane %v259_v52, 4  ;;  %v278_v63 = vrot.slane %v276_v54, 5  ;;  %v541_v0 = vrot.slane %v1774_v27, 5  ;;  %v545_v5 = vrot.slane %v1791_v39, 5  ;;  %v204_v53 = vld [vmem:[%s2056_s1 + $0x18] sm:$0xf] }
  0x1d   : > { %1490 = vmatprep.mubr.msk.bf16.mxu1 %vm334_vm3, %v1350_v56  ;;  %v251_v4 = vsel %vm1780_vm4, %v246_v57, %v250_v44  ;;  %v281_v10 = vshrl.u32 %v1802_v55, 16  ;;  %v284_v11 = vshll.u32 %v1802_v55, 16  ;;  %v273_v14 = vor.u32 %v272_v62, %v269_v58 }
  0x1e   : > { %v265_v13 = vsel %vm1780_vm4, %v260_v61, %v264_v49  ;;  %v1390_v15 = vcombine.low %v237_v51, %v251_v4  ;;  %v290_v19 = vshll.u32 %v1806_v60, 16  ;;  %v295_v28 = vshrl.u32 %v1810_v2, 16  ;;  %v206_v49 = vld [vmem:[%s2056_s1 + $0x20] sm:$0xf] }
  0x1f   : > { %v1827_v21 = vcombine.low %v251_v4, %v265_v13  ;;  %v283_v23 = vrot.slane %v281_v10, 4  ;;  %v286_v24 = vrot.slane %v284_v11, 5  ;;  %v274_v29 = vrot.slane %v273_v14, 4 }
  0x20   : > { %1530 = vmatprep.mubr.msk.bf16.mxu0 %vm334_vm3, %v1390_v15  ;;  %v292_v30 = vrot.slane %v290_v19, 5  ;;  %v298_v31 = vshll.u32 %v1810_v2, 16  ;;  %v304_v33 = vshll.u32 %v1819_v12, 16  ;;  %v297_v37 = vrot.slane %v295_v28, 4  ;;  %v1916_v28 = vld [vmem:[%s1737_s26 + $0x40] sm:$0xf] }
  0x21   : > { %1491 = vmatmul.mubr.msk.bf16.vlgmr.msra.gmra.mrb[0].mxu1 %vm334_vm3, %v1827_v21  ;;  %v287_v36 = vor.u32 %v286_v24, %v283_v23  ;;  %v309_v38 = vshrl.u32 %v1825_v20, 16  ;;  %v312_v40 = vshll.u32 %v1825_v20, 16  ;;  %v279_v41 = vsel %vm1780_vm4, %v274_v29, %v278_v63  ;;  %v1919_v29 = vld [vmem:[%s1737_s26 + $0x44] sm:$0x1] }
  0x22   : > { %1499 = vmatpush3.bf16.msra.mxu1 %v1761_v17  ;;  %v300_v42 = vrot.slane %v298_v31, 5  ;;  %v306_v43 = vrot.slane %v304_v33, 5  ;;  %v318_v44 = vshll.u32 %v1830_v25, 16  ;;  %v1391_v45 = vcombine.low %v265_v13, %v279_v41 }
  0x23   : > { %v288_v46 = vrot.slane %v287_v36, 4  ;;  %v311_v47 = vrot.slane %v309_v38, 4  ;;  %v314_v48 = vrot.slane %v312_v40, 5  ;;  %1646 = vmatprep.subr.msk.bf16.mxu1 %vm347_vm0, %v1839_v35  ;;  %v1367_v17 = vrot.slane %v1746_v8, 9 }
  0x24   : > { %v301_v50 = vor.u32 %v300_v42, %v297_v37  ;;  %v320_v51 = vrot.slane %v318_v44, 5  ;;  %v1368_v52 = vrot.slane %v1758_v16, 9  ;;  %1531 = vmatmul.mubr.msk.bf16.vlgmr.msra.gmra.mrb[0].mxu0 %vm334_vm3, %v1391_v45  ;;  %v1369_v57 = vrot.slane %v1771_v26, 9  ;;  %v205_v37 = vld [vmem:[%s2056_s1 + $0x1c] sm:$0xf] }
  0x25   : > { %v1865_v54 = vsel %vm1780_vm4, %v288_v46, %v292_v30  ;;  %v315_v56 = vor.u32 %v314_v48, %v311_v47  ;;  %v1370_v58 = vrot.slane %v1785_v34, 9  ;;  %1539 = vmatpush3.bf16.msra.mxu0 %v1764_v18  ;;  %v534_v63 = vsel %vm1851_vm7, %v1367_v17, %v533_v22  ;;  %v196_v44 = vld [vmem:[%s1737_s26 + $0x48] sm:$0xf]  ;;  %v197_v45 = vld [vmem:[%s1737_s26 + $0x4c] sm:$0x1] }
  0x26   : > { %v1871_v61 = vcombine.low %v279_v41, %v1865_v54  ;;  %v302_v62 = vrot.slane %v301_v50, 4  ;;  %v538_v4 = vsel %vm1851_vm7, %v1368_v52, %v537_v59  ;;  %1651 = vmatprep.subr.msk.bf16.mxu0 %vm347_vm0, %v204_v53  ;;  %v1371_v22 = vrot.slane %v1802_v55, 9 }
  0x27   : > { %v316_v10 = vrot.slane %v315_v56, 4  ;;  %v1399_v11 = vcombine.low %v534_v63, %v538_v4  ;;  %v549_v13 = vrot.slane %v1806_v60, 5  ;;  %v1372_v14 = vrot.slane %v1810_v2, 9 }
  0x28   : > { %1494 = vmatprep.mubr.msk.bf16.mxu1 %vm334_vm3, %v1871_v61  ;;  %v1884_v18 = vsel %vm1780_vm4, %v302_v62, %v306_v43  ;;  %v553_v15 = vrot.slane %v1819_v12, 5  ;;  %v542_v23 = vsel %vm1851_vm7, %v1369_v57, %v541_v0  ;;  %v546_v24 = vsel %vm1851_vm7, %v1370_v58, %v545_v5 }
  0x29   : > { %v1891_v59 = vsel %vm1780_vm4, %v316_v10, %v320_v51  ;;  %1540 = vmatprep.mubr.msk.bf16.mxu0 %vm334_vm3, %v1399_v11  ;;  %v550_v60 = vsel %vm1851_vm7, %v1371_v22, %v549_v13  ;;  %v1400_v27 = vcombine.low %v542_v23, %v546_v24  ;;  %v1373_v39 = vrot.slane %v1825_v20, 9 }
  0x2a   : > { %v1899_v19 = vcombine.low %v1884_v18, %v1891_v59  ;;  %v1913_v12 = vsel %vm1851_vm7, %v1372_v14, %v553_v15  ;;  %v557_v5 = vrot.slane %v1830_v25, 5  ;;  %v1398_v30 = vrot.slane %v1916_v28, 9 }
  0x2b   : > { %v1401_v0 = vcombine.low %v550_v60, %v1913_v12  ;;  %v863_v31 = vrot.slane %v1919_v29, 5  ;;  %v965_v33 = vsel %vm347_vm0, %v204_v53, 0  ;;  %v1359_v36 = vcombine.low %v1758_v16, %v1771_v26 }
  0x2c   : > { %1495 = vmatmul.mubr.msk.bf16.gmra.mrb[4].mxu1 %vm334_vm3, %v1899_v19  ;;  %v584_v38 = vsel %vm347_vm0, %v1839_v35, 0  ;;  %v1360_v25 = vcombine.low %v1785_v34, %v1802_v55  ;;  %v529_v40 = vrot.slane %v1743_v7, 5  ;;  %v558_v41 = vsel %vm1851_vm7, %v1373_v39, %v557_v5  ;;  %v201_v7 = vld [vmem:[%s2056_s1 + $0xc] sm:$0xf] }
  0x2d   : > { %1500 = vmatprep.mubr.msk.bf16.mxu1 %vm334_vm3, %v1358_v9  ;;  %v1946_v42 = vsel %vm1851_vm7, %v1398_v30, %v863_v31  ;;  %v1366_v43 = vrot.slane %v1740_v6, 9  ;;  %v1417_v35 = vrot.slane %v196_v44, 9  ;;  %v1138_v46 = vrot.slane %v197_v45, 5 }
  0x2e   : > { %v1402_v47 = vcombine.low %v558_v41, %v1946_v42  ;;  %v1361_v50 = vcombine.low %v1810_v2, %v1825_v20  ;;  %v1060_v17 = vsel %vm347_vm0, %v205_v37, 0  ;;  %v1375_v52 = vcombine.low %v538_v4, %v542_v23 }
  0x2f   : > { %v1960_v6 = vsel %vm1851_vm7, %v1417_v35, %v1138_v46  ;;  %v530_v48 = vsel %vm1851_vm7, %v1366_v43, %v529_v40  ;;  %v678_v53 = vsel %vm347_vm0, %v201_v7, 0  ;;  %v1376_v56 = vcombine.low %v546_v24, %v550_v60 }
  0x30   : > { %1541 = vmatmul.mubr.msk.bf16.vlgmr.msra.gmra.mrb[0].mxu0 %vm334_vm3, %v1400_v27  ;;  %v1374_v51 = vcombine.low %v530_v48, %v534_v63  ;;  %v1041_v57 = vshrl.u32 %v196_v44, 16  ;;  %v1044_v58 = vshll.u32 %v196_v44, 16  ;;  %v754_v62 = vshrl.u32 %v1916_v28, 16 }
  0x31   : > { %1549 = vmatpush3.bf16.msra.mxu0 %v965_v33  ;;  %1544 = vmatprep.mubr.msk.bf16.mxu0 %vm334_vm3, %v1401_v0  ;;  %v757_v63 = vshll.u32 %v1916_v28, 16  ;;  %v1407_v4 = vcombine.low %v1916_v28, %v196_v44  ;;  %v1377_v13 = vcombine.low %v1913_v12, %v558_v41  ;;  %v1382_v14 = vcombine.low %v1746_v8, %v1758_v16 }
  0x32   : > { %1652 = vmatprep.subr.msk.bf16.mxu0 %vm347_vm0, %v205_v37  ;;  %v756_v10 = vrot.slane %v754_v62, 4  ;;  %v1043_v9 = vrot.slane %v1041_v57, 4  ;;  %v1046_v22 = vrot.slane %v1044_v58, 5  ;;  %v763_v23 = vshll.u32 %v1919_v29, 16 }
  0x33   : > { %v759_v11 = vrot.slane %v757_v63, 5  ;;  %v1050_v60 = vshll.u32 %v197_v45, 16  ;;  %v1146_v0 = vsel %vm347_vm0, %v206_v49, 0  ;;  %v1383_v8 = vcombine.low %v1771_v26, %v1785_v34 }
  0x34   : > { %1501 = vmatmul.mubr.msk.bf16.vlgmr.msra.gmra.mrb[0].mxu1 %vm334_vm3, %v1359_v36  ;;  %v1047_v24 = vor.u32 %v1046_v22, %v1043_v9  ;;  %v765_v27 = vrot.slane %v763_v23, 5  ;;  %v1384_v16 = vcombine.low %v1802_v55, %v1810_v2  ;;  %v1385_v34 = vcombine.low %v1825_v20, %v1916_v28 }
  0x35   : > { %1509 = vmatpush3.bf16.msra.mxu1 %v584_v38  ;;  %1504 = vmatprep.mubr.msk.bf16.mxu1 %vm334_vm3, %v1360_v25  ;;  %v760_v15 = vor.u32 %v759_v11, %v756_v10  ;;  %v1052_v39 = vrot.slane %v1050_v60, 5  ;;  %v1392_v55 = vcombine.low %v1865_v54, %v1884_v18  ;;  %v1418_v32 = vcombine.low %v1946_v42, %v1960_v6 }
  0x36   : > { %1647 = vmatprep.subr.msk.bf16.mxu1 %vm347_vm0, %v201_v7  ;;  %v1048_v12 = vrot.slane %v1047_v24, 4 }
  0x38   : > { %1545 = vmatmul.mubr.msk.bf16.gmra.mrb[4].mxu0 %vm334_vm3, %v1402_v47  ;;  %v1053_v29 = vsel %vm1780_vm4, %v1048_v12, %v1052_v39 }
  0x39   : > { %1550 = vmatprep.mubr.msk.bf16.mxu0 %vm334_vm3, %v1359_v36 }
  0x3c   : > { %1505 = vmatmul.mubr.msk.bf16.gmra.mrb[4].mxu1 %vm334_vm3, %v1361_v50 }
  0x3d   : > { %1510 = vmatprep.mubr.msk.bf16.mxu1 %vm334_vm3, %v1374_v51 }
  0x40   : > { %1551 = vmatmul.mubr.msk.bf16.vlgmr.msra.gmra.mrb[0].mxu0 %vm334_vm3, %v1360_v25 }
  0x41   : > { %1559 = vmatpush3.bf16.msra.mxu0 %v1060_v17  ;;  %1554 = vmatprep.mubr.msk.bf16.mxu0 %vm334_vm3, %v1361_v50 }
  0x42   : > { %1653 = vmatprep.subr.msk.bf16.mxu0 %vm347_vm0, %v206_v49 }
  0x44   : > { %1511 = vmatmul.mubr.msk.bf16.vlgmr.msra.gmra.mrb[0].mxu1 %vm334_vm3, %v1375_v52 }
  0x45   : > { %1519 = vmatpush3.bf16.msra.mxu1 %v678_v53  ;;  %1514 = vmatprep.mubr.msk.bf16.mxu1 %vm334_vm3, %v1376_v56 }
  0x46   : > { %1649 = vmatprep.subr.msk.bf16.mxu1 %vm347_vm0, %v1713_v1  ;;  %v761_v1 = vrot.slane %v760_v15, 4 }
  0x48   : > { %1555 = vmatmul.mubr.msk.bf16.gmra.mrb[4].mxu0 %vm334_vm3, %v1407_v4 }
  0x49   : > { %1560 = vmatprep.mubr.msk.bf16.mxu0 %vm334_vm3, %v1827_v21  ;;  %v766_v21 = vsel %vm1780_vm4, %v761_v1, %v765_v27 }
  0x4a   : > { %v1412_v26 = vcombine.low %v766_v21, %v1053_v29 }
  0x4c   : > { %1515 = vmatmul.mubr.msk.bf16.gmra.mrb[4].mxu1 %vm334_vm3, %v1377_v13 }
  0x4d   : > { %1520 = vmatprep.mubr.msk.bf16.mxu1 %vm334_vm3, %v1382_v14 }
  0x50   : > { %1561 = vmatmul.mubr.msk.bf16.vlgmr.msra.gmra.mrb[0].mxu0 %vm334_vm3, %v1871_v61 }
  0x51   : > { %1569 = vmatpush3.bf16.msra.mxu0 %v1146_v0  ;;  %1564 = vmatprep.mubr.msk.bf16.mxu0 %vm334_vm3, %v1899_v19 }
  0x54   : > { %1521 = vmatmul.mubr.msk.bf16.vlgmr.msra.gmra.mrb[0].mxu1 %vm334_vm3, %v1383_v8 }
  0x55   : > { %1579 = vmatpush3.bf16.msra.mxu1 %v1723_v3  ;;  %1524 = vmatprep.mubr.msk.bf16.mxu1 %vm334_vm3, %v1384_v16  ;;  %v1393_v3 = vcombine.low %v1891_v59, %v766_v21  ;;  %v1423_v59 = vld [vmem:[%s2057_s2] ss:$0 sm:$0xff] }
  0x58   : > { %1565 = vmatmul.mubr.msk.bf16.gmra.mrb[4].mxu0 %vm334_vm3, %v1412_v26 }
  0x59   : > { %1570 = vmatprep.mubr.msk.bf16.mxu0 %vm334_vm3, %v1375_v52 }
  0x5c   : > { %1525 = vmatmul.mubr.msk.bf16.gmra.mrb[4].mxu1 %vm334_vm3, %v1385_v34 }
  0x5d   : > { %1534 = vmatprep.mubr.msk.bf16.mxu1 %vm334_vm3, %v1392_v55 }
  0x60   : > { %1571 = vmatmul.mubr.msk.bf16.vlgmr.msra.gmra.mrb[0].mxu0 %vm334_vm3, %v1376_v56 }
  0x61   : > { %1574 = vmatprep.mubr.msk.bf16.mxu0 %vm334_vm3, %v1377_v13 }
  0x68   : > { %1535 = vmatmul.mubr.msk.bf16.vlgmr.msra.gmra.mrb[4].mxu1 %vm334_vm3, %v1393_v3  ;;  %1575 = vmatmul.mubr.msk.bf16.gmra.mrb[4].mxu0 %vm334_vm3, %v1418_v32 }
 0x127   : > { %v1522_v2 = vpop.f32.mrb[0].mxu1 }
 0x128   : > { %v714_v20 = vpop.f32.mrb[1].mxu1 }
 0x129   : > { %v1523_v54 = vpop.f32.mrb[2].mxu1 }
 0x12a   : > { %v717_v61 = vpop.f32.mrb[3].mxu1 }
 0x133   : > { %v1572_v18 = vpop.f32.mrb[0].mxu0 }
 0x134   : > { %v1580_v19 = vadd.f32 %v1572_v18, %v1522_v2  ;;  %v1182_v28 = vpop.f32.mrb[1].mxu0 }
 0x135   : > { %v1581_v5 = vadd.f32 %v1182_v28, %v714_v20  ;;  %v1573_v30 = vpop.f32.mrb[2].mxu0 }
 0x136   : > { %v1230_v31 = vadd.f32 %v1580_v19, %v1423_v59  ;;  %v1582_v33 = vadd.f32 %v1573_v30, %v1523_v54  ;;  %v1185_v36 = vpop.f32.mrb[3].mxu0 }
 0x137   : > { %v1228_v37 = vadd.f32 %v1581_v5, %v1423_v59  ;;  %v1583_v38 = vadd.f32 %v1185_v36, %v717_v61 }
 0x138   : > { %v1238_v25 = vmax.f32 %v1230_v31, 0.0  ;;  %v1231_v40 = vadd.f32 %v1582_v33, %v1423_v59 }
 0x139   : > { %v1236_v41 = vmax.f32 %v1228_v37, 0.0  ;;  %v1229_v42 = vadd.f32 %v1583_v38, %v1423_v59 }
 0x13a   : > { %v1437_v43 = vpack.c.bf16 %v1238_v25, %v1238_v25  ;;  %v1239_v44 = vmax.f32 %v1231_v40, 0.0 }
 0x13b   : > { %v1536_v45 = vpop.f32.mrb[4].mxu1  ;;  %v1435_v7 = vpack.c.bf16 %v1236_v41, %v1236_v41  ;;  %v1237_v35 = vmax.f32 %v1229_v42, 0.0  ;;  %v1576_v46 = vpop.f32.mrb[4].mxu0 }
 0x13c   : > { %v837_v47 = vpop.f32.mrb[5].mxu1  ;;  %1279 = vst.msk [vmem:[%s2034_s17 + $0x8] sm:$0xf] %vm1276_vm8, %v1437_v43  ;;  %v1438_v6 = vpack.c.bf16 %v1239_v44, %v1239_v44  ;;  %v1584_v48 = vadd.f32 %v1576_v46, %v1536_v45  ;;  %v1198_v50 = vpop.f32.mrb[5].mxu0 }
 0x13d   : > { %v1537_v51 = vpop.f32.mrb[6].mxu1  ;;  %1277 = vst.msk [vmem:[%s2034_s17] sm:$0xf] %vm1276_vm8, %v1435_v7  ;;  %v1436_v17 = vpack.c.bf16 %v1237_v35, %v1237_v35  ;;  %v1585_v52 = vadd.f32 %v1198_v50, %v837_v47  ;;  %v1577_v49 = vpop.f32.mrb[6].mxu0 }
 0x13e   : > { %v840_v53 = vpop.f32.mrb[7].mxu1  ;;  %1280 = vst.msk [vmem:[%s2034_s17 + $0xc] sm:$0xf] %vm1276_vm8, %v1438_v6  ;;  %v1234_v56 = vadd.f32 %v1584_v48, %v1423_v59  ;;  %v1586_v57 = vadd.f32 %v1577_v49, %v1537_v51  ;;  %v1201_v58 = vpop.f32.mrb[7].mxu0 }
 0x13f   : > { %1278 = vst.msk [vmem:[%s2034_s17 + $0x4] sm:$0xf] %vm1276_vm8, %v1436_v17  ;;  %v1232_v62 = vadd.f32 %v1585_v52, %v1423_v59  ;;  %v1587_v63 = vadd.f32 %v1201_v58, %v840_v53 }
 0x140   : > { %v1242_v4 = vmax.f32 %v1234_v56, 0.0  ;;  %v1235_v10 = vadd.f32 %v1586_v57, %v1423_v59 }
 0x141   : > { %v1240_v11 = vmax.f32 %v1232_v62, 0.0  ;;  %v1233_v9 = vadd.f32 %v1587_v63, %v1423_v59 }
 0x142   : > { %v1441_v22 = vpack.c.bf16 %v1242_v4, %v1242_v4  ;;  %v1243_v13 = vmax.f32 %v1235_v10, 0.0 }
 0x143   : > { %v1439_v14 = vpack.c.bf16 %v1240_v11, %v1240_v11  ;;  %v1241_v15 = vmax.f32 %v1233_v9, 0.0 }
 0x144   : > { %1283 = vst.msk [vmem:[%s2034_s17 + $0x18] sm:$0xf] %vm1276_vm8, %v1441_v22  ;;  %v1442_v23 = vpack.c.bf16 %v1243_v13, %v1243_v13 }
 0x145   : > { %1281 = vst.msk [vmem:[%s2034_s17 + $0x10] sm:$0xf] %vm1276_vm8, %v1439_v14  ;;  %v1440_v24 = vpack.c.bf16 %v1241_v15, %v1241_v15 }
 0x146   : > { %1284 = vst.msk [vmem:[%s2034_s17 + $0x1c] sm:$0xf] %vm1276_vm8, %v1442_v23 }
 0x147   : > { %1282 = vst.msk [vmem:[%s2034_s17 + $0x14] sm:$0xf] %vm1276_vm8, %v1440_v24 }
 0x148 PF: > { %s13_s12 = sadd.s32 1, %s1677_s12  }
 0x149   : > { %p10_p5 = scmp.ge.s32.totalorder %s13_s12, 4  }
 0x14b   :  { %12 = sbr.rel (!%p10_p5) target bundleno = 1 (0x1), region = 62 }

// kernel: dann_forward.4
= control target key start
LH: loop header
LB: loop body
LE: loop exit
PB: predicated region body
PF: predicated region fallthrough
CT: control target
= control target key end

     0   :  { %s4250_s12 = smov 0   ;;  %s5344_s0 = inlined_call_operand.vmem [shape: bf16[36,18,4], index: 0, kind: input, shape index: {}]   ;;  %s5345_s1 = inlined_call_operand.vmem [shape: bf16[9,4,8], index: 1, kind: input, shape index: {}]   ;;  %s5346_s2 = inlined_call_operand.vmem [shape: f32[1,8], index: 2, kind: input, shape index: {}]   ;;  %s5347_s3 = inlined_call_operand.vmem [shape: bf16[512,8], index: 3, kind: output, shape index: {}]  }
   0x1 LB: > { %s3173_s13 = sadd.s32 4294967295, %s4228_s12   ;;  %p3177_p0 = scmp.ge.s32.totalorder %s4228_s12, 1  ;;  %s4228_s12 = sphi %s4250_s12, %s13_s12  }
   0x2   : > { %p139_p1 = scmp.lt.s32.totalorder %s4228_s12, 3 }
   0x4   : > { %p140_p2 = pnand %p3177_p0, %p139_p1 }
   0x6   : > { %143 = sbr.rel (%p140_p2) target bundleno = 557 (0x22d), region = 32 }
   0xd   : > { %v233_v0 = vld [vmem:[%s5345_s1 + $0x2] sm:$0x3]  ;;  %vm725_vm0 = vcmask 1041408   ;;  %v236_v1 = vld [vmem:[%s5345_s1 + $0x8] sm:$0x3]  ;;  %s164_s18 = smul.u32 18, %s3173_s13 }
   0xe   : > { %4181 = vmatprep.subr.msk.bf16.mxu1 %vm725_vm0, %v233_v0  ;;  %4185 = vmatprep.subr.msk.bf16.mxu0 %vm725_vm0, %v236_v1  ;;  %v727_v2 = vsel %vm725_vm0, %v233_v0, 0  ;;  %v4270_v3 = vsel %vm725_vm0, %v236_v1, 0  ;;  %v232_v4 = vld [vmem:[%s5345_s1] sm:$0x3]  ;;  %v237_v5 = vld [vmem:[%s5345_s1 + $0xa] sm:$0x3] }
   0xf   : > { %5379 = vst [vmem:[#allocation2_spill] sm:$0xff] %v4270_v3  ;;  %3618 = vmatpush3.bf16.msra.mxu1 %v727_v2  ;;  %3754 = vmatpush3.bf16.msra.mxu0 %v4270_v3  ;;  %p165_p3 = scmp.lt.s32.totalorder %s164_s18, 35  ;;  %vm241_vm1 = vsmask.f32 3328  ;;  %vm242_vm2 = vsmask.f32 7440 }
  0x10   : > { %4182 = vmatprep.subr.msk.bf16.mxu1 %vm725_vm0, %v232_v4  ;;  %4187 = vmatprep.subr.msk.bf16.mxu0 %vm725_vm0, %v237_v5  ;;  %v4287_v6 = vsel %vm725_vm0, %v232_v4, 0  ;;  %v4290_v7 = vsel %vm725_vm0, %v237_v5, 0  ;;  %v4295_v8 = vld [vmem:[%s5345_s1 + $0xc] sm:$0x3]  ;;  %vm676_vm3 = vcmask 31744   ;;  %vm4331_vm4 = vmor %vm241_vm1, %vm242_vm2  ;;  %vm1198_vm5 = vcmask 1042432  }
  0x11   : > { %s5426_s18 = smov (!%p165_p3, %s164_s18), 35  ;;  %v4319_v20 = vsel %vm725_vm0, %v4295_v8, 0  ;;  %vm1199_vm6 = vcmask 1046532   ;;  %s3179_s14 = sshll.u32 %s3173_s13, 5  ;;  %vm3084_vm8 = vcmask 60416  }
  0x12   : > { %s4191_s23 = smul.u32 12, %s5426_s18  ;;  %vm4512_vm7 = vmor %vm1198_vm5, %vm1199_vm6  ;;  %p172_p4 = scmp.lt.s32.totalorder %s3179_s14, 63 }
  0x14   : > { %s4284_s26 = scalar_lea.vmem %s5344_s0, %s4191_s23  ;;  %s5428_s14 = smov (!%p172_p4, %s3179_s14), 63 }
  0x15   : > { %v4298_v9 = vld [vmem:[%s4284_s26] sm:$0xf]  ;;  %v4301_v10 = vld [vmem:[%s4284_s26 + $0x4] sm:$0xf]  ;;  %v180_v11 = vld [vmem:[%s4284_s26 + $0x8] sm:$0x1] }
  0x16   : > { %v245_v12 = vshrl.u32 %v4298_v9, 16  ;;  %v248_v13 = vshll.u32 %v4298_v9, 16  ;;  %v254_v14 = vshll.u32 %v4301_v10, 16  ;;  %v258_v15 = vshrl.u32 %v4301_v10, 16  ;;  %v4309_v16 = vld [vmem:[%s4284_s26 + $0xc] sm:$0xf] }
  0x17   : > { %v264_v17 = vshll.u32 %v180_v11, 16  ;;  %v4312_v18 = vld [vmem:[%s4284_s26 + $0x10] sm:$0xf]  ;;  %v4315_v19 = vld [vmem:[%s4284_s26 + $0x14] sm:$0x1]  ;;  %v269_v26 = vshrl.u32 %v4309_v16, 16 }
  0x18   : > { %v247_v21 = vrot.slane %v245_v12, 4  ;;  %v250_v22 = vrot.slane %v248_v13, 5  ;;  %v256_v23 = vrot.slane %v254_v14, 5  ;;  %v260_v24 = vrot.slane %v258_v15, 4  ;;  %v4327_v33 = vld [vmem:[%s4284_s26 + $0x18] sm:$0xf] }
  0x19   : > { %v266_v25 = vrot.slane %v264_v17, 5  ;;  %v272_v27 = vshll.u32 %v4309_v16, 16  ;;  %v278_v28 = vshll.u32 %v4312_v18, 16  ;;  %v282_v31 = vshrl.u32 %v4312_v18, 16  ;;  %v4340_v39 = vld [vmem:[%s4284_s26 + $0x1c] sm:$0xf] }
  0x1a   : > { %v251_v29 = vor.u32 %v250_v22, %v247_v21  ;;  %v261_v30 = vor.u32 %v260_v24, %v256_v23  ;;  %v288_v32 = vshll.u32 %v4315_v19, 16  ;;  %v271_v35 = vrot.slane %v269_v26, 4  ;;  %v4344_v46 = vld [vmem:[%s4284_s26 + $0x20] sm:$0x1]  ;;  %v4354_v57 = vld [vmem:[%s4284_s26 + $0x24] sm:$0xf] }
  0x1b   : > { %v274_v36 = vrot.slane %v272_v27, 5  ;;  %v280_v37 = vrot.slane %v278_v28, 5  ;;  %v4337_v38 = vcombine.low %v4309_v16, %v4312_v18  ;;  %v284_v42 = vrot.slane %v282_v31, 4  ;;  %v4359_v62 = vld [vmem:[%s4284_s26 + $0x28] sm:$0xf]  ;;  %s3180_s17 = sshll.u32 %s5428_s14, 2 }
  0x1c   : > { %v252_v40 = vrot.slane %v251_v29, 4  ;;  %v262_v41 = vrot.slane %v261_v30, 4  ;;  %v290_v43 = vrot.slane %v288_v32, 5  ;;  %v1213_v45 = vrot.slane %v4315_v19, 5  ;;  %v4367_v4 = vld [vmem:[%s4284_s26 + $0x2c] sm:$0x1]  ;;  %s5239_s19 = scalar_lea.vmem %s5347_s3, %s3180_s17 }
  0x1d   : > { %v275_v44 = vor.u32 %v274_v36, %v271_v35  ;;  %v293_v47 = vshrl.u32 %v4327_v33, 16  ;;  %v296_v48 = vshll.u32 %v4327_v33, 16  ;;  %v285_v51 = vor.u32 %v284_v42, %v280_v37  ;;  %v4373_v14 = vld [vmem:[%s4284_s26 + $0x30] sm:$0xf]  ;;  %v4385_v28 = vld [vmem:[%s4284_s26 + $0x34] sm:$0xf] }
  0x1e   : > { %v257_v49 = vsel %vm4331_vm4, %v252_v40, %v256_v23  ;;  %v267_v50 = vsel %vm4331_vm4, %v262_v41, %v266_v25  ;;  %v302_v52 = vshll.u32 %v4340_v39, 16  ;;  %v306_v60 = vshrl.u32 %v4340_v39, 16  ;;  %v4380_v23 = vld [vmem:[%s5345_s1 + $0x4] sm:$0x3]  ;;  %v4392_v32 = vld [vmem:[%s4284_s26 + $0x38] sm:$0x1] }
  0x1f   : > { %v3181_v53 = vcombine.low %v257_v49, %v267_v50  ;;  %v276_v54 = vrot.slane %v275_v44, 4  ;;  %v295_v55 = vrot.slane %v293_v47, 4  ;;  %v298_v56 = vrot.slane %v296_v48, 5  ;;  %v4400_v48 = vld [vmem:[%s4284_s26 + $0x3c] sm:$0xf] }
  0x20   : > { %v286_v58 = vrot.slane %v285_v51, 4  ;;  %v304_v59 = vrot.slane %v302_v52, 5  ;;  %v312_v61 = vshll.u32 %v4344_v46, 16  ;;  %v1217_v1 = vrot.slane %v4340_v39, 5  ;;  %v4408_v52 = vld [vmem:[%s4284_s26 + $0x40] sm:$0xf] }
  0x21   : > { %3619 = vmatprep.mubr.msk.bf16.mxu1 %vm676_vm3, %v3181_v53  ;;  %v281_v63 = vsel %vm4331_vm4, %v276_v54, %v280_v37  ;;  %v299_v0 = vor.u32 %v298_v56, %v295_v55  ;;  %v1220_v2 = vrot.slane %v4344_v46, 5  ;;  %v308_v11 = vrot.slane %v306_v60, 4 }
  0x22   : > { %v291_v5 = vsel %vm4331_vm4, %v286_v58, %v290_v43  ;;  %v314_v12 = vrot.slane %v312_v61, 5  ;;  %v317_v13 = vshrl.u32 %v4354_v57, 16  ;;  %v320_v21 = vshll.u32 %v4354_v57, 16 }
  0x23   : > { %v3182_v15 = vcombine.low %v281_v63, %v291_v5  ;;  %v300_v17 = vrot.slane %v299_v0, 4  ;;  %v326_v22 = vshll.u32 %v4359_v62, 16  ;;  %v309_v24 = vor.u32 %v308_v11, %v304_v59  ;;  %v4420_v5 = vld [vmem:[%s4284_s26 + $0x44] sm:$0x1] }
  0x24   : > { %v319_v25 = vrot.slane %v317_v13, 4  ;;  %v330_v26 = vshrl.u32 %v4359_v62, 16  ;;  %v336_v27 = vshll.u32 %v4367_v4, 16  ;;  %v322_v30 = vrot.slane %v320_v21, 5  ;;  %v4425_v13 = vld [vmem:[%s4284_s26 + $0x48] sm:$0xf] }
  0x25   : > { %3755 = vmatprep.mubr.msk.bf16.mxu0 %vm676_vm3, %v3182_v15  ;;  %3620 = vmatmul.mubr.msk.bf16.vlgmr.msra.gmra.mrb[0].mxu1 %vm676_vm3, %v3182_v15  ;;  %v305_v29 = vsel %vm4331_vm4, %v300_v17, %v304_v59  ;;  %v328_v31 = vrot.slane %v326_v22, 5  ;;  %v341_v35 = vshrl.u32 %v4373_v14, 16  ;;  %v310_v36 = vrot.slane %v309_v24, 4  ;;  %v4432_v24 = vld [vmem:[%s4284_s26 + $0x4c] sm:$0xf] }
  0x26   : > { %3652 = vmatpush3.bf16.msra.mxu1 %v4287_v6  ;;  %v332_v37 = vrot.slane %v330_v26, 4  ;;  %v338_v40 = vrot.slane %v336_v27, 5  ;;  %v344_v41 = vshll.u32 %v4373_v14, 16  ;;  %v323_v42 = vor.u32 %v322_v30, %v319_v25 }
  0x27   : > { %v343_v43 = vrot.slane %v341_v35, 4  ;;  %v350_v44 = vshll.u32 %v4385_v28, 16  ;;  %v354_v47 = vshrl.u32 %v4385_v28, 16  ;;  %4183 = vmatprep.subr.msk.bf16.mxu1 %vm725_vm0, %v4380_v23  ;;  %v315_v49 = vsel %vm4331_vm4, %v310_v36, %v314_v12 }
  0x28   : > { %v333_v6 = vor.u32 %v332_v37, %v328_v31  ;;  %v346_v50 = vrot.slane %v344_v41, 5  ;;  %v360_v51 = vshll.u32 %v4392_v32, 16  ;;  %v4410_v53 = vcombine.low %v305_v29, %v315_v49 }
  0x29   : > { %v324_v54 = vrot.slane %v323_v42, 4  ;;  %v352_v55 = vrot.slane %v350_v44, 5  ;;  %v356_v56 = vrot.slane %v354_v47, 4  ;;  %v365_v61 = vshrl.u32 %v4400_v48, 16  ;;  %v4454_v42 = vld [vmem:[%s4284_s26 + $0x54] sm:$0xf] }
  0x2a   : > { %5382 = vst [vmem:[#allocation3_spill] sm:$0xff] %v4410_v53  ;;  %v334_v58 = vrot.slane %v333_v6, 4  ;;  %v347_v59 = vor.u32 %v346_v50, %v343_v43  ;;  %v362_v60 = vrot.slane %v360_v51, 5  ;;  %3756 = vmatmul.mubr.msk.bf16.vlgmr.msra.gmra.mrb[0].mxu0 %vm676_vm3, %v4410_v53  ;;  %3623 = vmatprep.mubr.msk.bf16.mxu1 %vm676_vm3, %v4410_v53  ;;  %v368_v11 = vshll.u32 %v4400_v48, 16  ;;  %5384 = vst [vmem:[#allocation5_spill] sm:$0xff] %v4454_v42 }
  0x2b   : > { %v329_v63 = vsel %vm4331_vm4, %v324_v54, %v328_v31  ;;  %v357_v0 = vor.u32 %v356_v56, %v352_v55  ;;  %v374_v12 = vshll.u32 %v4408_v52, 16  ;;  %3788 = vmatpush3.bf16.msra.mxu0 %v4290_v7  ;;  %v367_v21 = vrot.slane %v365_v61, 4  ;;  %v4459_v6 = vld [vmem:[%s4284_s26 + $0x58] sm:$0xf] }
  0x2c   : > { %v339_v15 = vsel %vm4331_vm4, %v334_v58, %v338_v40  ;;  %v348_v17 = vrot.slane %v347_v59, 4  ;;  %v378_v22 = vshrl.u32 %v4408_v52, 16  ;;  %v370_v27 = vrot.slane %v368_v11, 5  ;;  %4188 = vmatprep.subr.msk.bf16.mxu0 %vm725_vm0, %v4295_v8  ;;  %v4449_v8 = vld [vmem:[%s4284_s26 + $0x50] sm:$0x1] }
  0x2d   : > { %v4434_v25 = vcombine.low %v329_v63, %v339_v15  ;;  %v358_v26 = vrot.slane %v357_v0, 4  ;;  %v376_v29 = vrot.slane %v374_v12, 5  ;;  %v384_v31 = vshll.u32 %v4420_v5, 16  ;;  %v4472_v11 = vld [vmem:[%s4284_s26 + $0x5c] sm:$0x1] }
  0x2e   : > { %v353_v7 = vsel %vm4331_vm4, %v348_v17, %v352_v55  ;;  %v380_v30 = vrot.slane %v378_v22, 4  ;;  %v389_v35 = vshrl.u32 %v4425_v13, 16  ;;  %v371_v37 = vor.u32 %v370_v27, %v367_v21  ;;  %v4476_v15 = vld [vmem:[%s4284_s26 + $0x60] sm:$0xf]  ;;  %v4481_v27 = vld [vmem:[%s4284_s26 + $0x64] sm:$0xf] }
  0x2f   : > { %5383 = vst [vmem:[#allocation4_spill] sm:$0xff] %v4434_v25  ;;  %3759 = vmatprep.mubr.msk.bf16.mxu0 %vm676_vm3, %v4434_v25  ;;  %3624 = vmatmul.mubr.msk.bf16.gmra.mrb[4].mxu1 %vm676_vm3, %v4434_v25  ;;  %v363_v36 = vsel %vm4331_vm4, %v358_v26, %v362_v60  ;;  %v392_v40 = vshll.u32 %v4425_v13, 16  ;;  %v398_v41 = vshll.u32 %v4432_v24, 16  ;;  %v386_v47 = vrot.slane %v384_v31, 5  ;;  %v4693_v25 = vld [vmem:[%s4284_s26 + $0xa8] sm:$0xf] }
  0x30   : > { %v4456_v43 = vcombine.low %v353_v7, %v363_v36  ;;  %v381_v44 = vor.u32 %v380_v30, %v376_v29  ;;  %v391_v49 = vrot.slane %v389_v35, 4  ;;  %v372_v50 = vrot.slane %v371_v37, 4 }
  0x31   : > { %v394_v51 = vrot.slane %v392_v40, 5  ;;  %v400_v54 = vrot.slane %v398_v41, 5  ;;  %v402_v55 = vshrl.u32 %v4432_v24, 16  ;;  %v408_v58 = vshll.u32 %v4449_v8, 16 }
  0x32   : > { %5385 = vst [vmem:[#allocation6_spill] sm:$0xff] %v4456_v43  ;;  %3627 = vmatprep.mubr.msk.bf16.mxu1 %vm676_vm3, %v4456_v43  ;;  %v382_v56 = vrot.slane %v381_v44, 4  ;;  %v413_v59 = vshrl.u32 %v4454_v42, 16  ;;  %v416_v60 = vshll.u32 %v4454_v42, 16  ;;  %3760 = vmatmul.mubr.msk.bf16.gmra.mrb[4].mxu0 %vm676_vm3, %v4456_v43  ;;  %v377_v61 = vsel %vm4331_vm4, %v372_v50, %v376_v29 }
  0x33   : > { %v395_v63 = vor.u32 %v394_v51, %v391_v49  ;;  %v404_v0 = vrot.slane %v402_v55, 4  ;;  %v422_v12 = vshll.u32 %v4459_v6, 16  ;;  %v410_v21 = vrot.slane %v408_v58, 5 }
  0x34   : > { %v387_v17 = vsel %vm4331_vm4, %v382_v56, %v386_v47  ;;  %v415_v22 = vrot.slane %v413_v59, 4  ;;  %v418_v26 = vrot.slane %v416_v60, 5  ;;  %v426_v36 = vshrl.u32 %v4459_v6, 16  ;;  %v4495_v47 = vld [vmem:[%s4284_s26 + $0x68] sm:$0x1] }
  0x35   : > { %v4483_v7 = vcombine.low %v377_v61, %v387_v17  ;;  %v396_v29 = vrot.slane %v395_v63, 4  ;;  %v405_v30 = vor.u32 %v404_v0, %v400_v54  ;;  %v424_v31 = vrot.slane %v422_v12, 5 }
  0x36   : > { %v419_v35 = vor.u32 %v418_v26, %v415_v22  ;;  %v432_v37 = vshll.u32 %v4472_v11, 16  ;;  %v437_v40 = vshrl.u32 %v4476_v15, 16  ;;  %v440_v49 = vshll.u32 %v4476_v15, 16 }
  0x37   : > { %5386 = vst [vmem:[#allocation7_spill] sm:$0xff] %v4483_v7  ;;  %3763 = vmatprep.mubr.msk.bf16.mxu0 %vm676_vm3, %v4483_v7  ;;  %3628 = vmatmul.mubr.msk.bf16.gmra.mrb[8].mxu1 %vm676_vm3, %v4483_v7  ;;  %v401_v41 = vsel %vm4331_vm4, %v396_v29, %v400_v54  ;;  %v406_v44 = vrot.slane %v405_v30, 4  ;;  %v446_v50 = vshll.u32 %v4481_v27, 16  ;;  %v428_v55 = vrot.slane %v426_v36, 4  ;;  %v4503_v54 = vld [vmem:[%s4284_s26 + $0x6c] sm:$0xf] }
  0x38   : > { %v420_v51 = vrot.slane %v419_v35, 4  ;;  %v434_v56 = vrot.slane %v432_v37, 5  ;;  %v439_v58 = vrot.slane %v437_v40, 4  ;;  %v442_v60 = vrot.slane %v440_v49, 5  ;;  %v4519_v36 = vld [vmem:[%s4284_s26 + $0x70] sm:$0xf] }
  0x39   : > { %v411_v59 = vsel %vm4331_vm4, %v406_v44, %v410_v21  ;;  %v448_v61 = vrot.slane %v446_v50, 5  ;;  %v450_v63 = vshrl.u32 %v4481_v27, 16  ;;  %v429_v17 = vor.u32 %v428_v55, %v424_v31  ;;  %v4670_v7 = vld [vmem:[%s4284_s26 + $0xa0] sm:$0xf] }
  0x3a   : > { %v4505_v0 = vcombine.low %v401_v41, %v411_v59  ;;  %v425_v12 = vsel %vm4331_vm4, %v420_v51, %v424_v31  ;;  %v456_v22 = vshll.u32 %v4495_v47, 16  ;;  %v443_v21 = vor.u32 %v442_v60, %v439_v58  ;;  %v4532_v51 = vld [vmem:[%s4284_s26 + $0x74] sm:$0x1] }
  0x3b   : > { %v452_v29 = vrot.slane %v450_v63, 4  ;;  %v3246_v30 = vrot.slane %v4309_v16, 9  ;;  %v1210_v35 = vrot.slane %v4312_v18, 5  ;;  %v430_v31 = vrot.slane %v429_v17, 4 }
  0x3c   : > { %5387 = vst [vmem:[#allocation8_spill] sm:$0xff] %v4505_v0  ;;  %3764 = vmatmul.mubr.msk.bf16.gmra.mrb[8].mxu0 %vm676_vm3, %v4505_v0  ;;  %3631 = vmatprep.mubr.msk.bf16.mxu1 %vm676_vm3, %v4505_v0  ;;  %v458_v37 = vrot.slane %v456_v22, 5  ;;  %v461_v40 = vshrl.u32 %v4503_v54, 16  ;;  %v464_v41 = vshll.u32 %v4503_v54, 16  ;;  %v444_v44 = vrot.slane %v443_v21, 4 }
  0x3d   : > { %v453_v49 = vor.u32 %v452_v29, %v448_v61  ;;  %v1211_v16 = vsel %vm4512_vm7, %v3246_v30, %v1210_v35  ;;  %v1212_v18 = vrot.slane %v1210_v35, 4  ;;  %v435_v50 = vsel %vm4331_vm4, %v430_v31, %v434_v56  ;;  %v4544_v56 = vld [vmem:[%s4284_s26 + $0x78] sm:$0xf]  ;;  %v4560_v31 = vld [vmem:[%s4284_s26 + $0x7c] sm:$0xf] }
  0x3e   : > { %v463_v55 = vrot.slane %v461_v40, 4  ;;  %v466_v58 = vrot.slane %v464_v41, 5  ;;  %v470_v59 = vshll.u32 %v4519_v36, 16  ;;  %v4535_v60 = vcombine.low %v425_v12, %v435_v50 }
  0x3f   : > { %v449_v63 = vsel %vm4331_vm4, %v444_v44, %v448_v61  ;;  %v454_v17 = vrot.slane %v453_v49, 4  ;;  %v1214_v22 = vsel %vm4512_vm7, %v1212_v18, %v1213_v45  ;;  %v474_v35 = vshrl.u32 %v4519_v36, 16  ;;  %v4565_v49 = vld [vmem:[%s4284_s26 + $0x80] sm:$0x1] }
  0x40   : > { %5390 = vst [vmem:[#allocation9_spill] sm:$0xff] %v4535_v60  ;;  %v4546_v21 = vcombine.low %v1211_v16, %v1214_v22  ;;  %v467_v29 = vor.u32 %v466_v58, %v463_v55  ;;  %v472_v30 = vrot.slane %v470_v59, 5  ;;  %3767 = vmatprep.mubr.msk.bf16.mxu0 %vm676_vm3, %v4535_v60  ;;  %3632 = vmatmul.mubr.msk.bf16.gmra.mrb[12].mxu1 %vm676_vm3, %v4535_v60  ;;  %v480_v45 = vshll.u32 %v4532_v51, 16  ;;  %v4663_v60 = vld [vmem:[%s4284_s26 + $0x9c] sm:$0xf] }
  0x41   : > { %v459_v19 = vsel %vm4331_vm4, %v454_v17, %v458_v37  ;;  %v3247_v61 = vrot.slane %v4327_v33, 9  ;;  %v1219_v12 = vrot.slane %v1217_v1, 4  ;;  %v476_v44 = vrot.slane %v474_v35, 4 }
  0x42   : > { %5391 = vst [vmem:[#allocation10_spill] sm:$0xff] %v4546_v21  ;;  %v4562_v40 = vcombine.low %v449_v63, %v459_v19  ;;  %v468_v41 = vrot.slane %v467_v29, 4  ;;  %v485_v16 = vshrl.u32 %v4544_v56, 16  ;;  %v482_v18 = vrot.slane %v480_v45, 5  ;;  %v4591_v29 = vld [vmem:[%s4284_s26 + $0x84] sm:$0xf] }
  0x43   : > { %v1218_v37 = vsel %vm4512_vm7, %v3247_v61, %v1217_v1  ;;  %v1221_v50 = vsel %vm4512_vm7, %v1219_v12, %v1220_v2  ;;  %v488_v55 = vshll.u32 %v4544_v56, 16  ;;  %v477_v59 = vor.u32 %v476_v44, %v472_v30 }
  0x44   : > { %5392 = vst [vmem:[#allocation11_spill] sm:$0xff] %v4562_v40  ;;  %3768 = vmatmul.mubr.msk.bf16.gmra.mrb[12].mxu0 %vm676_vm3, %v4562_v40  ;;  %3635 = vmatprep.mubr.msk.bf16.mxu1 %vm676_vm3, %v4562_v40  ;;  %v473_v58 = vsel %vm4331_vm4, %v468_v41, %v472_v30  ;;  %v4583_v63 = vcombine.low %v1218_v37, %v1221_v50  ;;  %v487_v1 = vrot.slane %v485_v16, 4  ;;  %v494_v2 = vshll.u32 %v4560_v31, 16  ;;  %v4597_v16 = vld [vmem:[%s4284_s26 + $0x88] sm:$0xf] }
  0x45   : > { %3789 = vmatprep.mubr.msk.bf16.mxu0 %vm676_vm3, %v4546_v21  ;;  %v490_v46 = vrot.slane %v488_v55, 5  ;;  %v498_v17 = vshrl.u32 %v4560_v31, 16  ;;  %v504_v22 = vshll.u32 %v4565_v49, 16  ;;  %v478_v35 = vrot.slane %v477_v59, 4 }
  0x46   : > { %5393 = vst [vmem:[#allocation12_spill] sm:$0xff] %v4583_v63  ;;  %v3248_v30 = vrot.slane %v4354_v57, 9  ;;  %v1224_v19 = vrot.slane %v4359_v62, 5  ;;  %v1227_v45 = vrot.slane %v4367_v4, 5  ;;  %v496_v12 = vrot.slane %v494_v2, 5 }
  0x47   : > { %v491_v61 = vor.u32 %v490_v46, %v487_v1  ;;  %v500_v41 = vrot.slane %v498_v17, 4  ;;  %v506_v44 = vrot.slane %v504_v22, 5  ;;  %v483_v37 = vsel %vm4331_vm4, %v478_v35, %v482_v18  ;;  %v4607_v1 = vld [vmem:[%s4284_s26 + $0x8c] sm:$0x1] }
  0x48   : > { %v1225_v50 = vsel %vm4512_vm7, %v3248_v30, %v1224_v19  ;;  %v1226_v55 = vrot.slane %v1224_v19, 4  ;;  %v509_v59 = vshrl.u32 %v4591_v29, 16  ;;  %v4604_v3 = vcombine.low %v473_v58, %v483_v37 }
  0x49   : > { %v492_v40 = vrot.slane %v491_v61, 4  ;;  %v501_v4 = vor.u32 %v500_v41, %v496_v12  ;;  %v512_v46 = vshll.u32 %v4591_v29, 16  ;;  %v518_v18 = vshll.u32 %v4597_v16, 16  ;;  %v4621_v61 = vld [vmem:[%s4284_s26 + $0x90] sm:$0xf] }
  0x4a   : > { %5394 = vst [vmem:[#allocation13_spill] sm:$0xff] %v4604_v3  ;;  %v1228_v2 = vsel %vm4512_vm7, %v1226_v55, %v1227_v45  ;;  %v511_v17 = vrot.slane %v509_v59, 4  ;;  %v522_v22 = vshrl.u32 %v4597_v16, 16  ;;  %3636 = vmatmul.mubr.msk.bf16.gmra.mrb[16].mxu1 %vm676_vm3, %v4604_v3  ;;  %v4626_v45 = vld [vmem:[%s5345_s1 + $0xe] sm:$0x3]  ;;  %v1231_v59 = vrot.slane %v4385_v28, 5 }
  0x4b   : > { %v497_v58 = vsel %vm4331_vm4, %v492_v40, %v496_v12  ;;  %v502_v35 = vrot.slane %v501_v4, 4  ;;  %v4618_v30 = vcombine.low %v1225_v50, %v1228_v2  ;;  %v514_v19 = vrot.slane %v512_v46, 5  ;;  %5396 = vst [vmem:[#allocation15_spill] sm:$0xff] %v4626_v45  ;;  %v4640_v46 = vld [vmem:[%s4284_s26 + $0x94] sm:$0xf] }
  0x4c   : > { %3790 = vmatmul.mubr.msk.bf16.vlgmr.msra.gmra.mrb[0].mxu0 %vm676_vm3, %v4583_v63  ;;  %v520_v41 = vrot.slane %v518_v18, 5  ;;  %v524_v37 = vrot.slane %v522_v22, 4  ;;  %v528_v40 = vshll.u32 %v4607_v1, 16  ;;  %v3249_v12 = vrot.slane %v4373_v14, 9  ;;  %v4645_v3 = vld [vmem:[%s4284_s26 + $0x98] sm:$0x1] }
  0x4d   : > { %5395 = vst [vmem:[#allocation14_spill] sm:$0xff] %v4618_v30  ;;  %3822 = vmatpush3.bf16.msra.mxu0 %v4319_v20  ;;  %v507_v50 = vsel %vm4331_vm4, %v502_v35, %v506_v44  ;;  %3793 = vmatprep.mubr.msk.bf16.mxu0 %vm676_vm3, %v4618_v30  ;;  %v515_v55 = vor.u32 %v514_v19, %v511_v17  ;;  %v1234_v4 = vrot.slane %v4392_v32, 5  ;;  %v533_v20 = vshrl.u32 %v4621_v61, 16 }
  0x4e   : > { %v4642_v2 = vcombine.low %v497_v58, %v507_v50  ;;  %v525_v18 = vor.u32 %v524_v37, %v520_v41  ;;  %v530_v22 = vrot.slane %v528_v40, 5  ;;  %4189 = vmatprep.subr.msk.bf16.mxu0 %vm725_vm0, %v4626_v45  ;;  %v1232_v17 = vsel %vm4512_vm7, %v3249_v12, %v1231_v59 }
  0x4f   : > { %v516_v44 = vrot.slane %v515_v55, 4  ;;  %v1233_v35 = vrot.slane %v1231_v59, 4  ;;  %v536_v32 = vshll.u32 %v4621_v61, 16  ;;  %v535_v19 = vrot.slane %v533_v20, 4 }
  0x50   : > { %5397 = vst [vmem:[#allocation16_spill] sm:$0xff] %v4642_v2  ;;  %3639 = vmatprep.mubr.msk.bf16.mxu1 %vm676_vm3, %v4642_v2  ;;  %v526_v58 = vrot.slane %v525_v18, 4  ;;  %v542_v37 = vshll.u32 %v4640_v46, 16  ;;  %v546_v40 = vshrl.u32 %v4640_v46, 16  ;;  %v552_v59 = vshll.u32 %v4645_v3, 16 }
  0x51   : > { %v521_v50 = vsel %vm4331_vm4, %v516_v44, %v520_v41  ;;  %v1235_v55 = vsel %vm4512_vm7, %v1233_v35, %v1234_v4  ;;  %v538_v12 = vrot.slane %v536_v32, 5  ;;  %v3250_v4 = vrot.slane %v4400_v48, 9 }
  0x52   : > { %v531_v2 = vsel %vm4331_vm4, %v526_v58, %v530_v22  ;;  %v4667_v18 = vcombine.low %v1232_v17, %v1235_v55  ;;  %v544_v20 = vrot.slane %v542_v37, 5  ;;  %v548_v0 = vrot.slane %v546_v40, 4  ;;  %v4683_v58 = vld [vmem:[%s4284_s26 + $0xa4] sm:$0x1] }
  0x53   : > { %v4672_v43 = vcombine.low %v521_v50, %v531_v2  ;;  %v539_v41 = vor.u32 %v538_v12, %v535_v19  ;;  %v554_v44 = vrot.slane %v552_v59, 5  ;;  %v1238_v32 = vrot.slane %v4408_v52, 5 }
  0x54   : > { %5398 = vst [vmem:[#allocation17_spill] sm:$0xff] %v4667_v18  ;;  %3794 = vmatmul.mubr.msk.bf16.gmra.mrb[4].mxu0 %vm676_vm3, %v4667_v18  ;;  %v549_v35 = vor.u32 %v548_v0, %v544_v20  ;;  %v1241_v22 = vrot.slane %v4420_v5, 5  ;;  %v557_v17 = vshrl.u32 %v4663_v60, 16  ;;  %v560_v19 = vshll.u32 %v4663_v60, 16 }
  0x55   : > { %5399 = vst [vmem:[#allocation18_spill] sm:$0xff] %v4672_v43  ;;  %3640 = vmatmul.mubr.msk.bf16.gmra.mrb[20].mxu1 %vm676_vm3, %v4672_v43  ;;  %v540_v2 = vrot.slane %v539_v41, 4  ;;  %v566_v37 = vshll.u32 %v4670_v7, 16  ;;  %v570_v0 = vshrl.u32 %v4670_v7, 16  ;;  %v1239_v5 = vsel %vm4512_vm7, %v3250_v4, %v1238_v32 }
  0x56   : > { %v550_v40 = vrot.slane %v549_v35, 4  ;;  %v1240_v50 = vrot.slane %v1238_v32, 4  ;;  %v559_v55 = vrot.slane %v557_v17, 4  ;;  %v562_v59 = vrot.slane %v560_v19, 5  ;;  %v4702_v32 = vld [vmem:[%s4284_s26 + $0xac] sm:$0xf] }
  0x57   : > { %v545_v12 = vsel %vm4331_vm4, %v540_v2, %v544_v20  ;;  %v568_v41 = vrot.slane %v566_v37, 5  ;;  %v572_v43 = vrot.slane %v570_v0, 4  ;;  %v576_v35 = vshll.u32 %v4683_v58, 16 }
  0x58   : > { %v555_v53 = vsel %vm4331_vm4, %v550_v40, %v554_v44  ;;  %v1242_v18 = vsel %vm4512_vm7, %v1240_v50, %v1241_v22  ;;  %v3251_v4 = vrot.slane %v4425_v13, 9  ;;  %v563_v2 = vor.u32 %v562_v59, %v559_v55 }
  0x59   : > { %v4704_v17 = vcombine.low %v545_v12, %v555_v53  ;;  %v4706_v20 = vcombine.low %v1239_v5, %v1242_v18  ;;  %v573_v19 = vor.u32 %v572_v43, %v568_v41  ;;  %v578_v37 = vrot.slane %v576_v35, 5  ;;  %v4716_v18 = vld [vmem:[%s4284_s26 + $0xb0] sm:$0x1] }
  0x5a   : > { %v1245_v0 = vrot.slane %v4432_v24, 5  ;;  %v1248_v44 = vrot.slane %v4449_v8, 5  ;;  %v581_v22 = vshrl.u32 %v4693_v25, 16  ;;  %v564_v53 = vrot.slane %v563_v2, 4 }
  0x5b   : > { %5400 = vst [vmem:[#allocation19_spill] sm:$0xff] %v4704_v17  ;;  %5401 = vst [vmem:[#allocation20_spill] sm:$0xff] %v4706_v20  ;;  %3643 = vmatprep.mubr.msk.bf16.mxu1 %vm676_vm3, %v4704_v17  ;;  %3797 = vmatprep.mubr.msk.bf16.mxu0 %vm676_vm3, %v4706_v20  ;;  %v574_v40 = vrot.slane %v573_v19, 4  ;;  %v584_v43 = vshll.u32 %v4693_v25, 16  ;;  %v590_v5 = vshll.u32 %v4702_v32, 16  ;;  %v594_v12 = vshrl.u32 %v4702_v32, 16 }
  0x5c   : > { %v1246_v8 = vsel %vm4512_vm7, %v3251_v4, %v1245_v0  ;;  %v1247_v50 = vrot.slane %v1245_v0, 4  ;;  %v583_v55 = vrot.slane %v581_v22, 4  ;;  %v569_v59 = vsel %vm4331_vm4, %v564_v53, %v568_v41  ;;  %v4728_v17 = vld [vmem:[%s4284_s26 + $0xb4] sm:$0xf]  ;;  %v4740_v53 = vld [vmem:[%s4284_s26 + $0xb8] sm:$0xf] }
  0x5d   : > { %v579_v35 = vsel %vm4331_vm4, %v574_v40, %v578_v37  ;;  %v586_v2 = vrot.slane %v584_v43, 5  ;;  %v592_v19 = vrot.slane %v590_v5, 5  ;;  %v596_v0 = vrot.slane %v594_v12, 4 }
  0x5e   : > { %v4730_v20 = vcombine.low %v569_v59, %v579_v35  ;;  %v1249_v4 = vsel %vm4512_vm7, %v1247_v50, %v1248_v44  ;;  %v600_v22 = vshll.u32 %v4716_v18, 16  ;;  %v3252_v41 = vrot.slane %v4454_v42, 9  ;;  %v4746_v44 = vld [vmem:[%s4284_s26 + $0xbc] sm:$0x1] }
  0x5f   : > { %v4735_v30 = vcombine.low %v1246_v8, %v1249_v4  ;;  %v587_v63 = vor.u32 %v586_v2, %v583_v55  ;;  %v1252_v37 = vrot.slane %v4459_v6, 5  ;;  %v597_v40 = vor.u32 %v596_v0, %v592_v19 }
  0x60   : > { %5402 = vst [vmem:[#allocation21_spill] sm:$0xff] %v4730_v20  ;;  %3644 = vmatmul.mubr.msk.bf16.gmra.mrb[24].mxu1 %vm676_vm3, %v4730_v20  ;;  %v602_v43 = vrot.slane %v600_v22, 5  ;;  %v1255_v5 = vrot.slane %v4472_v11, 5  ;;  %v605_v50 = vshrl.u32 %v4728_v17, 16  ;;  %v608_v59 = vshll.u32 %v4728_v17, 16 }
  0x61   : > { %5403 = vst [vmem:[#allocation22_spill] sm:$0xff] %v4735_v30  ;;  %3798 = vmatmul.mubr.msk.bf16.gmra.mrb[8].mxu0 %vm676_vm3, %v4735_v30  ;;  %v588_v8 = vrot.slane %v587_v63, 4  ;;  %v1253_v55 = vsel %vm4512_vm7, %v3252_v41, %v1252_v37  ;;  %v1254_v12 = vrot.slane %v1252_v37, 4  ;;  %v598_v35 = vrot.slane %v597_v40, 4 }
  0x62   : > { %v607_v2 = vrot.slane %v605_v50, 4  ;;  %v614_v4 = vshll.u32 %v4740_v53, 16  ;;  %v618_v11 = vshrl.u32 %v4740_v53, 16  ;;  %v610_v20 = vrot.slane %v608_v59, 5 }
  0x63   : > { %v593_v0 = vsel %vm4331_vm4, %v588_v8, %v592_v19  ;;  %v1256_v22 = vsel %vm4512_vm7, %v1254_v12, %v1255_v5  ;;  %v624_v63 = vshll.u32 %v4746_v44, 16  ;;  %v603_v41 = vsel %vm4331_vm4, %v598_v35, %v602_v43 }
  0x64   : > { %v4763_v37 = vcombine.low %v1253_v55, %v1256_v22  ;;  %v616_v40 = vrot.slane %v614_v4, 5  ;;  %v620_v50 = vrot.slane %v618_v11, 4  ;;  %v4765_v30 = vcombine.low %v593_v0, %v603_v41 }
  0x65   : > { %v611_v21 = vor.u32 %v610_v20, %v607_v2  ;;  %v626_v45 = vrot.slane %v624_v63, 5  ;;  %v3253_v42 = vrot.slane %v4476_v15, 9  ;;  %v1259_v5 = vrot.slane %v4481_v27, 5 }
  0x66   : > { %3801 = vmatprep.mubr.msk.bf16.mxu0 %vm676_vm3, %v4763_v37  ;;  %v621_v19 = vor.u32 %v620_v50, %v616_v40  ;;  %v1262_v8 = vrot.slane %v4495_v47, 5  ;;  %v3254_v43 = vrot.slane %v4503_v54, 9  ;;  %3647 = vmatprep.mubr.msk.bf16.mxu1 %vm676_vm3, %v4765_v30  ;;  %v3213_v20 = vcombine.low %v4298_v9, %v4301_v10 }
  0x67   : > { %v612_v55 = vrot.slane %v611_v21, 4  ;;  %v1266_v12 = vrot.slane %v4519_v36, 5  ;;  %v1269_v59 = vrot.slane %v4532_v51, 5  ;;  %v1260_v2 = vsel %vm4512_vm7, %v3253_v42, %v1259_v5 }
  0x68   : > { %v622_v35 = vrot.slane %v621_v19, 4  ;;  %v1261_v4 = vrot.slane %v1259_v5, 4  ;;  %v1273_v47 = vrot.slane %v4560_v31, 5  ;;  %v3255_v9 = vrot.slane %v4544_v56, 9 }
  0x69   : > { %v617_v11 = vsel %vm4331_vm4, %v612_v55, %v616_v40  ;;  %v1267_v21 = vsel %vm4512_vm7, %v3254_v43, %v1266_v12  ;;  %v1268_v0 = vrot.slane %v1266_v12, 4  ;;  %v1276_v42 = vrot.slane %v4565_v49, 5 }
  0x6a   : > { %v627_v10 = vsel %vm4331_vm4, %v622_v35, %v626_v45  ;;  %v1263_v51 = vsel %vm4512_vm7, %v1261_v4, %v1262_v8  ;;  %v1275_v22 = vrot.slane %v1273_v47, 4  ;;  %v3256_v19 = vrot.slane %v4591_v29, 9 }
  0x6b   : > { %v4792_v63 = vcombine.low %v617_v11, %v627_v10  ;;  %v4794_v41 = vcombine.low %v1260_v2, %v1263_v51  ;;  %v1270_v40 = vsel %vm4512_vm7, %v1268_v0, %v1269_v59  ;;  %v1280_v5 = vrot.slane %v4597_v16, 5 }
  0x6c   : > { %v4798_v50 = vcombine.low %v1267_v21, %v1270_v40  ;;  %v1283_v49 = vrot.slane %v4607_v1, 5  ;;  %v1274_v45 = vsel %vm4512_vm7, %v3255_v9, %v1273_v47  ;;  %v1277_v8 = vsel %vm4512_vm7, %v1275_v22, %v1276_v42 }
  0x6d   : > { %3648 = vmatmul.mubr.msk.bf16.gmra.mrb[28].mxu1 %vm676_vm3, %v4792_v63  ;;  %3802 = vmatmul.mubr.msk.bf16.gmra.mrb[12].mxu0 %vm676_vm3, %v4794_v41  ;;  %v1282_v43 = vrot.slane %v1280_v5, 4  ;;  %v1287_v55 = vrot.slane %v4640_v46, 5  ;;  %v1294_v12 = vrot.slane %v4670_v7, 5  ;;  %v1281_v59 = vsel %vm4512_vm7, %v3256_v19, %v1280_v5 }
  0x6e   : > { %3653 = vmatprep.mubr.msk.bf16.mxu1 %vm676_vm3, %v3213_v20  ;;  %3805 = vmatprep.mubr.msk.bf16.mxu0 %vm676_vm3, %v4798_v50  ;;  %v4820_v20 = vcombine.low %v1274_v45, %v1277_v8  ;;  %v3257_v35 = vrot.slane %v4621_v61, 9  ;;  %v1290_v4 = vrot.slane %v4645_v3, 5  ;;  %v4826_v47 = vcombine.low %v4327_v33, %v4340_v39  ;;  %v4838_v3 = vld [vmem:[%s5345_s1 + $0x6] sm:$0x3] }
  0x6f   : > { %v1284_v1 = vsel %vm4512_vm7, %v1282_v43, %v1283_v49  ;;  %v1289_v2 = vrot.slane %v1287_v55, 4  ;;  %v3258_v11 = vrot.slane %v4663_v60, 9  ;;  %v1410_v21 = vsel %vm725_vm0, %v4380_v23, 0 }
  0x70   : > { %v4831_v0 = vcombine.low %v1281_v59, %v1284_v1  ;;  %v1296_v9 = vrot.slane %v1294_v12, 4  ;;  %v1297_v10 = vrot.slane %v4683_v58, 5  ;;  %v1301_v51 = vrot.slane %v4702_v32, 5 }
  0x71   : > { %v1288_v33 = vsel %vm4512_vm7, %v3257_v35, %v1287_v55  ;;  %v1291_v39 = vsel %vm4512_vm7, %v1289_v2, %v1290_v4  ;;  %v4852_v23 = vcombine.low %v4354_v57, %v4359_v62  ;;  %v1295_v58 = vsel %vm4512_vm7, %v3258_v11, %v1294_v12 }
  0x72   : > { %v4858_v22 = vcombine.low %v4476_v15, %v4481_v27  ;;  %v1298_v42 = vsel %vm4512_vm7, %v1296_v9, %v1297_v10  ;;  %v3259_v40 = vrot.slane %v4693_v25, 9  ;;  %v1308_v19 = vrot.slane %v4740_v53, 5 }
  0x73   : > { %v4868_v57 = vcombine.low %v4503_v54, %v4519_v36  ;;  %v4872_v62 = vcombine.low %v1288_v33, %v1291_v39  ;;  %v1303_v15 = vrot.slane %v1301_v51, 4  ;;  %v1304_v27 = vrot.slane %v4716_v18, 5  ;;  %v228_v18 = vld [vmem:[%s4284_s26 + $0xc8] sm:$0x1] }
  0x74   : > { %v4877_v5 = vcombine.low %v4544_v56, %v4560_v31  ;;  %v4881_v49 = vcombine.low %v4591_v29, %v4597_v16  ;;  %v4885_v54 = vcombine.low %v4621_v61, %v4640_v46  ;;  %v4889_v36 = vcombine.low %v4663_v60, %v4670_v7  ;;  %v4908_v61 = vld [vmem:[%s4284_s26 + $0xc4] sm:$0xf] }
  0x75   : > { %3654 = vmatmul.mubr.msk.bf16.vlgmr.msra.gmra.mrb[0].mxu1 %vm676_vm3, %v4337_v38  ;;  %3806 = vmatmul.mubr.msk.bf16.gmra.mrb[16].mxu0 %vm676_vm3, %v4820_v20  ;;  %v4893_v45 = vcombine.low %v4693_v25, %v4702_v32  ;;  %v4897_v56 = vcombine.low %v4373_v14, %v4385_v28  ;;  %v4899_v31 = vcombine.low %v1295_v58, %v1298_v42  ;;  %v3260_v16 = vrot.slane %v4728_v17, 9  ;;  %v5404_v42 = vld [vmem:[#allocation5_spill] sm:$0xff] }
  0x76   : > { %3686 = vmatpush3.bf16.msra.mxu1 %v1410_v21  ;;  %3657 = vmatprep.mubr.msk.bf16.mxu1 %vm676_vm3, %v4826_v47  ;;  %v4903_v29 = vcombine.low %v4728_v17, %v4740_v53  ;;  %v1310_v7 = vrot.slane %v1308_v19, 4  ;;  %v1311_v60 = vrot.slane %v4746_v44, 5  ;;  %v1302_v14 = vsel %vm4512_vm7, %v3259_v40, %v1301_v51  ;;  %v4928_v17 = vld [vmem:[%s4284_s26 + $0xc0] sm:$0xf] }
  0x77   : > { %3809 = vmatprep.mubr.msk.bf16.mxu0 %vm676_vm3, %v4831_v0  ;;  %4184 = vmatprep.subr.msk.bf16.mxu1 %vm725_vm0, %v4838_v3  ;;  %v1305_v28 = vsel %vm4512_vm7, %v1303_v15, %v1304_v27  ;;  %v2038_v25 = vrot.slane %v4908_v61, 5  ;;  %v1309_v46 = vsel %vm4512_vm7, %v3260_v16, %v1308_v19  ;;  %v4933_v53 = vcombine.low %v4400_v48, %v4408_v52 }
  0x78   : > { %v1312_v32 = vsel %vm4512_vm7, %v1310_v7, %v1311_v60  ;;  %v4935_v44 = vcombine.low %v1302_v14, %v1305_v28  ;;  %v4939_v8 = vcombine.low %v4425_v13, %v4432_v24  ;;  %v1810_v43 = vshrl.u32 %v4928_v17, 16  ;;  %v240_v60 = vld [vmem:[%s5345_s1 + $0x10] sm:$0x3]  ;;  %v4218_v14 = vld [vmem:[%s4284_s26 + $0x4] sm:$0xf] }
  0x79   : > { %v1813_v55 = vshll.u32 %v4928_v17, 16  ;;  %v1819_v12 = vshll.u32 %v4908_v61, 16  ;;  %v1823_v59 = vshrl.u32 %v4908_v61, 16  ;;  %v4945_v1 = vcombine.low %v1309_v46, %v1312_v32  ;;  %v4220_v32 = vld [vmem:[%s4284_s26] sm:$0xf] }
  0x7a   : > { %v3327_v35 = vrot.slane %v4928_v17, 9  ;;  %v2040_v48 = vrot.slane %v2038_v25, 4  ;;  %v2041_v52 = vrot.slane %v228_v18, 5  ;;  %v1812_v2 = vrot.slane %v1810_v43, 4 }
  0x7b   : > { %v1815_v4 = vrot.slane %v1813_v55, 5  ;;  %v1821_v11 = vrot.slane %v1819_v12, 5  ;;  %v1825_v21 = vrot.slane %v1823_v59, 4  ;;  %v1829_v9 = vshll.u32 %v228_v18, 16 }
  0x7c   : > { %v2039_v10 = vsel %vm4512_vm7, %v3327_v35, %v2038_v25  ;;  %v2042_v51 = vsel %vm4512_vm7, %v2040_v48, %v2041_v52  ;;  %v4962_v40 = vcombine.low %v5404_v42, %v4459_v6  ;;  %v5405_v6 = vld [vmem:[#allocation15_spill] sm:$0xff]  ;;  %v1203_v28 = vrot.slane %v4218_v14, 5  ;;  %v5406_v48 = vld [vmem:[#allocation10_spill] sm:$0xff]  ;;  %v5407_v52 = vld [vmem:[#allocation12_spill] sm:$0xff] }
  0x7d   : > { %3658 = vmatmul.mubr.msk.bf16.gmra.mrb[4].mxu1 %vm676_vm3, %v4852_v23  ;;  %3810 = vmatmul.mubr.msk.bf16.gmra.mrb[20].mxu0 %vm676_vm3, %v4872_v62  ;;  %v1816_v13 = vor.u32 %v1815_v4, %v1812_v2  ;;  %v1826_v24 = vor.u32 %v1825_v21, %v1821_v11  ;;  %v1831_v58 = vrot.slane %v1829_v9, 5  ;;  %v4964_v19 = vcombine.low %v2039_v10, %v2042_v51  ;;  %v4219_v25 = vld [vmem:[%s4284_s26 + $0x8] sm:$0x1]  ;;  %v5409_v4 = vld [vmem:[#allocation17_spill] sm:$0xff]  ;;  %v5410_v21 = vld [vmem:[#allocation20_spill] sm:$0xff] }
  0x7e   : > { %3661 = vmatprep.mubr.msk.bf16.mxu1 %vm676_vm3, %v4897_v56  ;;  %3813 = vmatprep.mubr.msk.bf16.mxu0 %vm676_vm3, %v4899_v31  ;;  %v2480_v7 = vsel %vm725_vm0, %v5405_v6, 0  ;;  %v1206_v46 = vrot.slane %v4219_v25, 5  ;;  %v3245_v18 = vrot.slane %v4220_v32, 9  ;;  %v1205_v43 = vrot.slane %v1203_v28, 4  ;;  %v4221_v2 = vld [vmem:[%s5345_s1 + $0x8] sm:$0x3] }
  0x7f   : > { %v1817_v33 = vrot.slane %v1816_v13, 4  ;;  %v1827_v39 = vrot.slane %v1826_v24, 4  ;;  %v1614_v35 = vsel %vm725_vm0, %v4838_v3, 0  ;;  %v5408_v3 = vld [vmem:[#allocation14_spill] sm:$0xff]  ;;  %v5059_v24 = vld [vmem:[%s4284_s26 + $0xcc] sm:$0xf] }
  0x80   : > { %v1204_v55 = vsel %vm4512_vm7, %v3245_v18, %v1203_v28  ;;  %v1207_v12 = vsel %vm4512_vm7, %v1205_v43, %v1206_v46  ;;  %v5411_v13 = vld [vmem:[#allocation22_spill] sm:$0xff]  ;;  %v5062_v9 = vld [vmem:[%s4284_s26 + $0xd0] sm:$0xf]  ;;  %v2690_v10 = vsel %vm725_vm0, %v240_v60, 0  ;;  %v5417_v42 = vld [vmem:[#allocation9_spill] sm:$0xff]  ;;  %v2453_v14 = vshll.u32 %v5059_v24, 16 }
  0x81   : > { %v1822_v15 = vsel %vm4331_vm4, %v1817_v33, %v1821_v11  ;;  %v1832_v27 = vsel %vm4331_vm4, %v1827_v39, %v1831_v58  ;;  %v3261_v59 = vcombine.low %v1204_v55, %v1207_v12  ;;  %v5048_v11 = vcombine.low %v4928_v17, %v4908_v61  ;;  %v5412_v17 = vld [vmem:[#allocation3_spill] sm:$0xff]  ;;  %v5413_v51 = vld [vmem:[#allocation4_spill] sm:$0xff]  ;;  %v5414_v33 = vld [vmem:[#allocation6_spill] sm:$0xff] }
  0x82   : > { %v4970_v16 = vcombine.low %v1822_v15, %v1832_v27  ;;  %v3345_v61 = vcombine.low %v5059_v24, %v5062_v9  ;;  %v5415_v39 = vld [vmem:[#allocation7_spill] sm:$0xff]  ;;  %v5416_v58 = vld [vmem:[#allocation8_spill] sm:$0xff]  ;;  %v5419_v27 = vld [vmem:[#allocation13_spill] sm:$0xff]  ;;  %v2463_v28 = vshrl.u32 %v5062_v9, 16  ;;  %v2455_v32 = vrot.slane %v2453_v14, 5 }
  0x83   : > { %v5418_v15 = vld [vmem:[#allocation11_spill] sm:$0xff]  ;;  %v5420_v6 = vld [vmem:[#allocation16_spill] sm:$0xff]  ;;  %v5422_v25 = vld [vmem:[#allocation2_spill] sm:$0xff]  ;;  %v2678_v34 = vrot.slane %v5062_v9, 5 }
  0x84   : > { %v5423_v46 = vld [vmem:[#allocation19_spill] sm:$0xff]  ;;  %v2465_v43 = vrot.slane %v2463_v28, 4  ;;  %v231_v55 = vld [vmem:[%s4284_s26 + $0xd4] sm:$0x1]  ;;  %v5424_v12 = vld [vmem:[#allocation21_spill] sm:$0xff] }
  0x85   : > { %3662 = vmatmul.mubr.msk.bf16.gmra.mrb[8].mxu1 %vm676_vm3, %v4933_v53  ;;  %3814 = vmatmul.mubr.msk.bf16.gmra.mrb[24].mxu0 %vm676_vm3, %v4935_v44 }
  0x86   : > { %3665 = vmatprep.mubr.msk.bf16.mxu1 %vm676_vm3, %v4939_v8  ;;  %3817 = vmatprep.mubr.msk.bf16.mxu0 %vm676_vm3, %v4945_v1 }
  0x8d   : > { %3666 = vmatmul.mubr.msk.bf16.gmra.mrb[12].mxu1 %vm676_vm3, %v4962_v40  ;;  %3818 = vmatmul.mubr.msk.bf16.gmra.mrb[28].mxu0 %vm676_vm3, %v4964_v19 }
  0x8e   : > { %3669 = vmatprep.mubr.msk.bf16.mxu1 %vm676_vm3, %v4858_v22  ;;  %3823 = vmatprep.mubr.msk.bf16.mxu0 %vm676_vm3, %v4826_v47 }
  0x95   : > { %3670 = vmatmul.mubr.msk.bf16.gmra.mrb[16].mxu1 %vm676_vm3, %v4868_v57  ;;  %3824 = vmatmul.mubr.msk.bf16.vlgmr.msra.gmra.mrb[0].mxu0 %vm676_vm3, %v4852_v23 }
  0x96   : > { %3856 = vmatpush3.bf16.msra.mxu0 %v2480_v7  ;;  %3673 = vmatprep.mubr.msk.bf16.mxu1 %vm676_vm3, %v4877_v5  ;;  %v5421_v7 = vld [vmem:[#allocation18_spill] sm:$0xff] }
  0x97   : > { %3827 = vmatprep.mubr.msk.bf16.mxu0 %vm676_vm3, %v4897_v56  ;;  %4190 = vmatprep.subr.msk.bf16.mxu0 %vm725_vm0, %v240_v60  ;;  %v2450_v60 = vshrl.u32 %v5059_v24, 16 }
  0x9d   : > { %3674 = vmatmul.mubr.msk.bf16.gmra.mrb[20].mxu1 %vm676_vm3, %v4881_v49  ;;  %3828 = vmatmul.mubr.msk.bf16.gmra.mrb[4].mxu0 %vm676_vm3, %v4933_v53 }
  0x9e   : > { %3677 = vmatprep.mubr.msk.bf16.mxu1 %vm676_vm3, %v4885_v54  ;;  %3831 = vmatprep.mubr.msk.bf16.mxu0 %vm676_vm3, %v4939_v8 }
  0xa5   : > { %3678 = vmatmul.mubr.msk.bf16.gmra.mrb[24].mxu1 %vm676_vm3, %v4889_v36  ;;  %3832 = vmatmul.mubr.msk.bf16.gmra.mrb[8].mxu0 %vm676_vm3, %v4962_v40 }
  0xa6   : > { %3681 = vmatprep.mubr.msk.bf16.mxu1 %vm676_vm3, %v4893_v45  ;;  %3835 = vmatprep.mubr.msk.bf16.mxu0 %vm676_vm3, %v4858_v22 }
  0xad   : > { %3682 = vmatmul.mubr.msk.bf16.gmra.mrb[28].mxu1 %vm676_vm3, %v4903_v29  ;;  %3836 = vmatmul.mubr.msk.bf16.gmra.mrb[12].mxu0 %vm676_vm3, %v4868_v57 }
  0xae   : > { %3687 = vmatprep.mubr.msk.bf16.mxu1 %vm676_vm3, %v3261_v59  ;;  %3839 = vmatprep.mubr.msk.bf16.mxu0 %vm676_vm3, %v4877_v5 }
  0xb5   : > { %3688 = vmatmul.mubr.msk.bf16.vlgmr.msra.gmra.mrb[0].mxu1 %vm676_vm3, %v5406_v48  ;;  %3840 = vmatmul.mubr.msk.bf16.gmra.mrb[16].mxu0 %vm676_vm3, %v4881_v49 }
  0xb6   : > { %3720 = vmatpush3.bf16.msra.mxu1 %v1614_v35  ;;  %3691 = vmatprep.mubr.msk.bf16.mxu1 %vm676_vm3, %v5407_v52  ;;  %v2469_v35 = vshll.u32 %v231_v55, 16 }
  0xb7   : > { %3843 = vmatprep.mubr.msk.bf16.mxu0 %vm676_vm3, %v4885_v54  ;;  %4186 = vmatprep.subr.msk.bf16.mxu1 %vm725_vm0, %v4221_v2 }
  0xbd   : > { %3692 = vmatmul.mubr.msk.bf16.gmra.mrb[4].mxu1 %vm676_vm3, %v5408_v3  ;;  %3844 = vmatmul.mubr.msk.bf16.gmra.mrb[20].mxu0 %vm676_vm3, %v4889_v36 }
  0xbe   : > { %3695 = vmatprep.mubr.msk.bf16.mxu1 %vm676_vm3, %v5409_v4  ;;  %3847 = vmatprep.mubr.msk.bf16.mxu0 %vm676_vm3, %v4893_v45 }
  0xc5   : > { %3696 = vmatmul.mubr.msk.bf16.gmra.mrb[8].mxu1 %vm676_vm3, %v5410_v21  ;;  %3848 = vmatmul.mubr.msk.bf16.gmra.mrb[24].mxu0 %vm676_vm3, %v4903_v29 }
  0xc6   : > { %3699 = vmatprep.mubr.msk.bf16.mxu1 %vm676_vm3, %v5411_v13  ;;  %3851 = vmatprep.mubr.msk.bf16.mxu0 %vm676_vm3, %v5048_v11 }
  0xcd   : > { %3700 = vmatmul.mubr.msk.bf16.gmra.mrb[12].mxu1 %vm676_vm3, %v4763_v37  ;;  %3852 = vmatmul.mubr.msk.bf16.gmra.mrb[28].mxu0 %vm676_vm3, %v3345_v61  ;;  %v2471_v61 = vrot.slane %v2469_v35, 5 }
  0xce   : > { %3703 = vmatprep.mubr.msk.bf16.mxu1 %vm676_vm3, %v4794_v41  ;;  %3857 = vmatprep.mubr.msk.bf16.mxu0 %vm676_vm3, %v5412_v17 }
  0xd5   : > { %3704 = vmatmul.mubr.msk.bf16.gmra.mrb[16].mxu1 %vm676_vm3, %v4798_v50  ;;  %3858 = vmatmul.mubr.msk.bf16.vlgmr.msra.gmra.mrb[0].mxu0 %vm676_vm3, %v5413_v51 }
  0xd6   : > { %3890 = vmatpush3.bf16.msra.mxu0 %v2690_v10  ;;  %3707 = vmatprep.mubr.msk.bf16.mxu1 %vm676_vm3, %v4820_v20 }
  0xd7   : > { %3861 = vmatprep.mubr.msk.bf16.mxu0 %vm676_vm3, %v5414_v33 }
  0xdd   : > { %3708 = vmatmul.mubr.msk.bf16.gmra.mrb[20].mxu1 %vm676_vm3, %v4831_v0  ;;  %3862 = vmatmul.mubr.msk.bf16.gmra.mrb[4].mxu0 %vm676_vm3, %v5415_v39 }
  0xde   : > { %3711 = vmatprep.mubr.msk.bf16.mxu1 %vm676_vm3, %v4872_v62  ;;  %3865 = vmatprep.mubr.msk.bf16.mxu0 %vm676_vm3, %v5416_v58 }
  0xe5   : > { %3712 = vmatmul.mubr.msk.bf16.gmra.mrb[24].mxu1 %vm676_vm3, %v4899_v31  ;;  %3866 = vmatmul.mubr.msk.bf16.gmra.mrb[8].mxu0 %vm676_vm3, %v5417_v42 }
  0xe6   : > { %3715 = vmatprep.mubr.msk.bf16.mxu1 %vm676_vm3, %v4935_v44  ;;  %3869 = vmatprep.mubr.msk.bf16.mxu0 %vm676_vm3, %v5418_v15 }
  0xed   : > { %3716 = vmatmul.mubr.msk.bf16.gmra.mrb[28].mxu1 %vm676_vm3, %v4945_v1  ;;  %3870 = vmatmul.mubr.msk.bf16.gmra.mrb[12].mxu0 %vm676_vm3, %v5419_v27 }
  0xee   : > { %3721 = vmatprep.mubr.msk.bf16.mxu1 %vm676_vm3, %v4337_v38  ;;  %3873 = vmatprep.mubr.msk.bf16.mxu0 %vm676_vm3, %v5420_v6  ;;  %v2459_v38 = vshll.u32 %v5062_v9, 16 }
  0xf0   : > { %v2461_v18 = vrot.slane %v2459_v38, 5 }
  0xf2   : > { %v2466_v59 = vor.u32 %v2465_v43, %v2461_v18 }
  0xf4   : > { %v2467_v2 = vrot.slane %v2466_v59, 4 }
  0xf5   : > { %3722 = vmatmul.mubr.msk.bf16.vlgmr.msra.gmra.mrb[0].mxu1 %vm676_vm3, %v4826_v47  ;;  %3874 = vmatmul.mubr.msk.bf16.gmra.mrb[16].mxu0 %vm676_vm3, %v5421_v7  ;;  %v2452_v47 = vrot.slane %v2450_v60, 4 }
  0xf6   : > { %3924 = vmatpush3.bf16.msra.mxu1 %v5422_v25  ;;  %3725 = vmatprep.mubr.msk.bf16.mxu1 %vm676_vm3, %v4852_v23 }
  0xf7   : > { %3877 = vmatprep.mubr.msk.bf16.mxu0 %vm676_vm3, %v5423_v46  ;;  %v2456_v23 = vor.u32 %v2455_v32, %v2452_v47 }
  0xf9   : > { %v2457_v48 = vrot.slane %v2456_v23, 4 }
  0xfd   : > { %3726 = vmatmul.mubr.msk.bf16.gmra.mrb[4].mxu1 %vm676_vm3, %v4897_v56  ;;  %3878 = vmatmul.mubr.msk.bf16.gmra.mrb[20].mxu0 %vm676_vm3, %v5424_v12  ;;  %v2462_v56 = vsel %vm4331_vm4, %v2457_v48, %v2461_v18 }
  0xfe   : > { %3729 = vmatprep.mubr.msk.bf16.mxu1 %vm676_vm3, %v4933_v53  ;;  %3881 = vmatprep.mubr.msk.bf16.mxu0 %vm676_vm3, %v4765_v30  ;;  %v2472_v53 = vsel %vm4331_vm4, %v2467_v2, %v2471_v61 }
  0xff   : > { %v3362_v17 = vcombine.low %v2462_v56, %v2472_v53 }
 0x105   : > { %3730 = vmatmul.mubr.msk.bf16.gmra.mrb[8].mxu1 %vm676_vm3, %v4939_v8  ;;  %3882 = vmatmul.mubr.msk.bf16.gmra.mrb[24].mxu0 %vm676_vm3, %v4792_v63 }
 0x106   : > { %3733 = vmatprep.mubr.msk.bf16.mxu1 %vm676_vm3, %v4962_v40  ;;  %3885 = vmatprep.mubr.msk.bf16.mxu0 %vm676_vm3, %v4970_v16 }
 0x10d   : > { %3734 = vmatmul.mubr.msk.bf16.gmra.mrb[12].mxu1 %vm676_vm3, %v4858_v22  ;;  %3886 = vmatmul.mubr.msk.bf16.gmra.mrb[28].mxu0 %vm676_vm3, %v3362_v17 }
 0x10e   : > { %3737 = vmatprep.mubr.msk.bf16.mxu1 %vm676_vm3, %v4868_v57  ;;  %3891 = vmatprep.mubr.msk.bf16.mxu0 %vm676_vm3, %v5407_v52 }
 0x115   : > { %3738 = vmatmul.mubr.msk.bf16.gmra.mrb[16].mxu1 %vm676_vm3, %v4877_v5  ;;  %3892 = vmatmul.mubr.msk.bf16.vlgmr.msra.gmra.mrb[0].mxu0 %vm676_vm3, %v5408_v3 }
 0x116   : > { %3741 = vmatprep.mubr.msk.bf16.mxu1 %vm676_vm3, %v4881_v49  ;;  %3895 = vmatprep.mubr.msk.bf16.mxu0 %vm676_vm3, %v5409_v4 }
 0x11d   : > { %3742 = vmatmul.mubr.msk.bf16.gmra.mrb[20].mxu1 %vm676_vm3, %v4885_v54  ;;  %3896 = vmatmul.mubr.msk.bf16.gmra.mrb[4].mxu0 %vm676_vm3, %v5410_v21 }
 0x11e   : > { %3745 = vmatprep.mubr.msk.bf16.mxu1 %vm676_vm3, %v4889_v36  ;;  %3899 = vmatprep.mubr.msk.bf16.mxu0 %vm676_vm3, %v5411_v13 }
 0x125   : > { %3746 = vmatmul.mubr.msk.bf16.gmra.mrb[24].mxu1 %vm676_vm3, %v4893_v45  ;;  %3900 = vmatmul.mubr.msk.bf16.gmra.mrb[8].mxu0 %vm676_vm3, %v4763_v37  ;;  %v3379_v37 = vrot.slane %v5059_v24, 9 }
 0x126   : > { %3749 = vmatprep.mubr.msk.bf16.mxu1 %vm676_vm3, %v4903_v29  ;;  %3903 = vmatprep.mubr.msk.bf16.mxu0 %vm676_vm3, %v4794_v41  ;;  %v2680_v41 = vrot.slane %v2678_v34, 4 }
 0x12d   : > { %3750 = vmatmul.mubr.msk.bf16.gmra.mrb[28].mxu1 %vm676_vm3, %v5048_v11  ;;  %3904 = vmatmul.mubr.msk.bf16.gmra.mrb[12].mxu0 %vm676_vm3, %v4798_v50  ;;  %v2681_v50 = vrot.slane %v231_v55, 5 }
 0x12e   : > { %3771 = vmatprep.mubr.msk.bf16.mxu1 %vm676_vm3, %v5419_v27  ;;  %3907 = vmatprep.mubr.msk.bf16.mxu0 %vm676_vm3, %v4820_v20  ;;  %v2679_v20 = vsel %vm4512_vm7, %v3379_v37, %v2678_v34 }
 0x135   : > { %3772 = vmatmul.mubr.msk.bf16.vlgmr.msra.gmra.mrb[16].mxu1 %vm676_vm3, %v5420_v6  ;;  %3908 = vmatmul.mubr.msk.bf16.gmra.mrb[16].mxu0 %vm676_vm3, %v4831_v0  ;;  %v2682_v0 = vsel %vm4512_vm7, %v2680_v41, %v2681_v50 }
 0x136   : > { %3775 = vmatprep.mubr.msk.bf16.mxu1 %vm676_vm3, %v5421_v7  ;;  %3911 = vmatprep.mubr.msk.bf16.mxu0 %vm676_vm3, %v4872_v62  ;;  %v3380_v22 = vcombine.low %v2679_v20, %v2682_v0 }
 0x13d   : > { %3776 = vmatmul.mubr.msk.bf16.gmra.mrb[20].mxu1 %vm676_vm3, %v5423_v46  ;;  %3912 = vmatmul.mubr.msk.bf16.gmra.mrb[20].mxu0 %vm676_vm3, %v4899_v31 }
 0x13e   : > { %3779 = vmatprep.mubr.msk.bf16.mxu1 %vm676_vm3, %v5424_v12  ;;  %3915 = vmatprep.mubr.msk.bf16.mxu0 %vm676_vm3, %v4935_v44 }
 0x145   : > { %3780 = vmatmul.mubr.msk.bf16.gmra.mrb[24].mxu1 %vm676_vm3, %v4765_v30  ;;  %3916 = vmatmul.mubr.msk.bf16.gmra.mrb[24].mxu0 %vm676_vm3, %v4945_v1 }
 0x146   : > { %3783 = vmatprep.mubr.msk.bf16.mxu1 %vm676_vm3, %v4792_v63  ;;  %3919 = vmatprep.mubr.msk.bf16.mxu0 %vm676_vm3, %v4964_v19 }
 0x14d   : > { %3784 = vmatmul.mubr.msk.bf16.gmra.mrb[28].mxu1 %vm676_vm3, %v4970_v16  ;;  %3920 = vmatmul.mubr.msk.bf16.gmra.mrb[28].mxu0 %vm676_vm3, %v3380_v22  ;;  %v5231_v16 = vld [vmem:[%s5346_s2] ss:$0 sm:$0xff] }
 0x1c8   : > { %v3723_v30 = vpop.f32.mrb[0].mxu1 }
 0x1c9   : > { %v1650_v57 = vpop.f32.mrb[1].mxu1 }
 0x1ca   : > { %v3724_v62 = vpop.f32.mrb[2].mxu1 }
 0x1cb   : > { %v1653_v63 = vpop.f32.mrb[3].mxu1 }
 0x1d0   : > { %v3727_v5 = vpop.f32.mrb[4].mxu1 }
 0x1d1   : > { %v1666_v49 = vpop.f32.mrb[5].mxu1 }
 0x1d2   : > { %v3728_v54 = vpop.f32.mrb[6].mxu1 }
 0x1d3   : > { %v1669_v36 = vpop.f32.mrb[7].mxu1 }
 0x1d8   : > { %v3731_v45 = vpop.f32.mrb[8].mxu1 }
 0x1d9   : > { %v5212_v31 = vpop.f32.mrb[9].mxu1 }
 0x1da   : > { %v5214_v26 = vpop.f32.mrb[10].mxu1 }
 0x1db   : > { %v5216_v29 = vpop.f32.mrb[11].mxu1 }
 0x1e0   : > { %v5218_v44 = vpop.f32.mrb[12].mxu1 }
 0x1e1   : > { %v5222_v8 = vpop.f32.mrb[13].mxu1 }
 0x1e2   : > { %v5224_v1 = vpop.f32.mrb[14].mxu1 }
 0x1e3   : > { %v5226_v40 = vpop.f32.mrb[15].mxu1 }
 0x1e8   : > { %v3893_v19 = vpop.f32.mrb[0].mxu0 }
 0x1e9   : > { %v3925_v52 = vadd.f32 %v3893_v19, %v3723_v30  ;;  %v2726_v3 = vpop.f32.mrb[1].mxu0 }
 0x1ea   : > { %v3926_v4 = vadd.f32 %v2726_v3, %v1650_v57  ;;  %v3894_v11 = vpop.f32.mrb[2].mxu0 }
 0x1eb   : > { %v2894_v21 = vadd.f32 %v3925_v52, %v5231_v16  ;;  %v3927_v13 = vadd.f32 %v3894_v11, %v3724_v62  ;;  %v2729_v24 = vpop.f32.mrb[3].mxu0 }
 0x1ec   : > { %v2892_v9 = vadd.f32 %v3926_v4, %v5231_v16  ;;  %v3928_v10 = vadd.f32 %v2729_v24, %v1653_v63 }
 0x1ed   : > { %v2926_v51 = vmax.f32 %v2894_v21, 0.0  ;;  %v2895_v33 = vadd.f32 %v3927_v13, %v5231_v16 }
 0x1ee   : > { %v2924_v39 = vmax.f32 %v2892_v9, 0.0  ;;  %v2893_v58 = vadd.f32 %v3928_v10, %v5231_v16 }
 0x1ef   : > { %v3434_v42 = vpack.c.bf16 %v2926_v51, %v2926_v51  ;;  %v2927_v15 = vmax.f32 %v2895_v33, 0.0 }
 0x1f0   : > { %v3432_v27 = vpack.c.bf16 %v2924_v39, %v2924_v39  ;;  %v2925_v6 = vmax.f32 %v2893_v58, 0.0  ;;  %v3897_v7 = vpop.f32.mrb[4].mxu0 }
 0x1f1   : > { %3087 = vst.msk [vmem:[%s5239_s19 + $0x8] sm:$0xf] %vm3084_vm8, %v3434_v42  ;;  %v3435_v60 = vpack.c.bf16 %v2927_v15, %v2927_v15  ;;  %v3929_v14 = vadd.f32 %v3897_v7, %v3727_v5  ;;  %v2742_v28 = vpop.f32.mrb[5].mxu0 }
 0x1f2   : > { %3085 = vst.msk [vmem:[%s5239_s19] sm:$0xf] %vm3084_vm8, %v3432_v27  ;;  %v3433_v25 = vpack.c.bf16 %v2925_v6, %v2925_v6  ;;  %v3930_v38 = vadd.f32 %v2742_v28, %v1666_v49  ;;  %v3898_v46 = vpop.f32.mrb[6].mxu0 }
 0x1f3   : > { %3088 = vst.msk [vmem:[%s5239_s19 + $0xc] sm:$0xf] %vm3084_vm8, %v3435_v60  ;;  %v2898_v47 = vadd.f32 %v3929_v14, %v5231_v16  ;;  %v3931_v32 = vadd.f32 %v3898_v46, %v3728_v54  ;;  %v2745_v18 = vpop.f32.mrb[7].mxu0 }
 0x1f4   : > { %3086 = vst.msk [vmem:[%s5239_s19 + $0x4] sm:$0xf] %vm3084_vm8, %v3433_v25  ;;  %v2896_v43 = vadd.f32 %v3930_v38, %v5231_v16  ;;  %v3932_v55 = vadd.f32 %v2745_v18, %v1669_v36 }
 0x1f5   : > { %v2930_v12 = vmax.f32 %v2898_v47, 0.0  ;;  %v2899_v23 = vadd.f32 %v3931_v32, %v5231_v16 }
 0x1f6   : > { %v2928_v59 = vmax.f32 %v2896_v43, 0.0  ;;  %v2897_v35 = vadd.f32 %v3932_v55, %v5231_v16 }
 0x1f7   : > { %v3438_v48 = vpack.c.bf16 %v2930_v12, %v2930_v12  ;;  %v2931_v2 = vmax.f32 %v2899_v23, 0.0 }
 0x1f8   : > { %v3436_v61 = vpack.c.bf16 %v2928_v59, %v2928_v59  ;;  %v2929_v56 = vmax.f32 %v2897_v35, 0.0  ;;  %v3901_v53 = vpop.f32.mrb[8].mxu0 }
 0x1f9   : > { %3091 = vst.msk [vmem:[%s5239_s19 + $0x18] sm:$0xf] %vm3084_vm8, %v3438_v48  ;;  %v3439_v17 = vpack.c.bf16 %v2931_v2, %v2931_v2  ;;  %v3933_v34 = vadd.f32 %v3901_v53, %v3731_v45  ;;  %v2758_v37 = vpop.f32.mrb[9].mxu0 }
 0x1fa   : > { %3089 = vst.msk [vmem:[%s5239_s19 + $0x10] sm:$0xf] %vm3084_vm8, %v3436_v61  ;;  %v3437_v41 = vpack.c.bf16 %v2929_v56, %v2929_v56  ;;  %v3934_v50 = vadd.f32 %v2758_v37, %v5212_v31  ;;  %v3902_v20 = vpop.f32.mrb[10].mxu0 }
 0x1fb   : > { %3092 = vst.msk [vmem:[%s5239_s19 + $0x1c] sm:$0xf] %vm3084_vm8, %v3439_v17  ;;  %v2902_v0 = vadd.f32 %v3933_v34, %v5231_v16  ;;  %v3935_v22 = vadd.f32 %v3902_v20, %v5214_v26  ;;  %v2761_v30 = vpop.f32.mrb[11].mxu0 }
 0x1fc   : > { %3090 = vst.msk [vmem:[%s5239_s19 + $0x14] sm:$0xf] %vm3084_vm8, %v3437_v41  ;;  %v2900_v57 = vadd.f32 %v3934_v50, %v5231_v16  ;;  %v3936_v62 = vadd.f32 %v2761_v30, %v5216_v29 }
 0x1fd   : > { %v2934_v63 = vmax.f32 %v2902_v0, 0.0  ;;  %v2903_v5 = vadd.f32 %v3935_v22, %v5231_v16 }
 0x1fe   : > { %v2932_v49 = vmax.f32 %v2900_v57, 0.0  ;;  %v2901_v54 = vadd.f32 %v3936_v62, %v5231_v16 }
 0x1ff   : > { %v3442_v36 = vpack.c.bf16 %v2934_v63, %v2934_v63  ;;  %v2935_v45 = vmax.f32 %v2903_v5, 0.0 }
 0x200   : > { %v3440_v31 = vpack.c.bf16 %v2932_v49, %v2932_v49  ;;  %v2933_v26 = vmax.f32 %v2901_v54, 0.0  ;;  %v3905_v19 = vpop.f32.mrb[12].mxu0 }
 0x201   : > { %3095 = vst.msk [vmem:[%s5239_s19 + $0x28] sm:$0xf] %vm3084_vm8, %v3442_v36  ;;  %v3443_v52 = vpack.c.bf16 %v2935_v45, %v2935_v45  ;;  %v3937_v3 = vadd.f32 %v3905_v19, %v5218_v44  ;;  %v2774_v4 = vpop.f32.mrb[13].mxu0 }
 0x202   : > { %3093 = vst.msk [vmem:[%s5239_s19 + $0x20] sm:$0xf] %vm3084_vm8, %v3440_v31  ;;  %v3441_v29 = vpack.c.bf16 %v2933_v26, %v2933_v26  ;;  %v3938_v11 = vadd.f32 %v2774_v4, %v5222_v8  ;;  %v3906_v21 = vpop.f32.mrb[14].mxu0 }
 0x203   : > { %3096 = vst.msk [vmem:[%s5239_s19 + $0x2c] sm:$0xf] %vm3084_vm8, %v3443_v52  ;;  %v2906_v13 = vadd.f32 %v3937_v3, %v5231_v16  ;;  %v3939_v24 = vadd.f32 %v3906_v21, %v5224_v1  ;;  %v2777_v9 = vpop.f32.mrb[15].mxu0 }
 0x204   : > { %3094 = vst.msk [vmem:[%s5239_s19 + $0x24] sm:$0xf] %vm3084_vm8, %v3441_v29  ;;  %v2904_v10 = vadd.f32 %v3938_v11, %v5231_v16  ;;  %v3940_v44 = vadd.f32 %v2777_v9, %v5226_v40 }
 0x205   : > { %v2938_v51 = vmax.f32 %v2906_v13, 0.0  ;;  %v2907_v33 = vadd.f32 %v3939_v24, %v5231_v16 }
 0x206   : > { %v2936_v8 = vmax.f32 %v2904_v10, 0.0  ;;  %v2905_v39 = vadd.f32 %v3940_v44, %v5231_v16 }
 0x207   : > { %v3446_v58 = vpack.c.bf16 %v2938_v51, %v2938_v51  ;;  %v2939_v42 = vmax.f32 %v2907_v33, 0.0 }
 0x208   : > { %v3444_v15 = vpack.c.bf16 %v2936_v8, %v2936_v8  ;;  %v2937_v27 = vmax.f32 %v2905_v39, 0.0  ;;  %v3773_v1 = vpop.f32.mrb[16].mxu1  ;;  %v3909_v6 = vpop.f32.mrb[16].mxu0 }
 0x209   : > { %3099 = vst.msk [vmem:[%s5239_s19 + $0x38] sm:$0xf] %vm3084_vm8, %v3446_v58  ;;  %v3447_v7 = vpack.c.bf16 %v2939_v42, %v2939_v42  ;;  %v3941_v60 = vadd.f32 %v3909_v6, %v3773_v1  ;;  %v1940_v40 = vpop.f32.mrb[17].mxu1  ;;  %v2790_v14 = vpop.f32.mrb[17].mxu0 }
 0x20a   : > { %3097 = vst.msk [vmem:[%s5239_s19 + $0x30] sm:$0xf] %vm3084_vm8, %v3444_v15  ;;  %v3445_v28 = vpack.c.bf16 %v2937_v27, %v2937_v27  ;;  %v3942_v25 = vadd.f32 %v2790_v14, %v1940_v40  ;;  %v3774_v38 = vpop.f32.mrb[18].mxu1  ;;  %v3910_v46 = vpop.f32.mrb[18].mxu0 }
 0x20b   : > { %3100 = vst.msk [vmem:[%s5239_s19 + $0x3c] sm:$0xf] %vm3084_vm8, %v3447_v7  ;;  %v2910_v47 = vadd.f32 %v3941_v60, %v5231_v16  ;;  %v3943_v32 = vadd.f32 %v3910_v46, %v3774_v38  ;;  %v1943_v18 = vpop.f32.mrb[19].mxu1  ;;  %v2793_v43 = vpop.f32.mrb[19].mxu0 }
 0x20c   : > { %3098 = vst.msk [vmem:[%s5239_s19 + $0x34] sm:$0xf] %vm3084_vm8, %v3445_v28  ;;  %v2908_v55 = vadd.f32 %v3942_v25, %v5231_v16  ;;  %v3944_v12 = vadd.f32 %v2793_v43, %v1943_v18 }
 0x20d   : > { %v2942_v23 = vmax.f32 %v2910_v47, 0.0  ;;  %v2911_v59 = vadd.f32 %v3943_v32, %v5231_v16 }
 0x20e   : > { %v2940_v35 = vmax.f32 %v2908_v55, 0.0  ;;  %v2909_v48 = vadd.f32 %v3944_v12, %v5231_v16 }
 0x20f   : > { %v3450_v2 = vpack.c.bf16 %v2942_v23, %v2942_v23  ;;  %v2943_v61 = vmax.f32 %v2911_v59, 0.0 }
 0x210   : > { %v3448_v56 = vpack.c.bf16 %v2940_v35, %v2940_v35  ;;  %v2941_v53 = vmax.f32 %v2909_v48, 0.0  ;;  %v3777_v17 = vpop.f32.mrb[20].mxu1  ;;  %v3913_v34 = vpop.f32.mrb[20].mxu0 }
 0x211   : > { %3103 = vst.msk [vmem:[%s5239_s19 + $0x48] sm:$0xf] %vm3084_vm8, %v3450_v2  ;;  %v3451_v37 = vpack.c.bf16 %v2943_v61, %v2943_v61  ;;  %v3945_v41 = vadd.f32 %v3913_v34, %v3777_v17  ;;  %v1956_v50 = vpop.f32.mrb[21].mxu1  ;;  %v2806_v20 = vpop.f32.mrb[21].mxu0 }
 0x212   : > { %3101 = vst.msk [vmem:[%s5239_s19 + $0x40] sm:$0xf] %vm3084_vm8, %v3448_v56  ;;  %v3449_v0 = vpack.c.bf16 %v2941_v53, %v2941_v53  ;;  %v3946_v22 = vadd.f32 %v2806_v20, %v1956_v50  ;;  %v3778_v30 = vpop.f32.mrb[22].mxu1  ;;  %v3914_v57 = vpop.f32.mrb[22].mxu0 }
 0x213   : > { %3104 = vst.msk [vmem:[%s5239_s19 + $0x4c] sm:$0xf] %vm3084_vm8, %v3451_v37  ;;  %v2914_v62 = vadd.f32 %v3945_v41, %v5231_v16  ;;  %v3947_v63 = vadd.f32 %v3914_v57, %v3778_v30  ;;  %v1959_v5 = vpop.f32.mrb[23].mxu1  ;;  %v2809_v49 = vpop.f32.mrb[23].mxu0 }
 0x214   : > { %3102 = vst.msk [vmem:[%s5239_s19 + $0x44] sm:$0xf] %vm3084_vm8, %v3449_v0  ;;  %v2912_v54 = vadd.f32 %v3946_v22, %v5231_v16  ;;  %v3948_v36 = vadd.f32 %v2809_v49, %v1959_v5 }
 0x215   : > { %v2946_v45 = vmax.f32 %v2914_v62, 0.0  ;;  %v2915_v31 = vadd.f32 %v3947_v63, %v5231_v16 }
 0x216   : > { %v2944_v26 = vmax.f32 %v2912_v54, 0.0  ;;  %v2913_v19 = vadd.f32 %v3948_v36, %v5231_v16 }
 0x217   : > { %v3454_v52 = vpack.c.bf16 %v2946_v45, %v2946_v45  ;;  %v2947_v3 = vmax.f32 %v2915_v31, 0.0 }
 0x218   : > { %v3452_v4 = vpack.c.bf16 %v2944_v26, %v2944_v26  ;;  %v2945_v29 = vmax.f32 %v2913_v19, 0.0  ;;  %v3781_v11 = vpop.f32.mrb[24].mxu1  ;;  %v3917_v21 = vpop.f32.mrb[24].mxu0 }
 0x219   : > { %3107 = vst.msk [vmem:[%s5239_s19 + $0x58] sm:$0xf] %vm3084_vm8, %v3454_v52  ;;  %v3455_v13 = vpack.c.bf16 %v2947_v3, %v2947_v3  ;;  %v3949_v24 = vadd.f32 %v3917_v21, %v3781_v11  ;;  %v1972_v9 = vpop.f32.mrb[25].mxu1  ;;  %v2822_v10 = vpop.f32.mrb[25].mxu0 }
 0x21a   : > { %3105 = vst.msk [vmem:[%s5239_s19 + $0x50] sm:$0xf] %vm3084_vm8, %v3452_v4  ;;  %v3453_v44 = vpack.c.bf16 %v2945_v29, %v2945_v29  ;;  %v3950_v51 = vadd.f32 %v2822_v10, %v1972_v9  ;;  %v3782_v33 = vpop.f32.mrb[26].mxu1  ;;  %v3918_v8 = vpop.f32.mrb[26].mxu0 }
 0x21b   : > { %3108 = vst.msk [vmem:[%s5239_s19 + $0x5c] sm:$0xf] %vm3084_vm8, %v3455_v13  ;;  %v2918_v39 = vadd.f32 %v3949_v24, %v5231_v16  ;;  %v3951_v58 = vadd.f32 %v3918_v8, %v3782_v33  ;;  %v1975_v42 = vpop.f32.mrb[27].mxu1  ;;  %v2825_v15 = vpop.f32.mrb[27].mxu0 }
 0x21c   : > { %3106 = vst.msk [vmem:[%s5239_s19 + $0x54] sm:$0xf] %vm3084_vm8, %v3453_v44  ;;  %v2916_v27 = vadd.f32 %v3950_v51, %v5231_v16  ;;  %v3952_v1 = vadd.f32 %v2825_v15, %v1975_v42 }
 0x21d   : > { %v2950_v6 = vmax.f32 %v2918_v39, 0.0  ;;  %v2919_v7 = vadd.f32 %v3951_v58, %v5231_v16 }
 0x21e   : > { %v2948_v60 = vmax.f32 %v2916_v27, 0.0  ;;  %v2917_v40 = vadd.f32 %v3952_v1, %v5231_v16 }
 0x21f   : > { %v3458_v14 = vpack.c.bf16 %v2950_v6, %v2950_v6  ;;  %v2951_v28 = vmax.f32 %v2919_v7, 0.0 }
 0x220   : > { %v3456_v25 = vpack.c.bf16 %v2948_v60, %v2948_v60  ;;  %v2949_v38 = vmax.f32 %v2917_v40, 0.0  ;;  %v3785_v46 = vpop.f32.mrb[28].mxu1  ;;  %v3921_v47 = vpop.f32.mrb[28].mxu0 }
 0x221   : > { %3111 = vst.msk [vmem:[%s5239_s19 + $0x68] sm:$0xf] %vm3084_vm8, %v3458_v14  ;;  %v3459_v32 = vpack.c.bf16 %v2951_v28, %v2951_v28  ;;  %v3953_v18 = vadd.f32 %v3921_v47, %v3785_v46  ;;  %v1988_v43 = vpop.f32.mrb[29].mxu1  ;;  %v2838_v55 = vpop.f32.mrb[29].mxu0 }
 0x222   : > { %3109 = vst.msk [vmem:[%s5239_s19 + $0x60] sm:$0xf] %vm3084_vm8, %v3456_v25  ;;  %v3457_v12 = vpack.c.bf16 %v2949_v38, %v2949_v38  ;;  %v3954_v23 = vadd.f32 %v2838_v55, %v1988_v43  ;;  %v3786_v59 = vpop.f32.mrb[30].mxu1  ;;  %v3922_v35 = vpop.f32.mrb[30].mxu0 }
 0x223   : > { %3112 = vst.msk [vmem:[%s5239_s19 + $0x6c] sm:$0xf] %vm3084_vm8, %v3459_v32  ;;  %v2922_v48 = vadd.f32 %v3953_v18, %v5231_v16  ;;  %v3955_v2 = vadd.f32 %v3922_v35, %v3786_v59  ;;  %v1991_v61 = vpop.f32.mrb[31].mxu1  ;;  %v2841_v56 = vpop.f32.mrb[31].mxu0 }
 0x224   : > { %3110 = vst.msk [vmem:[%s5239_s19 + $0x64] sm:$0xf] %vm3084_vm8, %v3457_v12  ;;  %v2920_v53 = vadd.f32 %v3954_v23, %v5231_v16  ;;  %v3956_v17 = vadd.f32 %v2841_v56, %v1991_v61 }
 0x225   : > { %v2954_v34 = vmax.f32 %v2922_v48, 0.0  ;;  %v2923_v37 = vadd.f32 %v3955_v2, %v5231_v16 }
 0x226   : > { %v2952_v41 = vmax.f32 %v2920_v53, 0.0  ;;  %v2921_v50 = vadd.f32 %v3956_v17, %v5231_v16 }
 0x227   : > { %v3462_v20 = vpack.c.bf16 %v2954_v34, %v2954_v34  ;;  %v2955_v0 = vmax.f32 %v2923_v37, 0.0 }
 0x228   : > { %v3460_v22 = vpack.c.bf16 %v2952_v41, %v2952_v41  ;;  %v2953_v30 = vmax.f32 %v2921_v50, 0.0 }
 0x229   : > { %3115 = vst.msk [vmem:[%s5239_s19 + $0x78] sm:$0xf] %vm3084_vm8, %v3462_v20  ;;  %v3463_v57 = vpack.c.bf16 %v2955_v0, %v2955_v0 }
 0x22a   : > { %3113 = vst.msk [vmem:[%s5239_s19 + $0x70] sm:$0xf] %vm3084_vm8, %v3460_v22  ;;  %v3461_v62 = vpack.c.bf16 %v2953_v30, %v2953_v30 }
 0x22b   : > { %3116 = vst.msk [vmem:[%s5239_s19 + $0x7c] sm:$0xf] %vm3084_vm8, %v3463_v57 }
 0x22c   : > { %3114 = vst.msk [vmem:[%s5239_s19 + $0x74] sm:$0xf] %vm3084_vm8, %v3461_v62 }
 0x22d PF: > { %s13_s12 = sadd.s32 1, %s4228_s12  }
 0x22e   : > { %p10_p5 = scmp.ge.s32.totalorder %s13_s12, 4  }
 0x230   :  { %12 = sbr.rel (!%p10_p5) target bundleno = 1 (0x1), region = 62 }

// kernel: dann_forward.7
= control target key start
LH: loop header
LB: loop body
LE: loop exit
PB: predicated region body
PF: predicated region fallthrough
CT: control target
= control target key end

     0   :  { %s7996_s18 = smov 0   ;;  %s10049_s0 = inlined_call_operand.vmem [shape: bf16[36,18,8], index: 0, kind: input, shape index: {}]   ;;  %s10050_s1 = inlined_call_operand.vmem [shape: bf16[36,18,16], index: 1, kind: input, shape index: {}]   ;;  %s10051_s2 = inlined_call_operand.vmem [shape: bf16[9,8,3], index: 2, kind: input, shape index: {}]   ;;  %s10052_s3 = inlined_call_operand.vmem [shape: bf16[9,16,3], index: 3, kind: input, shape index: {}]   ;;  %s10053_s4 = inlined_call_operand.vmem [shape: f32[1,3], index: 4, kind: input, shape index: {}]   ;;  %s10054_s5 = inlined_call_operand.vmem [shape: f32[512,3], index: 5, kind: output, shape index: {}]  }
   0x1 LB: > { %s5904_s19 = sadd.s32 4294967295, %s7964_s18   ;;  %p5908_p0 = scmp.ge.s32.totalorder %s7964_s18, 1  ;;  %s7964_s18 = sphi %s7996_s18, %s15_s18  }
   0x2   : > { %p201_p1 = scmp.lt.s32.totalorder %s7964_s18, 3 }
   0x4   : > { %p202_p2 = pnand %p5908_p0, %p201_p1 }
   0x6   : > { %205 = sbr.rel (%p202_p2) target bundleno = 851 (0x353), region = 40 }
   0xd   : > { %v7837_v0 = vld [vmem:[%s10052_s3] sm:$0xff]   ;;  %s236_s22 = smul.u32 18, %s5904_s19  ;;  %vm804_vm0 = vcmask 1043456   ;;  %v7842_v3 = vld [vmem:[%s10052_s3 + $0x8] sm:$0xff]   ;;  %vm3122_vm1 = vcmask 130048   ;;  %v8060_v18 = vld [vmem:[%s10052_s3 + $0x10] sm:$0xff]  }
   0xe   : > { %v312_v1 = vld [vmem:[%s10051_s2 + $0x4] sm:$0xf]  ;;  %6969 = vmatprep.subr.bf16.mxu0 %v7837_v0  ;;  %v311_v4 = vld [vmem:[%s10051_s2] sm:$0xf]  ;;  %v8027_v6 = vld [vmem:[%s10051_s2 + $0x8] sm:$0xf] }
   0xf   : > { %p237_p3 = scmp.lt.s32.totalorder %s236_s22, 35  ;;  %7819 = vmatprep.subr.msk.bf16.mxu1 %vm804_vm0, %v312_v1  ;;  %v806_v2 = vsel %vm804_vm0, %v312_v1, 0  ;;  %6970 = vmatpush3.bf16.msra.mxu0 %v7837_v0  ;;  %v8022_v5 = vsel %vm804_vm0, %v311_v4, 0  ;;  %v8064_v19 = vsel %vm804_vm0, %v8027_v6, 0  ;;  %vm320_vm2 = vsmask.f32 3328 }
  0x10   : > { %6664 = vmatpush3.bf16.msra.mxu1 %v806_v2  ;;  %7003 = vmatprep.subr.bf16.mxu0 %v7842_v3  ;;  %vm321_vm3 = vsmask.f32 7440  ;;  %vm755_vm4 = vcmask 64512   ;;  %vm1277_vm6 = vcmask 1042432   ;;  %vm1278_vm7 = vcmask 1046532  }
  0x11   : > { %s10471_s22 = smov (!%p237_p3, %s236_s22), 35  ;;  %7820 = vmatprep.subr.msk.bf16.mxu1 %vm804_vm0, %v311_v4  ;;  %vm8151_vm5 = vmor %vm320_vm2, %vm321_vm3  ;;  %vm5803_vm9 = vcmask 23552  }
  0x12   : > { %s7828_s29 = smul.u32 12, %s10471_s22  ;;  %vm8990_vm8 = vmor %vm1277_vm6, %vm1278_vm7 }
  0x14   : > { %s8032_s9 = scalar_lea.vmem %s10050_s1, %s7828_s29  ;;  %s8076_s14 = scalar_lea.vmem %s10049_s0, %s7828_s29 }
  0x15   : > { %v8035_v7 = vld [vmem:[%s8032_s9] sm:$0xf]  ;;  %v8038_v8 = vld [vmem:[%s8032_s9 + $0x4] sm:$0xf]  ;;  %v8041_v9 = vld [vmem:[%s8032_s9 + $0xc] sm:$0xf] }
  0x16   : > { %10203 = vst [vmem:[#allocation2_spill] sm:$0xff] %v8035_v7  ;;  %10204 = vst [vmem:[#allocation3_spill] sm:$0xff] %v8038_v8  ;;  %v6129_v10 = vcombine.low %v8035_v7, %v8038_v8  ;;  %v3365_v11 = vshrl.u32 %v8035_v7, 16  ;;  %v3368_v12 = vshll.u32 %v8035_v7, 16  ;;  %v3374_v13 = vshll.u32 %v8038_v8, 16 }
  0x17   : > { %10205 = vst [vmem:[#allocation4_spill] sm:$0xff] %v8041_v9  ;;  %v8049_v14 = vld [vmem:[%s8032_s9 + $0x10] sm:$0xf]  ;;  %v3378_v15 = vshrl.u32 %v8038_v8, 16  ;;  %v10056_v16 = vrot.slane %v8038_v8, 5  ;;  %v3389_v23 = vshrl.u32 %v8041_v9, 16 }
  0x18   : > { %10206 = vst [vmem:[#allocation5_spill] sm:$0xff] %v8049_v14  ;;  %v8055_v17 = vcombine.low %v8041_v9, %v8049_v14  ;;  %6971 = vmatprep.mubr.msk.bf16.mxu0 %vm3122_vm1, %v6129_v10  ;;  %v3367_v20 = vrot.slane %v3365_v11, 4  ;;  %v3370_v21 = vrot.slane %v3368_v12, 5  ;;  %v8067_v22 = vrot.slane %v3374_v13, 5  ;;  %v8071_v24 = vld [vmem:[%s8032_s9 + $0x18] sm:$0xf] }
  0x19   : > { %v3380_v25 = vrot.slane %v3378_v15, 4  ;;  %v3392_v27 = vshll.u32 %v8041_v9, 16  ;;  %v3398_v28 = vshll.u32 %v8049_v14, 16  ;;  %v8084_v29 = vld [vmem:[%s8032_s9 + $0x1c] sm:$0xf]  ;;  %v8088_v31 = vrot.slane %v10056_v16, 4 }
  0x1a   : > { %10207 = vst [vmem:[#allocation6_spill] sm:$0xff] %v8055_v17  ;;  %6972 = vmatmul.mubr.msk.bf16.vlgmr.msra.gmra.mrb[0].mxu0 %vm3122_vm1, %v8055_v17  ;;  %v3371_v30 = vor.u32 %v3370_v21, %v3367_v20  ;;  %v3391_v32 = vrot.slane %v3389_v23, 4  ;;  %v3402_v33 = vshrl.u32 %v8049_v14, 16  ;;  %v10055_v37 = vrot.slane %v8049_v14, 5  ;;  %v8096_v38 = vld [vmem:[%s8076_s14] sm:$0xf] }
  0x1b   : > { %10208 = vst [vmem:[#allocation7_spill] sm:$0xff] %v8088_v31  ;;  %7004 = vmatpush3.bf16.msra.mxu0 %v7842_v3  ;;  %v3381_v34 = vor.u32 %v3380_v25, %v8067_v22  ;;  %v3394_v35 = vrot.slane %v3392_v27, 5  ;;  %v8092_v36 = vrot.slane %v3398_v28, 5  ;;  %v8102_v41 = vcombine.low %v8071_v24, %v8084_v29  ;;  %v8105_v42 = vld [vmem:[%s8076_s14 + $0x4] sm:$0xf] }
  0x1c   : > { %7037 = vmatprep.subr.bf16.mxu0 %v8060_v18  ;;  %v3404_v39 = vrot.slane %v3402_v33, 4  ;;  %v259_v43 = vld [vmem:[%s8076_s14 + $0x8] sm:$0x1]  ;;  %v8108_v44 = vrot.slane %v3371_v30, 4  ;;  %v8114_v48 = vld [vmem:[%s8032_s9 + $0x24] sm:$0xf] }
  0x1d   : > { %10209 = vst [vmem:[#allocation8_spill] sm:$0xff] %v8102_v41  ;;  %v8110_v45 = vrot.slane %v3381_v34, 4  ;;  %v3395_v46 = vor.u32 %v3394_v35, %v3391_v32  ;;  %v8119_v50 = vrot.slane %v10055_v37, 4  ;;  %6975 = vmatprep.mubr.msk.bf16.mxu0 %vm3122_vm1, %v8102_v41  ;;  %v324_v51 = vshrl.u32 %v8096_v38, 16  ;;  %v8126_v53 = vld [vmem:[%s8032_s9 + $0x28] sm:$0xf] }
  0x1e   : > { %v3405_v49 = vor.u32 %v3404_v39, %v8092_v36  ;;  %v327_v52 = vshll.u32 %v8096_v38, 16  ;;  %v333_v55 = vshll.u32 %v8105_v42, 16  ;;  %v337_v56 = vshrl.u32 %v8105_v42, 16  ;;  %v8132_v58 = vld [vmem:[%s8076_s14 + $0xc] sm:$0xf] }
  0x1f   : > { %10210 = vst [vmem:[#allocation9_spill] sm:$0xff] %v8119_v50  ;;  %v343_v57 = vshll.u32 %v259_v43, 16  ;;  %v8134_v59 = vrot.slane %v3395_v46, 4  ;;  %v326_v61 = vrot.slane %v324_v51, 4  ;;  %v8138_v63 = vld [vmem:[%s8076_s14 + $0x10] sm:$0xf]  ;;  %v8144_v3 = vcombine.low %v8114_v48, %v8126_v53 }
  0x20   : > { %v329_v62 = vrot.slane %v327_v52, 5  ;;  %v8140_v0 = vrot.slane %v3405_v49, 4  ;;  %v335_v1 = vrot.slane %v333_v55, 5  ;;  %v339_v2 = vrot.slane %v337_v56, 4  ;;  %v262_v4 = vld [vmem:[%s8076_s14 + $0x14] sm:$0x1] }
  0x21   : > { %10211 = vst [vmem:[#allocation10_spill] sm:$0xff] %v8144_v3  ;;  %v345_v11 = vrot.slane %v343_v57, 5  ;;  %v10212_v15 = vmov 0  ;;  %v348_v21 = vshrl.u32 %v8132_v58, 16  ;;  %v351_v23 = vshll.u32 %v8132_v58, 16 }
  0x22   : > { %v330_v10 = vor.u32 %v329_v62, %v326_v61  ;;  %v10213_v15 = vsel %vm8151_vm5, 4294967295, %v10212_v15  ;;  %v340_v20 = vor.u32 %v339_v2, %v335_v1  ;;  %6976 = vmatmul.mubr.msk.bf16.gmra.mrb[4].mxu0 %vm3122_vm1, %v8144_v3  ;;  %v357_v25 = vshll.u32 %v8138_v63, 16  ;;  %v8161_v27 = vld [vmem:[%s8032_s9 + $0x30] sm:$0xf]  ;;  %v8166_v34 = vld [vmem:[%s8032_s9 + $0x34] sm:$0xf] }
  0x23   : > { %10214 = vst [vmem:[#allocation11_spill] sm:$0xff] %v10213_v15  ;;  %v361_v32 = vshrl.u32 %v8138_v63, 16  ;;  %v367_v33 = vshll.u32 %v262_v4, 16  ;;  %v350_v39 = vrot.slane %v348_v21, 4  ;;  %v353_v43 = vrot.slane %v351_v23, 5 }
  0x24   : > { %v331_v28 = vrot.slane %v330_v10, 4  ;;  %v341_v35 = vrot.slane %v340_v20, 4  ;;  %v359_v46 = vrot.slane %v357_v25, 5  ;;  %v8169_v49 = vld [vmem:[%s8076_s14 + $0x18] sm:$0xf]  ;;  %v8181_v2 = vcombine.low %v8161_v27, %v8166_v34 }
  0x25   : > { %v363_v52 = vrot.slane %v361_v32, 4  ;;  %v369_v55 = vrot.slane %v367_v33, 5  ;;  %v8174_v56 = vld [vmem:[%s8076_s14 + $0x1c] sm:$0xf]  ;;  %v265_v57 = vld [vmem:[%s8076_s14 + $0x20] sm:$0x1]  ;;  %v354_v62 = vor.u32 %v353_v43, %v350_v39 }
  0x26   : > { %v336_v51 = vsel %vm8151_vm5, %v331_v28, %v335_v1  ;;  %v346_v61 = vsel %vm8151_vm5, %v341_v35, %v345_v11  ;;  %10215 = vst [vmem:[#allocation12_spill] sm:$0xff] %v8181_v2  ;;  %v8185_v10 = vld [vmem:[%s8032_s9 + $0x3c] sm:$0xf]  ;;  %v8188_v20 = vld [vmem:[%s8032_s9 + $0x40] sm:$0xf]  ;;  %6979 = vmatprep.mubr.msk.bf16.mxu0 %vm3122_vm1, %v8181_v2  ;;  %v372_v11 = vshrl.u32 %v8169_v49, 16 }
  0x27   : > { %v5913_v1 = vcombine.low %v336_v51, %v346_v61  ;;  %v364_v21 = vor.u32 %v363_v52, %v359_v46  ;;  %v355_v28 = vrot.slane %v354_v62, 4  ;;  %v375_v32 = vshll.u32 %v8169_v49, 16  ;;  %v8198_v35 = vld [vmem:[%s8076_s14 + $0x24] sm:$0xf]  ;;  %v8207_v61 = vld [vmem:[%s8076_s14 + $0x28] sm:$0xf] }
  0x28   : > { %v381_v33 = vshll.u32 %v8174_v56, 16  ;;  %v385_v43 = vshrl.u32 %v8174_v56, 16  ;;  %v391_v51 = vshll.u32 %v265_v57, 16  ;;  %v8204_v52 = vcombine.low %v8185_v10, %v8188_v20  ;;  %v268_v16 = vld [vmem:[%s8076_s14 + $0x2c] sm:$0x1] }
  0x29   : > { %6665 = vmatprep.mubr.msk.bf16.mxu1 %vm755_vm4, %v5913_v1  ;;  %v365_v39 = vrot.slane %v364_v21, 4  ;;  %v360_v62 = vsel %vm8151_vm5, %v355_v28, %v359_v46  ;;  %v374_v40 = vrot.slane %v372_v11, 4  ;;  %v377_v37 = vrot.slane %v375_v32, 5  ;;  %v8217_v57 = vld [vmem:[%s8032_s9 + $0x48] sm:$0xf] }
  0x2a   : > { %10216 = vst [vmem:[#allocation13_spill] sm:$0xff] %v8204_v52  ;;  %v383_v26 = vrot.slane %v381_v33, 5  ;;  %v387_v21 = vrot.slane %v385_v43, 4  ;;  %v393_v25 = vrot.slane %v391_v51, 5  ;;  %6980 = vmatmul.mubr.msk.bf16.gmra.mrb[8].mxu0 %vm3122_vm1, %v8204_v52  ;;  %v8220_v23 = vld [vmem:[%s8032_s9 + $0x4c] sm:$0xf] }
  0x2b   : > { %v370_v1 = vsel %vm8151_vm5, %v365_v39, %v369_v55  ;;  %v378_v46 = vor.u32 %v377_v37, %v374_v40  ;;  %v396_v55 = vshrl.u32 %v8198_v35, 16  ;;  %v399_v33 = vshll.u32 %v8198_v35, 16  ;;  %v8241_v30 = vld [vmem:[%s8076_s14 + $0x34] sm:$0xf]  ;;  %v271_v60 = vld [vmem:[%s8076_s14 + $0x38] sm:$0x1] }
  0x2c   : > { %v8222_v4 = vcombine.low %v360_v62, %v370_v1  ;;  %v388_v32 = vor.u32 %v387_v21, %v383_v26  ;;  %v405_v39 = vshll.u32 %v8207_v61, 16  ;;  %v409_v51 = vshrl.u32 %v8207_v61, 16  ;;  %v8237_v62 = vld [vmem:[%s8076_s14 + $0x30] sm:$0xf]  ;;  %v8317_v41 = vld [vmem:[%s8032_s9 + $0x6c] sm:$0xf] }
  0x2d   : > { %v379_v43 = vrot.slane %v378_v46, 4  ;;  %v415_v37 = vshll.u32 %v268_v16, 16  ;;  %v8234_v40 = vcombine.low %v8217_v57, %v8220_v23  ;;  %v398_v21 = vrot.slane %v396_v55, 4  ;;  %v8326_v17 = vld [vmem:[%s8032_s9 + $0x70] sm:$0xf] }
  0x2e   : > { %10217 = vst [vmem:[#allocation14_spill] sm:$0xff] %v8222_v4  ;;  %6666 = vmatmul.mubr.msk.bf16.vlgmr.msra.gmra.mrb[0].mxu1 %vm755_vm4, %v8222_v4  ;;  %v389_v1 = vrot.slane %v388_v32, 4  ;;  %v401_v11 = vrot.slane %v399_v33, 5  ;;  %v407_v28 = vrot.slane %v405_v39, 5  ;;  %v411_v13 = vrot.slane %v409_v51, 4 }
  0x2f   : > { %10218 = vst [vmem:[#allocation15_spill] sm:$0xff] %v8234_v40  ;;  %6698 = vmatpush3.bf16.msra.mxu1 %v8022_v5  ;;  %v384_v46 = vsel %vm8151_vm5, %v379_v43, %v383_v26  ;;  %v417_v12 = vrot.slane %v415_v37, 5  ;;  %6983 = vmatprep.mubr.msk.bf16.mxu0 %vm3122_vm1, %v8234_v40  ;;  %v8256_v33 = vld [vmem:[%s8032_s9 + $0x54] sm:$0xf]  ;;  %v8259_v39 = vld [vmem:[%s8032_s9 + $0x58] sm:$0xf] }
  0x30   : > { %7821 = vmatprep.subr.msk.bf16.mxu1 %vm804_vm0, %v8027_v6  ;;  %v394_v5 = vsel %vm8151_vm5, %v389_v1, %v393_v25  ;;  %v402_v32 = vor.u32 %v401_v11, %v398_v21  ;;  %v412_v51 = vor.u32 %v411_v13, %v407_v28  ;;  %v420_v37 = vshrl.u32 %v8237_v62, 16  ;;  %v8268_v21 = vld [vmem:[%s8076_s14 + $0x3c] sm:$0xf]  ;;  %v274_v4 = vld [vmem:[%s8076_s14 + $0x44] sm:$0x1] }
  0x31   : > { %v8261_v43 = vcombine.low %v384_v46, %v394_v5  ;;  %v423_v6 = vshll.u32 %v8237_v62, 16  ;;  %v429_v25 = vshll.u32 %v8241_v30, 16  ;;  %v433_v11 = vshrl.u32 %v8241_v30, 16  ;;  %v8289_v40 = vld [vmem:[%s8032_s9 + $0x60] sm:$0xf] }
  0x32   : > { %v403_v16 = vrot.slane %v402_v32, 4  ;;  %v439_v1 = vshll.u32 %v271_v60, 16  ;;  %v413_v46 = vrot.slane %v412_v51, 4  ;;  %v422_v13 = vrot.slane %v420_v37, 4  ;;  %v8277_v32 = vld [vmem:[%s8076_s14 + $0x40] sm:$0xf] }
  0x33   : > { %10219 = vst [vmem:[#allocation16_spill] sm:$0xff] %v8261_v43  ;;  %6669 = vmatprep.mubr.msk.bf16.mxu1 %vm755_vm4, %v8261_v43  ;;  %v425_v5 = vrot.slane %v423_v6, 5  ;;  %v8274_v26 = vcombine.low %v8256_v33, %v8259_v39  ;;  %v431_v54 = vrot.slane %v429_v25, 5  ;;  %v435_v47 = vrot.slane %v433_v11, 4  ;;  %v8302_v43 = vld [vmem:[%s8076_s14 + $0x48] sm:$0xf] }
  0x34   : > { %v408_v55 = vsel %vm8151_vm5, %v403_v16, %v407_v28  ;;  %v418_v51 = vsel %vm8151_vm5, %v413_v46, %v417_v12  ;;  %v441_v6 = vrot.slane %v439_v1, 5  ;;  %v8292_v28 = vld [vmem:[%s8032_s9 + $0x64] sm:$0xf]  ;;  %v444_v12 = vshrl.u32 %v8268_v21, 16  ;;  %10222 = vst [vmem:[#allocation19_spill] sm:$0xff] %v8302_v43 }
  0x35   : > { %10220 = vst [vmem:[#allocation17_spill] sm:$0xff] %v8274_v26  ;;  %v426_v37 = vor.u32 %v425_v5, %v422_v13  ;;  %6984 = vmatmul.mubr.msk.bf16.gmra.mrb[12].mxu0 %vm3122_vm1, %v8274_v26  ;;  %v8294_v16 = vcombine.low %v408_v55, %v418_v51  ;;  %v436_v25 = vor.u32 %v435_v47, %v431_v54  ;;  %v447_v1 = vshll.u32 %v8268_v21, 16  ;;  %v8305_v60 = vld [vmem:[%s8076_s14 + $0x4c] sm:$0xf]  ;;  %v277_v11 = vld [vmem:[%s8076_s14 + $0x50] sm:$0x1] }
  0x36   : > { %v453_v13 = vshll.u32 %v8277_v32, 16  ;;  %v457_v5 = vshrl.u32 %v8277_v32, 16  ;;  %v446_v55 = vrot.slane %v444_v12, 4  ;;  %v463_v51 = vshll.u32 %v274_v4, 16  ;;  %v8345_v50 = vld [vmem:[%s8076_s14 + $0x58] sm:$0xf] }
  0x37   : > { %10221 = vst [vmem:[#allocation18_spill] sm:$0xff] %v8294_v16  ;;  %v427_v46 = vrot.slane %v426_v37, 4  ;;  %6670 = vmatmul.mubr.msk.bf16.gmra.mrb[4].mxu1 %vm755_vm4, %v8294_v16  ;;  %v437_v47 = vrot.slane %v436_v25, 4  ;;  %v8311_v37 = vcombine.low %v8289_v40, %v8292_v28  ;;  %v449_v52 = vrot.slane %v447_v1, 5  ;;  %10227 = vst [vmem:[#allocation24_spill] sm:$0xff] %v8345_v50 }
  0x38   : > { %v455_v2 = vrot.slane %v453_v13, 5  ;;  %v459_v3 = vrot.slane %v457_v5, 4  ;;  %v465_v12 = vrot.slane %v463_v51, 5  ;;  %v471_v5 = vshll.u32 %v8302_v43, 16  ;;  %v280_v9 = vld [vmem:[%s8076_s14 + $0x5c] sm:$0x1] }
  0x39   : > { %10223 = vst [vmem:[#allocation20_spill] sm:$0xff] %v8311_v37  ;;  %v432_v26 = vsel %vm8151_vm5, %v427_v46, %v431_v54  ;;  %v442_v16 = vsel %vm8151_vm5, %v437_v47, %v441_v6  ;;  %6987 = vmatprep.mubr.msk.bf16.mxu0 %vm3122_vm1, %v8311_v37  ;;  %v450_v46 = vor.u32 %v449_v52, %v446_v55  ;;  %v468_v6 = vshrl.u32 %v8302_v43, 16  ;;  %v8342_v52 = vld [vmem:[%s8076_s14 + $0x54] sm:$0xf]  ;;  %v8359_v14 = vld [vmem:[%s8032_s9 + $0x78] sm:$0xf] }
  0x3a   : > { %v8328_v54 = vcombine.low %v432_v26, %v442_v16  ;;  %v460_v1 = vor.u32 %v459_v3, %v455_v2  ;;  %v477_v47 = vshll.u32 %v8305_v60, 16  ;;  %v481_v51 = vshrl.u32 %v8305_v60, 16  ;;  %10226 = vst [vmem:[#allocation23_spill] sm:$0xff] %v8342_v52  ;;  %10229 = vst [vmem:[#allocation26_spill] sm:$0xff] %v8359_v14  ;;  %v8406_v8 = vld [vmem:[%s8076_s14 + $0x6c] sm:$0xf] }
  0x3b   : > { %v451_v4 = vrot.slane %v450_v46, 4  ;;  %v487_v16 = vshll.u32 %v277_v11, 16  ;;  %v8339_v3 = vcombine.low %v8317_v41, %v8326_v17  ;;  %v470_v55 = vrot.slane %v468_v6, 4  ;;  %10237 = vst [vmem:[#allocation34_spill] sm:$0xff] %v8406_v8  ;;  %v8462_v43 = vld [vmem:[%s8032_s9 + $0xa0] sm:$0xf] }
  0x3c   : > { %10224 = vst [vmem:[#allocation21_spill] sm:$0xff] %v8328_v54  ;;  %6673 = vmatprep.mubr.msk.bf16.mxu1 %vm755_vm4, %v8328_v54  ;;  %v461_v26 = vrot.slane %v460_v1, 4  ;;  %v473_v13 = vrot.slane %v471_v5, 5  ;;  %v479_v25 = vrot.slane %v477_v47, 5  ;;  %v483_v37 = vrot.slane %v481_v51, 4  ;;  %10247 = vst [vmem:[#allocation44_spill] sm:$0xff] %v8462_v43 }
  0x3d   : > { %10225 = vst [vmem:[#allocation22_spill] sm:$0xff] %v8339_v3  ;;  %v456_v54 = vsel %vm8151_vm5, %v451_v4, %v455_v2  ;;  %v489_v1 = vrot.slane %v487_v16, 5  ;;  %6988 = vmatmul.mubr.msk.bf16.gmra.mrb[16].mxu0 %vm3122_vm1, %v8339_v3  ;;  %v8362_v2 = vld [vmem:[%s8032_s9 + $0x7c] sm:$0xf]  ;;  %v492_v4 = vshrl.u32 %v8342_v52, 16  ;;  %v501_v16 = vshll.u32 %v8345_v50, 16 }
  0x3e   : > { %v466_v11 = vsel %vm8151_vm5, %v461_v26, %v465_v12  ;;  %v474_v5 = vor.u32 %v473_v13, %v470_v55  ;;  %v484_v47 = vor.u32 %v483_v37, %v479_v25  ;;  %10230 = vst [vmem:[#allocation27_spill] sm:$0xff] %v8362_v2  ;;  %v495_v26 = vshll.u32 %v8342_v52, 16  ;;  %v8376_v3 = vld [vmem:[%s8076_s14 + $0x60] sm:$0xf]  ;;  %v286_v52 = vld [vmem:[%s8076_s14 + $0x74] sm:$0x1] }
  0x3f   : > { %v8355_v6 = vcombine.low %v456_v54, %v466_v11  ;;  %v505_v13 = vshrl.u32 %v8345_v50, 16  ;;  %v511_v55 = vshll.u32 %v280_v9, 16  ;;  %v494_v11 = vrot.slane %v492_v4, 4  ;;  %10232 = vst [vmem:[#allocation29_spill] sm:$0xff] %v8376_v3  ;;  %v8384_v4 = vld [vmem:[%s8076_s14 + $0x64] sm:$0xf] }
  0x40   : > { %v475_v37 = vrot.slane %v474_v5, 4  ;;  %v485_v54 = vrot.slane %v484_v47, 4  ;;  %v497_v51 = vrot.slane %v495_v26, 5  ;;  %v503_v12 = vrot.slane %v501_v16, 5  ;;  %10233 = vst [vmem:[#allocation30_spill] sm:$0xff] %v8384_v4 }
  0x41   : > { %10228 = vst [vmem:[#allocation25_spill] sm:$0xff] %v8355_v6  ;;  %6674 = vmatmul.mubr.msk.bf16.gmra.mrb[8].mxu1 %vm755_vm4, %v8355_v6  ;;  %v8373_v46 = vcombine.low %v8359_v14, %v8362_v2  ;;  %v507_v9 = vrot.slane %v505_v13, 4  ;;  %v283_v26 = vld [vmem:[%s8076_s14 + $0x68] sm:$0x1]  ;;  %v513_v7 = vrot.slane %v511_v55, 5  ;;  %v516_v13 = vshrl.u32 %v8376_v3, 16 }
  0x42   : > { %v480_v31 = vsel %vm8151_vm5, %v475_v37, %v479_v25  ;;  %v490_v5 = vsel %vm8151_vm5, %v485_v54, %v489_v1  ;;  %v498_v16 = vor.u32 %v497_v51, %v494_v11  ;;  %v8393_v25 = vld [vmem:[%s8032_s9 + $0x84] sm:$0xf]  ;;  %v8396_v1 = vld [vmem:[%s8032_s9 + $0x88] sm:$0xf]  ;;  %v525_v55 = vshll.u32 %v8384_v4, 16 }
  0x43   : > { %10231 = vst [vmem:[#allocation28_spill] sm:$0xff] %v8373_v46  ;;  %v8387_v6 = vcombine.low %v480_v31, %v490_v5  ;;  %6991 = vmatprep.mubr.msk.bf16.mxu0 %vm3122_vm1, %v8373_v46  ;;  %10235 = vst [vmem:[#allocation32_spill] sm:$0xff] %v8393_v25  ;;  %v508_v37 = vor.u32 %v507_v9, %v503_v12  ;;  %v519_v31 = vshll.u32 %v8376_v3, 16  ;;  %v529_v11 = vshrl.u32 %v8384_v4, 16  ;;  %v8413_v3 = vld [vmem:[%s8076_s14 + $0x70] sm:$0xf] }
  0x44   : > { %10236 = vst [vmem:[#allocation33_spill] sm:$0xff] %v8396_v1  ;;  %v499_v51 = vrot.slane %v498_v16, 4  ;;  %v535_v5 = vshll.u32 %v283_v26, 16  ;;  %v518_v54 = vrot.slane %v516_v13, 4  ;;  %v8410_v46 = vcombine.low %v8393_v25, %v8396_v1  ;;  %10239 = vst [vmem:[#allocation36_spill] sm:$0xff] %v8413_v3 }
  0x45   : > { %10234 = vst [vmem:[#allocation31_spill] sm:$0xff] %v8387_v6  ;;  %6677 = vmatprep.mubr.msk.bf16.mxu1 %vm755_vm4, %v8387_v6  ;;  %v509_v9 = vrot.slane %v508_v37, 4  ;;  %v521_v47 = vrot.slane %v519_v31, 5  ;;  %v527_v4 = vrot.slane %v525_v55, 5  ;;  %v531_v26 = vrot.slane %v529_v11, 4 }
  0x46   : > { %10238 = vst [vmem:[#allocation35_spill] sm:$0xff] %v8410_v46  ;;  %v504_v16 = vsel %vm8151_vm5, %v499_v51, %v503_v12  ;;  %v537_v31 = vrot.slane %v535_v5, 5  ;;  %6992 = vmatmul.mubr.msk.bf16.gmra.mrb[20].mxu0 %vm3122_vm1, %v8410_v46  ;;  %v8425_v14 = vld [vmem:[%s8032_s9 + $0x90] sm:$0xf]  ;;  %v8428_v12 = vld [vmem:[%s8032_s9 + $0x94] sm:$0xf] }
  0x47   : > { %v514_v37 = vsel %vm8151_vm5, %v509_v9, %v513_v7  ;;  %v522_v13 = vor.u32 %v521_v47, %v518_v54  ;;  %10240 = vst [vmem:[#allocation37_spill] sm:$0xff] %v8425_v14  ;;  %10241 = vst [vmem:[#allocation38_spill] sm:$0xff] %v8428_v12  ;;  %v532_v55 = vor.u32 %v531_v26, %v527_v4  ;;  %v540_v7 = vshrl.u32 %v8406_v8, 16  ;;  %v8438_v50 = vld [vmem:[%s8076_s14 + $0x78] sm:$0xf] }
  0x48   : > { %v8430_v51 = vcombine.low %v504_v16, %v514_v37  ;;  %v543_v47 = vshll.u32 %v8406_v8, 16  ;;  %v549_v54 = vshll.u32 %v8413_v3, 16  ;;  %v553_v5 = vshrl.u32 %v8413_v3, 16  ;;  %10243 = vst [vmem:[#allocation40_spill] sm:$0xff] %v8438_v50  ;;  %v8441_v6 = vld [vmem:[%s8076_s14 + $0x7c] sm:$0xf] }
  0x49   : > { %v523_v9 = vrot.slane %v522_v13, 4  ;;  %10244 = vst [vmem:[#allocation41_spill] sm:$0xff] %v8441_v6  ;;  %v533_v16 = vrot.slane %v532_v55, 4  ;;  %v542_v26 = vrot.slane %v540_v7, 4  ;;  %v559_v37 = vshll.u32 %v286_v52, 16 }
  0x4a   : > { %10242 = vst [vmem:[#allocation39_spill] sm:$0xff] %v8430_v51  ;;  %6678 = vmatmul.mubr.msk.bf16.gmra.mrb[12].mxu1 %vm755_vm4, %v8430_v51  ;;  %v8447_v13 = vcombine.low %v8425_v14, %v8428_v12  ;;  %v289_v11 = vld [vmem:[%s8076_s14 + $0x80] sm:$0x1]  ;;  %v545_v8 = vrot.slane %v543_v47, 5  ;;  %v551_v3 = vrot.slane %v549_v54, 5  ;;  %v555_v25 = vrot.slane %v553_v5, 4 }
  0x4b   : > { %v528_v46 = vsel %vm8151_vm5, %v523_v9, %v527_v4  ;;  %v8453_v2 = vld [vmem:[%s8032_s9 + $0x9c] sm:$0xf]  ;;  %v538_v51 = vsel %vm8151_vm5, %v533_v16, %v537_v31  ;;  %v561_v7 = vrot.slane %v559_v37, 5  ;;  %v564_v31 = vshrl.u32 %v8438_v50, 16  ;;  %v8495_v14 = vld [vmem:[%s8032_s9 + $0xa8] sm:$0xf] }
  0x4c   : > { %10245 = vst [vmem:[#allocation42_spill] sm:$0xff] %v8447_v13  ;;  %10246 = vst [vmem:[#allocation43_spill] sm:$0xff] %v8453_v2  ;;  %6995 = vmatprep.mubr.msk.bf16.mxu0 %vm3122_vm1, %v8447_v13  ;;  %v8464_v4 = vcombine.low %v528_v46, %v538_v51  ;;  %v546_v9 = vor.u32 %v545_v8, %v542_v26  ;;  %v556_v47 = vor.u32 %v555_v25, %v551_v3  ;;  %v8478_v25 = vld [vmem:[%s8076_s14 + $0x84] sm:$0xf]  ;;  %v8561_v12 = vld [vmem:[%s8032_s9 + $0x8] sm:$0x1] }
  0x4d   : > { %v567_v5 = vshll.u32 %v8438_v50, 16  ;;  %v573_v16 = vshll.u32 %v8441_v6, 16  ;;  %v577_v37 = vshrl.u32 %v8441_v6, 16  ;;  %v583_v51 = vshll.u32 %v289_v11, 16  ;;  %10250 = vst [vmem:[#allocation47_spill] sm:$0xff] %v8478_v25  ;;  %10253 = vst [vmem:[#allocation50_spill] sm:$0xff] %v8495_v14 }
  0x4e   : > { %10248 = vst [vmem:[#allocation45_spill] sm:$0xff] %v8464_v4  ;;  %6681 = vmatprep.mubr.msk.bf16.mxu1 %vm755_vm4, %v8464_v4  ;;  %v547_v52 = vrot.slane %v546_v9, 4  ;;  %v557_v46 = vrot.slane %v556_v47, 4  ;;  %v8475_v8 = vcombine.low %v8453_v2, %v8462_v43  ;;  %v566_v26 = vrot.slane %v564_v31, 4  ;;  %v8481_v50 = vld [vmem:[%s8076_s14 + $0x88] sm:$0xf] }
  0x4f   : > { %v569_v54 = vrot.slane %v567_v5, 5  ;;  %v575_v55 = vrot.slane %v573_v16, 5  ;;  %v579_v13 = vrot.slane %v577_v37, 4  ;;  %10251 = vst [vmem:[#allocation48_spill] sm:$0xff] %v8481_v50  ;;  %v585_v47 = vrot.slane %v583_v51, 5 }
  0x50   : > { %10249 = vst [vmem:[#allocation46_spill] sm:$0xff] %v8475_v8  ;;  %v552_v4 = vsel %vm8151_vm5, %v547_v52, %v551_v3  ;;  %v562_v11 = vsel %vm8151_vm5, %v557_v46, %v561_v7  ;;  %6996 = vmatmul.mubr.msk.bf16.gmra.mrb[24].mxu0 %vm3122_vm1, %v8475_v8  ;;  %v292_v6 = vld [vmem:[%s8076_s14 + $0x8c] sm:$0x1]  ;;  %v588_v52 = vshrl.u32 %v8478_v25, 16  ;;  %v591_v46 = vshll.u32 %v8478_v25, 16 }
  0x51   : > { %v8491_v31 = vcombine.low %v552_v4, %v562_v11  ;;  %v570_v5 = vor.u32 %v569_v54, %v566_v26  ;;  %v580_v16 = vor.u32 %v579_v13, %v575_v55  ;;  %v8498_v3 = vld [vmem:[%s8032_s9 + $0xac] sm:$0xf]  ;;  %v597_v51 = vshll.u32 %v8481_v50, 16  ;;  %v8512_v8 = vld [vmem:[%s8076_s14 + $0x90] sm:$0xf] }
  0x52   : > { %v601_v54 = vshrl.u32 %v8481_v50, 16  ;;  %v607_v26 = vshll.u32 %v292_v6, 16  ;;  %v590_v11 = vrot.slane %v588_v52, 4  ;;  %v593_v37 = vrot.slane %v591_v46, 5  ;;  %10255 = vst [vmem:[#allocation52_spill] sm:$0xff] %v8512_v8 }
  0x53   : > { %10252 = vst [vmem:[#allocation49_spill] sm:$0xff] %v8491_v31  ;;  %6682 = vmatmul.mubr.msk.bf16.gmra.mrb[16].mxu1 %vm755_vm4, %v8491_v31  ;;  %v571_v13 = vrot.slane %v570_v5, 4  ;;  %v581_v4 = vrot.slane %v580_v16, 4  ;;  %v599_v7 = vrot.slane %v597_v51, 5  ;;  %v8509_v9 = vcombine.low %v8495_v14, %v8498_v3  ;;  %v8520_v52 = vld [vmem:[%s8076_s14 + $0x94] sm:$0xf] }
  0x54   : > { %v603_v6 = vrot.slane %v601_v54, 4  ;;  %10256 = vst [vmem:[#allocation53_spill] sm:$0xff] %v8520_v52  ;;  %v295_v46 = vld [vmem:[%s8076_s14 + $0x98] sm:$0x1]  ;;  %v594_v51 = vor.u32 %v593_v37, %v590_v11  ;;  %v609_v50 = vrot.slane %v607_v26, 5  ;;  %v612_v54 = vshrl.u32 %v8512_v8, 16 }
  0x55   : > { %10254 = vst [vmem:[#allocation51_spill] sm:$0xff] %v8509_v9  ;;  %v576_v25 = vsel %vm8151_vm5, %v571_v13, %v575_v55  ;;  %v586_v5 = vsel %vm8151_vm5, %v581_v4, %v585_v47  ;;  %6999 = vmatprep.mubr.msk.bf16.mxu0 %vm3122_vm1, %v8509_v9  ;;  %v8529_v55 = vld [vmem:[%s8032_s9 + $0xb4] sm:$0xf]  ;;  %v8532_v47 = vld [vmem:[%s8032_s9 + $0xb8] sm:$0xf]  ;;  %v621_v26 = vshll.u32 %v8520_v52, 16 }
  0x56   : > { %v8523_v31 = vcombine.low %v576_v25, %v586_v5  ;;  %v604_v13 = vor.u32 %v603_v6, %v599_v7  ;;  %v615_v25 = vshll.u32 %v8512_v8, 16  ;;  %v595_v37 = vrot.slane %v594_v51, 4  ;;  %v8542_v2 = vld [vmem:[%s8076_s14 + $0x9c] sm:$0xf]  ;;  %v8549_v8 = vld [vmem:[%s8076_s14 + $0xa0] sm:$0xf] }
  0x57   : > { %v625_v11 = vshrl.u32 %v8520_v52, 16  ;;  %v631_v5 = vshll.u32 %v295_v46, 16  ;;  %10258 = vst [vmem:[#allocation55_spill] sm:$0xff] %v8542_v2  ;;  %v614_v16 = vrot.slane %v612_v54, 4  ;;  %v8546_v9 = vcombine.low %v8529_v55, %v8532_v47  ;;  %10260 = vst [vmem:[#allocation57_spill] sm:$0xff] %v8549_v8 }
  0x58   : > { %10257 = vst [vmem:[#allocation54_spill] sm:$0xff] %v8523_v31  ;;  %6685 = vmatprep.mubr.msk.bf16.mxu1 %vm755_vm4, %v8523_v31  ;;  %v605_v6 = vrot.slane %v604_v13, 4  ;;  %v617_v4 = vrot.slane %v615_v25, 5  ;;  %v600_v51 = vsel %vm8151_vm5, %v595_v37, %v599_v7  ;;  %v623_v14 = vrot.slane %v621_v26, 5  ;;  %v298_v46 = vld [vmem:[%s8076_s14 + $0xa4] sm:$0x1] }
  0x59   : > { %10259 = vst [vmem:[#allocation56_spill] sm:$0xff] %v8546_v9  ;;  %v627_v52 = vrot.slane %v625_v11, 4  ;;  %v633_v25 = vrot.slane %v631_v5, 5  ;;  %7000 = vmatmul.mubr.msk.bf16.gmra.mrb[28].mxu0 %vm3122_vm1, %v8546_v9  ;;  %v636_v26 = vshrl.u32 %v8542_v2, 16  ;;  %v8571_v5 = vld [vmem:[%s8076_s14 + $0xa8] sm:$0xf] }
  0x5a   : > { %v610_v13 = vsel %vm8151_vm5, %v605_v6, %v609_v50  ;;  %v618_v54 = vor.u32 %v617_v4, %v614_v16  ;;  %v639_v50 = vshll.u32 %v8542_v2, 16  ;;  %v645_v16 = vshll.u32 %v8549_v8, 16  ;;  %10262 = vst [vmem:[#allocation59_spill] sm:$0xff] %v8571_v5  ;;  %v8582_v9 = vld [vmem:[%s8076_s14 + $0xac] sm:$0xf] }
  0x5b   : > { %v8563_v1 = vcombine.low %v600_v51, %v610_v13  ;;  %v628_v7 = vor.u32 %v627_v52, %v623_v14  ;;  %v649_v4 = vshrl.u32 %v8549_v8, 16  ;;  %v638_v52 = vrot.slane %v636_v26, 4 }
  0x5c   : > { %v619_v11 = vrot.slane %v618_v54, 4  ;;  %v655_v51 = vshll.u32 %v298_v46, 16  ;;  %v3377_v13 = vsel %vm8151_vm5, %v8108_v44, %v8067_v22  ;;  %v641_v37 = vrot.slane %v639_v50, 5  ;;  %v301_v46 = vld [vmem:[%s8076_s14 + $0xb0] sm:$0x1] }
  0x5d   : > { %10261 = vst [vmem:[#allocation58_spill] sm:$0xff] %v8563_v1  ;;  %6686 = vmatmul.mubr.msk.bf16.gmra.mrb[20].mxu1 %vm755_vm4, %v8563_v1  ;;  %v629_v6 = vrot.slane %v628_v7, 4  ;;  %v647_v43 = vrot.slane %v645_v16, 5  ;;  %v651_v31 = vrot.slane %v649_v4, 4  ;;  %v3384_v7 = vshll.u32 %v8561_v12, 16 }
  0x5e   : > { %v624_v54 = vsel %vm8151_vm5, %v619_v11, %v623_v14  ;;  %v657_v1 = vrot.slane %v655_v51, 5  ;;  %v660_v26 = vshrl.u32 %v8571_v5, 16  ;;  %v642_v22 = vor.u32 %v641_v37, %v638_v52  ;;  %v8597_v37 = vld [vmem:[%s8032_s9 + $0x14] sm:$0x1] }
  0x5f   : > { %v634_v2 = vsel %vm8151_vm5, %v629_v6, %v633_v25  ;;  %v652_v44 = vor.u32 %v651_v31, %v647_v43  ;;  %v663_v14 = vshll.u32 %v8571_v5, 16  ;;  %v3386_v11 = vrot.slane %v3384_v7, 5 }
  0x60   : > { %v8589_v8 = vcombine.low %v624_v54, %v634_v2  ;;  %v662_v50 = vrot.slane %v660_v26, 4  ;;  %v669_v16 = vshll.u32 %v8582_v9, 16  ;;  %v673_v25 = vshrl.u32 %v8582_v9, 16  ;;  %v8607_v26 = vld [vmem:[%s8076_s14 + $0xb4] sm:$0xf] }
  0x61   : > { %v643_v4 = vrot.slane %v642_v22, 4  ;;  %v653_v6 = vrot.slane %v652_v44, 4  ;;  %v665_v2 = vrot.slane %v663_v14, 5  ;;  %v679_v51 = vshll.u32 %v301_v46, 16 }
  0x62   : > { %10263 = vst [vmem:[#allocation60_spill] sm:$0xff] %v8589_v8  ;;  %6689 = vmatprep.mubr.msk.bf16.mxu1 %vm755_vm4, %v8589_v8  ;;  %v3387_v31 = vsel %vm8151_vm5, %v8110_v45, %v3386_v11  ;;  %v671_v52 = vrot.slane %v669_v16, 5  ;;  %v675_v54 = vrot.slane %v673_v25, 4  ;;  %v3401_v7 = vsel %vm8151_vm5, %v8134_v59, %v8092_v36  ;;  %v8610_v8 = vld [vmem:[%s8076_s14 + $0xb8] sm:$0xf] }
  0x63   : > { %v648_v46 = vsel %vm8151_vm5, %v643_v4, %v647_v43  ;;  %v658_v22 = vsel %vm8151_vm5, %v653_v6, %v657_v1  ;;  %v6162_v44 = vcombine.low %v3377_v13, %v3387_v31  ;;  %v666_v14 = vor.u32 %v665_v2, %v662_v50  ;;  %v304_v45 = vld [vmem:[%s8076_s14 + $0xbc] sm:$0x1] }
  0x64   : > { %v8617_v11 = vcombine.low %v648_v46, %v658_v22  ;;  %v676_v16 = vor.u32 %v675_v54, %v671_v52  ;;  %v681_v25 = vrot.slane %v679_v51, 5  ;;  %v3408_v5 = vshll.u32 %v8597_v37, 16 }
  0x65   : > { %7005 = vmatprep.mubr.msk.bf16.mxu0 %vm3122_vm1, %v6162_v44  ;;  %v667_v36 = vrot.slane %v666_v14, 4  ;;  %v684_v59 = vshrl.u32 %v8607_v26, 16  ;;  %v687_v43 = vshll.u32 %v8607_v26, 16  ;;  %v693_v4 = vshll.u32 %v8610_v8, 16 }
  0x66   : > { %10264 = vst [vmem:[#allocation61_spill] sm:$0xff] %v8617_v11  ;;  %6690 = vmatmul.mubr.msk.bf16.gmra.mrb[24].mxu1 %vm755_vm4, %v8617_v11  ;;  %v677_v1 = vrot.slane %v676_v16, 4  ;;  %v3410_v13 = vrot.slane %v3408_v5, 5  ;;  %v697_v50 = vshrl.u32 %v8610_v8, 16  ;;  %v703_v6 = vshll.u32 %v304_v45, 16 }
  0x67   : > { %v672_v2 = vsel %vm8151_vm5, %v667_v36, %v671_v52  ;;  %v686_v51 = vrot.slane %v684_v59, 4  ;;  %v689_v31 = vrot.slane %v687_v43, 5  ;;  %v695_v54 = vrot.slane %v693_v4, 5  ;;  %v8635_v16 = vld [vmem:[%s8032_s9 + $0x20] sm:$0x1] }
  0x68   : > { %v682_v46 = vsel %vm8151_vm5, %v677_v1, %v681_v25  ;;  %v3411_v22 = vsel %vm8151_vm5, %v8140_v0, %v3410_v13  ;;  %v699_v44 = vrot.slane %v697_v50, 4  ;;  %v705_v14 = vrot.slane %v703_v6, 5  ;;  %v8646_v25 = vld [vmem:[%s10052_s3 + $0x18] sm:$0xff]  }
  0x69   : > { %v8637_v5 = vcombine.low %v672_v2, %v682_v46  ;;  %v8639_v45 = vcombine.low %v3401_v7, %v3411_v22  ;;  %v690_v11 = vor.u32 %v689_v31, %v686_v51  ;;  %v10266_v52 = vshrl.u32 %v8071_v24, 16 }
  0x6a   : > { %v700_v59 = vor.u32 %v699_v44, %v695_v54  ;;  %v10267_v0 = vshll.u32 %v8071_v24, 16  ;;  %v3422_v4 = vshll.u32 %v8084_v29, 16  ;;  %v10268_v1 = vshrl.u32 %v8084_v29, 16  ;;  %v8663_v29 = vld [vmem:[%s8032_s9 + $0x2c] sm:$0x1] }
  0x6b   : > { %10265 = vst [vmem:[#allocation62_spill] sm:$0xff] %v8637_v5  ;;  %v3415_v36 = vrot.slane %v10266_v52, 4  ;;  %6693 = vmatprep.mubr.msk.bf16.mxu1 %vm755_vm4, %v8637_v5  ;;  %7006 = vmatmul.mubr.msk.bf16.vlgmr.msra.gmra.mrb[0].mxu0 %vm3122_vm1, %v8639_v45  ;;  %v691_v13 = vrot.slane %v690_v11, 4  ;;  %v3432_v50 = vshll.u32 %v8635_v16, 16  ;;  %v5945_v6 = vcombine.low %v8096_v38, %v8105_v42  ;;  %v10332_v5 = vld [vmem:[#allocation41_spill] sm:$0xff] }
  0x6c   : > { %v3418_v43 = vrot.slane %v10267_v0, 5  ;;  %v3428_v7 = vrot.slane %v10268_v1, 4  ;;  %v10269_v24 = vshrl.u32 %v8114_v48, 16  ;;  %v701_v51 = vrot.slane %v700_v59, 4  ;;  %7038 = vmatpush3.bf16.msra.mxu0 %v8060_v18 }
  0x6d   : > { %v3424_v46 = vrot.slane %v3422_v4, 5  ;;  %v10270_v22 = vshll.u32 %v8114_v48, 16  ;;  %v696_v11 = vsel %vm8151_vm5, %v691_v13, %v695_v54  ;;  %v3434_v52 = vrot.slane %v3432_v50, 5  ;;  %7071 = vmatprep.subr.bf16.mxu0 %v8646_v25  ;;  %v8684_v13 = vld [vmem:[%s8032_s9 + $0x38] sm:$0x1] }
  0x6e   : > { %v3439_v2 = vrot.slane %v10269_v24, 4  ;;  %v3419_v31 = vor.u32 %v3418_v43, %v3415_v36  ;;  %v3446_v38 = vshll.u32 %v8126_v53, 16  ;;  %v10271_v42 = vshrl.u32 %v8126_v53, 16 }
  0x6f   : > { %v3442_v44 = vrot.slane %v10270_v22, 5  ;;  %v706_v36 = vsel %vm8151_vm5, %v701_v51, %v705_v14  ;;  %v3429_v48 = vor.u32 %v3428_v7, %v3424_v46  ;;  %v3456_v1 = vshll.u32 %v8663_v29, 16 }
  0x70   : > { %v3452_v0 = vrot.slane %v10271_v42, 4  ;;  %v3420_v59 = vrot.slane %v3419_v31, 4  ;;  %v8676_v4 = vcombine.low %v696_v11, %v706_v36  ;;  %v3448_v18 = vrot.slane %v3446_v38, 5 }
  0x71   : > { %v3443_v43 = vor.u32 %v3442_v44, %v3439_v2  ;;  %v8681_v54 = vcombine.low %v8132_v58, %v8138_v63  ;;  %v3430_v50 = vrot.slane %v3429_v48, 4  ;;  %v10273_v14 = vshrl.u32 %v8161_v27, 16 }
  0x72   : > { %10272 = vst [vmem:[#allocation63_spill] sm:$0xff] %v8676_v4  ;;  %v3425_v53 = vsel %vm8151_vm5, %v3420_v59, %v3424_v46  ;;  %6694 = vmatmul.mubr.msk.bf16.gmra.mrb[28].mxu1 %vm755_vm4, %v8676_v4  ;;  %v3453_v2 = vor.u32 %v3452_v0, %v3448_v18  ;;  %v3458_v51 = vrot.slane %v3456_v1, 5  ;;  %v10274_v31 = vshll.u32 %v8161_v27, 16  ;;  %v8706_v59 = vld [vmem:[%s8032_s9 + $0x44] sm:$0x1] }
  0x73   : > { %v3444_v24 = vrot.slane %v3443_v43, 4  ;;  %v3463_v7 = vrot.slane %v10273_v14, 4  ;;  %v3470_v63 = vshll.u32 %v8166_v34, 16  ;;  %v3435_v22 = vsel %vm8151_vm5, %v3430_v50, %v3434_v52  ;;  %6699 = vmatprep.mubr.msk.bf16.mxu1 %vm755_vm4, %v5945_v6 }
  0x74   : > { %v3466_v58 = vrot.slane %v10274_v31, 5  ;;  %v10275_v44 = vshrl.u32 %v8166_v34, 16  ;;  %v3480_v38 = vshll.u32 %v8684_v13, 16  ;;  %v8703_v42 = vcombine.low %v3425_v53, %v3435_v22 }
  0x75   : > { %v3449_v46 = vsel %vm8151_vm5, %v3444_v24, %v3448_v18  ;;  %v3454_v0 = vrot.slane %v3453_v2, 4  ;;  %v3472_v36 = vrot.slane %v3470_v63, 5  ;;  %v8710_v52 = vcombine.low %v8169_v49, %v8174_v56 }
  0x76   : > { %v3476_v11 = vrot.slane %v10275_v44, 4  ;;  %10276 = vst [vmem:[#allocation64_spill] sm:$0xff] %v8703_v42  ;;  %v3467_v27 = vor.u32 %v3466_v58, %v3463_v7  ;;  %v3482_v48 = vrot.slane %v3480_v38, 5  ;;  %v10277_v6 = vshrl.u32 %v8185_v10, 16  ;;  %7009 = vmatprep.mubr.msk.bf16.mxu0 %vm3122_vm1, %v8703_v42 }
  0x77   : > { %v10278_v34 = vshll.u32 %v8185_v10, 16  ;;  %v3459_v1 = vsel %vm8151_vm5, %v3454_v0, %v3458_v51  ;;  %v3494_v24 = vshll.u32 %v8188_v20, 16  ;;  %v10280_v56 = vshrl.u32 %v8188_v20, 16  ;;  %v8730_v51 = vld [vmem:[%s8032_s9 + $0x50] sm:$0x1] }
  0x78   : > { %v3487_v43 = vrot.slane %v10277_v6, 4  ;;  %v3468_v53 = vrot.slane %v3467_v27, 4  ;;  %v3477_v50 = vor.u32 %v3476_v11, %v3472_v36  ;;  %v8721_v14 = vcombine.low %v3449_v46, %v3459_v1  ;;  %v8741_v0 = vld [vmem:[%s10051_s2 + $0xc] sm:$0xf] }
  0x79   : > { %v3490_v18 = vrot.slane %v10278_v34, 5  ;;  %v3500_v7 = vrot.slane %v10280_v56, 4  ;;  %v3504_v2 = vshll.u32 %v8706_v59, 16  ;;  %v3496_v63 = vrot.slane %v3494_v24, 5 }
  0x7a   : > { %10279 = vst [vmem:[#allocation65_spill] sm:$0xff] %v8721_v14  ;;  %v3473_v31 = vsel %vm8151_vm5, %v3468_v53, %v3472_v36  ;;  %v3478_v58 = vrot.slane %v3477_v50, 4  ;;  %7010 = vmatmul.mubr.msk.bf16.gmra.mrb[4].mxu0 %vm3122_vm1, %v8721_v14  ;;  %v10281_v20 = vshrl.u32 %v8217_v57, 16  ;;  %v10282_v11 = vshll.u32 %v8217_v57, 16  ;;  %6700 = vmatmul.mubr.msk.bf16.vlgmr.msra.gmra.mrb[0].mxu1 %vm755_vm4, %v8681_v54  ;;  %v8761_v53 = vld [vmem:[%s8032_s9 + $0x5c] sm:$0x1] }
  0x7b   : > { %v3491_v49 = vor.u32 %v3490_v18, %v3487_v43  ;;  %v3506_v46 = vrot.slane %v3504_v2, 5  ;;  %v3501_v36 = vor.u32 %v3500_v7, %v3496_v63  ;;  %v3518_v6 = vshll.u32 %v8220_v23, 16  ;;  %6732 = vmatpush3.bf16.msra.mxu1 %v8064_v19  ;;  %6703 = vmatprep.mubr.msk.bf16.mxu1 %vm755_vm4, %v8710_v52 }
  0x7c   : > { %v3511_v44 = vrot.slane %v10281_v20, 4  ;;  %v3514_v38 = vrot.slane %v10282_v11, 5  ;;  %v3483_v27 = vsel %vm8151_vm5, %v3478_v58, %v3482_v48  ;;  %v10283_v43 = vshrl.u32 %v8220_v23, 16  ;;  %7822 = vmatprep.subr.msk.bf16.mxu1 %vm804_vm0, %v8741_v0 }
  0x7d   : > { %v3492_v22 = vrot.slane %v3491_v49, 4  ;;  %v8751_v57 = vcombine.low %v3473_v31, %v3483_v27  ;;  %v8757_v18 = vcombine.low %v8198_v35, %v8207_v61  ;;  %v3528_v48 = vshll.u32 %v8730_v51, 16  ;;  %v8786_v27 = vld [vmem:[%s8032_s9 + $0x68] sm:$0x1] }
  0x7e   : > { %v3524_v34 = vrot.slane %v10283_v43, 4  ;;  %v3515_v1 = vor.u32 %v3514_v38, %v3511_v44  ;;  %v3502_v50 = vrot.slane %v3501_v36, 4  ;;  %v3520_v24 = vrot.slane %v3518_v6, 5 }
  0x7f   : > { %10284 = vst [vmem:[#allocation66_spill] sm:$0xff] %v8751_v57  ;;  %v3497_v23 = vsel %vm8151_vm5, %v3492_v22, %v3496_v63  ;;  %v10285_v19 = vshrl.u32 %v8256_v33, 16  ;;  %7013 = vmatprep.mubr.msk.bf16.mxu0 %vm3122_vm1, %v8751_v57  ;;  %v3530_v61 = vrot.slane %v3528_v48, 5  ;;  %v10286_v56 = vshll.u32 %v8256_v33, 16  ;;  %v7898_v57 = vld [vmem:[%s8076_s14 + $0x28] sm:$0xf] }
  0x80   : > { %v3516_v35 = vrot.slane %v3515_v1, 4  ;;  %v3542_v2 = vshll.u32 %v8259_v39, 16  ;;  %v3507_v31 = vsel %vm8151_vm5, %v3502_v50, %v3506_v46  ;;  %v3525_v58 = vor.u32 %v3524_v34, %v3520_v24 }
  0x81   : > { %v3535_v49 = vrot.slane %v10285_v19, 4  ;;  %v3538_v7 = vrot.slane %v10286_v56, 5  ;;  %v10287_v63 = vshrl.u32 %v8259_v39, 16  ;;  %v3552_v20 = vshll.u32 %v8761_v53, 16 }
  0x82   : > { %v8779_v44 = vcombine.low %v3497_v23, %v3507_v31  ;;  %v8783_v11 = vcombine.low %v8237_v62, %v8241_v30  ;;  %v3544_v33 = vrot.slane %v3542_v2, 5  ;;  %v3521_v36 = vsel %vm8151_vm5, %v3516_v35, %v3520_v24  ;;  %6704 = vmatmul.mubr.msk.bf16.gmra.mrb[4].mxu1 %vm755_vm4, %v8757_v18 }
  0x83   : > { %v3548_v22 = vrot.slane %v10287_v63, 4  ;;  %v3539_v38 = vor.u32 %v3538_v7, %v3535_v49  ;;  %v3526_v46 = vrot.slane %v3525_v58, 4  ;;  %v3554_v6 = vrot.slane %v3552_v20, 5  ;;  %v8815_v7 = vld [vmem:[%s8032_s9 + $0x74] sm:$0x1] }
  0x84   : > { %10288 = vst [vmem:[#allocation67_spill] sm:$0xff] %v8779_v44  ;;  %v10289_v39 = vshrl.u32 %v8289_v40, 16  ;;  %7014 = vmatmul.mubr.msk.bf16.gmra.mrb[8].mxu0 %vm3122_vm1, %v8779_v44  ;;  %v10290_v30 = vshll.u32 %v8289_v40, 16  ;;  %v3566_v48 = vshll.u32 %v8292_v28, 16  ;;  %v8803_v50 = vcombine.low %v8268_v21, %v8277_v32  ;;  %6707 = vmatprep.mubr.msk.bf16.mxu1 %vm755_vm4, %v8783_v11 }
  0x85   : > { %v3540_v34 = vrot.slane %v3539_v38, 4  ;;  %v3549_v1 = vor.u32 %v3548_v22, %v3544_v33  ;;  %v3531_v23 = vsel %vm8151_vm5, %v3526_v46, %v3530_v61  ;;  %v10291_v24 = vshrl.u32 %v8292_v28, 16 }
  0x86   : > { %v3559_v43 = vrot.slane %v10289_v39, 4  ;;  %v3562_v62 = vrot.slane %v10290_v30, 5  ;;  %v3576_v49 = vshll.u32 %v8786_v27, 16  ;;  %v8808_v35 = vcombine.low %v3521_v36, %v3531_v23 }
  0x87   : > { %v3572_v19 = vrot.slane %v10291_v24, 4  ;;  %v3545_v40 = vsel %vm8151_vm5, %v3540_v34, %v3544_v33  ;;  %v3550_v56 = vrot.slane %v3549_v1, 4  ;;  %v3568_v21 = vrot.slane %v3566_v48, 5  ;;  %v10297_v1 = vld [vmem:[#allocation19_spill] sm:$0xff] }
  0x88   : > { %10292 = vst [vmem:[#allocation68_spill] sm:$0xff] %v8808_v35  ;;  %v3563_v61 = vor.u32 %v3562_v62, %v3559_v43  ;;  %v3578_v32 = vrot.slane %v3576_v49, 5  ;;  %v10293_v28 = vshrl.u32 %v8317_v41, 16  ;;  %v10294_v31 = vshll.u32 %v8317_v41, 16  ;;  %7017 = vmatprep.mubr.msk.bf16.mxu0 %vm3122_vm1, %v8808_v35  ;;  %v8832_v41 = vld [vmem:[%s8032_s9 + $0x80] sm:$0x1] }
  0x89   : > { %v3555_v63 = vsel %vm8151_vm5, %v3550_v56, %v3554_v6  ;;  %v3590_v20 = vshll.u32 %v8326_v17, 16  ;;  %v10295_v38 = vshrl.u32 %v8326_v17, 16  ;;  %v3573_v46 = vor.u32 %v3572_v19, %v3568_v21  ;;  %v10299_v62 = vld [vmem:[#allocation26_spill] sm:$0xff] }
  0x8a   : > { %v3583_v2 = vrot.slane %v10293_v28, 4  ;;  %v3586_v58 = vrot.slane %v10294_v31, 5  ;;  %v3564_v22 = vrot.slane %v3563_v61, 4  ;;  %v8828_v36 = vcombine.low %v3545_v40, %v3555_v63  ;;  %v10302_v61 = vld [vmem:[#allocation27_spill] sm:$0xff]  ;;  %6708 = vmatmul.mubr.msk.bf16.gmra.mrb[8].mxu1 %vm755_vm4, %v8803_v50  ;;  %v10304_v63 = vld [vmem:[#allocation24_spill] sm:$0xff] }
  0x8b   : > { %v3596_v33 = vrot.slane %v10295_v38, 4  ;;  %v3600_v43 = vshll.u32 %v8815_v7, 16  ;;  %v8838_v6 = vcombine.low %v10297_v1, %v8305_v60  ;;  %v3592_v30 = vrot.slane %v3590_v20, 5  ;;  %v7897_v35 = vld [vmem:[%s8076_s14 + $0x20] sm:$0x1] }
  0x8c   : > { %10296 = vst [vmem:[#allocation69_spill] sm:$0xff] %v8828_v36  ;;  %v3587_v39 = vor.u32 %v3586_v58, %v3583_v2  ;;  %v3569_v34 = vsel %vm8151_vm5, %v3564_v22, %v3568_v21  ;;  %v10300_v48 = vshrl.u32 %v10299_v62, 16  ;;  %v3574_v23 = vrot.slane %v3573_v46, 4  ;;  %7018 = vmatmul.mubr.msk.bf16.gmra.mrb[12].mxu0 %vm3122_vm1, %v8828_v36  ;;  %v10305_v22 = vld [vmem:[#allocation23_spill] sm:$0xff] }
  0x8d   : > { %10298 = vst [vmem:[#allocation19_spill] sm:$0xff] %v8838_v6  ;;  %v3602_v19 = vrot.slane %v3600_v43, 5  ;;  %v10301_v49 = vshll.u32 %v10299_v62, 16  ;;  %v3597_v56 = vor.u32 %v3596_v33, %v3592_v30  ;;  %v3614_v21 = vshll.u32 %v10302_v61, 16  ;;  %v8861_v33 = vld [vmem:[%s8032_s9 + $0x8c] sm:$0x1]  ;;  %6711 = vmatprep.mubr.msk.bf16.mxu1 %vm755_vm4, %v8838_v6 }
  0x8e   : > { %v3607_v17 = vrot.slane %v10300_v48, 4  ;;  %v3588_v24 = vrot.slane %v3587_v39, 4  ;;  %v10303_v60 = vshrl.u32 %v10302_v61, 16  ;;  %v3624_v2 = vshll.u32 %v8832_v41, 16  ;;  %v10308_v62 = vld [vmem:[#allocation32_spill] sm:$0xff] }
  0x8f   : > { %v3610_v40 = vrot.slane %v10301_v49, 5  ;;  %v3579_v31 = vsel %vm8151_vm5, %v3574_v23, %v3578_v32  ;;  %v8858_v20 = vcombine.low %v10305_v22, %v10304_v63  ;;  %v3598_v39 = vrot.slane %v3597_v56, 4  ;;  %v10311_v49 = vld [vmem:[#allocation33_spill] sm:$0xff] }
  0x90   : > { %v3620_v28 = vrot.slane %v10303_v60, 4  ;;  %v3593_v58 = vsel %vm8151_vm5, %v3588_v24, %v3592_v30  ;;  %v8863_v46 = vcombine.low %v3569_v34, %v3579_v31  ;;  %v3616_v43 = vrot.slane %v3614_v21, 5  ;;  %v10315_v31 = vld [vmem:[#allocation29_spill] sm:$0xff] }
  0x91   : > { %10306 = vst [vmem:[#allocation26_spill] sm:$0xff] %v8858_v20  ;;  %v3611_v38 = vor.u32 %v3610_v40, %v3607_v17  ;;  %v3626_v1 = vrot.slane %v3624_v2, 5  ;;  %v10309_v48 = vshrl.u32 %v10308_v62, 16  ;;  %v10310_v23 = vshll.u32 %v10308_v62, 16  ;;  %v10314_v2 = vld [vmem:[#allocation30_spill] sm:$0xff] }
  0x92   : > { %10307 = vst [vmem:[#allocation27_spill] sm:$0xff] %v8863_v46  ;;  %v3638_v17 = vshll.u32 %v10311_v49, 16  ;;  %7021 = vmatprep.mubr.msk.bf16.mxu0 %vm3122_vm1, %v8863_v46  ;;  %v3603_v34 = vsel %vm8151_vm5, %v3598_v39, %v3602_v19  ;;  %v3621_v40 = vor.u32 %v3620_v28, %v3616_v43  ;;  %v10312_v56 = vshrl.u32 %v10311_v49, 16  ;;  %v8886_v62 = vld [vmem:[%s8032_s9 + $0x98] sm:$0x1]  ;;  %6712 = vmatmul.mubr.msk.bf16.gmra.mrb[12].mxu1 %vm755_vm4, %v8858_v20 }
  0x93   : > { %v3612_v32 = vrot.slane %v3611_v38, 4  ;;  %v3631_v30 = vrot.slane %v10309_v48, 4  ;;  %v3634_v24 = vrot.slane %v10310_v23, 5  ;;  %v3648_v21 = vshll.u32 %v8861_v33, 16  ;;  %v10317_v39 = vld [vmem:[#allocation37_spill] sm:$0xff] }
  0x94   : > { %v3644_v61 = vrot.slane %v10312_v56, 4  ;;  %v8879_v60 = vcombine.low %v3593_v58, %v3603_v34  ;;  %v8883_v63 = vcombine.low %v10315_v31, %v10314_v2  ;;  %v3640_v38 = vrot.slane %v3638_v17, 5  ;;  %v10320_v2 = vld [vmem:[#allocation38_spill] sm:$0xff] }
  0x95   : > { %v3635_v22 = vor.u32 %v3634_v24, %v3631_v30  ;;  %v3617_v48 = vsel %vm8151_vm5, %v3612_v32, %v3616_v43  ;;  %v3622_v19 = vrot.slane %v3621_v40, 4  ;;  %v3650_v28 = vrot.slane %v3648_v21, 5  ;;  %v10321_v43 = vld [vmem:[#allocation36_spill] sm:$0xff]  ;;  %v10322_v32 = vld [vmem:[#allocation34_spill] sm:$0xff] }
  0x96   : > { %10313 = vst [vmem:[#allocation24_spill] sm:$0xff] %v8879_v60  ;;  %10316 = vst [vmem:[#allocation23_spill] sm:$0xff] %v8883_v63  ;;  %v10318_v23 = vshrl.u32 %v10317_v39, 16  ;;  %v3645_v58 = vor.u32 %v3644_v61, %v3640_v38  ;;  %v10319_v34 = vshll.u32 %v10317_v39, 16  ;;  %v3662_v31 = vshll.u32 %v10320_v2, 16  ;;  %7022 = vmatmul.mubr.msk.bf16.gmra.mrb[16].mxu0 %vm3122_vm1, %v8879_v60  ;;  %6715 = vmatprep.mubr.msk.bf16.mxu1 %vm755_vm4, %v8883_v63 }
  0x97   : > { %v3636_v56 = vrot.slane %v3635_v22, 4  ;;  %v3627_v30 = vsel %vm8151_vm5, %v3622_v19, %v3626_v1  ;;  %v8901_v24 = vcombine.low %v10322_v32, %v10321_v43  ;;  %v10324_v17 = vshrl.u32 %v10320_v2, 16  ;;  %v8913_v1 = vld [vmem:[%s8032_s9 + $0xa4] sm:$0x1]  ;;  %v10326_v2 = vld [vmem:[#allocation43_spill] sm:$0xff] }
  0x98   : > { %v3655_v49 = vrot.slane %v10318_v23, 4  ;;  %v3658_v10 = vrot.slane %v10319_v34, 5  ;;  %v3672_v61 = vshll.u32 %v8886_v62, 16  ;;  %v8908_v21 = vcombine.low %v3617_v48, %v3627_v30 }
  0x99   : > { %10323 = vst [vmem:[#allocation32_spill] sm:$0xff] %v8901_v24  ;;  %v3668_v40 = vrot.slane %v10324_v17, 4  ;;  %v3641_v22 = vsel %vm8151_vm5, %v3636_v56, %v3640_v38  ;;  %v3646_v39 = vrot.slane %v3645_v58, 4  ;;  %v3664_v19 = vrot.slane %v3662_v31, 5 }
  0x9a   : > { %10325 = vst [vmem:[#allocation33_spill] sm:$0xff] %v8908_v21  ;;  %v3659_v23 = vor.u32 %v3658_v10, %v3655_v49  ;;  %v3674_v34 = vrot.slane %v3672_v61, 5  ;;  %v10327_v43 = vshrl.u32 %v10326_v2, 16  ;;  %v10328_v17 = vshll.u32 %v10326_v2, 16  ;;  %7025 = vmatprep.mubr.msk.bf16.mxu0 %vm3122_vm1, %v8908_v21  ;;  %v10329_v49 = vld [vmem:[#allocation44_spill] sm:$0xff]  ;;  %6716 = vmatmul.mubr.msk.bf16.gmra.mrb[16].mxu1 %vm755_vm4, %v8901_v24 }
  0x9b   : > { %v3651_v10 = vsel %vm8151_vm5, %v3646_v39, %v3650_v28  ;;  %v3686_v56 = vshll.u32 %v10329_v49, 16  ;;  %v10330_v58 = vshrl.u32 %v10329_v49, 16  ;;  %v3669_v61 = vor.u32 %v3668_v40, %v3664_v19  ;;  %v8932_v2 = vld [vmem:[%s8032_s9 + $0xb0] sm:$0x1] }
  0x9c   : > { %v3679_v32 = vrot.slane %v10327_v43, 4  ;;  %v3682_v48 = vrot.slane %v10328_v17, 5  ;;  %v3660_v38 = vrot.slane %v3659_v23, 4  ;;  %v8928_v31 = vcombine.low %v3641_v22, %v3651_v10  ;;  %v10333_v21 = vld [vmem:[#allocation40_spill] sm:$0xff]  ;;  %v10335_v23 = vld [vmem:[#allocation50_spill] sm:$0xff] }
  0x9d   : > { %v3692_v30 = vrot.slane %v10330_v58, 4  ;;  %v3696_v43 = vshll.u32 %v8913_v1, 16  ;;  %v8938_v28 = vcombine.low %v10333_v21, %v10332_v5  ;;  %v3688_v39 = vrot.slane %v3686_v56, 5  ;;  %v10339_v56 = vld [vmem:[#allocation48_spill] sm:$0xff] }
  0x9e   : > { %10331 = vst [vmem:[#allocation30_spill] sm:$0xff] %v8928_v31  ;;  %v3683_v4 = vor.u32 %v3682_v48, %v3679_v32  ;;  %v3665_v17 = vsel %vm8151_vm5, %v3660_v38, %v3664_v19  ;;  %v10336_v49 = vshrl.u32 %v10335_v23, 16  ;;  %v3670_v22 = vrot.slane %v3669_v61, 4  ;;  %7026 = vmatmul.mubr.msk.bf16.gmra.mrb[20].mxu0 %vm3122_vm1, %v8928_v31  ;;  %v10340_v61 = vld [vmem:[#allocation47_spill] sm:$0xff] }
  0x9f   : > { %10334 = vst [vmem:[#allocation29_spill] sm:$0xff] %v8938_v28  ;;  %v3698_v40 = vrot.slane %v3696_v43, 5  ;;  %v10337_v32 = vshll.u32 %v10335_v23, 16  ;;  %v3693_v60 = vor.u32 %v3692_v30, %v3688_v39  ;;  %v3710_v46 = vshll.u32 %v8498_v3, 16  ;;  %v8959_v23 = vld [vmem:[%s8032_s9 + $0xbc] sm:$0x1]  ;;  %6719 = vmatprep.mubr.msk.bf16.mxu1 %vm755_vm4, %v8938_v28 }
  0xa0   : > { %v3703_v58 = vrot.slane %v10336_v49, 4  ;;  %v3684_v10 = vrot.slane %v3683_v4, 4  ;;  %v10338_v19 = vshrl.u32 %v8498_v3, 16  ;;  %v3720_v5 = vshll.u32 %v8932_v2, 16 }
  0xa1   : > { %v3706_v48 = vrot.slane %v10337_v32, 5  ;;  %v3675_v21 = vsel %vm8151_vm5, %v3670_v22, %v3674_v34  ;;  %v8956_v43 = vcombine.low %v10340_v61, %v10339_v56  ;;  %v3694_v49 = vrot.slane %v3693_v60, 4  ;;  %v10347_v61 = vld [vmem:[#allocation53_spill] sm:$0xff] }
  0xa2   : > { %v3716_v38 = vrot.slane %v10338_v19, 4  ;;  %v3689_v4 = vsel %vm8151_vm5, %v3684_v10, %v3688_v39  ;;  %v8963_v3 = vcombine.low %v3665_v17, %v3675_v21  ;;  %v3712_v32 = vrot.slane %v3710_v46, 5 }
  0xa3   : > { %10341 = vst [vmem:[#allocation37_spill] sm:$0xff] %v8956_v43  ;;  %v3707_v30 = vor.u32 %v3706_v48, %v3703_v58  ;;  %v3722_v19 = vrot.slane %v3720_v5, 5  ;;  %v10343_v39 = vshrl.u32 %v8529_v55, 16  ;;  %v10344_v10 = vshll.u32 %v8529_v55, 16  ;;  %6720 = vmatmul.mubr.msk.bf16.gmra.mrb[20].mxu1 %vm755_vm4, %v8956_v43 }
  0xa4   : > { %10342 = vst [vmem:[#allocation38_spill] sm:$0xff] %v8963_v3  ;;  %v3734_v48 = vshll.u32 %v8532_v47, 16  ;;  %7029 = vmatprep.mubr.msk.bf16.mxu0 %vm3122_vm1, %v8963_v3  ;;  %v3699_v60 = vsel %vm8151_vm5, %v3694_v49, %v3698_v40  ;;  %v3717_v46 = vor.u32 %v3716_v38, %v3712_v32  ;;  %v10345_v17 = vshrl.u32 %v8532_v47, 16 }
  0xa5   : > { %v3708_v34 = vrot.slane %v3707_v30, 4  ;;  %v3727_v22 = vrot.slane %v10343_v39, 4  ;;  %v3730_v58 = vrot.slane %v10344_v10, 5  ;;  %v3744_v21 = vshll.u32 %v8959_v23, 16  ;;  %v10348_v30 = vld [vmem:[#allocation52_spill] sm:$0xff] }
  0xa6   : > { %v3740_v5 = vrot.slane %v10345_v17, 4  ;;  %v8979_v56 = vcombine.low %v3689_v4, %v3699_v60  ;;  %v8983_v55 = vcombine.low %v10348_v30, %v10347_v61  ;;  %v3736_v10 = vrot.slane %v3734_v48, 5  ;;  %v10362_v30 = vld [vmem:[#allocation9_spill] sm:$0xff] }
  0xa7   : > { %v3731_v39 = vor.u32 %v3730_v58, %v3727_v22  ;;  %v3713_v3 = vsel %vm8151_vm5, %v3708_v34, %v3712_v32  ;;  %v3718_v31 = vrot.slane %v3717_v46, 4  ;;  %v3746_v36 = vrot.slane %v3744_v21, 5  ;;  %v10353_v58 = vld [vmem:[#allocation3_spill] sm:$0xff]  ;;  %v10358_v46 = vld [vmem:[#allocation5_spill] sm:$0xff] }
  0xa8   : > { %10346 = vst [vmem:[#allocation36_spill] sm:$0xff] %v8979_v56  ;;  %10349 = vst [vmem:[#allocation34_spill] sm:$0xff] %v8983_v55  ;;  %v3741_v38 = vor.u32 %v3740_v5, %v3736_v10  ;;  %v4064_v47 = vrot.slane %v8561_v12, 5  ;;  %v4071_v22 = vrot.slane %v8597_v37, 5  ;;  %7030 = vmatmul.mubr.msk.bf16.gmra.mrb[24].mxu0 %vm3122_vm1, %v8979_v56  ;;  %v10354_v48 = vrot.slane %v10353_v58, 5  ;;  %v10355_v12 = vld [vmem:[#allocation2_spill] sm:$0xff]  ;;  %6723 = vmatprep.mubr.msk.bf16.mxu1 %vm755_vm4, %v8983_v55 }
  0xa9   : > { %v3732_v40 = vrot.slane %v3731_v39, 4  ;;  %v3723_v4 = vsel %vm8151_vm5, %v3718_v31, %v3722_v19  ;;  %v10356_v60 = vrot.slane %v10355_v12, 9  ;;  %v10357_v19 = vld [vmem:[#allocation7_spill] sm:$0xff]  ;;  %v10359_v17 = vrot.slane %v10358_v46, 5  ;;  %v10360_v5 = vld [vmem:[#allocation4_spill] sm:$0xff] }
  0xaa   : > { %v8997_v32 = vcombine.low %v3713_v3, %v3723_v4  ;;  %v3742_v34 = vrot.slane %v3741_v38, 4  ;;  %v4065_v3 = vsel %vm8990_vm8, %v10357_v19, %v4064_v47  ;;  %v10361_v21 = vrot.slane %v10360_v5, 9  ;;  %v7882_v47 = vld [vmem:[%s8032_s9 + $0x1c] sm:$0xf]  ;;  %v7883_v58 = vld [vmem:[%s8076_s14 + $0x4] sm:$0xf] }
  0xab   : > { %v4062_v31 = vsel %vm8990_vm8, %v10356_v60, %v10354_v48  ;;  %v3737_v37 = vsel %vm8151_vm5, %v3732_v40, %v3736_v10  ;;  %v4072_v39 = vsel %vm8990_vm8, %v10362_v30, %v4071_v22  ;;  %v4075_v4 = vrot.slane %v7882_v47, 5  ;;  %v7884_v12 = vld [vmem:[%s8076_s14 + $0x8] sm:$0x1]  ;;  %v10364_v19 = vld [vmem:[#allocation57_spill] sm:$0xff] }
  0xac   : > { %10352 = vst [vmem:[#allocation43_spill] sm:$0xff] %v8997_v32  ;;  %v4069_v61 = vsel %vm8990_vm8, %v10361_v21, %v10359_v17  ;;  %7033 = vmatprep.mubr.msk.bf16.mxu0 %vm3122_vm1, %v8997_v32  ;;  %v3747_v10 = vsel %vm8151_vm5, %v3742_v34, %v3746_v36  ;;  %v6211_v40 = vcombine.low %v4062_v31, %v4065_v3  ;;  %v1282_v48 = vrot.slane %v7883_v58, 5  ;;  %v10365_v46 = vld [vmem:[#allocation55_spill] sm:$0xff]  ;;  %v7885_v31 = vld [vmem:[%s8032_s9 + $0x18] sm:$0xf] }
  0xad   : > { %v9027_v38 = vcombine.low %v4069_v61, %v4072_v39  ;;  %v9031_v22 = vcombine.low %v3737_v37, %v3747_v10  ;;  %v1285_v60 = vrot.slane %v7884_v12, 5  ;;  %v9036_v17 = vcombine.low %v10365_v46, %v10364_v19  ;;  %v10367_v36 = vld [vmem:[#allocation59_spill] sm:$0xff]  ;;  %v7886_v61 = vld [vmem:[%s8076_s14] sm:$0xf]  ;;  %v7887_v39 = vld [vmem:[%s8076_s14 + $0x10] sm:$0xf] }
  0xae   : > { %v9040_v34 = vcombine.low %v10367_v36, %v8582_v9  ;;  %v6197_v3 = vrot.slane %v7885_v31, 9  ;;  %v4077_v5 = vrot.slane %v4075_v4, 4  ;;  %v4078_v21 = vrot.slane %v8635_v16, 5  ;;  %v7888_v47 = vld [vmem:[%s8032_s9 + $0x28] sm:$0xf] }
  0xaf   : > { %10363 = vst [vmem:[#allocation44_spill] sm:$0xff] %v9031_v22  ;;  %10366 = vst [vmem:[#allocation41_spill] sm:$0xff] %v9036_v17  ;;  %v5977_v30 = vrot.slane %v7886_v61, 9  ;;  %v1284_v37 = vrot.slane %v1282_v48, 4  ;;  %v1289_v10 = vrot.slane %v7887_v39, 5  ;;  %v4082_v9 = vrot.slane %v7888_v47, 5  ;;  %6724 = vmatmul.mubr.msk.bf16.gmra.mrb[24].mxu1 %vm755_vm4, %v9036_v17 }
  0xb0   : > { %10368 = vst [vmem:[#allocation40_spill] sm:$0xff] %v9040_v34  ;;  %7034 = vmatmul.mubr.msk.bf16.gmra.mrb[28].mxu0 %vm3122_vm1, %v9031_v22  ;;  %v4076_v16 = vsel %vm8990_vm8, %v6197_v3, %v4075_v4  ;;  %6727 = vmatprep.mubr.msk.bf16.mxu1 %vm755_vm4, %v9040_v34  ;;  %v4079_v58 = vsel %vm8990_vm8, %v4077_v5, %v4078_v21  ;;  %v7889_v46 = vld [vmem:[%s8032_s9 + $0x34] sm:$0xf]  ;;  %v7891_v61 = vld [vmem:[%s8032_s9 + $0x24] sm:$0xf]  ;;  %v4085_v5 = vrot.slane %v8663_v29, 5 }
  0xb1   : > { %7039 = vmatprep.mubr.msk.bf16.mxu0 %vm3122_vm1, %v6211_v40  ;;  %v1283_v12 = vsel %vm8990_vm8, %v5977_v30, %v1282_v48  ;;  %v1286_v19 = vsel %vm8990_vm8, %v1284_v37, %v1285_v60  ;;  %v4089_v36 = vrot.slane %v7889_v46, 5  ;;  %v7890_v40 = vld [vmem:[%s8076_s14 + $0x14] sm:$0x1]  ;;  %v6198_v4 = vrot.slane %v7891_v61, 9  ;;  %v7892_v3 = vld [vmem:[%s8076_s14 + $0x1c] sm:$0xf] }
  0xb2   : > { %v1292_v31 = vrot.slane %v7890_v40, 5  ;;  %v1296_v39 = vrot.slane %v7892_v3, 5  ;;  %v4084_v47 = vrot.slane %v4082_v9, 4  ;;  %v7893_v21 = vld [vmem:[%s8076_s14 + $0xc] sm:$0xf]  ;;  %v1291_v30 = vrot.slane %v1289_v10, 4 }
  0xb3   : > { %v5978_v48 = vrot.slane %v7893_v21, 9  ;;  %v9070_v60 = vcombine.low %v8607_v26, %v8610_v8  ;;  %v9072_v37 = vcombine.low %v4076_v16, %v4079_v58  ;;  %v5993_v46 = vcombine.low %v1283_v12, %v1286_v19  ;;  %v7894_v40 = vld [vmem:[%s8032_s9 + $0x30] sm:$0xf]  ;;  %v7895_v22 = vld [vmem:[%s8076_s14 + $0x18] sm:$0xf]  ;;  %v9083_v26 = vld [vmem:[%s10052_s3 + $0x20] sm:$0xff]  }
  0xb4   : > { %v6199_v61 = vrot.slane %v7894_v40, 9  ;;  %v4091_v15 = vrot.slane %v4089_v36, 4  ;;  %v4092_v3 = vrot.slane %v8684_v13, 5  ;;  %v5979_v32 = vrot.slane %v7895_v22, 9  ;;  %v7896_v29 = vld [vmem:[%s8032_s9 + $0x40] sm:$0xf] }
  0xb5   : > { %10369 = vst [vmem:[#allocation50_spill] sm:$0xff] %v9070_v60  ;;  %v4096_v56 = vrot.slane %v7896_v29, 5  ;;  %v1298_v21 = vrot.slane %v1296_v39, 4  ;;  %v1299_v44 = vrot.slane %v7897_v35, 5  ;;  %v1303_v8 = vrot.slane %v7898_v57, 5 }
  0xb6   : > { %v4083_v13 = vsel %vm8990_vm8, %v6198_v4, %v4082_v9  ;;  %v4086_v22 = vsel %vm8990_vm8, %v4084_v47, %v4085_v5  ;;  %v1290_v35 = vsel %vm8990_vm8, %v5978_v48, %v1289_v10  ;;  %v1293_v57 = vsel %vm8990_vm8, %v1291_v30, %v1292_v31  ;;  %v7899_v16 = vld [vmem:[%s8032_s9 + $0x3c] sm:$0xf]  ;;  %v7900_v19 = vld [vmem:[%s8032_s9 + $0x4c] sm:$0xf] }
  0xb7   : > { %6728 = vmatmul.mubr.msk.bf16.gmra.mrb[28].mxu1 %vm755_vm4, %v9070_v60  ;;  %v4090_v9 = vsel %vm8990_vm8, %v6199_v61, %v4089_v36  ;;  %v6200_v58 = vrot.slane %v7899_v16, 9  ;;  %v4099_v12 = vrot.slane %v8706_v59, 5  ;;  %v4103_v10 = vrot.slane %v7900_v19, 5  ;;  %v7901_v36 = vld [vmem:[%s8076_s14 + $0x24] sm:$0xf] }
  0xb8   : > { %7040 = vmatmul.mubr.msk.bf16.vlgmr.msra.gmra.mrb[0].mxu0 %vm3122_vm1, %v9027_v38  ;;  %6733 = vmatprep.mubr.msk.bf16.mxu1 %vm755_vm4, %v5993_v46  ;;  %v4093_v31 = vsel %vm8990_vm8, %v4091_v15, %v4092_v3  ;;  %v1297_v4 = vsel %vm8990_vm8, %v5979_v32, %v1296_v39  ;;  %v4098_v47 = vrot.slane %v4096_v56, 4  ;;  %v5980_v5 = vrot.slane %v7901_v36, 9  ;;  %v7902_v30 = vld [vmem:[%s8076_s14 + $0x2c] sm:$0x1]  ;;  %v7903_v61 = vld [vmem:[%s8076_s14 + $0x34] sm:$0xf] }
  0xb9   : > { %7043 = vmatprep.mubr.msk.bf16.mxu0 %vm3122_vm1, %v9072_v37  ;;  %7072 = vmatpush3.bf16.msra.mxu0 %v8646_v25  ;;  %v1300_v48 = vsel %vm8990_vm8, %v1298_v21, %v1299_v44  ;;  %v1305_v59 = vrot.slane %v1303_v8, 4  ;;  %v1306_v40 = vrot.slane %v7902_v30, 5  ;;  %v1310_v46 = vrot.slane %v7903_v61, 5  ;;  %v7904_v44 = vld [vmem:[%s8032_s9 + $0x48] sm:$0xf] }
  0xba   : > { %7105 = vmatprep.subr.bf16.mxu0 %v9083_v26  ;;  %v9116_v25 = vcombine.low %v4083_v13, %v4086_v22  ;;  %v9118_v15 = vcombine.low %v1290_v35, %v1293_v57  ;;  %v1693_v32 = vsel %vm804_vm0, %v8741_v0, 0  ;;  %v9122_v39 = vcombine.low %v4090_v9, %v4093_v31  ;;  %v7905_v57 = vld [vmem:[%s8076_s14 + $0x30] sm:$0xf] }
  0xbb   : > { %v6201_v3 = vrot.slane %v7904_v44, 9  ;;  %v4105_v29 = vrot.slane %v4103_v10, 4  ;;  %v4106_v21 = vrot.slane %v8730_v51, 5  ;;  %v9126_v16 = vcombine.low %v1297_v4, %v1300_v48  ;;  %v7906_v51 = vld [vmem:[%s8076_s14 + $0x38] sm:$0x1] }
  0xbc   : > { %v4097_v13 = vsel %vm8990_vm8, %v6200_v58, %v4096_v56  ;;  %v4100_v22 = vsel %vm8990_vm8, %v4098_v47, %v4099_v12  ;;  %v1304_v0 = vsel %vm8990_vm8, %v5980_v5, %v1303_v8  ;;  %v1307_v35 = vsel %vm8990_vm8, %v1305_v59, %v1306_v40  ;;  %v7907_v56 = vld [vmem:[%s8032_s9 + $0x58] sm:$0xf]  ;;  %v9144_v12 = vld [vmem:[%s10051_s2 + $0x10] sm:$0xf]  ;;  %v7908_v47 = vld [vmem:[%s8076_s14 + $0x40] sm:$0xf] }
  0xbd   : > { %10370 = vst [vmem:[#allocation48_spill] sm:$0xff] %v9126_v16  ;;  %v5981_v9 = vrot.slane %v7905_v57, 9  ;;  %v1312_v19 = vrot.slane %v1310_v46, 4  ;;  %v1313_v31 = vrot.slane %v7906_v51, 5  ;;  %v4110_v58 = vrot.slane %v7907_v56, 5 }
  0xbe   : > { %v4104_v8 = vsel %vm8990_vm8, %v6201_v3, %v4103_v10  ;;  %v4107_v4 = vsel %vm8990_vm8, %v4105_v29, %v4106_v21  ;;  %v1317_v36 = vrot.slane %v7908_v47, 5  ;;  %v7909_v5 = vld [vmem:[%s8032_s9 + $0x64] sm:$0xf]  ;;  %v9158_v59 = vcombine.low %v4097_v13, %v4100_v22  ;;  %v7910_v40 = vld [vmem:[%s8032_s9 + $0x54] sm:$0xf] }
  0xbf   : > { %6734 = vmatmul.mubr.msk.bf16.vlgmr.msra.gmra.mrb[0].mxu1 %vm755_vm4, %v9118_v15  ;;  %v4117_v48 = vrot.slane %v7909_v5, 5  ;;  %v9160_v30 = vcombine.low %v1304_v0, %v1307_v35  ;;  %v6202_v10 = vrot.slane %v7910_v40, 9  ;;  %v1311_v61 = vsel %vm8990_vm8, %v5981_v9, %v1310_v46  ;;  %v7912_v22 = vld [vmem:[%s8076_s14 + $0x3c] sm:$0xf]  ;;  %v7913_v46 = vld [vmem:[%s8076_s14 + $0x44] sm:$0x1] }
  0xc0   : > { %7044 = vmatmul.mubr.msk.bf16.gmra.mrb[4].mxu0 %vm3122_vm1, %v9116_v25  ;;  %6766 = vmatpush3.bf16.msra.mxu1 %v1693_v32  ;;  %v1314_v44 = vsel %vm8990_vm8, %v1312_v19, %v1313_v31  ;;  %v4113_v3 = vrot.slane %v8761_v53, 5  ;;  %v7911_v32 = vld [vmem:[%s8076_s14 + $0x4c] sm:$0xf]  ;;  %v9171_v21 = vcombine.low %v4104_v8, %v4107_v4  ;;  %v4112_v13 = vrot.slane %v4110_v58, 4  ;;  %v7914_v9 = vld [vmem:[%s8032_s9 + $0x60] sm:$0xf] }
  0xc1   : > { %7047 = vmatprep.mubr.msk.bf16.mxu0 %vm3122_vm1, %v9122_v39  ;;  %6737 = vmatprep.mubr.msk.bf16.mxu1 %vm755_vm4, %v9126_v16  ;;  %v1324_v29 = vrot.slane %v7911_v32, 5  ;;  %v5982_v0 = vrot.slane %v7912_v22, 9  ;;  %v1320_v35 = vrot.slane %v7913_v46, 5  ;;  %v1319_v57 = vrot.slane %v1317_v36, 4  ;;  %v7915_v56 = vld [vmem:[%s8076_s14 + $0x48] sm:$0xf] }
  0xc2   : > { %7823 = vmatprep.subr.msk.bf16.mxu1 %vm804_vm0, %v9144_v12  ;;  %v6203_v19 = vrot.slane %v7914_v9, 9  ;;  %v4119_v53 = vrot.slane %v4117_v48, 4  ;;  %v4120_v51 = vrot.slane %v8786_v27, 5  ;;  %v9177_v31 = vcombine.low %v1311_v61, %v1314_v44  ;;  %v7916_v8 = vld [vmem:[%s8032_s9 + $0x70] sm:$0xf] }
  0xc3   : > { %v5983_v47 = vrot.slane %v7915_v56, 9  ;;  %v4124_v4 = vrot.slane %v7916_v8, 5  ;;  %v1326_v5 = vrot.slane %v1324_v29, 4  ;;  %v7917_v40 = vld [vmem:[%s8076_s14 + $0x50] sm:$0x1]  ;;  %v4111_v46 = vsel %vm8990_vm8, %v6202_v10, %v4110_v58 }
  0xc4   : > { %10371 = vst [vmem:[#allocation47_spill] sm:$0xff] %v9177_v31  ;;  %v1327_v32 = vrot.slane %v7917_v40, 5  ;;  %v7918_v22 = vld [vmem:[%s8076_s14 + $0x58] sm:$0xf]  ;;  %v4114_v27 = vsel %vm8990_vm8, %v4112_v13, %v4113_v3  ;;  %v1318_v61 = vsel %vm8990_vm8, %v5982_v0, %v1317_v36  ;;  %v7919_v44 = vld [vmem:[%s8032_s9 + $0x7c] sm:$0xf]  ;;  %v1321_v58 = vsel %vm8990_vm8, %v1319_v57, %v1320_v35 }
  0xc5   : > { %v1331_v16 = vrot.slane %v7918_v22, 5  ;;  %v4131_v9 = vrot.slane %v7919_v44, 5  ;;  %v4118_v10 = vsel %vm8990_vm8, %v6203_v19, %v4117_v48  ;;  %v4121_v3 = vsel %vm8990_vm8, %v4119_v53, %v4120_v51  ;;  %v7920_v36 = vld [vmem:[%s8032_s9 + $0x6c] sm:$0xf]  ;;  %v7921_v40 = vld [vmem:[%s8076_s14 + $0x54] sm:$0xf] }
  0xc6   : > { %v6204_v13 = vrot.slane %v7920_v36, 9  ;;  %v1325_v0 = vsel %vm8990_vm8, %v5983_v47, %v1324_v29  ;;  %v4126_v56 = vrot.slane %v4124_v4, 4  ;;  %v4127_v8 = vrot.slane %v8815_v7, 5  ;;  %v7922_v19 = vld [vmem:[%s8076_s14 + $0x5c] sm:$0x1] }
  0xc7   : > { %6738 = vmatmul.mubr.msk.bf16.gmra.mrb[4].mxu1 %vm755_vm4, %v9160_v30  ;;  %v5984_v35 = vrot.slane %v7921_v40, 9  ;;  %v1328_v48 = vsel %vm8990_vm8, %v1326_v5, %v1327_v32  ;;  %v1333_v57 = vrot.slane %v1331_v16, 4  ;;  %v1334_v53 = vrot.slane %v7922_v19, 5  ;;  %v7923_v51 = vld [vmem:[%s8076_s14 + $0x64] sm:$0xf] }
  0xc8   : > { %7048 = vmatmul.mubr.msk.bf16.gmra.mrb[8].mxu0 %vm3122_vm1, %v9158_v59  ;;  %6741 = vmatprep.mubr.msk.bf16.mxu1 %vm755_vm4, %v9177_v31  ;;  %v1338_v22 = vrot.slane %v7923_v51, 5  ;;  %v9213_v44 = vcombine.low %v4111_v46, %v4114_v27  ;;  %v7924_v36 = vld [vmem:[%s8032_s9 + $0x78] sm:$0xf]  ;;  %v4133_v29 = vrot.slane %v4131_v9, 4  ;;  %v4134_v47 = vrot.slane %v8832_v41, 5 }
  0xc9   : > { %7051 = vmatprep.mubr.msk.bf16.mxu0 %vm3122_vm1, %v9171_v21  ;;  %v6205_v31 = vrot.slane %v7924_v36, 9  ;;  %v9217_v7 = vcombine.low %v1318_v61, %v1321_v58  ;;  %v9219_v40 = vcombine.low %v4118_v10, %v4121_v3  ;;  %v9221_v5 = vcombine.low %v1325_v0, %v1328_v48  ;;  %v7925_v61 = vld [vmem:[%s8076_s14 + $0x60] sm:$0xf]  ;;  %v7926_v3 = vld [vmem:[%s8076_s14 + $0x68] sm:$0x1] }
  0xca   : > { %v4125_v32 = vsel %vm8990_vm8, %v6204_v13, %v4124_v4  ;;  %v4128_v46 = vsel %vm8990_vm8, %v4126_v56, %v4127_v8  ;;  %v1332_v27 = vsel %vm8990_vm8, %v5984_v35, %v1331_v16  ;;  %v1335_v41 = vsel %vm8990_vm8, %v1333_v57, %v1334_v53  ;;  %v7927_v16 = vld [vmem:[%s8032_s9 + $0x88] sm:$0xf]  ;;  %v7928_v8 = vld [vmem:[%s8076_s14 + $0x70] sm:$0xf]  ;;  %v7929_v48 = vld [vmem:[%s8032_s9 + $0x94] sm:$0xf] }
  0xcb   : > { %v5985_v58 = vrot.slane %v7925_v61, 9  ;;  %v1340_v10 = vrot.slane %v1338_v22, 4  ;;  %v1341_v0 = vrot.slane %v7926_v3, 5  ;;  %v4132_v4 = vsel %vm8990_vm8, %v6205_v31, %v4131_v9  ;;  %v7930_v19 = vld [vmem:[%s8032_s9 + $0x84] sm:$0xf] }
  0xcc   : > { %v4135_v13 = vsel %vm8990_vm8, %v4133_v29, %v4134_v47  ;;  %v4138_v56 = vrot.slane %v7927_v16, 5  ;;  %v1345_v35 = vrot.slane %v7928_v8, 5  ;;  %v4145_v57 = vrot.slane %v7929_v48, 5  ;;  %v7931_v47 = vld [vmem:[%s8076_s14 + $0x7c] sm:$0xf] }
  0xcd   : > { %v9248_v31 = vcombine.low %v4125_v32, %v4128_v46  ;;  %v9250_v9 = vcombine.low %v1332_v27, %v1335_v41  ;;  %v6206_v53 = vrot.slane %v7930_v19, 9  ;;  %v9253_v51 = vcombine.low %v4132_v4, %v4135_v13  ;;  %v7932_v46 = vld [vmem:[%s8076_s14 + $0x6c] sm:$0xf]  ;;  %v7933_v41 = vld [vmem:[%s8032_s9 + $0x90] sm:$0xf] }
  0xce   : > { %v1339_v36 = vsel %vm8990_vm8, %v5985_v58, %v1338_v22  ;;  %v1342_v29 = vsel %vm8990_vm8, %v1340_v10, %v1341_v0  ;;  %v1352_v61 = vrot.slane %v7931_v47, 5  ;;  %v4140_v3 = vrot.slane %v4138_v56, 4  ;;  %v7934_v4 = vld [vmem:[%s8076_s14 + $0x74] sm:$0x1]  ;;  %v7935_v10 = vld [vmem:[%s8076_s14 + $0x78] sm:$0xf] }
  0xcf   : > { %6742 = vmatmul.mubr.msk.bf16.gmra.mrb[8].mxu1 %vm755_vm4, %v9217_v7  ;;  %10372 = vst [vmem:[#allocation53_spill] sm:$0xff] %v9253_v51  ;;  %v4141_v32 = vrot.slane %v8861_v33, 5  ;;  %v5986_v27 = vrot.slane %v7932_v46, 9  ;;  %v6207_v16 = vrot.slane %v7933_v41, 9  ;;  %v1347_v8 = vrot.slane %v1345_v35, 4 }
  0xd0   : > { %7052 = vmatmul.mubr.msk.bf16.gmra.mrb[12].mxu0 %vm3122_vm1, %v9213_v44  ;;  %6745 = vmatprep.mubr.msk.bf16.mxu1 %vm755_vm4, %v9221_v5  ;;  %v1348_v13 = vrot.slane %v7934_v4, 5  ;;  %v4147_v48 = vrot.slane %v4145_v57, 4  ;;  %v4148_v22 = vrot.slane %v8886_v62, 5  ;;  %v9265_v58 = vcombine.low %v1339_v36, %v1342_v29  ;;  %v7936_v47 = vld [vmem:[%s8076_s14 + $0x80] sm:$0x1] }
  0xd1   : > { %7055 = vmatprep.mubr.msk.bf16.mxu0 %vm3122_vm1, %v9219_v40  ;;  %v5987_v0 = vrot.slane %v7935_v10, 9  ;;  %v1354_v19 = vrot.slane %v1352_v61, 4  ;;  %v1355_v33 = vrot.slane %v7936_v47, 5  ;;  %v4139_v46 = vsel %vm8990_vm8, %v6206_v53, %v4138_v56  ;;  %v7937_v53 = vld [vmem:[%s8032_s9 + $0xa0] sm:$0xf] }
  0xd2   : > { %10373 = vst [vmem:[#allocation52_spill] sm:$0xff] %v9265_v58  ;;  %v4142_v41 = vsel %vm8990_vm8, %v4140_v3, %v4141_v32  ;;  %v1346_v62 = vsel %vm8990_vm8, %v5986_v27, %v1345_v35  ;;  %v4146_v36 = vsel %vm8990_vm8, %v6207_v16, %v4145_v57  ;;  %v1349_v29 = vsel %vm8990_vm8, %v1347_v8, %v1348_v13  ;;  %v7938_v35 = vld [vmem:[%s8076_s14 + $0x88] sm:$0xf]  ;;  %v7939_v57 = vld [vmem:[%s8032_s9 + $0xac] sm:$0xf] }
  0xd3   : > { %v4149_v56 = vsel %vm8990_vm8, %v4147_v48, %v4148_v22  ;;  %v4152_v3 = vrot.slane %v7937_v53, 5  ;;  %v1359_v32 = vrot.slane %v7938_v35, 5  ;;  %v4159_v27 = vrot.slane %v7939_v57, 5  ;;  %v7940_v13 = vld [vmem:[%s8076_s14 + $0x94] sm:$0xf] }
  0xd4   : > { %v9292_v16 = vcombine.low %v4139_v46, %v4142_v41  ;;  %v1353_v8 = vsel %vm8990_vm8, %v5987_v0, %v1352_v61  ;;  %v1356_v4 = vsel %vm8990_vm8, %v1354_v19, %v1355_v33  ;;  %v1366_v48 = vrot.slane %v7940_v13, 5  ;;  %v7941_v47 = vld [vmem:[%s8032_s9 + $0x9c] sm:$0xf]  ;;  %v7942_v35 = vld [vmem:[%s8076_s14 + $0x84] sm:$0xf] }
  0xd5   : > { %v9299_v22 = vcombine.low %v1346_v62, %v1349_v29  ;;  %v9301_v10 = vcombine.low %v4146_v36, %v4149_v56  ;;  %v6208_v53 = vrot.slane %v7941_v47, 9  ;;  %v4155_v46 = vrot.slane %v8913_v1, 5  ;;  %v7943_v0 = vld [vmem:[%s8076_s14 + $0x8c] sm:$0x1]  ;;  %v7944_v19 = vld [vmem:[%s8032_s9 + $0xa8] sm:$0xf] }
  0xd6   : > { %v4154_v41 = vrot.slane %v4152_v3, 4  ;;  %v5988_v57 = vrot.slane %v7942_v35, 9  ;;  %v1361_v61 = vrot.slane %v1359_v32, 4  ;;  %v6209_v33 = vrot.slane %v7944_v19, 9  ;;  %v7945_v29 = vld [vmem:[%s8076_s14 + $0x90] sm:$0xf] }
  0xd7   : > { %6746 = vmatmul.mubr.msk.bf16.gmra.mrb[12].mxu1 %vm755_vm4, %v9250_v9  ;;  %v4161_v62 = vrot.slane %v4159_v27, 4  ;;  %v4162_v36 = vrot.slane %v8932_v2, 5  ;;  %v5989_v56 = vrot.slane %v7945_v29, 9  ;;  %v1368_v13 = vrot.slane %v1366_v48, 4  ;;  %v7946_v47 = vld [vmem:[%s8076_s14 + $0x98] sm:$0x1] }
  0xd8   : > { %7056 = vmatmul.mubr.msk.bf16.gmra.mrb[16].mxu0 %vm3122_vm1, %v9248_v31  ;;  %6749 = vmatprep.mubr.msk.bf16.mxu1 %vm755_vm4, %v9265_v58  ;;  %v1362_v58 = vrot.slane %v7943_v0, 5  ;;  %v1369_v1 = vrot.slane %v7946_v47, 5  ;;  %v4156_v2 = vsel %vm8990_vm8, %v4154_v41, %v4155_v46  ;;  %v7947_v0 = vld [vmem:[%s8032_s9 + $0xb8] sm:$0xf]  ;;  %v7948_v46 = vld [vmem:[%s8076_s14 + $0xa0] sm:$0xf] }
  0xd9   : > { %7059 = vmatprep.mubr.msk.bf16.mxu0 %vm3122_vm1, %v9253_v51  ;;  %v9307_v51 = vcombine.low %v1353_v8, %v1356_v4  ;;  %v4153_v8 = vsel %vm8990_vm8, %v6208_v53, %v4152_v3  ;;  %v1360_v4 = vsel %vm8990_vm8, %v5988_v57, %v1359_v32  ;;  %v4166_v19 = vrot.slane %v7947_v0, 5  ;;  %v7949_v57 = vld [vmem:[%s8076_s14 + $0xac] sm:$0xf] }
  0xda   : > { %v1363_v35 = vsel %vm8990_vm8, %v1361_v61, %v1362_v58  ;;  %v4160_v3 = vsel %vm8990_vm8, %v6209_v33, %v4159_v27  ;;  %v4163_v53 = vsel %vm8990_vm8, %v4161_v62, %v4162_v36  ;;  %v1373_v41 = vrot.slane %v7948_v46, 5  ;;  %v7950_v62 = vld [vmem:[%s8032_s9 + $0xb4] sm:$0xf] }
  0xdb   : > { %10374 = vst [vmem:[#allocation3_spill] sm:$0xff] %v9307_v51  ;;  %v1367_v32 = vsel %vm8990_vm8, %v5989_v56, %v1366_v48  ;;  %v1370_v58 = vsel %vm8990_vm8, %v1368_v13, %v1369_v1  ;;  %v1380_v61 = vrot.slane %v7949_v57, 5  ;;  %v9340_v29 = vcombine.low %v4153_v8, %v4156_v2  ;;  %v7951_v48 = vld [vmem:[%s8076_s14 + $0x9c] sm:$0xf]  ;;  %v7952_v1 = vld [vmem:[%s8076_s14 + $0xa4] sm:$0x1] }
  0xdc   : > { %v9342_v27 = vcombine.low %v1360_v4, %v1363_v35  ;;  %v9344_v33 = vcombine.low %v4160_v3, %v4163_v53  ;;  %v6210_v36 = vrot.slane %v7950_v62, 9  ;;  %v4168_v47 = vrot.slane %v4166_v19, 4  ;;  %v7953_v8 = vld [vmem:[%s8076_s14 + $0xa8] sm:$0xf]  ;;  %v7954_v4 = vld [vmem:[%s8076_s14 + $0xb0] sm:$0x1] }
  0xdd   : > { %v4169_v0 = vrot.slane %v8959_v23, 5  ;;  %v9348_v46 = vcombine.low %v1367_v32, %v1370_v58  ;;  %v5990_v56 = vrot.slane %v7951_v48, 9  ;;  %v1375_v13 = vrot.slane %v1373_v41, 4  ;;  %v7955_v58 = vld [vmem:[%s8076_s14 + $0xb8] sm:$0xf] }
  0xde   : > { %v1376_v57 = vrot.slane %v7952_v1, 5  ;;  %v5991_v2 = vrot.slane %v7953_v8, 9  ;;  %v1383_v35 = vrot.slane %v7954_v4, 5  ;;  %v4167_v23 = vsel %vm8990_vm8, %v6210_v36, %v4166_v19  ;;  %v7956_v1 = vld [vmem:[%s8076_s14 + $0xb4] sm:$0xf] }
  0xdf   : > { %6750 = vmatmul.mubr.msk.bf16.gmra.mrb[16].mxu1 %vm755_vm4, %v9299_v22  ;;  %v4170_v3 = vsel %vm8990_vm8, %v4168_v47, %v4169_v0  ;;  %v1374_v53 = vsel %vm8990_vm8, %v5990_v56, %v1373_v41  ;;  %v1387_v62 = vrot.slane %v7955_v58, 5  ;;  %v5992_v8 = vrot.slane %v7956_v1, 9  ;;  %v7957_v56 = vld [vmem:[%s8076_s14 + $0xbc] sm:$0x1]  ;;  %v10386_v1 = vld [vmem:[#allocation42_spill] sm:$0xff] }
  0xe0   : > { %7060 = vmatmul.mubr.msk.bf16.gmra.mrb[20].mxu0 %vm3122_vm1, %v9292_v16  ;;  %6753 = vmatprep.mubr.msk.bf16.mxu1 %vm755_vm4, %v9307_v51  ;;  %v1382_v51 = vrot.slane %v1380_v61, 4  ;;  %v1377_v32 = vsel %vm8990_vm8, %v1375_v13, %v1376_v57  ;;  %v1381_v48 = vsel %vm8990_vm8, %v5991_v2, %v1380_v61  ;;  %v9375_v36 = vcombine.low %v4167_v23, %v4170_v3  ;;  %v10375_v61 = vld [vmem:[#allocation6_spill] sm:$0xff]  ;;  %v7876_v2 = vld [vmem:[%s10052_s3 + $0x28] sm:$0xff]   ;;  %v10379_v58 = vld [vmem:[#allocation13_spill] sm:$0xff] }
  0xe1   : > { %7063 = vmatprep.mubr.msk.bf16.mxu0 %vm3122_vm1, %v9301_v10  ;;  %v9377_v47 = vcombine.low %v1374_v53, %v1377_v32  ;;  %v1389_v41 = vrot.slane %v1387_v62, 4  ;;  %v1390_v4 = vrot.slane %v7957_v56, 5  ;;  %v10377_v23 = vld [vmem:[#allocation10_spill] sm:$0xff]  ;;  %v1919_v3 = vsel %vm804_vm0, %v9144_v12, 0  ;;  %v10378_v53 = vld [vmem:[#allocation12_spill] sm:$0xff] }
  0xe2   : > { %v1384_v19 = vsel %vm8990_vm8, %v1382_v51, %v1383_v35  ;;  %v1388_v51 = vsel %vm8990_vm8, %v5992_v8, %v1387_v62  ;;  %v10376_v35 = vld [vmem:[#allocation8_spill] sm:$0xff]  ;;  %v10383_v62 = vld [vmem:[#allocation22_spill] sm:$0xff] }
  0xe3   : > { %v9379_v0 = vcombine.low %v1381_v48, %v1384_v19  ;;  %v1391_v13 = vsel %vm8990_vm8, %v1389_v41, %v1390_v4  ;;  %v316_v32 = vld [vmem:[%s10051_s2 + $0x14] sm:$0xf]  ;;  %v10385_v19 = vld [vmem:[#allocation35_spill] sm:$0xff]  ;;  %v10387_v8 = vld [vmem:[#allocation46_spill] sm:$0xff] }
  0xe4   : > { %v9395_v57 = vcombine.low %v1388_v51, %v1391_v13  ;;  %v10382_v12 = vld [vmem:[#allocation20_spill] sm:$0xff]  ;;  %v10388_v41 = vld [vmem:[#allocation51_spill] sm:$0xff]  ;;  %v9462_v4 = vld [vmem:[%s8032_s9 + $0xc0] sm:$0xf] }
  0xe5   : > { %v10384_v48 = vld [vmem:[#allocation28_spill] sm:$0xff]  ;;  %v9482_v13 = vld [vmem:[%s8076_s14 + $0xc0] sm:$0xf] }
  0xe6   : > { %v10389_v56 = vld [vmem:[#allocation56_spill] sm:$0xff] }
  0xe7   : > { %6754 = vmatmul.mubr.msk.bf16.gmra.mrb[20].mxu1 %vm755_vm4, %v9342_v27 }
  0xe8   : > { %7064 = vmatmul.mubr.msk.bf16.gmra.mrb[24].mxu0 %vm3122_vm1, %v9340_v29  ;;  %6757 = vmatprep.mubr.msk.bf16.mxu1 %vm755_vm4, %v9348_v46 }
  0xe9   : > { %7067 = vmatprep.mubr.msk.bf16.mxu0 %vm3122_vm1, %v9344_v33 }
  0xef   : > { %6758 = vmatmul.mubr.msk.bf16.gmra.mrb[24].mxu1 %vm755_vm4, %v9377_v47 }
  0xf0   : > { %7068 = vmatmul.mubr.msk.bf16.gmra.mrb[28].mxu0 %vm3122_vm1, %v9375_v36  ;;  %6761 = vmatprep.mubr.msk.bf16.mxu1 %vm755_vm4, %v9379_v0 }
  0xf1   : > { %7073 = vmatprep.mubr.msk.bf16.mxu0 %vm3122_vm1, %v10375_v61  ;;  %v9465_v61 = vld [vmem:[%s8032_s9 + $0xc4] sm:$0xf] }
  0xf2   : > { %v9471_v51 = vcombine.low %v9462_v4, %v9465_v61 }
  0xf4   : > { %10390 = vst [vmem:[#allocation2_spill] sm:$0xff] %v9471_v51 }
  0xf7   : > { %6762 = vmatmul.mubr.msk.bf16.gmra.mrb[28].mxu1 %vm755_vm4, %v9395_v57 }
  0xf8   : > { %7074 = vmatmul.mubr.msk.bf16.vlgmr.msra.gmra.mrb[0].mxu0 %vm3122_vm1, %v10376_v35  ;;  %6767 = vmatprep.mubr.msk.bf16.mxu1 %vm755_vm4, %v8681_v54  ;;  %v10380_v54 = vld [vmem:[#allocation15_spill] sm:$0xff] }
  0xf9   : > { %7077 = vmatprep.mubr.msk.bf16.mxu0 %vm3122_vm1, %v10377_v23  ;;  %7106 = vmatpush3.bf16.msra.mxu0 %v9083_v26  ;;  %v10381_v26 = vld [vmem:[#allocation17_spill] sm:$0xff] }
  0xfa   : > { %7139 = vmatprep.subr.bf16.mxu0 %v7876_v2 }
  0xff   : > { %6768 = vmatmul.mubr.msk.bf16.vlgmr.msra.gmra.mrb[0].mxu1 %vm755_vm4, %v8710_v52 }
 0x100   : > { %7078 = vmatmul.mubr.msk.bf16.gmra.mrb[4].mxu0 %vm3122_vm1, %v10378_v53  ;;  %6800 = vmatpush3.bf16.msra.mxu1 %v1919_v3  ;;  %v9485_v3 = vld [vmem:[%s8076_s14 + $0xc4] sm:$0xf] }
 0x101   : > { %7081 = vmatprep.mubr.msk.bf16.mxu0 %vm3122_vm1, %v10379_v58  ;;  %6771 = vmatprep.mubr.msk.bf16.mxu1 %vm755_vm4, %v8757_v18 }
 0x102   : > { %7824 = vmatprep.subr.msk.bf16.mxu1 %vm804_vm0, %v316_v32 }
 0x107   : > { %6772 = vmatmul.mubr.msk.bf16.gmra.mrb[4].mxu1 %vm755_vm4, %v8783_v11 }
 0x108   : > { %7082 = vmatmul.mubr.msk.bf16.gmra.mrb[8].mxu0 %vm3122_vm1, %v10380_v54  ;;  %6775 = vmatprep.mubr.msk.bf16.mxu1 %vm755_vm4, %v8803_v50 }
 0x109   : > { %7085 = vmatprep.mubr.msk.bf16.mxu0 %vm3122_vm1, %v10381_v26 }
 0x10f   : > { %6776 = vmatmul.mubr.msk.bf16.gmra.mrb[8].mxu1 %vm755_vm4, %v8838_v6  ;;  %v10415_v6 = vld [vmem:[#allocation44_spill] sm:$0xff] }
 0x110   : > { %7086 = vmatmul.mubr.msk.bf16.gmra.mrb[12].mxu0 %vm3122_vm1, %v10382_v12  ;;  %6779 = vmatprep.mubr.msk.bf16.mxu1 %vm755_vm4, %v8858_v20  ;;  %v10413_v20 = vld [vmem:[#allocation43_spill] sm:$0xff] }
 0x111   : > { %7089 = vmatprep.mubr.msk.bf16.mxu0 %vm3122_vm1, %v10383_v62  ;;  %v10414_v62 = vld [vmem:[#allocation60_spill] sm:$0xff] }
 0x117   : > { %6780 = vmatmul.mubr.msk.bf16.gmra.mrb[12].mxu1 %vm755_vm4, %v8883_v63 }
 0x118   : > { %7090 = vmatmul.mubr.msk.bf16.gmra.mrb[16].mxu0 %vm3122_vm1, %v10384_v48  ;;  %6783 = vmatprep.mubr.msk.bf16.mxu1 %vm755_vm4, %v8901_v24 }
 0x119   : > { %7093 = vmatprep.mubr.msk.bf16.mxu0 %vm3122_vm1, %v10385_v19 }
 0x11f   : > { %6784 = vmatmul.mubr.msk.bf16.gmra.mrb[16].mxu1 %vm755_vm4, %v8938_v28  ;;  %v10409_v28 = vld [vmem:[#allocation38_spill] sm:$0xff] }
 0x120   : > { %7094 = vmatmul.mubr.msk.bf16.gmra.mrb[20].mxu0 %vm3122_vm1, %v10386_v1  ;;  %6787 = vmatprep.mubr.msk.bf16.mxu1 %vm755_vm4, %v8956_v43  ;;  %v10410_v1 = vld [vmem:[#allocation54_spill] sm:$0xff] }
 0x121   : > { %7097 = vmatprep.mubr.msk.bf16.mxu0 %vm3122_vm1, %v10387_v8  ;;  %v9550_v8 = vld [vmem:[%s8032_s9 + $0xc8] sm:$0x1] }
 0x127   : > { %6788 = vmatmul.mubr.msk.bf16.gmra.mrb[20].mxu1 %vm755_vm4, %v8983_v55  ;;  %v10407_v55 = vld [vmem:[#allocation30_spill] sm:$0xff] }
 0x128   : > { %7098 = vmatmul.mubr.msk.bf16.gmra.mrb[24].mxu0 %vm3122_vm1, %v10388_v41  ;;  %6791 = vmatprep.mubr.msk.bf16.mxu1 %vm755_vm4, %v9036_v17  ;;  %v9489_v17 = vcombine.low %v9482_v13, %v9485_v3 }
 0x129   : > { %7101 = vmatprep.mubr.msk.bf16.mxu0 %vm3122_vm1, %v10389_v56  ;;  %v4687_v56 = vshrl.u32 %v9465_v61, 16 }
 0x12a   : > { %10391 = vst [vmem:[#allocation7_spill] sm:$0xff] %v9489_v17 }
 0x12b   : > { %v4689_v43 = vrot.slane %v4687_v56, 4  ;;  %v1902_v56 = vshrl.u32 %v9485_v3, 16 }
 0x12f   : > { %6792 = vmatmul.mubr.msk.bf16.gmra.mrb[24].mxu1 %vm755_vm4, %v9040_v34  ;;  %v10393_v34 = vld [vmem:[#allocation66_spill] sm:$0xff] }
 0x130   : > { %7102 = vmatmul.mubr.msk.bf16.gmra.mrb[28].mxu0 %vm3122_vm1, %v9471_v51  ;;  %6795 = vmatprep.mubr.msk.bf16.mxu1 %vm755_vm4, %v9070_v60  ;;  %v9494_v51 = vld [vmem:[%s10052_s3 + $0x30] sm:$0xff]   ;;  %v2129_v60 = vsel %vm804_vm0, %v316_v32, 0 }
 0x131   : > { %7107 = vmatprep.mubr.msk.bf16.mxu0 %vm3122_vm1, %v8639_v45  ;;  %v10392_v45 = vld [vmem:[#allocation14_spill] sm:$0xff]  ;;  %v10397_v32 = vld [vmem:[#allocation68_spill] sm:$0xff] }
 0x137   : > { %6796 = vmatmul.mubr.msk.bf16.gmra.mrb[28].mxu1 %vm755_vm4, %v9489_v17  ;;  %v10394_v17 = vld [vmem:[#allocation16_spill] sm:$0xff] }
 0x138   : > { %7108 = vmatmul.mubr.msk.bf16.vlgmr.msra.gmra.mrb[0].mxu0 %vm3122_vm1, %v8703_v42  ;;  %6801 = vmatprep.mubr.msk.bf16.mxu1 %vm755_vm4, %v10392_v45  ;;  %v9511_v42 = vld [vmem:[%s10051_s2 + $0x18] sm:$0xf] }
 0x139   : > { %7111 = vmatprep.mubr.msk.bf16.mxu0 %vm3122_vm1, %v8721_v14  ;;  %7140 = vmatpush3.bf16.msra.mxu0 %v7876_v2  ;;  %v10395_v14 = vld [vmem:[#allocation67_spill] sm:$0xff]  ;;  %v10396_v2 = vld [vmem:[#allocation18_spill] sm:$0xff]  ;;  %v10398_v45 = vld [vmem:[#allocation21_spill] sm:$0xff] }
 0x13a   : > { %7173 = vmatprep.subr.bf16.mxu0 %v9494_v51 }
 0x13f   : > { %6802 = vmatmul.mubr.msk.bf16.vlgmr.msra.gmra.mrb[0].mxu1 %vm755_vm4, %v10394_v17  ;;  %v10400_v17 = vld [vmem:[#allocation25_spill] sm:$0xff] }
 0x140   : > { %7112 = vmatmul.mubr.msk.bf16.gmra.mrb[4].mxu0 %vm3122_vm1, %v10393_v34  ;;  %6834 = vmatpush3.bf16.msra.mxu1 %v2129_v60  ;;  %v10399_v34 = vld [vmem:[#allocation69_spill] sm:$0xff]  ;;  %v10402_v60 = vld [vmem:[#allocation31_spill] sm:$0xff] }
 0x141   : > { %7115 = vmatprep.mubr.msk.bf16.mxu0 %vm3122_vm1, %v10395_v14  ;;  %6805 = vmatprep.mubr.msk.bf16.mxu1 %vm755_vm4, %v10396_v2  ;;  %v10401_v14 = vld [vmem:[#allocation27_spill] sm:$0xff]  ;;  %v10403_v2 = vld [vmem:[#allocation24_spill] sm:$0xff] }
 0x142   : > { %7825 = vmatprep.subr.msk.bf16.mxu1 %vm804_vm0, %v9511_v42 }
 0x147   : > { %6806 = vmatmul.mubr.msk.bf16.gmra.mrb[4].mxu1 %vm755_vm4, %v10398_v45  ;;  %v10405_v45 = vld [vmem:[#allocation33_spill] sm:$0xff] }
 0x148   : > { %7116 = vmatmul.mubr.msk.bf16.gmra.mrb[8].mxu0 %vm3122_vm1, %v10397_v32  ;;  %6809 = vmatprep.mubr.msk.bf16.mxu1 %vm755_vm4, %v10400_v17  ;;  %v10404_v32 = vld [vmem:[#allocation39_spill] sm:$0xff]  ;;  %v4677_v17 = vshll.u32 %v9462_v4, 16 }
 0x149   : > { %7119 = vmatprep.mubr.msk.bf16.mxu0 %vm3122_vm1, %v10399_v34  ;;  %v4674_v34 = vshrl.u32 %v9462_v4, 16 }
 0x14a   : > { %v4679_v41 = vrot.slane %v4677_v17, 5  ;;  %v1889_v17 = vshrl.u32 %v9482_v13, 16 }
 0x14f   : > { %6810 = vmatmul.mubr.msk.bf16.gmra.mrb[8].mxu1 %vm755_vm4, %v10402_v60  ;;  %v10408_v60 = vld [vmem:[#allocation49_spill] sm:$0xff] }
 0x150   : > { %7120 = vmatmul.mubr.msk.bf16.gmra.mrb[12].mxu0 %vm3122_vm1, %v10401_v14  ;;  %6813 = vmatprep.mubr.msk.bf16.mxu1 %vm755_vm4, %v10404_v32  ;;  %v10406_v14 = vld [vmem:[#allocation45_spill] sm:$0xff]  ;;  %v4676_v32 = vrot.slane %v4674_v34, 4  ;;  %v1892_v34 = vshll.u32 %v9482_v13, 16 }
 0x151   : > { %7123 = vmatprep.mubr.msk.bf16.mxu0 %vm3122_vm1, %v10403_v2  ;;  %v4683_v2 = vshll.u32 %v9465_v61, 16 }
 0x152   : > { %v1894_v48 = vrot.slane %v1892_v34, 5 }
 0x157   : > { %6814 = vmatmul.mubr.msk.bf16.gmra.mrb[12].mxu1 %vm755_vm4, %v10406_v14  ;;  %v10411_v14 = vld [vmem:[#allocation36_spill] sm:$0xff] }
 0x158   : > { %7124 = vmatmul.mubr.msk.bf16.gmra.mrb[16].mxu0 %vm3122_vm1, %v10405_v45  ;;  %6817 = vmatprep.mubr.msk.bf16.mxu1 %vm755_vm4, %v10408_v60  ;;  %v4685_v45 = vrot.slane %v4683_v2, 5  ;;  %v4693_v60 = vshll.u32 %v9550_v8, 16  ;;  %v10412_v2 = vld [vmem:[#allocation58_spill] sm:$0xff] }
 0x159   : > { %7127 = vmatprep.mubr.msk.bf16.mxu0 %vm3122_vm1, %v10407_v55  ;;  %v4680_v55 = vor.u32 %v4679_v41, %v4676_v32  ;;  %v9566_v32 = vld [vmem:[%s8076_s14 + $0xc8] sm:$0x1] }
 0x15a   : > { %v4690_v24 = vor.u32 %v4689_v43, %v4685_v45  ;;  %v4695_v63 = vrot.slane %v4693_v60, 5  ;;  %v1904_v43 = vrot.slane %v1902_v56, 4  ;;  %v10417_v60 = vld [vmem:[#allocation61_spill] sm:$0xff]  ;;  %v1908_v34 = vshll.u32 %v9566_v32, 16 }
 0x15c   : > { %v4691_v19 = vrot.slane %v4690_v24, 4  ;;  %v1910_v12 = vrot.slane %v1908_v34, 5  ;;  %v2120_v34 = vrot.slane %v9566_v32, 5  ;;  %v7881_v32 = vld [vmem:[%s10052_s3 + $0x40] sm:$0xff]  }
 0x15e   : > { %v4696_v24 = vsel %vm8151_vm5, %v4691_v19, %v4695_v63  ;;  %v10419_v63 = vld [vmem:[#allocation63_spill] sm:$0xff] }
 0x15f   : > { %6818 = vmatmul.mubr.msk.bf16.gmra.mrb[16].mxu1 %vm755_vm4, %v10410_v1  ;;  %v4681_v1 = vrot.slane %v4680_v55, 4 }
 0x160   : > { %7128 = vmatmul.mubr.msk.bf16.gmra.mrb[20].mxu0 %vm3122_vm1, %v10409_v28  ;;  %6821 = vmatprep.mubr.msk.bf16.mxu1 %vm755_vm4, %v10412_v2  ;;  %v1898_v28 = vshll.u32 %v9485_v3, 16 }
 0x161   : > { %7131 = vmatprep.mubr.msk.bf16.mxu0 %vm3122_vm1, %v10411_v14  ;;  %v1891_v14 = vrot.slane %v1889_v17, 4  ;;  %v4686_v55 = vsel %vm8151_vm5, %v4681_v1, %v4685_v45  ;;  %v7878_v1 = vld [vmem:[%s10052_s3 + $0x38] sm:$0xff]   ;;  %v4905_v45 = vrot.slane %v9465_v61, 5 }
 0x162   : > { %v1900_v41 = vrot.slane %v1898_v28, 5  ;;  %v9581_v56 = vcombine.low %v4686_v55, %v4696_v24  ;;  %v4908_v55 = vrot.slane %v9550_v8, 5  ;;  %v2117_v8 = vrot.slane %v9485_v3, 5 }
 0x163   : > { %v1895_v28 = vor.u32 %v1894_v48, %v1891_v14 }
 0x164   : > { %v1905_v17 = vor.u32 %v1904_v43, %v1900_v41  ;;  %v4907_v43 = vrot.slane %v4905_v45, 4 }
 0x166   : > { %v4909_v24 = vsel %vm8990_vm8, %v4907_v43, %v4908_v55  ;;  %v10439_v43 = vld [vmem:[#allocation56_spill] sm:$0xff]  ;;  %v10440_v55 = vld [vmem:[#allocation41_spill] sm:$0xff] }
 0x167   : > { %6822 = vmatmul.mubr.msk.bf16.gmra.mrb[20].mxu1 %vm755_vm4, %v10414_v62  ;;  %v1906_v62 = vrot.slane %v1905_v17, 4  ;;  %v2119_v17 = vrot.slane %v2117_v8, 4 }
 0x168   : > { %7132 = vmatmul.mubr.msk.bf16.gmra.mrb[24].mxu0 %vm3122_vm1, %v10413_v20  ;;  %6825 = vmatprep.mubr.msk.bf16.mxu1 %vm755_vm4, %v10417_v60  ;;  %v1896_v20 = vrot.slane %v1895_v28, 4  ;;  %v6059_v28 = vrot.slane %v9482_v13, 9 }
 0x169   : > { %7135 = vmatprep.mubr.msk.bf16.mxu0 %vm3122_vm1, %v10415_v6  ;;  %v10418_v6 = vld [vmem:[#allocation62_spill] sm:$0xff]  ;;  %v1911_v48 = vsel %vm8151_vm5, %v1906_v62, %v1910_v12  ;;  %v10420_v12 = vld [vmem:[#allocation48_spill] sm:$0xff]  ;;  %v2121_v13 = vsel %vm8990_vm8, %v2119_v17, %v2120_v34 }
 0x16a   : > { %v1901_v14 = vsel %vm8151_vm5, %v1896_v20, %v1900_v41  ;;  %v2333_v20 = vsel %vm804_vm0, %v9511_v42, 0  ;;  %v10421_v42 = vld [vmem:[#allocation47_spill] sm:$0xff]  ;;  %v10423_v62 = vld [vmem:[#allocation52_spill] sm:$0xff]  ;;  %v6280_v41 = vrot.slane %v9462_v4, 9  ;;  %v2118_v3 = vsel %vm8990_vm8, %v6059_v28, %v2117_v8  ;;  %v10443_v34 = vld [vmem:[#allocation50_spill] sm:$0xff] }
 0x16b   : > { %v9595_v19 = vcombine.low %v1901_v14, %v1911_v48  ;;  %v9687_v14 = vcombine.low %v2118_v3, %v2121_v13  ;;  %v10433_v48 = vld [vmem:[#allocation42_spill] sm:$0xff]  ;;  %v9755_v8 = vld [vmem:[%s8032_s9 + $0xd0] sm:$0xf]  ;;  %v10445_v13 = vld [vmem:[#allocation7_spill] sm:$0xff] }
 0x16c   : > { %v4906_v61 = vsel %vm8990_vm8, %v6280_v41, %v4905_v45  ;;  %v10437_v45 = vld [vmem:[#allocation51_spill] sm:$0xff]  ;;  %v10438_v41 = vld [vmem:[#allocation34_spill] sm:$0xff]  ;;  %v10442_v28 = vld [vmem:[#allocation40_spill] sm:$0xff] }
 0x16d   : > { %v9671_v4 = vcombine.low %v4906_v61, %v4909_v24  ;;  %v10441_v61 = vld [vmem:[#allocation2_spill] sm:$0xff]  ;;  %v9752_v24 = vld [vmem:[%s8032_s9 + $0xcc] sm:$0xf]  ;;  %v10444_v3 = vld [vmem:[#allocation64_spill] sm:$0xff] }
 0x16e   : > { %v6299_v17 = vcombine.low %v9752_v24, %v9755_v8 }
 0x16f   : > { %6826 = vmatmul.mubr.msk.bf16.gmra.mrb[24].mxu1 %vm755_vm4, %v10418_v6 }
 0x170   : > { %7136 = vmatmul.mubr.msk.bf16.gmra.mrb[28].mxu0 %vm3122_vm1, %v9581_v56  ;;  %6829 = vmatprep.mubr.msk.bf16.mxu1 %vm755_vm4, %v10419_v63 }
 0x171   : > { %7141 = vmatprep.mubr.msk.bf16.mxu0 %vm3122_vm1, %v9027_v38  ;;  %v318_v38 = vld [vmem:[%s10051_s2 + $0x1c] sm:$0xf] }
 0x177   : > { %6830 = vmatmul.mubr.msk.bf16.gmra.mrb[28].mxu1 %vm755_vm4, %v9595_v19 }
 0x178   : > { %7142 = vmatmul.mubr.msk.bf16.vlgmr.msra.gmra.mrb[0].mxu0 %vm3122_vm1, %v9072_v37  ;;  %6835 = vmatprep.mubr.msk.bf16.mxu1 %vm755_vm4, %v9118_v15  ;;  %v10422_v15 = vld [vmem:[#allocation53_spill] sm:$0xff] }
 0x179   : > { %7145 = vmatprep.mubr.msk.bf16.mxu0 %vm3122_vm1, %v9116_v25  ;;  %7174 = vmatpush3.bf16.msra.mxu0 %v9494_v51  ;;  %v10424_v51 = vld [vmem:[#allocation3_spill] sm:$0xff] }
 0x17a   : > { %7207 = vmatprep.subr.bf16.mxu0 %v7878_v1 }
 0x17f   : > { %6836 = vmatmul.mubr.msk.bf16.vlgmr.msra.gmra.mrb[0].mxu1 %vm755_vm4, %v10420_v12 }
 0x180   : > { %7146 = vmatmul.mubr.msk.bf16.gmra.mrb[4].mxu0 %vm3122_vm1, %v9122_v39  ;;  %6868 = vmatpush3.bf16.msra.mxu1 %v2333_v20  ;;  %v10435_v20 = vld [vmem:[#allocation46_spill] sm:$0xff] }
 0x181   : > { %7149 = vmatprep.mubr.msk.bf16.mxu0 %vm3122_vm1, %v9158_v59  ;;  %6839 = vmatprep.mubr.msk.bf16.mxu1 %vm755_vm4, %v9160_v30 }
 0x182   : > { %7826 = vmatprep.subr.msk.bf16.mxu1 %vm804_vm0, %v318_v38 }
 0x187   : > { %6840 = vmatmul.mubr.msk.bf16.gmra.mrb[4].mxu1 %vm755_vm4, %v10421_v42 }
 0x188   : > { %7150 = vmatmul.mubr.msk.bf16.gmra.mrb[8].mxu0 %vm3122_vm1, %v9171_v21  ;;  %6843 = vmatprep.mubr.msk.bf16.mxu1 %vm755_vm4, %v9217_v7 }
 0x189   : > { %7153 = vmatprep.mubr.msk.bf16.mxu0 %vm3122_vm1, %v9213_v44 }
 0x18f   : > { %6844 = vmatmul.mubr.msk.bf16.gmra.mrb[8].mxu1 %vm755_vm4, %v9221_v5 }
 0x190   : > { %7154 = vmatmul.mubr.msk.bf16.gmra.mrb[12].mxu0 %vm3122_vm1, %v9219_v40  ;;  %6847 = vmatprep.mubr.msk.bf16.mxu1 %vm755_vm4, %v9250_v9 }
 0x191   : > { %7157 = vmatprep.mubr.msk.bf16.mxu0 %vm3122_vm1, %v9248_v31 }
 0x197   : > { %6848 = vmatmul.mubr.msk.bf16.gmra.mrb[12].mxu1 %vm755_vm4, %v10423_v62 }
 0x198   : > { %7158 = vmatmul.mubr.msk.bf16.gmra.mrb[16].mxu0 %vm3122_vm1, %v10422_v15  ;;  %6851 = vmatprep.mubr.msk.bf16.mxu1 %vm755_vm4, %v9299_v22 }
 0x199   : > { %7161 = vmatprep.mubr.msk.bf16.mxu0 %vm3122_vm1, %v9292_v16 }
 0x19f   : > { %6852 = vmatmul.mubr.msk.bf16.gmra.mrb[16].mxu1 %vm755_vm4, %v10424_v51 }
 0x1a0   : > { %7162 = vmatmul.mubr.msk.bf16.gmra.mrb[20].mxu0 %vm3122_vm1, %v9301_v10  ;;  %6855 = vmatprep.mubr.msk.bf16.mxu1 %vm755_vm4, %v9342_v27 }
 0x1a1   : > { %7165 = vmatprep.mubr.msk.bf16.mxu0 %vm3122_vm1, %v9340_v29 }
 0x1a7   : > { %6856 = vmatmul.mubr.msk.bf16.gmra.mrb[20].mxu1 %vm755_vm4, %v9348_v46 }
 0x1a8   : > { %7166 = vmatmul.mubr.msk.bf16.gmra.mrb[24].mxu0 %vm3122_vm1, %v9344_v33  ;;  %6859 = vmatprep.mubr.msk.bf16.mxu1 %vm755_vm4, %v9377_v47 }
 0x1a9   : > { %7169 = vmatprep.mubr.msk.bf16.mxu0 %vm3122_vm1, %v9375_v36 }
 0x1af   : > { %6860 = vmatmul.mubr.msk.bf16.gmra.mrb[24].mxu1 %vm755_vm4, %v9379_v0 }
 0x1b0   : > { %7170 = vmatmul.mubr.msk.bf16.gmra.mrb[28].mxu0 %vm3122_vm1, %v9671_v4  ;;  %6863 = vmatprep.mubr.msk.bf16.mxu1 %vm755_vm4, %v9395_v57 }
 0x1b1   : > { %7175 = vmatprep.mubr.msk.bf16.mxu0 %vm3122_vm1, %v10376_v35  ;;  %v2559_v35 = vsel %vm804_vm0, %v318_v38, 0  ;;  %v10436_v38 = vld [vmem:[#allocation37_spill] sm:$0xff] }
 0x1b7   : > { %6864 = vmatmul.mubr.msk.bf16.gmra.mrb[28].mxu1 %vm755_vm4, %v9687_v14 }
 0x1b8   : > { %7176 = vmatmul.mubr.msk.bf16.vlgmr.msra.gmra.mrb[0].mxu0 %vm3122_vm1, %v10377_v23  ;;  %6869 = vmatprep.mubr.msk.bf16.mxu1 %vm755_vm4, %v8710_v52  ;;  %v319_v23 = vld [vmem:[%s10051_s2 + $0x20] sm:$0xf]  ;;  %v10425_v52 = vld [vmem:[#allocation20_spill] sm:$0xff] }
 0x1b9   : > { %7179 = vmatprep.mubr.msk.bf16.mxu0 %vm3122_vm1, %v10378_v53  ;;  %7208 = vmatpush3.bf16.msra.mxu0 %v7878_v1  ;;  %v10426_v53 = vld [vmem:[#allocation19_spill] sm:$0xff]  ;;  %v10434_v1 = vld [vmem:[#allocation29_spill] sm:$0xff] }
 0x1ba   : > { %7241 = vmatprep.subr.bf16.mxu0 %v7881_v32 }
 0x1bf   : > { %6870 = vmatmul.mubr.msk.bf16.vlgmr.msra.gmra.mrb[0].mxu1 %vm755_vm4, %v8757_v18  ;;  %v10427_v18 = vld [vmem:[#allocation22_spill] sm:$0xff] }
 0x1c0   : > { %7180 = vmatmul.mubr.msk.bf16.gmra.mrb[4].mxu0 %vm3122_vm1, %v10379_v58  ;;  %6902 = vmatpush3.bf16.msra.mxu1 %v2559_v35  ;;  %v10428_v58 = vld [vmem:[#allocation26_spill] sm:$0xff]  ;;  %v9769_v35 = vld [vmem:[%s8076_s14 + $0xcc] sm:$0xf] }
 0x1c1   : > { %7183 = vmatprep.mubr.msk.bf16.mxu0 %vm3122_vm1, %v10380_v54  ;;  %6873 = vmatprep.mubr.msk.bf16.mxu1 %vm755_vm4, %v8783_v11  ;;  %v10429_v11 = vld [vmem:[#allocation28_spill] sm:$0xff]  ;;  %v10430_v54 = vld [vmem:[#allocation23_spill] sm:$0xff] }
 0x1c2   : > { %7827 = vmatprep.subr.msk.bf16.mxu1 %vm804_vm0, %v319_v23 }
 0x1c7   : > { %6874 = vmatmul.mubr.msk.bf16.gmra.mrb[4].mxu1 %vm755_vm4, %v8803_v50  ;;  %v10431_v50 = vld [vmem:[#allocation35_spill] sm:$0xff] }
 0x1c8   : > { %7184 = vmatmul.mubr.msk.bf16.gmra.mrb[8].mxu0 %vm3122_vm1, %v10381_v26  ;;  %6877 = vmatprep.mubr.msk.bf16.mxu1 %vm755_vm4, %v10426_v53  ;;  %v10432_v26 = vld [vmem:[#allocation32_spill] sm:$0xff] }
 0x1c9   : > { %7187 = vmatprep.mubr.msk.bf16.mxu0 %vm3122_vm1, %v10425_v52  ;;  %v9772_v52 = vld [vmem:[%s8076_s14 + $0xd0] sm:$0xf] }
 0x1ca   : > { %v6077_v53 = vcombine.low %v9769_v35, %v9772_v52 }
 0x1cf   : > { %6878 = vmatmul.mubr.msk.bf16.gmra.mrb[8].mxu1 %vm755_vm4, %v10428_v58  ;;  %v10447_v58 = vld [vmem:[#allocation66_spill] sm:$0xff] }
 0x1d0   : > { %7188 = vmatmul.mubr.msk.bf16.gmra.mrb[12].mxu0 %vm3122_vm1, %v10427_v18  ;;  %6881 = vmatprep.mubr.msk.bf16.mxu1 %vm755_vm4, %v10430_v54  ;;  %v10446_v18 = vld [vmem:[#allocation65_spill] sm:$0xff]  ;;  %v2769_v54 = vsel %vm804_vm0, %v319_v23, 0  ;;  %v10456_v23 = vld [vmem:[#allocation31_spill] sm:$0xff] }
 0x1d1   : > { %7191 = vmatprep.mubr.msk.bf16.mxu0 %vm3122_vm1, %v10429_v11  ;;  %v10448_v11 = vld [vmem:[#allocation16_spill] sm:$0xff] }
 0x1d7   : > { %6882 = vmatmul.mubr.msk.bf16.gmra.mrb[12].mxu1 %vm755_vm4, %v10432_v26  ;;  %v10450_v26 = vld [vmem:[#allocation18_spill] sm:$0xff] }
 0x1d8   : > { %7192 = vmatmul.mubr.msk.bf16.gmra.mrb[16].mxu0 %vm3122_vm1, %v10431_v50  ;;  %6885 = vmatprep.mubr.msk.bf16.mxu1 %vm755_vm4, %v10434_v1  ;;  %v10449_v50 = vld [vmem:[#allocation67_spill] sm:$0xff]  ;;  %v10452_v1 = vld [vmem:[#allocation21_spill] sm:$0xff] }
 0x1d9   : > { %7195 = vmatprep.mubr.msk.bf16.mxu0 %vm3122_vm1, %v10433_v48  ;;  %v10451_v48 = vld [vmem:[#allocation68_spill] sm:$0xff] }
 0x1df   : > { %6886 = vmatmul.mubr.msk.bf16.gmra.mrb[16].mxu1 %vm755_vm4, %v10436_v38  ;;  %v10454_v38 = vld [vmem:[#allocation25_spill] sm:$0xff] }
 0x1e0   : > { %7196 = vmatmul.mubr.msk.bf16.gmra.mrb[20].mxu0 %vm3122_vm1, %v10435_v20  ;;  %6889 = vmatprep.mubr.msk.bf16.mxu1 %vm755_vm4, %v10438_v41  ;;  %v10453_v20 = vld [vmem:[#allocation69_spill] sm:$0xff]  ;;  %v10458_v41 = vld [vmem:[#allocation39_spill] sm:$0xff] }
 0x1e1   : > { %7199 = vmatprep.mubr.msk.bf16.mxu0 %vm3122_vm1, %v10437_v45  ;;  %v10457_v45 = vld [vmem:[#allocation24_spill] sm:$0xff] }
 0x1e7   : > { %6890 = vmatmul.mubr.msk.bf16.gmra.mrb[20].mxu1 %vm755_vm4, %v10440_v55  ;;  %v10460_v55 = vld [vmem:[#allocation45_spill] sm:$0xff] }
 0x1e8   : > { %7200 = vmatmul.mubr.msk.bf16.gmra.mrb[24].mxu0 %vm3122_vm1, %v10439_v43  ;;  %6893 = vmatprep.mubr.msk.bf16.mxu1 %vm755_vm4, %v10442_v28  ;;  %v10459_v43 = vld [vmem:[#allocation33_spill] sm:$0xff]  ;;  %v5323_v28 = vshrl.u32 %v9752_v24, 16 }
 0x1e9   : > { %7203 = vmatprep.mubr.msk.bf16.mxu0 %vm3122_vm1, %v10441_v61  ;;  %v10461_v61 = vld [vmem:[#allocation30_spill] sm:$0xff] }
 0x1ef   : > { %6894 = vmatmul.mubr.msk.bf16.gmra.mrb[24].mxu1 %vm755_vm4, %v10443_v34  ;;  %v5336_v34 = vshrl.u32 %v9755_v8, 16 }
 0x1f0   : > { %7204 = vmatmul.mubr.msk.bf16.gmra.mrb[28].mxu0 %vm3122_vm1, %v6299_v17  ;;  %6897 = vmatprep.mubr.msk.bf16.mxu1 %vm755_vm4, %v10445_v13  ;;  %v5326_v17 = vshll.u32 %v9752_v24, 16  ;;  %v10463_v13 = vld [vmem:[#allocation38_spill] sm:$0xff] }
 0x1f1   : > { %7209 = vmatprep.mubr.msk.bf16.mxu0 %vm3122_vm1, %v10444_v3  ;;  %v10462_v3 = vld [vmem:[#allocation49_spill] sm:$0xff] }
 0x1f7   : > { %6898 = vmatmul.mubr.msk.bf16.gmra.mrb[28].mxu1 %vm755_vm4, %v6077_v53  ;;  %v5332_v53 = vshll.u32 %v9755_v8, 16 }
 0x1f8   : > { %7210 = vmatmul.mubr.msk.bf16.vlgmr.msra.gmra.mrb[0].mxu0 %vm3122_vm1, %v10446_v18  ;;  %6903 = vmatprep.mubr.msk.bf16.mxu1 %vm755_vm4, %v10448_v11  ;;  %v10464_v18 = vld [vmem:[#allocation54_spill] sm:$0xff]  ;;  %v5328_v11 = vrot.slane %v5326_v17, 5 }
 0x1f9   : > { %7213 = vmatprep.mubr.msk.bf16.mxu0 %vm3122_vm1, %v10447_v58  ;;  %7242 = vmatpush3.bf16.msra.mxu0 %v7881_v32  ;;  %v10455_v32 = vld [vmem:[#allocation27_spill] sm:$0xff]  ;;  %v5325_v58 = vrot.slane %v5323_v28, 4 }
 0x1ff   : > { %6904 = vmatmul.mubr.msk.bf16.vlgmr.msra.gmra.mrb[0].mxu1 %vm755_vm4, %v10450_v26  ;;  %v9821_v26 = vld [vmem:[%s8032_s9 + $0xd4] sm:$0x1]  ;;  %s5911_s9 = sshll.u32 %s5904_s19, 5 }
 0x200   : > { %7214 = vmatmul.mubr.msk.bf16.gmra.mrb[4].mxu0 %vm3122_vm1, %v10449_v50  ;;  %6936 = vmatpush3.bf16.msra.mxu1 %v2769_v54  ;;  %v5334_v54 = vrot.slane %v5332_v53, 5  ;;  %v5338_v50 = vrot.slane %v5336_v34, 4  ;;  %p251_p4 = scmp.lt.s32.totalorder %s5911_s9, 63 }
 0x201   : > { %7217 = vmatprep.mubr.msk.bf16.mxu0 %vm3122_vm1, %v10451_v48  ;;  %6907 = vmatprep.mubr.msk.bf16.mxu1 %vm755_vm4, %v10452_v1  ;;  %v10465_v48 = vld [vmem:[#allocation36_spill] sm:$0xff]  ;;  %v10466_v1 = vld [vmem:[#allocation58_spill] sm:$0xff] }
 0x202   : > { %s10473_s9 = smov (!%p251_p4, %s5911_s9), 63 }
 0x207   : > { %6908 = vmatmul.mubr.msk.bf16.gmra.mrb[4].mxu1 %vm755_vm4, %v10454_v38  ;;  %v5329_v38 = vor.u32 %v5328_v11, %v5325_v58  ;;  %v9837_v58 = vld [vmem:[%s8076_s14 + $0xd4] sm:$0x1]  ;;  %s5912_s14 = sshll.u32 %s10473_s9, 3 }
 0x208   : > { %7218 = vmatmul.mubr.msk.bf16.gmra.mrb[8].mxu0 %vm3122_vm1, %v10453_v20  ;;  %6911 = vmatprep.mubr.msk.bf16.mxu1 %vm755_vm4, %v10456_v23  ;;  %v10467_v20 = vld [vmem:[#allocation43_spill] sm:$0xff]  ;;  %v5342_v23 = vshll.u32 %v9821_v26, 16  ;;  %v10469_v11 = vld [vmem:[#allocation44_spill] sm:$0xff]  ;;  %s9948_s23 = scalar_lea.vmem %s10054_s5, %s5912_s14 }
 0x209   : > { %7221 = vmatprep.mubr.msk.bf16.mxu0 %vm3122_vm1, %v10455_v32  ;;  %v5339_v32 = vor.u32 %v5338_v50, %v5334_v54  ;;  %v5330_v28 = vrot.slane %v5329_v38, 4  ;;  %v2548_v38 = vshll.u32 %v9837_v58, 16 }
 0x20a   : > { %v5344_v34 = vrot.slane %v5342_v23, 5 }
 0x20b   : > { %v5340_v17 = vrot.slane %v5339_v32, 4  ;;  %v5335_v50 = vsel %vm8151_vm5, %v5330_v28, %v5334_v54 }
 0x20f   : > { %6912 = vmatmul.mubr.msk.bf16.gmra.mrb[8].mxu1 %vm755_vm4, %v10458_v41  ;;  %v2532_v41 = vshll.u32 %v9769_v35, 16 }
 0x210   : > { %7222 = vmatmul.mubr.msk.bf16.gmra.mrb[12].mxu0 %vm3122_vm1, %v10457_v45  ;;  %6915 = vmatprep.mubr.msk.bf16.mxu1 %vm755_vm4, %v10460_v55  ;;  %v2529_v45 = vshrl.u32 %v9769_v35, 16  ;;  %v10468_v55 = vld [vmem:[#allocation60_spill] sm:$0xff] }
 0x211   : > { %7225 = vmatprep.mubr.msk.bf16.mxu0 %vm3122_vm1, %v10459_v43  ;;  %v2542_v43 = vshrl.u32 %v9772_v52, 16 }
 0x217   : > { %6916 = vmatmul.mubr.msk.bf16.gmra.mrb[12].mxu1 %vm755_vm4, %v10462_v3  ;;  %v2531_v3 = vrot.slane %v2529_v45, 4 }
 0x218   : > { %7226 = vmatmul.mubr.msk.bf16.gmra.mrb[16].mxu0 %vm3122_vm1, %v10461_v61  ;;  %6919 = vmatprep.mubr.msk.bf16.mxu1 %vm755_vm4, %v10464_v18  ;;  %v2538_v61 = vshll.u32 %v9772_v52, 16  ;;  %v2544_v18 = vrot.slane %v2542_v43, 4 }
 0x219   : > { %7229 = vmatprep.mubr.msk.bf16.mxu0 %vm3122_vm1, %v10463_v13  ;;  %v2534_v13 = vrot.slane %v2532_v41, 5 }
 0x21a   : > { %v2540_v53 = vrot.slane %v2538_v61, 5 }
 0x21f   : > { %6920 = vmatmul.mubr.msk.bf16.gmra.mrb[16].mxu1 %vm755_vm4, %v10466_v1  ;;  %v2535_v1 = vor.u32 %v2534_v13, %v2531_v3 }
 0x220   : > { %7230 = vmatmul.mubr.msk.bf16.gmra.mrb[20].mxu0 %vm3122_vm1, %v10465_v48  ;;  %6923 = vmatprep.mubr.msk.bf16.mxu1 %vm755_vm4, %v10468_v55  ;;  %v5345_v48 = vsel %vm8151_vm5, %v5340_v17, %v5344_v34 }
 0x221   : > { %7233 = vmatprep.mubr.msk.bf16.mxu0 %vm3122_vm1, %v10467_v20  ;;  %v2545_v20 = vor.u32 %v2544_v18, %v2540_v53  ;;  %v6317_v32 = vcombine.low %v5335_v50, %v5345_v48  ;;  %v2536_v23 = vrot.slane %v2535_v1, 4 }
 0x223   : > { %v2546_v45 = vrot.slane %v2545_v20, 4 }
 0x227   : > { %6924 = vmatmul.mubr.msk.bf16.gmra.mrb[20].mxu1 %vm755_vm4, %v10417_v60  ;;  %v2550_v60 = vrot.slane %v2548_v38, 5 }
 0x228   : > { %7234 = vmatmul.mubr.msk.bf16.gmra.mrb[24].mxu0 %vm3122_vm1, %v10469_v11  ;;  %6927 = vmatprep.mubr.msk.bf16.mxu1 %vm755_vm4, %v10418_v6  ;;  %v2541_v6 = vsel %vm8151_vm5, %v2536_v23, %v2540_v53 }
 0x229   : > { %7237 = vmatprep.mubr.msk.bf16.mxu0 %vm3122_vm1, %v9581_v56  ;;  %v2551_v56 = vsel %vm8151_vm5, %v2546_v45, %v2550_v60 }
 0x22a   : > { %v6094_v54 = vcombine.low %v2541_v6, %v2551_v56 }
 0x22f   : > { %6928 = vmatmul.mubr.msk.bf16.gmra.mrb[24].mxu1 %vm755_vm4, %v10419_v63 }
 0x230   : > { %7238 = vmatmul.mubr.msk.bf16.gmra.mrb[28].mxu0 %vm3122_vm1, %v6317_v32  ;;  %6931 = vmatprep.mubr.msk.bf16.mxu1 %vm755_vm4, %v9595_v19 }
 0x231   : > { %7243 = vmatprep.mubr.msk.bf16.mxu0 %vm3122_vm1, %v9072_v37  ;;  %v5554_v37 = vrot.slane %v9755_v8, 5 }
 0x237   : > { %6932 = vmatmul.mubr.msk.bf16.gmra.mrb[28].mxu1 %vm755_vm4, %v6094_v54 }
 0x238   : > { %7244 = vmatmul.mubr.msk.bf16.vlgmr.msra.gmra.mrb[0].mxu0 %vm3122_vm1, %v9116_v25  ;;  %6937 = vmatprep.mubr.msk.bf16.mxu1 %vm755_vm4, %v10420_v12  ;;  %v6335_v25 = vrot.slane %v9752_v24, 9 }
 0x239   : > { %7247 = vmatprep.mubr.msk.bf16.mxu0 %vm3122_vm1, %v9122_v39  ;;  %v5556_v39 = vrot.slane %v5554_v37, 4 }
 0x23f   : > { %6938 = vmatmul.mubr.msk.bf16.vlgmr.msra.gmra.mrb[0].mxu1 %vm755_vm4, %v9160_v30  ;;  %v5555_v30 = vsel %vm8990_vm8, %v6335_v25, %v5554_v37 }
 0x240   : > { %7248 = vmatmul.mubr.msk.bf16.gmra.mrb[4].mxu0 %vm3122_vm1, %v9158_v59  ;;  %6941 = vmatprep.mubr.msk.bf16.mxu1 %vm755_vm4, %v10421_v42  ;;  %v5557_v59 = vrot.slane %v9821_v26, 5 }
 0x241   : > { %7251 = vmatprep.mubr.msk.bf16.mxu0 %vm3122_vm1, %v9171_v21 }
 0x242   : > { %v5558_v21 = vsel %vm8990_vm8, %v5556_v39, %v5557_v59 }
 0x247   : > { %6942 = vmatmul.mubr.msk.bf16.gmra.mrb[4].mxu1 %vm755_vm4, %v9217_v7  ;;  %v6336_v7 = vcombine.low %v5555_v30, %v5558_v21 }
 0x248   : > { %7252 = vmatmul.mubr.msk.bf16.gmra.mrb[8].mxu0 %vm3122_vm1, %v9213_v44  ;;  %6945 = vmatprep.mubr.msk.bf16.mxu1 %vm755_vm4, %v9221_v5  ;;  %v2757_v44 = vrot.slane %v9772_v52, 5 }
 0x249   : > { %7255 = vmatprep.mubr.msk.bf16.mxu0 %vm3122_vm1, %v9219_v40  ;;  %v6111_v40 = vrot.slane %v9769_v35, 9 }
 0x24a   : > { %v2759_v5 = vrot.slane %v2757_v44, 4 }
 0x24f   : > { %6946 = vmatmul.mubr.msk.bf16.gmra.mrb[8].mxu1 %vm755_vm4, %v9250_v9  ;;  %v2758_v9 = vsel %vm8990_vm8, %v6111_v40, %v2757_v44 }
 0x250   : > { %7256 = vmatmul.mubr.msk.bf16.gmra.mrb[12].mxu0 %vm3122_vm1, %v9248_v31  ;;  %6949 = vmatprep.mubr.msk.bf16.mxu1 %vm755_vm4, %v10423_v62  ;;  %v2760_v31 = vrot.slane %v9837_v58, 5 }
 0x251   : > { %7259 = vmatprep.mubr.msk.bf16.mxu0 %vm3122_vm1, %v10422_v15 }
 0x257   : > { %6950 = vmatmul.mubr.msk.bf16.gmra.mrb[12].mxu1 %vm755_vm4, %v9299_v22 }
 0x258   : > { %7260 = vmatmul.mubr.msk.bf16.gmra.mrb[16].mxu0 %vm3122_vm1, %v9292_v16  ;;  %6953 = vmatprep.mubr.msk.bf16.mxu1 %vm755_vm4, %v10424_v51  ;;  %v2761_v16 = vsel %vm8990_vm8, %v2759_v5, %v2760_v31 }
 0x259   : > { %7263 = vmatprep.mubr.msk.bf16.mxu0 %vm3122_vm1, %v9301_v10  ;;  %v6112_v22 = vcombine.low %v2758_v9, %v2761_v16 }
 0x25f   : > { %6954 = vmatmul.mubr.msk.bf16.gmra.mrb[16].mxu1 %vm755_vm4, %v9342_v27 }
 0x260   : > { %7264 = vmatmul.mubr.msk.bf16.gmra.mrb[20].mxu0 %vm3122_vm1, %v9340_v29  ;;  %6957 = vmatprep.mubr.msk.bf16.mxu1 %vm755_vm4, %v9348_v46 }
 0x261   : > { %7267 = vmatprep.mubr.msk.bf16.mxu0 %vm3122_vm1, %v9344_v33 }
 0x267   : > { %6958 = vmatmul.mubr.msk.bf16.gmra.mrb[20].mxu1 %vm755_vm4, %v9377_v47  ;;  %v9943_v47 = vld [vmem:[%s10053_s4] ss:$0 sm:$0xff] }
 0x268   : > { %7268 = vmatmul.mubr.msk.bf16.gmra.mrb[24].mxu0 %vm3122_vm1, %v9375_v36  ;;  %6961 = vmatprep.mubr.msk.bf16.mxu1 %vm755_vm4, %v9379_v0 }
 0x269   : > { %7271 = vmatprep.mubr.msk.bf16.mxu0 %vm3122_vm1, %v9671_v4 }
 0x26f   : > { %6962 = vmatmul.mubr.msk.bf16.gmra.mrb[24].mxu1 %vm755_vm4, %v9395_v57 }
 0x270   : > { %7272 = vmatmul.mubr.msk.bf16.gmra.mrb[28].mxu0 %vm3122_vm1, %v6336_v7  ;;  %6965 = vmatprep.mubr.msk.bf16.mxu1 %vm755_vm4, %v9687_v14 }
 0x277   : > { %6966 = vmatmul.mubr.msk.bf16.gmra.mrb[28].mxu1 %vm755_vm4, %v6112_v22 }
 0x30b   : > { %v7245_v10 = vpop.f32.mrb[0].mxu0 }
 0x30c   : > { %v5605_v29 = vpop.f32.mrb[1].mxu0 }
 0x30d   : > { %v7246_v27 = vpop.f32.mrb[2].mxu0 }
 0x30e   : > { %v5608_v33 = vpop.f32.mrb[3].mxu0 }
 0x312   : > { %v6939_v36 = vpop.f32.mrb[0].mxu1 }
 0x313   : > { %v7249_v46 = vpop.f32.mrb[4].mxu0  ;;  %v7275_v0 = vadd.f32 %v7245_v10, %v6939_v36  ;;  %v2805_v57 = vpop.f32.mrb[1].mxu1 }
 0x314   : > { %v5621_v49 = vpop.f32.mrb[5].mxu0  ;;  %v7276_v63 = vadd.f32 %v5605_v29, %v2805_v57  ;;  %v6940_v19 = vpop.f32.mrb[2].mxu1 }
 0x315   : > { %v7250_v2 = vpop.f32.mrb[6].mxu0  ;;  %v5773_v42 = vadd.f32 %v7275_v0, %v9943_v47  ;;  %v7277_v15 = vadd.f32 %v7246_v27, %v6940_v19  ;;  %v2808_v62 = vpop.f32.mrb[3].mxu1 }
 0x316   : > { %v5624_v12 = vpop.f32.mrb[7].mxu0  ;;  %v5771_v51 = vadd.f32 %v7276_v63, %v9943_v47  ;;  %v7278_v4 = vadd.f32 %v5608_v33, %v2808_v62 }
 0x317   : > { %5806 = vst.msk [vmem:[%s9948_s23 + $0x10] sm:$0xff] %vm5803_vm9, %v5773_v42  ;;  %v5774_v14 = vadd.f32 %v7277_v15, %v9943_v47 }
 0x318   : > { %5804 = vst.msk [vmem:[%s9948_s23] sm:$0xff] %vm5803_vm9, %v5771_v51  ;;  %v5772_v24 = vadd.f32 %v7278_v4, %v9943_v47 }
 0x319   : > { %5807 = vst.msk [vmem:[%s9948_s23 + $0x18] sm:$0xff] %vm5803_vm9, %v5774_v14 }
 0x31a   : > { %5805 = vst.msk [vmem:[%s9948_s23 + $0x8] sm:$0xff] %vm5803_vm9, %v5772_v24  ;;  %v6943_v35 = vpop.f32.mrb[4].mxu1 }
 0x31b   : > { %v7253_v8 = vpop.f32.mrb[8].mxu0  ;;  %v7279_v26 = vadd.f32 %v7249_v46, %v6943_v35  ;;  %v2821_v41 = vpop.f32.mrb[5].mxu1 }
 0x31c   : > { %v5637_v52 = vpop.f32.mrb[9].mxu0  ;;  %v7280_v55 = vadd.f32 %v5621_v49, %v2821_v41  ;;  %v6944_v61 = vpop.f32.mrb[6].mxu1 }
 0x31d   : > { %v7254_v43 = vpop.f32.mrb[10].mxu0  ;;  %v5777_v17 = vadd.f32 %v7279_v26, %v9943_v47  ;;  %v7281_v34 = vadd.f32 %v7250_v2, %v6944_v61  ;;  %v2824_v3 = vpop.f32.mrb[7].mxu1 }
 0x31e   : > { %v5640_v28 = vpop.f32.mrb[11].mxu0  ;;  %v5775_v13 = vadd.f32 %v7280_v55, %v9943_v47  ;;  %v7282_v53 = vadd.f32 %v5624_v12, %v2824_v3 }
 0x31f   : > { %5810 = vst.msk [vmem:[%s9948_s23 + $0x30] sm:$0xff] %vm5803_vm9, %v5777_v17  ;;  %v5778_v18 = vadd.f32 %v7281_v34, %v9943_v47 }
 0x320   : > { %5808 = vst.msk [vmem:[%s9948_s23 + $0x20] sm:$0xff] %vm5803_vm9, %v5775_v13  ;;  %v5776_v58 = vadd.f32 %v7282_v53, %v9943_v47 }
 0x321   : > { %5811 = vst.msk [vmem:[%s9948_s23 + $0x38] sm:$0xff] %vm5803_vm9, %v5778_v18 }
 0x322   : > { %5809 = vst.msk [vmem:[%s9948_s23 + $0x28] sm:$0xff] %vm5803_vm9, %v5776_v58  ;;  %v6947_v50 = vpop.f32.mrb[8].mxu1 }
 0x323   : > { %v7257_v11 = vpop.f32.mrb[12].mxu0  ;;  %v7283_v1 = vadd.f32 %v7253_v8, %v6947_v50  ;;  %v2837_v20 = vpop.f32.mrb[9].mxu1 }
 0x324   : > { %v5653_v48 = vpop.f32.mrb[13].mxu0  ;;  %v7284_v32 = vadd.f32 %v5637_v52, %v2837_v20  ;;  %v6948_v23 = vpop.f32.mrb[10].mxu1 }
 0x325   : > { %v7258_v38 = vpop.f32.mrb[14].mxu0  ;;  %v5781_v60 = vadd.f32 %v7283_v1, %v9943_v47  ;;  %v7285_v6 = vadd.f32 %v7254_v43, %v6948_v23  ;;  %v2840_v56 = vpop.f32.mrb[11].mxu1 }
 0x326   : > { %v5656_v45 = vpop.f32.mrb[15].mxu0  ;;  %v5779_v54 = vadd.f32 %v7284_v32, %v9943_v47  ;;  %v7286_v37 = vadd.f32 %v5640_v28, %v2840_v56 }
 0x327   : > { %5814 = vst.msk [vmem:[%s9948_s23 + $0x50] sm:$0xff] %vm5803_vm9, %v5781_v60  ;;  %v5782_v25 = vadd.f32 %v7285_v6, %v9943_v47 }
 0x328   : > { %5812 = vst.msk [vmem:[%s9948_s23 + $0x40] sm:$0xff] %vm5803_vm9, %v5779_v54  ;;  %v5780_v39 = vadd.f32 %v7286_v37, %v9943_v47 }
 0x329   : > { %5815 = vst.msk [vmem:[%s9948_s23 + $0x58] sm:$0xff] %vm5803_vm9, %v5782_v25 }
 0x32a   : > { %5813 = vst.msk [vmem:[%s9948_s23 + $0x48] sm:$0xff] %vm5803_vm9, %v5780_v39  ;;  %v6951_v30 = vpop.f32.mrb[12].mxu1 }
 0x32b   : > { %v7261_v59 = vpop.f32.mrb[16].mxu0  ;;  %v7287_v44 = vadd.f32 %v7257_v11, %v6951_v30  ;;  %v2853_v7 = vpop.f32.mrb[13].mxu1 }
 0x32c   : > { %v5669_v21 = vpop.f32.mrb[17].mxu0  ;;  %v7288_v5 = vadd.f32 %v5653_v48, %v2853_v7  ;;  %v6952_v31 = vpop.f32.mrb[14].mxu1 }
 0x32d   : > { %v7262_v40 = vpop.f32.mrb[18].mxu0  ;;  %v5785_v16 = vadd.f32 %v7287_v44, %v9943_v47  ;;  %v7289_v22 = vadd.f32 %v7258_v38, %v6952_v31  ;;  %v2856_v10 = vpop.f32.mrb[15].mxu1 }
 0x32e   : > { %v5672_v9 = vpop.f32.mrb[19].mxu0  ;;  %v5783_v29 = vadd.f32 %v7288_v5, %v9943_v47  ;;  %v7290_v27 = vadd.f32 %v5656_v45, %v2856_v10 }
 0x32f   : > { %5818 = vst.msk [vmem:[%s9948_s23 + $0x70] sm:$0xff] %vm5803_vm9, %v5785_v16  ;;  %v5786_v33 = vadd.f32 %v7289_v22, %v9943_v47 }
 0x330   : > { %5816 = vst.msk [vmem:[%s9948_s23 + $0x60] sm:$0xff] %vm5803_vm9, %v5783_v29  ;;  %v5784_v46 = vadd.f32 %v7290_v27, %v9943_v47 }
 0x331   : > { %5819 = vst.msk [vmem:[%s9948_s23 + $0x78] sm:$0xff] %vm5803_vm9, %v5786_v33 }
 0x332   : > { %5817 = vst.msk [vmem:[%s9948_s23 + $0x68] sm:$0xff] %vm5803_vm9, %v5784_v46  ;;  %v6955_v49 = vpop.f32.mrb[16].mxu1 }
 0x333   : > { %v7265_v36 = vpop.f32.mrb[20].mxu0  ;;  %v7291_v57 = vadd.f32 %v7261_v59, %v6955_v49  ;;  %v2869_v2 = vpop.f32.mrb[17].mxu1 }
 0x334   : > { %v5685_v0 = vpop.f32.mrb[21].mxu0  ;;  %v7292_v19 = vadd.f32 %v5669_v21, %v2869_v2  ;;  %v6956_v12 = vpop.f32.mrb[18].mxu1 }
 0x335   : > { %v7266_v63 = vpop.f32.mrb[22].mxu0  ;;  %v5789_v15 = vadd.f32 %v7291_v57, %v9943_v47  ;;  %v7293_v62 = vadd.f32 %v7262_v40, %v6956_v12  ;;  %v2872_v51 = vpop.f32.mrb[19].mxu1 }
 0x336   : > { %v5688_v42 = vpop.f32.mrb[23].mxu0  ;;  %v5787_v4 = vadd.f32 %v7292_v19, %v9943_v47  ;;  %v7294_v14 = vadd.f32 %v5672_v9, %v2872_v51 }
 0x337   : > { %5822 = vst.msk [vmem:[%s9948_s23 + $0x90] sm:$0xff] %vm5803_vm9, %v5789_v15  ;;  %v5790_v24 = vadd.f32 %v7293_v62, %v9943_v47 }
 0x338   : > { %5820 = vst.msk [vmem:[%s9948_s23 + $0x80] sm:$0xff] %vm5803_vm9, %v5787_v4  ;;  %v5788_v8 = vadd.f32 %v7294_v14, %v9943_v47 }
 0x339   : > { %5823 = vst.msk [vmem:[%s9948_s23 + $0x98] sm:$0xff] %vm5803_vm9, %v5790_v24 }
 0x33a   : > { %5821 = vst.msk [vmem:[%s9948_s23 + $0x88] sm:$0xff] %vm5803_vm9, %v5788_v8  ;;  %v6959_v52 = vpop.f32.mrb[20].mxu1 }
 0x33b   : > { %v7269_v35 = vpop.f32.mrb[24].mxu0  ;;  %v7295_v41 = vadd.f32 %v7265_v36, %v6959_v52  ;;  %v2885_v43 = vpop.f32.mrb[21].mxu1 }
 0x33c   : > { %v5701_v26 = vpop.f32.mrb[25].mxu0  ;;  %v7296_v61 = vadd.f32 %v5685_v0, %v2885_v43  ;;  %v6960_v28 = vpop.f32.mrb[22].mxu1 }
 0x33d   : > { %v7270_v55 = vpop.f32.mrb[26].mxu0  ;;  %v5793_v34 = vadd.f32 %v7295_v41, %v9943_v47  ;;  %v7297_v3 = vadd.f32 %v7266_v63, %v6960_v28  ;;  %v2888_v13 = vpop.f32.mrb[23].mxu1 }
 0x33e   : > { %v5704_v17 = vpop.f32.mrb[27].mxu0  ;;  %v5791_v53 = vadd.f32 %v7296_v61, %v9943_v47  ;;  %v7298_v18 = vadd.f32 %v5688_v42, %v2888_v13 }
 0x33f   : > { %5826 = vst.msk [vmem:[%s9948_s23 + $0xb0] sm:$0xff] %vm5803_vm9, %v5793_v34  ;;  %v5794_v58 = vadd.f32 %v7297_v3, %v9943_v47 }
 0x340   : > { %5824 = vst.msk [vmem:[%s9948_s23 + $0xa0] sm:$0xff] %vm5803_vm9, %v5791_v53  ;;  %v5792_v11 = vadd.f32 %v7298_v18, %v9943_v47 }
 0x341   : > { %5827 = vst.msk [vmem:[%s9948_s23 + $0xb8] sm:$0xff] %vm5803_vm9, %v5794_v58 }
 0x342   : > { %5825 = vst.msk [vmem:[%s9948_s23 + $0xa8] sm:$0xff] %vm5803_vm9, %v5792_v11  ;;  %v6963_v48 = vpop.f32.mrb[24].mxu1 }
 0x343   : > { %v7273_v50 = vpop.f32.mrb[28].mxu0  ;;  %v7299_v20 = vadd.f32 %v7269_v35, %v6963_v48  ;;  %v2901_v38 = vpop.f32.mrb[25].mxu1 }
 0x344   : > { %v5717_v1 = vpop.f32.mrb[29].mxu0  ;;  %v7300_v23 = vadd.f32 %v5701_v26, %v2901_v38  ;;  %v6964_v45 = vpop.f32.mrb[26].mxu1 }
 0x345   : > { %v7274_v32 = vpop.f32.mrb[30].mxu0  ;;  %v5797_v6 = vadd.f32 %v7299_v20, %v9943_v47  ;;  %v7301_v56 = vadd.f32 %v7270_v55, %v6964_v45  ;;  %v2904_v54 = vpop.f32.mrb[27].mxu1 }
 0x346   : > { %v5720_v60 = vpop.f32.mrb[31].mxu0  ;;  %v5795_v37 = vadd.f32 %v7300_v23, %v9943_v47  ;;  %v7302_v25 = vadd.f32 %v5704_v17, %v2904_v54 }
 0x347   : > { %5830 = vst.msk [vmem:[%s9948_s23 + $0xd0] sm:$0xff] %vm5803_vm9, %v5797_v6  ;;  %v5798_v39 = vadd.f32 %v7301_v56, %v9943_v47 }
 0x348   : > { %5828 = vst.msk [vmem:[%s9948_s23 + $0xc0] sm:$0xff] %vm5803_vm9, %v5795_v37  ;;  %v5796_v59 = vadd.f32 %v7302_v25, %v9943_v47 }
 0x349   : > { %5831 = vst.msk [vmem:[%s9948_s23 + $0xd8] sm:$0xff] %vm5803_vm9, %v5798_v39 }
 0x34a   : > { %5829 = vst.msk [vmem:[%s9948_s23 + $0xc8] sm:$0xff] %vm5803_vm9, %v5796_v59  ;;  %v6967_v30 = vpop.f32.mrb[28].mxu1 }
 0x34b   : > { %v7303_v21 = vadd.f32 %v7273_v50, %v6967_v30  ;;  %v2917_v44 = vpop.f32.mrb[29].mxu1 }
 0x34c   : > { %v7304_v7 = vadd.f32 %v5717_v1, %v2917_v44  ;;  %v6968_v40 = vpop.f32.mrb[30].mxu1 }
 0x34d   : > { %v5801_v5 = vadd.f32 %v7303_v21, %v9943_v47  ;;  %v7305_v31 = vadd.f32 %v7274_v32, %v6968_v40  ;;  %v2920_v9 = vpop.f32.mrb[31].mxu1 }
 0x34e   : > { %v5799_v16 = vadd.f32 %v7304_v7, %v9943_v47  ;;  %v7306_v22 = vadd.f32 %v5720_v60, %v2920_v9 }
 0x34f   : > { %5834 = vst.msk [vmem:[%s9948_s23 + $0xf0] sm:$0xff] %vm5803_vm9, %v5801_v5  ;;  %v5802_v10 = vadd.f32 %v7305_v31, %v9943_v47 }
 0x350   : > { %5832 = vst.msk [vmem:[%s9948_s23 + $0xe0] sm:$0xff] %vm5803_vm9, %v5799_v16  ;;  %v5800_v29 = vadd.f32 %v7306_v22, %v9943_v47 }
 0x351   : > { %5835 = vst.msk [vmem:[%s9948_s23 + $0xf8] sm:$0xff] %vm5803_vm9, %v5802_v10 }
 0x352   : > { %5833 = vst.msk [vmem:[%s9948_s23 + $0xe8] sm:$0xff] %vm5803_vm9, %v5800_v29 }
 0x353 PF: > { %s15_s18 = sadd.s32 1, %s7964_s18  }
 0x354   : > { %p12_p5 = scmp.ge.s32.totalorder %s15_s18, 4  }
 0x356   :  { %14 = sbr.rel (!%p12_p5) target bundleno = 1 (0x1), region = 73 }

</bundles_post_ra>
